<compile_context>
chip_gen: v6e
topology: v6e:2x2x1
jax: 0.10.0
libtpu: 0.0.40
codegen_flags: <defaults>
</compile_context>

<pallas_src>
import jax
import jax.numpy as jnp
import numpy as np
from jax import lax
from jax.experimental import pallas as pl
from jax.experimental.pallas import tpu as pltpu

TAU = 0.5          # IoU threshold from NeuralNetwork_OL_v2_IoU(tau=0.5)
K_STEPS = 4        # grid steps streaming the FC weight
FC_CH = 16         # conv1 output channels (= FC "channel" chunks)
CPS = FC_CH // K_STEPS


# ----------------------------------------------------------------------------
# Fused whole-model kernel
# ----------------------------------------------------------------------------
def make_fused_kernel(B):
    L1 = 505     # 22*23 - 1 : flat conv1/pool1 output length (incl. masked garbage col)

    def kernel(y0_ref, wf0_ref, b0_ref, mask_ref, wf1_ref, b1_ref,
               wfc_ref, bfc_ref, wo_ref, bo_ref,
               z_ref, lg_ref,
               z1_ref, feats_ref, hid_ref):
        k = pl.program_id(0)

        # ------------- step 0: both conv stages, all batch elements ---------------
        @pl.when(k == 0)
        def _convs():
            hid_ref[...] = jnp.zeros_like(hid_ref)
            for b in range(B):
                # conv0 + pool0 + relu, produced directly as the four zero-padded
                # phase planes X1_{p,q} that conv1 consumes.
                for idx in range(4):                     # output phase (p, q)
                    p, q = idx // 2, idx % 2
                    mm = jnp.dot(wf0_ref[idx * 64:(idx + 1) * 64, :], y0_ref[b],
                                 preferred_element_type=jnp.float32)    # (64, 529)
                    acc = mm[0:16, :]
                    for pp in range(1, 4):               # max over pool0 phases
                        acc = jnp.maximum(acc, mm[16 * pp:16 * pp + 16, :])
                    x1 = (jnp.maximum(acc + b0_ref[...], 0.0)
                          * mask_ref[idx:idx + 1, :])                    # (16, 529)
                    # scatter the 4 shifted copies of this plane into the packed
                    # conv1 contraction operand Z1 (rows = (u*4+v)*16 + cin).
                    for s in range(2):
                        for t in range(2):
                            u, v = p + 2 * s, q + 2 * t
                            row = (u * 4 + v) * 16
                            off = s * 23 + t
                            z1_ref[row:row + 16, :] = x1[:, off:off + L1]
                # conv1 + pool1 + relu: one (64,256)x(256,505) matmul.
                mm1 = jnp.dot(wf1_ref[...], z1_ref[...],
                              preferred_element_type=jnp.float32)        # (64, 505)
                fa = mm1[0:16, :]
                for pp in range(1, 4):                   # max over pool1 phases
                    fa = jnp.maximum(fa, mm1[16 * pp:16 * pp + 16, :])
                feats_ref[:, b, :] = jnp.maximum(fa + b1_ref[...], 0.0)  # (16, 505)

        # -------- every step: accumulate a K-slice of the 7744->256 Linear --------
        acc = hid_ref[...]
        for c in range(CPS):
            lhs = feats_ref[CPS * k + c].astype(jnp.bfloat16)            # (B, 505)
            acc = acc + jnp.dot(lhs, wfc_ref[c],
                                preferred_element_type=jnp.float32)
        hid_ref[...] = acc

        # ------------- last step: 256->4 head, column remap, IoU ------------------
        @pl.when(k == pl.num_programs(0) - 1)
        def _head():
            h = jnp.maximum(hid_ref[...] + bfc_ref[...], 0.0)            # (B, 256)
            # wo_ref / bo_ref already contain the column remap -> these ARE logits
            logits = jnp.dot(h, wo_ref[...],
                             preferred_element_type=jnp.float32) + bo_ref[...]
            lg_ref[...] = logits                                          # (B, 4)
            c0, c1 = logits[:, 0:1], logits[:, 1:2]
            c2, c3 = logits[:, 2:3], logits[:, 3:4]
            g0, g1, g2, g3 = c0, c1, c2, c3          # forward() is called with gt=None
            # TODO(synk): IoU.IoU source is not part of d_loc.py; a standard
            # (corner, size)-box IoU minus tau is assumed (matches the reference).
            lo0, lo1 = jnp.maximum(c0, g0), jnp.maximum(c1, g1)
            hi0 = jnp.minimum(c0 + c2, g0 + g2)
            hi1 = jnp.minimum(c1 + c3, g1 + g3)
            inter = jnp.maximum(hi0 - lo0, 0.0) * jnp.maximum(hi1 - lo1, 0.0)
            union = c2 * c3 + g2 * g3 - inter
            z_ref[...] = inter / union - TAU

    return kernel


def fused_forward(y0, fp):
    B = y0.shape[0]
    z, logits = pl.pallas_call(
        make_fused_kernel(B),
        out_shape=(jax.ShapeDtypeStruct((B, 1), jnp.float32),
                   jax.ShapeDtypeStruct((B, 4), jnp.float32)),
        grid=(K_STEPS,),
        in_specs=[
            pl.BlockSpec((B, 49, 529), lambda k: (0, 0, 0)),     # stride-4 input planes
            pl.BlockSpec((256, 49), lambda k: (0, 0)),           # folded conv0 weight
            pl.BlockSpec((16, 1), lambda k: (0, 0)),             # conv0 bias
            pl.BlockSpec((4, 529), lambda k: (0, 0)),            # phase-plane border masks
            pl.BlockSpec((64, 256), lambda k: (0, 0)),           # folded conv1 weight
            pl.BlockSpec((16, 1), lambda k: (0, 0)),             # conv1 bias
            pl.BlockSpec((CPS, 505, 256), lambda k: (k, 0, 0)),  # FC weight (bf16, streamed)
            pl.BlockSpec((1, 256), lambda k: (0, 0)),            # FC bias
            pl.BlockSpec((256, 4), lambda k: (0, 0)),            # folded output weight
            pl.BlockSpec((1, 4), lambda k: (0, 0)),              # folded output bias
        ],
        out_specs=(pl.BlockSpec((B, 1), lambda k: (0, 0)),
                   pl.BlockSpec((B, 4), lambda k: (0, 0))),
        scratch_shapes=[
            pltpu.VMEM((256, 505), jnp.float32),     # packed conv1 contraction operand
            pltpu.VMEM((16, B, 505), jnp.float32),   # flattened features [chan, batch, spatial]
            pltpu.VMEM((B, 256), jnp.float32),       # FC accumulator
        ],
        compiler_params=pltpu.CompilerParams(
            dimension_semantics=("arbitrary",)),
    )(y0, fp["wf0"], fp["b0"], fp["mask"], fp["wf1"], fp["b1"],
      fp["wfc"], fp["bfc"], fp["wo"], fp["bo"])
    return z, logits


# ----------------------------------------------------------------------------
# Wrapper-side layout glue (tiny) and offline weight folding
# ----------------------------------------------------------------------------
def phase_decompose_input(x):
    """Stride-4 / 49-offset phase decomposition of the zero-padded 88x88 input."""
    N = x.shape[0]
    xb = jnp.pad(x.astype(jnp.float32), ((0, 0), (0, 0), (3, 4), (3, 4)))  # (N,1,95,95)
    planes = [xb[:, 0, u:u + 92:4, v:v + 92:4]                              # (N,23,23)
              for u in range(7) for v in range(7)]
    return jnp.stack(planes, axis=1).reshape(N, 49, 529)


@jax.jit
def model_forward(x, fp):
    y0 = phase_decompose_input(x)
    return fused_forward(y0, fp)


def fold_params(p):
    w0 = np.asarray(p["w0"], np.float32)      # (16,1,3,3)
    b0 = np.asarray(p["b0"], np.float32)
    w1 = np.asarray(p["w1"], np.float32)      # (16,16,3,3)
    b1 = np.asarray(p["b1"], np.float32)
    wfc = np.asarray(p["wfc"], np.float32)    # (256,7744)
    bfc = np.asarray(p["bfc"], np.float32)
    wo = np.asarray(p["wo"], np.float32)      # (4,256)
    bo = np.asarray(p["bo"], np.float32)

    # conv0: fold taps (dh,dw), pool0 phase (a,b) and output phase (p,q) into (256,49).
    wf0 = np.zeros((256, 49), np.float32)
    for pq in range(4):
        pph, qph = pq // 2, pq % 2
        for ab in range(4):
            a, bb = ab // 2, ab % 2
            for dh in range(3):
                for dw in range(3):
                    col = (2 * pph + a + dh) * 7 + (2 * qph + bb + dw)
                    r0 = pq * 64 + ab * 16
                    wf0[r0:r0 + 16, col] = w0[:, 0, dh, dw]

    # conv1: pack 9 taps x 16 input channels into the contraction dim -> (64, 256).
    wf1 = np.zeros((64, 256), np.float32)
    for ab in range(4):
        a, bb = ab // 2, ab % 2
        for dh in range(3):
            for dw in range(3):
                u, v = a + dh, bb + dw
                cb = (u * 4 + v) * 16
                wf1[ab * 16:(ab + 1) * 16, cb:cb + 16] = w1[:, :, dh, dw]

    # zero masks for the padded border of conv1's input phase planes (4, 23*23).
    ii, jj = np.meshgrid(np.arange(23), np.arange(23), indexing="ij")
    rows = []
    for pq in range(4):
        pph, qph = pq // 2, pq % 2
        rok = (ii >= 1) if pph == 0 else (ii <= 21)
        cok = (jj >= 1) if qph == 0 else (jj <= 21)
        rows.append((rok & cok).astype(np.float32).reshape(-1))
    mask = np.stack(rows, axis=0)                                      # (4, 529)

    # FC: fold NCHW flatten + garbage-column drop into the weight -> (16, 505, 256).
    wfc_r = wfc.reshape(256, 16, 22, 22).transpose(1, 2, 3, 0)         # (c, i, j, h)
    wfc_r = np.pad(wfc_r, ((0, 0), (0, 0), (0, 1), (0, 0)))            # j: 22 -> 23 (zeros)
    wfc_fold = wfc_r.reshape(16, 506, 256)[:, :505, :]

    # output layer: fold the column remap (c0,c1,c2,c3) = (r1, r0, r2-r0, r3-r1).
    T = np.zeros((4, 4), np.float32)
    T[1, 0] = T[0, 1] = T[2, 2] = T[3, 3] = 1.0
    T[0, 2] = T[1, 3] = -1.0
    wo_fold = wo.T @ T                                                  # (256, 4)
    bo_fold = (bo @ T).reshape(1, 4)

    return dict(
        wf0=jnp.asarray(wf0),
        b0=jnp.asarray(b0.reshape(16, 1)),
        mask=jnp.asarray(mask),
        wf1=jnp.asarray(wf1),
        b1=jnp.asarray(b1.reshape(16, 1)),
        wfc=jnp.asarray(wfc_fold, dtype=jnp.bfloat16),   # bf16 storage, f32 accumulate
        bfc=jnp.asarray(bfc.reshape(1, 256)),
        wo=jnp.asarray(wo_fold),
        bo=jnp.asarray(bo_fold),
    )


# ----------------------------------------------------------------------------
# Pure-JAX reference and parameter init
# ----------------------------------------------------------------------------
def reference_forward(x, p):
    x = x.astype(jnp.float32)
    dn0 = lax.conv_dimension_numbers(x.shape, p["w0"].shape, ("NCHW", "OIHW", "NCHW"))
    y = lax.conv_general_dilated(x, p["w0"], (1, 1), ((1, 1), (1, 1)),
                                 dimension_numbers=dn0) + p["b0"].reshape(1, -1, 1, 1)
    y = lax.reduce_window(y, -jnp.inf, lax.max, (1, 1, 2, 2), (1, 1, 2, 2), "VALID")
    y = jnp.maximum(y, 0.0)
    dn1 = lax.conv_dimension_numbers(y.shape, p["w1"].shape, ("NCHW", "OIHW", "NCHW"))
    y = lax.conv_general_dilated(y, p["w1"], (1, 1), ((1, 1), (1, 1)),
                                 dimension_numbers=dn1) + p["b1"].reshape(1, -1, 1, 1)
    y = lax.reduce_window(y, -jnp.inf, lax.max, (1, 1, 2, 2), (1, 1, 2, 2), "VALID")
    y = jnp.maximum(y, 0.0)
    f = y.reshape(x.shape[0], -1)
    h = jnp.maximum(f @ p["wfc"].T + p["bfc"], 0.0)
    raw = h @ p["wo"].T + p["bo"]
    c0 = raw[:, 1]; c1 = raw[:, 0]
    c2 = raw[:, 2] - raw[:, 0]; c3 = raw[:, 3] - raw[:, 1]
    logits = jnp.stack([c0, c1, c2, c3], axis=1)
    g = logits
    lo0 = jnp.maximum(logits[:, 0], g[:, 0]); lo1 = jnp.maximum(logits[:, 1], g[:, 1])
    hi0 = jnp.minimum(logits[:, 0] + logits[:, 2], g[:, 0] + g[:, 2])
    hi1 = jnp.minimum(logits[:, 1] + logits[:, 3], g[:, 1] + g[:, 3])
    inter = jnp.maximum(hi0 - lo0, 0.0) * jnp.maximum(hi1 - lo1, 0.0)
    union = logits[:, 2] * logits[:, 3] + g[:, 2] * g[:, 3] - inter
    z = (inter / union - TAU)[:, None]
    return z, logits


def init_params(key):
    ks = jax.random.split(key, 8)

    def u(k, shape, fan_in):
        b = 1.0 / float(np.sqrt(fan_in))
        return jax.random.uniform(k, shape, jnp.float32, -b, b)

    return dict(
        w0=u(ks[0], (16, 1, 3, 3), 9),      b0=u(ks[1], (16,), 9),
        w1=u(ks[2], (16, 16, 3, 3), 144),   b1=u(ks[3], (16,), 144),
        wfc=u(ks[4], (256, 7744), 7744),    bfc=u(ks[5], (256,), 7744),
        wo=u(ks[6], (4, 256), 256),         bo=u(ks[7], (4,), 256),
    )


if __name__ == "__main__":
    key = jax.random.PRNGKey(0)
    kx, kp = jax.random.split(key)
    # input spatial must be 88x88 (=> 16*22*22 = 7744 features into the Linear)
    x = jax.random.normal(kx, (2, 1, 88, 88), dtype=jnp.float32)
    params = init_params(kp)
    fparams = fold_params(params)

    z, logits = model_forward(x, fparams)
    jax.block_until_ready((z, logits))

    # reference uses the same bf16-rounded FC weight so the comparison isolates
    # kernel correctness from the (intentional) bf16 storage of that weight.
    p_ref = dict(params)
    p_ref["wfc"] = params["wfc"].astype(jnp.bfloat16).astype(jnp.float32)
    z_ref, logits_ref = reference_forward(x, p_ref)

    lg, lg_r = np.asarray(logits), np.asarray(logits_ref)
    np.testing.assert_allclose(lg, lg_r, rtol=2e-2, atol=2e-2)

    z_np, z_rnp = np.asarray(z), np.asarray(z_ref)
    assert z_np.shape == (2, 1) and lg.shape == (2, 4)
    # gt = logits makes the IoU degenerate; compare z only where it is well-conditioned
    safe = (np.abs(lg_r[:, 2]) > 0.05) & (np.abs(lg_r[:, 3]) > 0.05)
    assert np.all(np.isfinite(z_np[safe]))
    np.testing.assert_allclose(z_np[safe], z_rnp[safe], rtol=2e-2, atol=2e-2)
    print("KERNEL_OK")
</pallas_src>

<mosaic_0001>
module attributes {stable_mosaic.version = 11 : i64} {
  func.func @kernel(%arg0: i32, %arg1: memref<2x49x529xf32, #tpu.memory_space<vmem>>, %arg2: memref<256x49xf32, #tpu.memory_space<vmem>>, %arg3: memref<16x1xf32, #tpu.memory_space<vmem>>, %arg4: memref<4x529xf32, #tpu.memory_space<vmem>>, %arg5: memref<64x256xf32, #tpu.memory_space<vmem>>, %arg6: memref<16x1xf32, #tpu.memory_space<vmem>>, %arg7: memref<4x505x256xbf16, #tpu.memory_space<vmem>>, %arg8: memref<1x256xf32, #tpu.memory_space<vmem>>, %arg9: memref<256x4xf32, #tpu.memory_space<vmem>>, %arg10: memref<1x4xf32, #tpu.memory_space<vmem>>, %arg11: memref<2x1xf32, #tpu.memory_space<vmem>>, %arg12: memref<2x4xf32, #tpu.memory_space<vmem>>, %arg13: memref<256x505xf32, #tpu.memory_space<vmem>>, %arg14: memref<16x2x505xf32, #tpu.memory_space<vmem>>, %arg15: memref<2x256xf32, #tpu.memory_space<vmem>>) attributes {dimension_semantics = [#tpu.dimension_semantics<arbitrary>], iteration_bounds = array<i64: 4>, scalar_prefetch = 0 : i64, scratch_operands = 3 : i64, tpu.core_type = #tpu.core_type<tc>, window_params = [{pipeline_mode = #tpu.pipeline_mode<synchronous>, transform_indices = @transform_0, window_bounds = array<i64: 2, 49, 529>}, {pipeline_mode = #tpu.pipeline_mode<synchronous>, transform_indices = @transform_1, window_bounds = array<i64: 256, 49>}, {pipeline_mode = #tpu.pipeline_mode<synchronous>, transform_indices = @transform_2, window_bounds = array<i64: 16, 1>}, {pipeline_mode = #tpu.pipeline_mode<synchronous>, transform_indices = @transform_3, window_bounds = array<i64: 4, 529>}, {pipeline_mode = #tpu.pipeline_mode<synchronous>, transform_indices = @transform_4, window_bounds = array<i64: 64, 256>}, {pipeline_mode = #tpu.pipeline_mode<synchronous>, transform_indices = @transform_5, window_bounds = array<i64: 16, 1>}, {transform_indices = @transform_6, window_bounds = array<i64: 4, 505, 256>}, {pipeline_mode = #tpu.pipeline_mode<synchronous>, transform_indices = @transform_7, window_bounds = array<i64: 1, 256>}, {pipeline_mode = #tpu.pipeline_mode<synchronous>, transform_indices = @transform_8, window_bounds = array<i64: 256, 4>}, {pipeline_mode = #tpu.pipeline_mode<synchronous>, transform_indices = @transform_9, window_bounds = array<i64: 1, 4>}, {pipeline_mode = #tpu.pipeline_mode<synchronous>, transform_indices = @transform_10, window_bounds = array<i64: 2, 1>}, {pipeline_mode = #tpu.pipeline_mode<synchronous>, transform_indices = @transform_11, window_bounds = array<i64: 2, 4>}]} {
    %c0_i32 = arith.constant 0 : i32
    %0 = arith.cmpi eq, %arg0, %c0_i32 : i32
    %1 = arith.extui %0 : i1 to i32
    %c0_i32_0 = arith.constant 0 : i32
    %2 = arith.cmpi ne, %1, %c0_i32_0 : i32
    scf.if %2 {
      %cst_30 = arith.constant 0.000000e+00 : f32
      %48 = vector.broadcast %cst_30 : f32 to vector<2x256xf32>
      %c0_31 = arith.constant 0 : index
      %c0_32 = arith.constant 0 : index
      %49 = vector.load %arg15[%c0_31, %c0_32] : memref<2x256xf32, #tpu.memory_space<vmem>>, vector<2x256xf32>
      tpu.vector_store %arg15[%c0_31, %c0_32], %48 {strides = array<i32>} : memref<2x256xf32, #tpu.memory_space<vmem>>, vector<2x256xf32>,
      %c0_33 = arith.constant 0 : index
      %c0_34 = arith.constant 0 : index
      %50 = vector.load %arg2[%c0_33, %c0_34] : memref<256x49xf32, #tpu.memory_space<vmem>>, vector<64x49xf32>
      %c0_35 = arith.constant 0 : index
      %c0_36 = arith.constant 0 : index
      %c0_37 = arith.constant 0 : index
      %51 = vector.load %arg1[%c0_35, %c0_36, %c0_37] : memref<2x49x529xf32, #tpu.memory_space<vmem>>, vector<1x49x529xf32>
      %52 = vector.shape_cast %51 : vector<1x49x529xf32> to vector<49x529xf32>
      %cst_38 = arith.constant dense<0.000000e+00> : vector<64x529xf32>
      %53 = tpu.matmul %50, %52, %cst_38 {dimension_numbers = #tpu.dot_dimension_numbers<[1], [0], [0], [1], [0, 0, 1, 1], [], []>} : vector<64x49xf32>, vector<49x529xf32>, vector<64x529xf32> -> vector<64x529xf32>
      %54 = vector.extract_strided_slice %53 {offsets = [0, 0], sizes = [16, 529], strides = [1, 1]} : vector<64x529xf32> to vector<16x529xf32>
      %55 = vector.extract_strided_slice %53 {offsets = [16, 0], sizes = [16, 529], strides = [1, 1]} : vector<64x529xf32> to vector<16x529xf32>
      %56 = arith.maximumf %54, %55 : vector<16x529xf32>
      %57 = vector.extract_strided_slice %53 {offsets = [32, 0], sizes = [16, 529], strides = [1, 1]} : vector<64x529xf32> to vector<16x529xf32>
      %58 = arith.maximumf %56, %57 : vector<16x529xf32>
      %59 = vector.extract_strided_slice %53 {offsets = [48, 0], sizes = [16, 529], strides = [1, 1]} : vector<64x529xf32> to vector<16x529xf32>
      %60 = arith.maximumf %58, %59 : vector<16x529xf32>
      %c0_39 = arith.constant 0 : index
      %c0_40 = arith.constant 0 : index
      %61 = vector.load %arg3[%c0_39, %c0_40] : memref<16x1xf32, #tpu.memory_space<vmem>>, vector<16x1xf32>
      %62 = vector.broadcast %61 : vector<16x1xf32> to vector<16x529xf32>
      %63 = arith.addf %60, %62 : vector<16x529xf32>
      %cst_41 = arith.constant 0.000000e+00 : f32
      %64 = vector.broadcast %cst_41 : f32 to vector<16x529xf32>
      %65 = arith.maximumf %63, %64 : vector<16x529xf32>
      %c0_42 = arith.constant 0 : index
      %c0_43 = arith.constant 0 : index
      %66 = vector.load %arg4[%c0_42, %c0_43] : memref<4x529xf32, #tpu.memory_space<vmem>>, vector<1x529xf32>
      %67 = vector.broadcast %66 : vector<1x529xf32> to vector<16x529xf32>
      %68 = arith.mulf %65, %67 : vector<16x529xf32>
      %69 = vector.extract_strided_slice %68 {offsets = [0, 0], sizes = [16, 505], strides = [1, 1]} : vector<16x529xf32> to vector<16x505xf32>
      %c0_44 = arith.constant 0 : index
      %c0_45 = arith.constant 0 : index
      %70 = vector.load %arg13[%c0_44, %c0_45] : memref<256x505xf32, #tpu.memory_space<vmem>>, vector<16x505xf32>
      tpu.vector_store %arg13[%c0_44, %c0_45], %69 {strides = array<i32>} : memref<256x505xf32, #tpu.memory_space<vmem>>, vector<16x505xf32>,
      %71 = vector.extract_strided_slice %68 {offsets = [0, 1], sizes = [16, 505], strides = [1, 1]} : vector<16x529xf32> to vector<16x505xf32>
      %c32 = arith.constant 32 : index
      %c0_46 = arith.constant 0 : index
      %72 = vector.load %arg13[%c32, %c0_46] : memref<256x505xf32, #tpu.memory_space<vmem>>, vector<16x505xf32>
      tpu.vector_store %arg13[%c32, %c0_46], %71 {strides = array<i32>} : memref<256x505xf32, #tpu.memory_space<vmem>>, vector<16x505xf32>,
      %73 = vector.extract_strided_slice %68 {offsets = [0, 23], sizes = [16, 505], strides = [1, 1]} : vector<16x529xf32> to vector<16x505xf32>
      %c128 = arith.constant 128 : index
      %c0_47 = arith.constant 0 : index
      %74 = vector.load %arg13[%c128, %c0_47] : memref<256x505xf32, #tpu.memory_space<vmem>>, vector<16x505xf32>
      tpu.vector_store %arg13[%c128, %c0_47], %73 {strides = array<i32>} : memref<256x505xf32, #tpu.memory_space<vmem>>, vector<16x505xf32>,
      %75 = vector.extract_strided_slice %68 {offsets = [0, 24], sizes = [16, 505], strides = [1, 1]} : vector<16x529xf32> to vector<16x505xf32>
      %c160 = arith.constant 160 : index
      %c0_48 = arith.constant 0 : index
      %76 = vector.load %arg13[%c160, %c0_48] : memref<256x505xf32, #tpu.memory_space<vmem>>, vector<16x505xf32>
      tpu.vector_store %arg13[%c160, %c0_48], %75 {strides = array<i32>} : memref<256x505xf32, #tpu.memory_space<vmem>>, vector<16x505xf32>,
      %c64 = arith.constant 64 : index
      %c0_49 = arith.constant 0 : index
      %77 = vector.load %arg2[%c64, %c0_49] : memref<256x49xf32, #tpu.memory_space<vmem>>, vector<64x49xf32>
      %c0_50 = arith.constant 0 : index
      %c0_51 = arith.constant 0 : index
      %c0_52 = arith.constant 0 : index
      %78 = vector.load %arg1[%c0_50, %c0_51, %c0_52] : memref<2x49x529xf32, #tpu.memory_space<vmem>>, vector<1x49x529xf32>
      %79 = vector.shape_cast %78 : vector<1x49x529xf32> to vector<49x529xf32>
      %cst_53 = arith.constant dense<0.000000e+00> : vector<64x529xf32>
      %80 = tpu.matmul %77, %79, %cst_53 {dimension_numbers = #tpu.dot_dimension_numbers<[1], [0], [0], [1], [0, 0, 1, 1], [], []>} : vector<64x49xf32>, vector<49x529xf32>, vector<64x529xf32> -> vector<64x529xf32>
      %81 = vector.extract_strided_slice %80 {offsets = [0, 0], sizes = [16, 529], strides = [1, 1]} : vector<64x529xf32> to vector<16x529xf32>
      %82 = vector.extract_strided_slice %80 {offsets = [16, 0], sizes = [16, 529], strides = [1, 1]} : vector<64x529xf32> to vector<16x529xf32>
      %83 = arith.maximumf %81, %82 : vector<16x529xf32>
      %84 = vector.extract_strided_slice %80 {offsets = [32, 0], sizes = [16, 529], strides = [1, 1]} : vector<64x529xf32> to vector<16x529xf32>
      %85 = arith.maximumf %83, %84 : vector<16x529xf32>
      %86 = vector.extract_strided_slice %80 {offsets = [48, 0], sizes = [16, 529], strides = [1, 1]} : vector<64x529xf32> to vector<16x529xf32>
      %87 = arith.maximumf %85, %86 : vector<16x529xf32>
      %c0_54 = arith.constant 0 : index
      %c0_55 = arith.constant 0 : index
      %88 = vector.load %arg3[%c0_54, %c0_55] : memref<16x1xf32, #tpu.memory_space<vmem>>, vector<16x1xf32>
      %89 = vector.broadcast %88 : vector<16x1xf32> to vector<16x529xf32>
      %90 = arith.addf %87, %89 : vector<16x529xf32>
      %cst_56 = arith.constant 0.000000e+00 : f32
      %91 = vector.broadcast %cst_56 : f32 to vector<16x529xf32>
      %92 = arith.maximumf %90, %91 : vector<16x529xf32>
      %c1_57 = arith.constant 1 : index
      %c0_58 = arith.constant 0 : index
      %93 = vector.load %arg4[%c1_57, %c0_58] : memref<4x529xf32, #tpu.memory_space<vmem>>, vector<1x529xf32>
      %94 = vector.broadcast %93 : vector<1x529xf32> to vector<16x529xf32>
      %95 = arith.mulf %92, %94 : vector<16x529xf32>
      %96 = vector.extract_strided_slice %95 {offsets = [0, 0], sizes = [16, 505], strides = [1, 1]} : vector<16x529xf32> to vector<16x505xf32>
      %c16 = arith.constant 16 : index
      %c0_59 = arith.constant 0 : index
      %97 = vector.load %arg13[%c16, %c0_59] : memref<256x505xf32, #tpu.memory_space<vmem>>, vector<16x505xf32>
      tpu.vector_store %arg13[%c16, %c0_59], %96 {strides = array<i32>} : memref<256x505xf32, #tpu.memory_space<vmem>>, vector<16x505xf32>,
      %98 = vector.extract_strided_slice %95 {offsets = [0, 1], sizes = [16, 505], strides = [1, 1]} : vector<16x529xf32> to vector<16x505xf32>
      %c48 = arith.constant 48 : index
      %c0_60 = arith.constant 0 : index
      %99 = vector.load %arg13[%c48, %c0_60] : memref<256x505xf32, #tpu.memory_space<vmem>>, vector<16x505xf32>
      tpu.vector_store %arg13[%c48, %c0_60], %98 {strides = array<i32>} : memref<256x505xf32, #tpu.memory_space<vmem>>, vector<16x505xf32>,
      %100 = vector.extract_strided_slice %95 {offsets = [0, 23], sizes = [16, 505], strides = [1, 1]} : vector<16x529xf32> to vector<16x505xf32>
      %c144 = arith.constant 144 : index
      %c0_61 = arith.constant 0 : index
      %101 = vector.load %arg13[%c144, %c0_61] : memref<256x505xf32, #tpu.memory_space<vmem>>, vector<16x505xf32>
      tpu.vector_store %arg13[%c144, %c0_61], %100 {strides = array<i32>} : memref<256x505xf32, #tpu.memory_space<vmem>>, vector<16x505xf32>,
      %102 = vector.extract_strided_slice %95 {offsets = [0, 24], sizes = [16, 505], strides = [1, 1]} : vector<16x529xf32> to vector<16x505xf32>
      %c176 = arith.constant 176 : index
      %c0_62 = arith.constant 0 : index
      %103 = vector.load %arg13[%c176, %c0_62] : memref<256x505xf32, #tpu.memory_space<vmem>>, vector<16x505xf32>
      tpu.vector_store %arg13[%c176, %c0_62], %102 {strides = array<i32>} : memref<256x505xf32, #tpu.memory_space<vmem>>, vector<16x505xf32>,
      %c128_63 = arith.constant 128 : index
      %c0_64 = arith.constant 0 : index
      %104 = vector.load %arg2[%c128_63, %c0_64] : memref<256x49xf32, #tpu.memory_space<vmem>>, vector<64x49xf32>
      %c0_65 = arith.constant 0 : index
      %c0_66 = arith.constant 0 : index
      %c0_67 = arith.constant 0 : index
      %105 = vector.load %arg1[%c0_65, %c0_66, %c0_67] : memref<2x49x529xf32, #tpu.memory_space<vmem>>, vector<1x49x529xf32>
      %106 = vector.shape_cast %105 : vector<1x49x529xf32> to vector<49x529xf32>
      %cst_68 = arith.constant dense<0.000000e+00> : vector<64x529xf32>
      %107 = tpu.matmul %104, %106, %cst_68 {dimension_numbers = #tpu.dot_dimension_numbers<[1], [0], [0], [1], [0, 0, 1, 1], [], []>} : vector<64x49xf32>, vector<49x529xf32>, vector<64x529xf32> -> vector<64x529xf32>
      %108 = vector.extract_strided_slice %107 {offsets = [0, 0], sizes = [16, 529], strides = [1, 1]} : vector<64x529xf32> to vector<16x529xf32>
      %109 = vector.extract_strided_slice %107 {offsets = [16, 0], sizes = [16, 529], strides = [1, 1]} : vector<64x529xf32> to vector<16x529xf32>
      %110 = arith.maximumf %108, %109 : vector<16x529xf32>
      %111 = vector.extract_strided_slice %107 {offsets = [32, 0], sizes = [16, 529], strides = [1, 1]} : vector<64x529xf32> to vector<16x529xf32>
      %112 = arith.maximumf %110, %111 : vector<16x529xf32>
      %113 = vector.extract_strided_slice %107 {offsets = [48, 0], sizes = [16, 529], strides = [1, 1]} : vector<64x529xf32> to vector<16x529xf32>
      %114 = arith.maximumf %112, %113 : vector<16x529xf32>
      %c0_69 = arith.constant 0 : index
      %c0_70 = arith.constant 0 : index
      %115 = vector.load %arg3[%c0_69, %c0_70] : memref<16x1xf32, #tpu.memory_space<vmem>>, vector<16x1xf32>
      %116 = vector.broadcast %115 : vector<16x1xf32> to vector<16x529xf32>
      %117 = arith.addf %114, %116 : vector<16x529xf32>
      %cst_71 = arith.constant 0.000000e+00 : f32
      %118 = vector.broadcast %cst_71 : f32 to vector<16x529xf32>
      %119 = arith.maximumf %117, %118 : vector<16x529xf32>
      %c2_72 = arith.constant 2 : index
      %c0_73 = arith.constant 0 : index
      %120 = vector.load %arg4[%c2_72, %c0_73] : memref<4x529xf32, #tpu.memory_space<vmem>>, vector<1x529xf32>
      %121 = vector.broadcast %120 : vector<1x529xf32> to vector<16x529xf32>
      %122 = arith.mulf %119, %121 : vector<16x529xf32>
      %123 = vector.extract_strided_slice %122 {offsets = [0, 0], sizes = [16, 505], strides = [1, 1]} : vector<16x529xf32> to vector<16x505xf32>
      %c64_74 = arith.constant 64 : index
      %c0_75 = arith.constant 0 : index
      %124 = vector.load %arg13[%c64_74, %c0_75] : memref<256x505xf32, #tpu.memory_space<vmem>>, vector<16x505xf32>
      tpu.vector_store %arg13[%c64_74, %c0_75], %123 {strides = array<i32>} : memref<256x505xf32, #tpu.memory_space<vmem>>, vector<16x505xf32>,
      %125 = vector.extract_strided_slice %122 {offsets = [0, 1], sizes = [16, 505], strides = [1, 1]} : vector<16x529xf32> to vector<16x505xf32>
      %c96 = arith.constant 96 : index
      %c0_76 = arith.constant 0 : index
      %126 = vector.load %arg13[%c96, %c0_76] : memref<256x505xf32, #tpu.memory_space<vmem>>, vector<16x505xf32>
      tpu.vector_store %arg13[%c96, %c0_76], %125 {strides = array<i32>} : memref<256x505xf32, #tpu.memory_space<vmem>>, vector<16x505xf32>,
      %127 = vector.extract_strided_slice %122 {offsets = [0, 23], sizes = [16, 505], strides = [1, 1]} : vector<16x529xf32> to vector<16x505xf32>
      %c192 = arith.constant 192 : index
      %c0_77 = arith.constant 0 : index
      %128 = vector.load %arg13[%c192, %c0_77] : memref<256x505xf32, #tpu.memory_space<vmem>>, vector<16x505xf32>
      tpu.vector_store %arg13[%c192, %c0_77], %127 {strides = array<i32>} : memref<256x505xf32, #tpu.memory_space<vmem>>, vector<16x505xf32>,
      %129 = vector.extract_strided_slice %122 {offsets = [0, 24], sizes = [16, 505], strides = [1, 1]} : vector<16x529xf32> to vector<16x505xf32>
      %c224 = arith.constant 224 : index
      %c0_78 = arith.constant 0 : index
      %130 = vector.load %arg13[%c224, %c0_78] : memref<256x505xf32, #tpu.memory_space<vmem>>, vector<16x505xf32>
      tpu.vector_store %arg13[%c224, %c0_78], %129 {strides = array<i32>} : memref<256x505xf32, #tpu.memory_space<vmem>>, vector<16x505xf32>,
      %c192_79 = arith.constant 192 : index
      %c0_80 = arith.constant 0 : index
      %131 = vector.load %arg2[%c192_79, %c0_80] : memref<256x49xf32, #tpu.memory_space<vmem>>, vector<64x49xf32>
      %c0_81 = arith.constant 0 : index
      %c0_82 = arith.constant 0 : index
      %c0_83 = arith.constant 0 : index
      %132 = vector.load %arg1[%c0_81, %c0_82, %c0_83] : memref<2x49x529xf32, #tpu.memory_space<vmem>>, vector<1x49x529xf32>
      %133 = vector.shape_cast %132 : vector<1x49x529xf32> to vector<49x529xf32>
      %cst_84 = arith.constant dense<0.000000e+00> : vector<64x529xf32>
      %134 = tpu.matmul %131, %133, %cst_84 {dimension_numbers = #tpu.dot_dimension_numbers<[1], [0], [0], [1], [0, 0, 1, 1], [], []>} : vector<64x49xf32>, vector<49x529xf32>, vector<64x529xf32> -> vector<64x529xf32>
      %135 = vector.extract_strided_slice %134 {offsets = [0, 0], sizes = [16, 529], strides = [1, 1]} : vector<64x529xf32> to vector<16x529xf32>
      %136 = vector.extract_strided_slice %134 {offsets = [16, 0], sizes = [16, 529], strides = [1, 1]} : vector<64x529xf32> to vector<16x529xf32>
      %137 = arith.maximumf %135, %136 : vector<16x529xf32>
      %138 = vector.extract_strided_slice %134 {offsets = [32, 0], sizes = [16, 529], strides = [1, 1]} : vector<64x529xf32> to vector<16x529xf32>
      %139 = arith.maximumf %137, %138 : vector<16x529xf32>
      %140 = vector.extract_strided_slice %134 {offsets = [48, 0], sizes = [16, 529], strides = [1, 1]} : vector<64x529xf32> to vector<16x529xf32>
      %141 = arith.maximumf %139, %140 : vector<16x529xf32>
      %c0_85 = arith.constant 0 : index
      %c0_86 = arith.constant 0 : index
      %142 = vector.load %arg3[%c0_85, %c0_86] : memref<16x1xf32, #tpu.memory_space<vmem>>, vector<16x1xf32>
      %143 = vector.broadcast %142 : vector<16x1xf32> to vector<16x529xf32>
      %144 = arith.addf %141, %143 : vector<16x529xf32>
      %cst_87 = arith.constant 0.000000e+00 : f32
      %145 = vector.broadcast %cst_87 : f32 to vector<16x529xf32>
      %146 = arith.maximumf %144, %145 : vector<16x529xf32>
      %c3_88 = arith.constant 3 : index
      %c0_89 = arith.constant 0 : index
      %147 = vector.load %arg4[%c3_88, %c0_89] : memref<4x529xf32, #tpu.memory_space<vmem>>, vector<1x529xf32>
      %148 = vector.broadcast %147 : vector<1x529xf32> to vector<16x529xf32>
      %149 = arith.mulf %146, %148 : vector<16x529xf32>
      %150 = vector.extract_strided_slice %149 {offsets = [0, 0], sizes = [16, 505], strides = [1, 1]} : vector<16x529xf32> to vector<16x505xf32>
      %c80 = arith.constant 80 : index
      %c0_90 = arith.constant 0 : index
      %151 = vector.load %arg13[%c80, %c0_90] : memref<256x505xf32, #tpu.memory_space<vmem>>, vector<16x505xf32>
      tpu.vector_store %arg13[%c80, %c0_90], %150 {strides = array<i32>} : memref<256x505xf32, #tpu.memory_space<vmem>>, vector<16x505xf32>,
      %152 = vector.extract_strided_slice %149 {offsets = [0, 1], sizes = [16, 505], strides = [1, 1]} : vector<16x529xf32> to vector<16x505xf32>
      %c112 = arith.constant 112 : index
      %c0_91 = arith.constant 0 : index
      %153 = vector.load %arg13[%c112, %c0_91] : memref<256x505xf32, #tpu.memory_space<vmem>>, vector<16x505xf32>
      tpu.vector_store %arg13[%c112, %c0_91], %152 {strides = array<i32>} : memref<256x505xf32, #tpu.memory_space<vmem>>, vector<16x505xf32>,
      %154 = vector.extract_strided_slice %149 {offsets = [0, 23], sizes = [16, 505], strides = [1, 1]} : vector<16x529xf32> to vector<16x505xf32>
      %c208 = arith.constant 208 : index
      %c0_92 = arith.constant 0 : index
      %155 = vector.load %arg13[%c208, %c0_92] : memref<256x505xf32, #tpu.memory_space<vmem>>, vector<16x505xf32>
      tpu.vector_store %arg13[%c208, %c0_92], %154 {strides = array<i32>} : memref<256x505xf32, #tpu.memory_space<vmem>>, vector<16x505xf32>,
      %156 = vector.extract_strided_slice %149 {offsets = [0, 24], sizes = [16, 505], strides = [1, 1]} : vector<16x529xf32> to vector<16x505xf32>
      %c240 = arith.constant 240 : index
      %c0_93 = arith.constant 0 : index
      %157 = vector.load %arg13[%c240, %c0_93] : memref<256x505xf32, #tpu.memory_space<vmem>>, vector<16x505xf32>
      tpu.vector_store %arg13[%c240, %c0_93], %156 {strides = array<i32>} : memref<256x505xf32, #tpu.memory_space<vmem>>, vector<16x505xf32>,
      %c0_94 = arith.constant 0 : index
      %c0_95 = arith.constant 0 : index
      %158 = vector.load %arg5[%c0_94, %c0_95] : memref<64x256xf32, #tpu.memory_space<vmem>>, vector<64x256xf32>
      %c0_96 = arith.constant 0 : index
      %c0_97 = arith.constant 0 : index
      %159 = vector.load %arg13[%c0_96, %c0_97] : memref<256x505xf32, #tpu.memory_space<vmem>>, vector<256x505xf32>
      %cst_98 = arith.constant dense<0.000000e+00> : vector<64x505xf32>
      %160 = tpu.matmul %158, %159, %cst_98 {dimension_numbers = #tpu.dot_dimension_numbers<[1], [0], [0], [1], [0, 0, 1, 1], [], []>} : vector<64x256xf32>, vector<256x505xf32>, vector<64x505xf32> -> vector<64x505xf32>
      %161 = vector.extract_strided_slice %160 {offsets = [0, 0], sizes = [16, 505], strides = [1, 1]} : vector<64x505xf32> to vector<16x505xf32>
      %162 = vector.extract_strided_slice %160 {offsets = [16, 0], sizes = [16, 505], strides = [1, 1]} : vector<64x505xf32> to vector<16x505xf32>
      %163 = arith.maximumf %161, %162 : vector<16x505xf32>
      %164 = vector.extract_strided_slice %160 {offsets = [32, 0], sizes = [16, 505], strides = [1, 1]} : vector<64x505xf32> to vector<16x505xf32>
      %165 = arith.maximumf %163, %164 : vector<16x505xf32>
      %166 = vector.extract_strided_slice %160 {offsets = [48, 0], sizes = [16, 505], strides = [1, 1]} : vector<64x505xf32> to vector<16x505xf32>
      %167 = arith.maximumf %165, %166 : vector<16x505xf32>
      %c0_99 = arith.constant 0 : index
      %c0_100 = arith.constant 0 : index
      %168 = vector.load %arg6[%c0_99, %c0_100] : memref<16x1xf32, #tpu.memory_space<vmem>>, vector<16x1xf32>
      %169 = vector.broadcast %168 : vector<16x1xf32> to vector<16x505xf32>
      %170 = arith.addf %167, %169 : vector<16x505xf32>
      %cst_101 = arith.constant 0.000000e+00 : f32
      %171 = vector.broadcast %cst_101 : f32 to vector<16x505xf32>
      %172 = arith.maximumf %170, %171 : vector<16x505xf32>
      %c0_102 = arith.constant 0 : index
      %c0_103 = arith.constant 0 : index
      %c0_104 = arith.constant 0 : index
      %173 = vector.load %arg14[%c0_102, %c0_103, %c0_104] : memref<16x2x505xf32, #tpu.memory_space<vmem>>, vector<16x1x505xf32>
      %174 = vector.shape_cast %173 : vector<16x1x505xf32> to vector<16x505xf32>
      %175 = vector.shape_cast %172 : vector<16x505xf32> to vector<16x1x505xf32>
      tpu.vector_store %arg14[%c0_102, %c0_103, %c0_104], %175 {strides = array<i32>} : memref<16x2x505xf32, #tpu.memory_space<vmem>>, vector<16x1x505xf32>,
      %c0_105 = arith.constant 0 : index
      %c0_106 = arith.constant 0 : index
      %176 = vector.load %arg2[%c0_105, %c0_106] : memref<256x49xf32, #tpu.memory_space<vmem>>, vector<64x49xf32>
      %c1_107 = arith.constant 1 : index
      %c0_108 = arith.constant 0 : index
      %c0_109 = arith.constant 0 : index
      %177 = vector.load %arg1[%c1_107, %c0_108, %c0_109] : memref<2x49x529xf32, #tpu.memory_space<vmem>>, vector<1x49x529xf32>
      %178 = vector.shape_cast %177 : vector<1x49x529xf32> to vector<49x529xf32>
      %cst_110 = arith.constant dense<0.000000e+00> : vector<64x529xf32>
      %179 = tpu.matmul %176, %178, %cst_110 {dimension_numbers = #tpu.dot_dimension_numbers<[1], [0], [0], [1], [0, 0, 1, 1], [], []>} : vector<64x49xf32>, vector<49x529xf32>, vector<64x529xf32> -> vector<64x529xf32>
      %180 = vector.extract_strided_slice %179 {offsets = [0, 0], sizes = [16, 529], strides = [1, 1]} : vector<64x529xf32> to vector<16x529xf32>
      %181 = vector.extract_strided_slice %179 {offsets = [16, 0], sizes = [16, 529], strides = [1, 1]} : vector<64x529xf32> to vector<16x529xf32>
      %182 = arith.maximumf %180, %181 : vector<16x529xf32>
      %183 = vector.extract_strided_slice %179 {offsets = [32, 0], sizes = [16, 529], strides = [1, 1]} : vector<64x529xf32> to vector<16x529xf32>
      %184 = arith.maximumf %182, %183 : vector<16x529xf32>
      %185 = vector.extract_strided_slice %179 {offsets = [48, 0], sizes = [16, 529], strides = [1, 1]} : vector<64x529xf32> to vector<16x529xf32>
      %186 = arith.maximumf %184, %185 : vector<16x529xf32>
      %c0_111 = arith.constant 0 : index
      %c0_112 = arith.constant 0 : index
      %187 = vector.load %arg3[%c0_111, %c0_112] : memref<16x1xf32, #tpu.memory_space<vmem>>, vector<16x1xf32>
      %188 = vector.broadcast %187 : vector<16x1xf32> to vector<16x529xf32>
      %189 = arith.addf %186, %188 : vector<16x529xf32>
      %cst_113 = arith.constant 0.000000e+00 : f32
      %190 = vector.broadcast %cst_113 : f32 to vector<16x529xf32>
      %191 = arith.maximumf %189, %190 : vector<16x529xf32>
      %c0_114 = arith.constant 0 : index
      %c0_115 = arith.constant 0 : index
      %192 = vector.load %arg4[%c0_114, %c0_115] : memref<4x529xf32, #tpu.memory_space<vmem>>, vector<1x529xf32>
      %193 = vector.broadcast %192 : vector<1x529xf32> to vector<16x529xf32>
      %194 = arith.mulf %191, %193 : vector<16x529xf32>
      %195 = vector.extract_strided_slice %194 {offsets = [0, 0], sizes = [16, 505], strides = [1, 1]} : vector<16x529xf32> to vector<16x505xf32>
      %c0_116 = arith.constant 0 : index
      %c0_117 = arith.constant 0 : index
      %196 = vector.load %arg13[%c0_116, %c0_117] : memref<256x505xf32, #tpu.memory_space<vmem>>, vector<16x505xf32>
      tpu.vector_store %arg13[%c0_116, %c0_117], %195 {strides = array<i32>} : memref<256x505xf32, #tpu.memory_space<vmem>>, vector<16x505xf32>,
      %197 = vector.extract_strided_slice %194 {offsets = [0, 1], sizes = [16, 505], strides = [1, 1]} : vector<16x529xf32> to vector<16x505xf32>
      %c32_118 = arith.constant 32 : index
      %c0_119 = arith.constant 0 : index
      %198 = vector.load %arg13[%c32_118, %c0_119] : memref<256x505xf32, #tpu.memory_space<vmem>>, vector<16x505xf32>
      tpu.vector_store %arg13[%c32_118, %c0_119], %197 {strides = array<i32>} : memref<256x505xf32, #tpu.memory_space<vmem>>, vector<16x505xf32>,
      %199 = vector.extract_strided_slice %194 {offsets = [0, 23], sizes = [16, 505], strides = [1, 1]} : vector<16x529xf32> to vector<16x505xf32>
      %c128_120 = arith.constant 128 : index
      %c0_121 = arith.constant 0 : index
      %200 = vector.load %arg13[%c128_120, %c0_121] : memref<256x505xf32, #tpu.memory_space<vmem>>, vector<16x505xf32>
      tpu.vector_store %arg13[%c128_120, %c0_121], %199 {strides = array<i32>} : memref<256x505xf32, #tpu.memory_space<vmem>>, vector<16x505xf32>,
      %201 = vector.extract_strided_slice %194 {offsets = [0, 24], sizes = [16, 505], strides = [1, 1]} : vector<16x529xf32> to vector<16x505xf32>
      %c160_122 = arith.constant 160 : index
      %c0_123 = arith.constant 0 : index
      %202 = vector.load %arg13[%c160_122, %c0_123] : memref<256x505xf32, #tpu.memory_space<vmem>>, vector<16x505xf32>
      tpu.vector_store %arg13[%c160_122, %c0_123], %201 {strides = array<i32>} : memref<256x505xf32, #tpu.memory_space<vmem>>, vector<16x505xf32>,
      %c64_124 = arith.constant 64 : index
      %c0_125 = arith.constant 0 : index
      %203 = vector.load %arg2[%c64_124, %c0_125] : memref<256x49xf32, #tpu.memory_space<vmem>>, vector<64x49xf32>
      %c1_126 = arith.constant 1 : index
      %c0_127 = arith.constant 0 : index
      %c0_128 = arith.constant 0 : index
      %204 = vector.load %arg1[%c1_126, %c0_127, %c0_128] : memref<2x49x529xf32, #tpu.memory_space<vmem>>, vector<1x49x529xf32>
      %205 = vector.shape_cast %204 : vector<1x49x529xf32> to vector<49x529xf32>
      %cst_129 = arith.constant dense<0.000000e+00> : vector<64x529xf32>
      %206 = tpu.matmul %203, %205, %cst_129 {dimension_numbers = #tpu.dot_dimension_numbers<[1], [0], [0], [1], [0, 0, 1, 1], [], []>} : vector<64x49xf32>, vector<49x529xf32>, vector<64x529xf32> -> vector<64x529xf32>
      %207 = vector.extract_strided_slice %206 {offsets = [0, 0], sizes = [16, 529], strides = [1, 1]} : vector<64x529xf32> to vector<16x529xf32>
      %208 = vector.extract_strided_slice %206 {offsets = [16, 0], sizes = [16, 529], strides = [1, 1]} : vector<64x529xf32> to vector<16x529xf32>
      %209 = arith.maximumf %207, %208 : vector<16x529xf32>
      %210 = vector.extract_strided_slice %206 {offsets = [32, 0], sizes = [16, 529], strides = [1, 1]} : vector<64x529xf32> to vector<16x529xf32>
      %211 = arith.maximumf %209, %210 : vector<16x529xf32>
      %212 = vector.extract_strided_slice %206 {offsets = [48, 0], sizes = [16, 529], strides = [1, 1]} : vector<64x529xf32> to vector<16x529xf32>
      %213 = arith.maximumf %211, %212 : vector<16x529xf32>
      %c0_130 = arith.constant 0 : index
      %c0_131 = arith.constant 0 : index
      %214 = vector.load %arg3[%c0_130, %c0_131] : memref<16x1xf32, #tpu.memory_space<vmem>>, vector<16x1xf32>
      %215 = vector.broadcast %214 : vector<16x1xf32> to vector<16x529xf32>
      %216 = arith.addf %213, %215 : vector<16x529xf32>
      %cst_132 = arith.constant 0.000000e+00 : f32
      %217 = vector.broadcast %cst_132 : f32 to vector<16x529xf32>
      %218 = arith.maximumf %216, %217 : vector<16x529xf32>
      %c1_133 = arith.constant 1 : index
      %c0_134 = arith.constant 0 : index
      %219 = vector.load %arg4[%c1_133, %c0_134] : memref<4x529xf32, #tpu.memory_space<vmem>>, vector<1x529xf32>
      %220 = vector.broadcast %219 : vector<1x529xf32> to vector<16x529xf32>
      %221 = arith.mulf %218, %220 : vector<16x529xf32>
      %222 = vector.extract_strided_slice %221 {offsets = [0, 0], sizes = [16, 505], strides = [1, 1]} : vector<16x529xf32> to vector<16x505xf32>
      %c16_135 = arith.constant 16 : index
      %c0_136 = arith.constant 0 : index
      %223 = vector.load %arg13[%c16_135, %c0_136] : memref<256x505xf32, #tpu.memory_space<vmem>>, vector<16x505xf32>
      tpu.vector_store %arg13[%c16_135, %c0_136], %222 {strides = array<i32>} : memref<256x505xf32, #tpu.memory_space<vmem>>, vector<16x505xf32>,
      %224 = vector.extract_strided_slice %221 {offsets = [0, 1], sizes = [16, 505], strides = [1, 1]} : vector<16x529xf32> to vector<16x505xf32>
      %c48_137 = arith.constant 48 : index
      %c0_138 = arith.constant 0 : index
      %225 = vector.load %arg13[%c48_137, %c0_138] : memref<256x505xf32, #tpu.memory_space<vmem>>, vector<16x505xf32>
      tpu.vector_store %arg13[%c48_137, %c0_138], %224 {strides = array<i32>} : memref<256x505xf32, #tpu.memory_space<vmem>>, vector<16x505xf32>,
      %226 = vector.extract_strided_slice %221 {offsets = [0, 23], sizes = [16, 505], strides = [1, 1]} : vector<16x529xf32> to vector<16x505xf32>
      %c144_139 = arith.constant 144 : index
      %c0_140 = arith.constant 0 : index
      %227 = vector.load %arg13[%c144_139, %c0_140] : memref<256x505xf32, #tpu.memory_space<vmem>>, vector<16x505xf32>
      tpu.vector_store %arg13[%c144_139, %c0_140], %226 {strides = array<i32>} : memref<256x505xf32, #tpu.memory_space<vmem>>, vector<16x505xf32>,
      %228 = vector.extract_strided_slice %221 {offsets = [0, 24], sizes = [16, 505], strides = [1, 1]} : vector<16x529xf32> to vector<16x505xf32>
      %c176_141 = arith.constant 176 : index
      %c0_142 = arith.constant 0 : index
      %229 = vector.load %arg13[%c176_141, %c0_142] : memref<256x505xf32, #tpu.memory_space<vmem>>, vector<16x505xf32>
      tpu.vector_store %arg13[%c176_141, %c0_142], %228 {strides = array<i32>} : memref<256x505xf32, #tpu.memory_space<vmem>>, vector<16x505xf32>,
      %c128_143 = arith.constant 128 : index
      %c0_144 = arith.constant 0 : index
      %230 = vector.load %arg2[%c128_143, %c0_144] : memref<256x49xf32, #tpu.memory_space<vmem>>, vector<64x49xf32>
      %c1_145 = arith.constant 1 : index
      %c0_146 = arith.constant 0 : index
      %c0_147 = arith.constant 0 : index
      %231 = vector.load %arg1[%c1_145, %c0_146, %c0_147] : memref<2x49x529xf32, #tpu.memory_space<vmem>>, vector<1x49x529xf32>
      %232 = vector.shape_cast %231 : vector<1x49x529xf32> to vector<49x529xf32>
      %cst_148 = arith.constant dense<0.000000e+00> : vector<64x529xf32>
      %233 = tpu.matmul %230, %232, %cst_148 {dimension_numbers = #tpu.dot_dimension_numbers<[1], [0], [0], [1], [0, 0, 1, 1], [], []>} : vector<64x49xf32>, vector<49x529xf32>, vector<64x529xf32> -> vector<64x529xf32>
      %234 = vector.extract_strided_slice %233 {offsets = [0, 0], sizes = [16, 529], strides = [1, 1]} : vector<64x529xf32> to vector<16x529xf32>
      %235 = vector.extract_strided_slice %233 {offsets = [16, 0], sizes = [16, 529], strides = [1, 1]} : vector<64x529xf32> to vector<16x529xf32>
      %236 = arith.maximumf %234, %235 : vector<16x529xf32>
      %237 = vector.extract_strided_slice %233 {offsets = [32, 0], sizes = [16, 529], strides = [1, 1]} : vector<64x529xf32> to vector<16x529xf32>
      %238 = arith.maximumf %236, %237 : vector<16x529xf32>
      %239 = vector.extract_strided_slice %233 {offsets = [48, 0], sizes = [16, 529], strides = [1, 1]} : vector<64x529xf32> to vector<16x529xf32>
      %240 = arith.maximumf %238, %239 : vector<16x529xf32>
      %c0_149 = arith.constant 0 : index
      %c0_150 = arith.constant 0 : index
      %241 = vector.load %arg3[%c0_149, %c0_150] : memref<16x1xf32, #tpu.memory_space<vmem>>, vector<16x1xf32>
      %242 = vector.broadcast %241 : vector<16x1xf32> to vector<16x529xf32>
      %243 = arith.addf %240, %242 : vector<16x529xf32>
      %cst_151 = arith.constant 0.000000e+00 : f32
      %244 = vector.broadcast %cst_151 : f32 to vector<16x529xf32>
      %245 = arith.maximumf %243, %244 : vector<16x529xf32>
      %c2_152 = arith.constant 2 : index
      %c0_153 = arith.constant 0 : index
      %246 = vector.load %arg4[%c2_152, %c0_153] : memref<4x529xf32, #tpu.memory_space<vmem>>, vector<1x529xf32>
      %247 = vector.broadcast %246 : vector<1x529xf32> to vector<16x529xf32>
      %248 = arith.mulf %245, %247 : vector<16x529xf32>
      %249 = vector.extract_strided_slice %248 {offsets = [0, 0], sizes = [16, 505], strides = [1, 1]} : vector<16x529xf32> to vector<16x505xf32>
      %c64_154 = arith.constant 64 : index
      %c0_155 = arith.constant 0 : index
      %250 = vector.load %arg13[%c64_154, %c0_155] : memref<256x505xf32, #tpu.memory_space<vmem>>, vector<16x505xf32>
      tpu.vector_store %arg13[%c64_154, %c0_155], %249 {strides = array<i32>} : memref<256x505xf32, #tpu.memory_space<vmem>>, vector<16x505xf32>,
      %251 = vector.extract_strided_slice %248 {offsets = [0, 1], sizes = [16, 505], strides = [1, 1]} : vector<16x529xf32> to vector<16x505xf32>
      %c96_156 = arith.constant 96 : index
      %c0_157 = arith.constant 0 : index
      %252 = vector.load %arg13[%c96_156, %c0_157] : memref<256x505xf32, #tpu.memory_space<vmem>>, vector<16x505xf32>
      tpu.vector_store %arg13[%c96_156, %c0_157], %251 {strides = array<i32>} : memref<256x505xf32, #tpu.memory_space<vmem>>, vector<16x505xf32>,
      %253 = vector.extract_strided_slice %248 {offsets = [0, 23], sizes = [16, 505], strides = [1, 1]} : vector<16x529xf32> to vector<16x505xf32>
      %c192_158 = arith.constant 192 : index
      %c0_159 = arith.constant 0 : index
      %254 = vector.load %arg13[%c192_158, %c0_159] : memref<256x505xf32, #tpu.memory_space<vmem>>, vector<16x505xf32>
      tpu.vector_store %arg13[%c192_158, %c0_159], %253 {strides = array<i32>} : memref<256x505xf32, #tpu.memory_space<vmem>>, vector<16x505xf32>,
      %255 = vector.extract_strided_slice %248 {offsets = [0, 24], sizes = [16, 505], strides = [1, 1]} : vector<16x529xf32> to vector<16x505xf32>
      %c224_160 = arith.constant 224 : index
      %c0_161 = arith.constant 0 : index
      %256 = vector.load %arg13[%c224_160, %c0_161] : memref<256x505xf32, #tpu.memory_space<vmem>>, vector<16x505xf32>
      tpu.vector_store %arg13[%c224_160, %c0_161], %255 {strides = array<i32>} : memref<256x505xf32, #tpu.memory_space<vmem>>, vector<16x505xf32>,
      %c192_162 = arith.constant 192 : index
      %c0_163 = arith.constant 0 : index
      %257 = vector.load %arg2[%c192_162, %c0_163] : memref<256x49xf32, #tpu.memory_space<vmem>>, vector<64x49xf32>
      %c1_164 = arith.constant 1 : index
      %c0_165 = arith.constant 0 : index
      %c0_166 = arith.constant 0 : index
      %258 = vector.load %arg1[%c1_164, %c0_165, %c0_166] : memref<2x49x529xf32, #tpu.memory_space<vmem>>, vector<1x49x529xf32>
      %259 = vector.shape_cast %258 : vector<1x49x529xf32> to vector<49x529xf32>
      %cst_167 = arith.constant dense<0.000000e+00> : vector<64x529xf32>
      %260 = tpu.matmul %257, %259, %cst_167 {dimension_numbers = #tpu.dot_dimension_numbers<[1], [0], [0], [1], [0, 0, 1, 1], [], []>} : vector<64x49xf32>, vector<49x529xf32>, vector<64x529xf32> -> vector<64x529xf32>
      %261 = vector.extract_strided_slice %260 {offsets = [0, 0], sizes = [16, 529], strides = [1, 1]} : vector<64x529xf32> to vector<16x529xf32>
      %262 = vector.extract_strided_slice %260 {offsets = [16, 0], sizes = [16, 529], strides = [1, 1]} : vector<64x529xf32> to vector<16x529xf32>
      %263 = arith.maximumf %261, %262 : vector<16x529xf32>
      %264 = vector.extract_strided_slice %260 {offsets = [32, 0], sizes = [16, 529], strides = [1, 1]} : vector<64x529xf32> to vector<16x529xf32>
      %265 = arith.maximumf %263, %264 : vector<16x529xf32>
      %266 = vector.extract_strided_slice %260 {offsets = [48, 0], sizes = [16, 529], strides = [1, 1]} : vector<64x529xf32> to vector<16x529xf32>
      %267 = arith.maximumf %265, %266 : vector<16x529xf32>
      %c0_168 = arith.constant 0 : index
      %c0_169 = arith.constant 0 : index
      %268 = vector.load %arg3[%c0_168, %c0_169] : memref<16x1xf32, #tpu.memory_space<vmem>>, vector<16x1xf32>
      %269 = vector.broadcast %268 : vector<16x1xf32> to vector<16x529xf32>
      %270 = arith.addf %267, %269 : vector<16x529xf32>
      %cst_170 = arith.constant 0.000000e+00 : f32
      %271 = vector.broadcast %cst_170 : f32 to vector<16x529xf32>
      %272 = arith.maximumf %270, %271 : vector<16x529xf32>
      %c3_171 = arith.constant 3 : index
      %c0_172 = arith.constant 0 : index
      %273 = vector.load %arg4[%c3_171, %c0_172] : memref<4x529xf32, #tpu.memory_space<vmem>>, vector<1x529xf32>
      %274 = vector.broadcast %273 : vector<1x529xf32> to vector<16x529xf32>
      %275 = arith.mulf %272, %274 : vector<16x529xf32>
      %276 = vector.extract_strided_slice %275 {offsets = [0, 0], sizes = [16, 505], strides = [1, 1]} : vector<16x529xf32> to vector<16x505xf32>
      %c80_173 = arith.constant 80 : index
      %c0_174 = arith.constant 0 : index
      %277 = vector.load %arg13[%c80_173, %c0_174] : memref<256x505xf32, #tpu.memory_space<vmem>>, vector<16x505xf32>
      tpu.vector_store %arg13[%c80_173, %c0_174], %276 {strides = array<i32>} : memref<256x505xf32, #tpu.memory_space<vmem>>, vector<16x505xf32>,
      %278 = vector.extract_strided_slice %275 {offsets = [0, 1], sizes = [16, 505], strides = [1, 1]} : vector<16x529xf32> to vector<16x505xf32>
      %c112_175 = arith.constant 112 : index
      %c0_176 = arith.constant 0 : index
      %279 = vector.load %arg13[%c112_175, %c0_176] : memref<256x505xf32, #tpu.memory_space<vmem>>, vector<16x505xf32>
      tpu.vector_store %arg13[%c112_175, %c0_176], %278 {strides = array<i32>} : memref<256x505xf32, #tpu.memory_space<vmem>>, vector<16x505xf32>,
      %280 = vector.extract_strided_slice %275 {offsets = [0, 23], sizes = [16, 505], strides = [1, 1]} : vector<16x529xf32> to vector<16x505xf32>
      %c208_177 = arith.constant 208 : index
      %c0_178 = arith.constant 0 : index
      %281 = vector.load %arg13[%c208_177, %c0_178] : memref<256x505xf32, #tpu.memory_space<vmem>>, vector<16x505xf32>
      tpu.vector_store %arg13[%c208_177, %c0_178], %280 {strides = array<i32>} : memref<256x505xf32, #tpu.memory_space<vmem>>, vector<16x505xf32>,
      %282 = vector.extract_strided_slice %275 {offsets = [0, 24], sizes = [16, 505], strides = [1, 1]} : vector<16x529xf32> to vector<16x505xf32>
      %c240_179 = arith.constant 240 : index
      %c0_180 = arith.constant 0 : index
      %283 = vector.load %arg13[%c240_179, %c0_180] : memref<256x505xf32, #tpu.memory_space<vmem>>, vector<16x505xf32>
      tpu.vector_store %arg13[%c240_179, %c0_180], %282 {strides = array<i32>} : memref<256x505xf32, #tpu.memory_space<vmem>>, vector<16x505xf32>,
      %c0_181 = arith.constant 0 : index
      %c0_182 = arith.constant 0 : index
      %284 = vector.load %arg5[%c0_181, %c0_182] : memref<64x256xf32, #tpu.memory_space<vmem>>, vector<64x256xf32>
      %c0_183 = arith.constant 0 : index
      %c0_184 = arith.constant 0 : index
      %285 = vector.load %arg13[%c0_183, %c0_184] : memref<256x505xf32, #tpu.memory_space<vmem>>, vector<256x505xf32>
      %cst_185 = arith.constant dense<0.000000e+00> : vector<64x505xf32>
      %286 = tpu.matmul %284, %285, %cst_185 {dimension_numbers = #tpu.dot_dimension_numbers<[1], [0], [0], [1], [0, 0, 1, 1], [], []>} : vector<64x256xf32>, vector<256x505xf32>, vector<64x505xf32> -> vector<64x505xf32>
      %287 = vector.extract_strided_slice %286 {offsets = [0, 0], sizes = [16, 505], strides = [1, 1]} : vector<64x505xf32> to vector<16x505xf32>
      %288 = vector.extract_strided_slice %286 {offsets = [16, 0], sizes = [16, 505], strides = [1, 1]} : vector<64x505xf32> to vector<16x505xf32>
      %289 = arith.maximumf %287, %288 : vector<16x505xf32>
      %290 = vector.extract_strided_slice %286 {offsets = [32, 0], sizes = [16, 505], strides = [1, 1]} : vector<64x505xf32> to vector<16x505xf32>
      %291 = arith.maximumf %289, %290 : vector<16x505xf32>
      %292 = vector.extract_strided_slice %286 {offsets = [48, 0], sizes = [16, 505], strides = [1, 1]} : vector<64x505xf32> to vector<16x505xf32>
      %293 = arith.maximumf %291, %292 : vector<16x505xf32>
      %c0_186 = arith.constant 0 : index
      %c0_187 = arith.constant 0 : index
      %294 = vector.load %arg6[%c0_186, %c0_187] : memref<16x1xf32, #tpu.memory_space<vmem>>, vector<16x1xf32>
      %295 = vector.broadcast %294 : vector<16x1xf32> to vector<16x505xf32>
      %296 = arith.addf %293, %295 : vector<16x505xf32>
      %cst_188 = arith.constant 0.000000e+00 : f32
      %297 = vector.broadcast %cst_188 : f32 to vector<16x505xf32>
      %298 = arith.maximumf %296, %297 : vector<16x505xf32>
      %c0_189 = arith.constant 0 : index
      %c1_190 = arith.constant 1 : index
      %c0_191 = arith.constant 0 : index
      %299 = vector.load %arg14[%c0_189, %c1_190, %c0_191] : memref<16x2x505xf32, #tpu.memory_space<vmem>>, vector<16x1x505xf32>
      %300 = vector.shape_cast %299 : vector<16x1x505xf32> to vector<16x505xf32>
      %301 = vector.shape_cast %298 : vector<16x505xf32> to vector<16x1x505xf32>
      tpu.vector_store %arg14[%c0_189, %c1_190, %c0_191], %301 {strides = array<i32>} : memref<16x2x505xf32, #tpu.memory_space<vmem>>, vector<16x1x505xf32>,
    } else {
    }
    %c0 = arith.constant 0 : index
    %c0_1 = arith.constant 0 : index
    %3 = vector.load %arg15[%c0, %c0_1] : memref<2x256xf32, #tpu.memory_space<vmem>>, vector<2x256xf32>
    %c4_i32 = arith.constant 4 : i32
    %4 = arith.muli %c4_i32, %arg0 : i32
    %c0_i32_2 = arith.constant 0 : i32
    %5 = arith.addi %4, %c0_i32_2 : i32
    %6 = arith.index_cast %5 : i32 to index
    %c0_3 = arith.constant 0 : index
    %c0_4 = arith.constant 0 : index
    %7 = vector.load %arg14[%6, %c0_3, %c0_4] : memref<16x2x505xf32, #tpu.memory_space<vmem>>, vector<1x2x505xf32>
    %8 = vector.shape_cast %7 : vector<1x2x505xf32> to vector<2x505xf32>
    %9 = arith.truncf %8 : vector<2x505xf32> to vector<2x505xbf16>
    %c0_5 = arith.constant 0 : index
    %c0_6 = arith.constant 0 : index
    %c0_7 = arith.constant 0 : index
    %10 = vector.load %arg7[%c0_5, %c0_6, %c0_7] : memref<4x505x256xbf16, #tpu.memory_space<vmem>>, vector<1x505x256xbf16>
    %11 = vector.shape_cast %10 : vector<1x505x256xbf16> to vector<505x256xbf16>
    %cst = arith.constant dense<0.000000e+00> : vector<2x256xf32>
    %12 = tpu.matmul %9, %11, %cst {dimension_numbers = #tpu.dot_dimension_numbers<[1], [0], [0], [1], [0, 0, 1, 1], [], []>} : vector<2x505xbf16>, vector<505x256xbf16>, vector<2x256xf32> -> vector<2x256xf32>
    %13 = arith.addf %3, %12 : vector<2x256xf32>
    %c4_i32_8 = arith.constant 4 : i32
    %14 = arith.muli %c4_i32_8, %arg0 : i32
    %c1_i32 = arith.constant 1 : i32
    %15 = arith.addi %14, %c1_i32 : i32
    %16 = arith.index_cast %15 : i32 to index
    %c0_9 = arith.constant 0 : index
    %c0_10 = arith.constant 0 : index
    %17 = vector.load %arg14[%16, %c0_9, %c0_10] : memref<16x2x505xf32, #tpu.memory_space<vmem>>, vector<1x2x505xf32>
    %18 = vector.shape_cast %17 : vector<1x2x505xf32> to vector<2x505xf32>
    %19 = arith.truncf %18 : vector<2x505xf32> to vector<2x505xbf16>
    %c1 = arith.constant 1 : index
    %c0_11 = arith.constant 0 : index
    %c0_12 = arith.constant 0 : index
    %20 = vector.load %arg7[%c1, %c0_11, %c0_12] : memref<4x505x256xbf16, #tpu.memory_space<vmem>>, vector<1x505x256xbf16>
    %21 = vector.shape_cast %20 : vector<1x505x256xbf16> to vector<505x256xbf16>
    %cst_13 = arith.constant dense<0.000000e+00> : vector<2x256xf32>
    %22 = tpu.matmul %19, %21, %cst_13 {dimension_numbers = #tpu.dot_dimension_numbers<[1], [0], [0], [1], [0, 0, 1, 1], [], []>} : vector<2x505xbf16>, vector<505x256xbf16>, vector<2x256xf32> -> vector<2x256xf32>
    %23 = arith.addf %13, %22 : vector<2x256xf32>
    %c4_i32_14 = arith.constant 4 : i32
    %24 = arith.muli %c4_i32_14, %arg0 : i32
    %c2_i32 = arith.constant 2 : i32
    %25 = arith.addi %24, %c2_i32 : i32
    %26 = arith.index_cast %25 : i32 to index
    %c0_15 = arith.constant 0 : index
    %c0_16 = arith.constant 0 : index
    %27 = vector.load %arg14[%26, %c0_15, %c0_16] : memref<16x2x505xf32, #tpu.memory_space<vmem>>, vector<1x2x505xf32>
    %28 = vector.shape_cast %27 : vector<1x2x505xf32> to vector<2x505xf32>
    %29 = arith.truncf %28 : vector<2x505xf32> to vector<2x505xbf16>
    %c2 = arith.constant 2 : index
    %c0_17 = arith.constant 0 : index
    %c0_18 = arith.constant 0 : index
    %30 = vector.load %arg7[%c2, %c0_17, %c0_18] : memref<4x505x256xbf16, #tpu.memory_space<vmem>>, vector<1x505x256xbf16>
    %31 = vector.shape_cast %30 : vector<1x505x256xbf16> to vector<505x256xbf16>
    %cst_19 = arith.constant dense<0.000000e+00> : vector<2x256xf32>
    %32 = tpu.matmul %29, %31, %cst_19 {dimension_numbers = #tpu.dot_dimension_numbers<[1], [0], [0], [1], [0, 0, 1, 1], [], []>} : vector<2x505xbf16>, vector<505x256xbf16>, vector<2x256xf32> -> vector<2x256xf32>
    %33 = arith.addf %23, %32 : vector<2x256xf32>
    %c4_i32_20 = arith.constant 4 : i32
    %34 = arith.muli %c4_i32_20, %arg0 : i32
    %c3_i32 = arith.constant 3 : i32
    %35 = arith.addi %34, %c3_i32 : i32
    %36 = arith.index_cast %35 : i32 to index
    %c0_21 = arith.constant 0 : index
    %c0_22 = arith.constant 0 : index
    %37 = vector.load %arg14[%36, %c0_21, %c0_22] : memref<16x2x505xf32, #tpu.memory_space<vmem>>, vector<1x2x505xf32>
    %38 = vector.shape_cast %37 : vector<1x2x505xf32> to vector<2x505xf32>
    %39 = arith.truncf %38 : vector<2x505xf32> to vector<2x505xbf16>
    %c3 = arith.constant 3 : index
    %c0_23 = arith.constant 0 : index
    %c0_24 = arith.constant 0 : index
    %40 = vector.load %arg7[%c3, %c0_23, %c0_24] : memref<4x505x256xbf16, #tpu.memory_space<vmem>>, vector<1x505x256xbf16>
    %41 = vector.shape_cast %40 : vector<1x505x256xbf16> to vector<505x256xbf16>
    %cst_25 = arith.constant dense<0.000000e+00> : vector<2x256xf32>
    %42 = tpu.matmul %39, %41, %cst_25 {dimension_numbers = #tpu.dot_dimension_numbers<[1], [0], [0], [1], [0, 0, 1, 1], [], []>} : vector<2x505xbf16>, vector<505x256xbf16>, vector<2x256xf32> -> vector<2x256xf32>
    %43 = arith.addf %33, %42 : vector<2x256xf32>
    %c0_26 = arith.constant 0 : index
    %c0_27 = arith.constant 0 : index
    %44 = vector.load %arg15[%c0_26, %c0_27] : memref<2x256xf32, #tpu.memory_space<vmem>>, vector<2x256xf32>
    tpu.vector_store %arg15[%c0_26, %c0_27], %43 {strides = array<i32>} : memref<2x256xf32, #tpu.memory_space<vmem>>, vector<2x256xf32>,
    %c3_i32_28 = arith.constant 3 : i32
    %45 = arith.cmpi eq, %arg0, %c3_i32_28 : i32
    %46 = arith.extui %45 : i1 to i32
    %c0_i32_29 = arith.constant 0 : i32
    %47 = arith.cmpi ne, %46, %c0_i32_29 : i32
    scf.if %47 {
      %c0_30 = arith.constant 0 : index
      %c0_31 = arith.constant 0 : index
      %48 = vector.load %arg15[%c0_30, %c0_31] : memref<2x256xf32, #tpu.memory_space<vmem>>, vector<2x256xf32>
      %c0_32 = arith.constant 0 : index
      %c0_33 = arith.constant 0 : index
      %49 = vector.load %arg8[%c0_32, %c0_33] : memref<1x256xf32, #tpu.memory_space<vmem>>, vector<1x256xf32>
      %50 = vector.broadcast %49 : vector<1x256xf32> to vector<2x256xf32>
      %51 = arith.addf %48, %50 : vector<2x256xf32>
      %cst_34 = arith.constant 0.000000e+00 : f32
      %52 = vector.broadcast %cst_34 : f32 to vector<2x256xf32>
      %53 = arith.maximumf %51, %52 : vector<2x256xf32>
      %c0_35 = arith.constant 0 : index
      %c0_36 = arith.constant 0 : index
      %54 = vector.load %arg9[%c0_35, %c0_36] : memref<256x4xf32, #tpu.memory_space<vmem>>, vector<256x4xf32>
      %cst_37 = arith.constant dense<0.000000e+00> : vector<2x4xf32>
      %55 = tpu.matmul %53, %54, %cst_37 {dimension_numbers = #tpu.dot_dimension_numbers<[1], [0], [0], [1], [0, 0, 1, 1], [], []>} : vector<2x256xf32>, vector<256x4xf32>, vector<2x4xf32> -> vector<2x4xf32>
      %c0_38 = arith.constant 0 : index
      %c0_39 = arith.constant 0 : index
      %56 = vector.load %arg10[%c0_38, %c0_39] : memref<1x4xf32, #tpu.memory_space<vmem>>, vector<1x4xf32>
      %57 = vector.broadcast %56 : vector<1x4xf32> to vector<2x4xf32>
      %58 = arith.addf %55, %57 : vector<2x4xf32>
      %c0_40 = arith.constant 0 : index
      %c0_41 = arith.constant 0 : index
      %59 = vector.load %arg12[%c0_40, %c0_41] : memref<2x4xf32, #tpu.memory_space<vmem>>, vector<2x4xf32>
      tpu.vector_store %arg12[%c0_40, %c0_41], %58 {strides = array<i32>} : memref<2x4xf32, #tpu.memory_space<vmem>>, vector<2x4xf32>,
      %60 = vector.extract_strided_slice %58 {offsets = [0, 0], sizes = [2, 1], strides = [1, 1]} : vector<2x4xf32> to vector<2x1xf32>
      %61 = vector.extract_strided_slice %58 {offsets = [0, 1], sizes = [2, 1], strides = [1, 1]} : vector<2x4xf32> to vector<2x1xf32>
      %62 = vector.extract_strided_slice %58 {offsets = [0, 2], sizes = [2, 1], strides = [1, 1]} : vector<2x4xf32> to vector<2x1xf32>
      %63 = vector.extract_strided_slice %58 {offsets = [0, 3], sizes = [2, 1], strides = [1, 1]} : vector<2x4xf32> to vector<2x1xf32>
      %64 = arith.maximumf %60, %60 : vector<2x1xf32>
      %65 = arith.maximumf %61, %61 : vector<2x1xf32>
      %66 = arith.addf %60, %62 : vector<2x1xf32>
      %67 = arith.addf %60, %62 : vector<2x1xf32>
      %68 = arith.minimumf %66, %67 : vector<2x1xf32>
      %69 = arith.addf %61, %63 : vector<2x1xf32>
      %70 = arith.addf %61, %63 : vector<2x1xf32>
      %71 = arith.minimumf %69, %70 : vector<2x1xf32>
      %72 = arith.subf %68, %64 : vector<2x1xf32>
      %cst_42 = arith.constant 0.000000e+00 : f32
      %73 = vector.broadcast %cst_42 : f32 to vector<2x1xf32>
      %74 = arith.maximumf %72, %73 : vector<2x1xf32>
      %75 = arith.subf %71, %65 : vector<2x1xf32>
      %cst_43 = arith.constant 0.000000e+00 : f32
      %76 = vector.broadcast %cst_43 : f32 to vector<2x1xf32>
      %77 = arith.maximumf %75, %76 : vector<2x1xf32>
      %78 = arith.mulf %74, %77 : vector<2x1xf32>
      %79 = arith.mulf %62, %63 : vector<2x1xf32>
      %80 = arith.mulf %62, %63 : vector<2x1xf32>
      %81 = arith.addf %79, %80 : vector<2x1xf32>
      %82 = arith.subf %81, %78 : vector<2x1xf32>
      %83 = arith.divf %78, %82 : vector<2x1xf32>
      %cst_44 = arith.constant 5.000000e-01 : f32
      %84 = vector.broadcast %cst_44 : f32 to vector<2x1xf32>
      %85 = arith.subf %83, %84 : vector<2x1xf32>
      %c0_45 = arith.constant 0 : index
      %c0_46 = arith.constant 0 : index
      %86 = vector.load %arg11[%c0_45, %c0_46] : memref<2x1xf32, #tpu.memory_space<vmem>>, vector<2x1xf32>
      tpu.vector_store %arg11[%c0_45, %c0_46], %85 {strides = array<i32>} : memref<2x1xf32, #tpu.memory_space<vmem>>, vector<2x1xf32>,
    } else {
    }
    return
  }
  func.func @transform_0(%arg0: i32) -> (i32, i32, i32) {
    %c0_i32 = arith.constant 0 : i32
    %c0_i32_0 = arith.constant 0 : i32
    %c0_i32_1 = arith.constant 0 : i32
    %c0_i32_2 = arith.constant 0 : i32
    return %c0_i32, %c0_i32_0, %c0_i32_1 : i32, i32, i32
  }
  func.func @transform_1(%arg0: i32) -> (i32, i32) {
    %c0_i32 = arith.constant 0 : i32
    %c0_i32_0 = arith.constant 0 : i32
    %c0_i32_1 = arith.constant 0 : i32
    return %c0_i32, %c0_i32_0 : i32, i32
  }
  func.func @transform_2(%arg0: i32) -> (i32, i32) {
    %c0_i32 = arith.constant 0 : i32
    %c0_i32_0 = arith.constant 0 : i32
    %c0_i32_1 = arith.constant 0 : i32
    return %c0_i32, %c0_i32_0 : i32, i32
  }
  func.func @transform_3(%arg0: i32) -> (i32, i32) {
    %c0_i32 = arith.constant 0 : i32
    %c0_i32_0 = arith.constant 0 : i32
    %c0_i32_1 = arith.constant 0 : i32
    return %c0_i32, %c0_i32_0 : i32, i32
  }
  func.func @transform_4(%arg0: i32) -> (i32, i32) {
    %c0_i32 = arith.constant 0 : i32
    %c0_i32_0 = arith.constant 0 : i32
    %c0_i32_1 = arith.constant 0 : i32
    return %c0_i32, %c0_i32_0 : i32, i32
  }
  func.func @transform_5(%arg0: i32) -> (i32, i32) {
    %c0_i32 = arith.constant 0 : i32
    %c0_i32_0 = arith.constant 0 : i32
    %c0_i32_1 = arith.constant 0 : i32
    return %c0_i32, %c0_i32_0 : i32, i32
  }
  func.func @transform_6(%arg0: i32) -> (i32, i32, i32) {
    %c0_i32 = arith.constant 0 : i32
    %c0_i32_0 = arith.constant 0 : i32
    %c0_i32_1 = arith.constant 0 : i32
    return %arg0, %c0_i32, %c0_i32_0 : i32, i32, i32
  }
  func.func @transform_7(%arg0: i32) -> (i32, i32) {
    %c0_i32 = arith.constant 0 : i32
    %c0_i32_0 = arith.constant 0 : i32
    %c0_i32_1 = arith.constant 0 : i32
    return %c0_i32, %c0_i32_0 : i32, i32
  }
  func.func @transform_8(%arg0: i32) -> (i32, i32) {
    %c0_i32 = arith.constant 0 : i32
    %c0_i32_0 = arith.constant 0 : i32
    %c0_i32_1 = arith.constant 0 : i32
    return %c0_i32, %c0_i32_0 : i32, i32
  }
  func.func @transform_9(%arg0: i32) -> (i32, i32) {
    %c0_i32 = arith.constant 0 : i32
    %c0_i32_0 = arith.constant 0 : i32
    %c0_i32_1 = arith.constant 0 : i32
    return %c0_i32, %c0_i32_0 : i32, i32
  }
  func.func @transform_10(%arg0: i32) -> (i32, i32) {
    %c0_i32 = arith.constant 0 : i32
    %c0_i32_0 = arith.constant 0 : i32
    %c0_i32_1 = arith.constant 0 : i32
    return %c0_i32, %c0_i32_0 : i32, i32
  }
  func.func @transform_11(%arg0: i32) -> (i32, i32) {
    %c0_i32 = arith.constant 0 : i32
    %c0_i32_0 = arith.constant 0 : i32
    %c0_i32_1 = arith.constant 0 : i32
    return %c0_i32, %c0_i32_0 : i32, i32
  }
}

</mosaic_0001>

<bundles_post_ra>
// kernel: model_forward.1
= control target key start
LH: loop header
LB: loop body
LE: loop exit
PB: predicated region body
PF: predicated region fallthrough
CT: control target
= control target key end

     0   :  { %17 = vsyncpa [#allocation6], 0  ;;  %s10963_s17 = smov 0   ;;  %s15070_s0 = inlined_call_operand.vmem [shape: f32[2,49,529], index: 0, kind: input, shape index: {}]   ;;  %s15071_s1 = inlined_call_operand.vmem [shape: f32[256,49], index: 1, kind: input, shape index: {}]   ;;  %s15072_s2 = inlined_call_operand.vmem [shape: f32[16,1], index: 2, kind: input, shape index: {}]   ;;  %s15073_s3 = inlined_call_operand.vmem [shape: f32[4,529], index: 3, kind: input, shape index: {}]   ;;  %s15074_s4 = inlined_call_operand.vmem [shape: f32[64,256], index: 4, kind: input, shape index: {}]   ;;  %s15075_s5 = inlined_call_operand.vmem [shape: f32[16,1], index: 5, kind: input, shape index: {}]   ;;  %s15076_s6 = inlined_call_operand.vmem [shape: bf16[16,505,256], index: 6, kind: input, shape index: {}]   ;;  %s15077_s7 = inlined_call_operand.vmem [shape: f32[1,256], index: 7, kind: input, shape index: {}]   ;;  %s15078_s8 = inlined_call_operand.vmem [shape: f32[256,4], index: 8, kind: input, shape index: {}]   ;;  %s15079_s9 = inlined_call_operand.vmem [shape: f32[1,4], index: 9, kind: input, shape index: {}]   ;;  %s15080_s10 = inlined_call_operand.vmem [shape: f32[2,1], index: 10, kind: output, shape index: {0}]   ;;  %s15081_s11 = inlined_call_operand.hbm [shape: f32[2,4], index: 11, kind: output, shape index: {1}]  }
   0x1 LB: > { %s10969_s18 = sadd.s32 4294967295, %s10889_s17   ;;  %p9192_p0 = scmp.ge.s32.totalorder %s10889_s17, 1  ;;  %s10889_s17 = sphi %s10963_s17, %s23_s17  }
   0x2   : > { %p333_p1 = scmp.lt.s32.totalorder %s10889_s17, 5 }
   0x4   : > { %p334_p2 = pnand %p9192_p0, %p333_p1 }
   0x5   : > { %s9193_s19 = sshll.u32 (!%p334_p2), %s10969_s18, 2  ;;  %p9196_p4 = scmp.ne.s32.totalorder (!%p334_p2), %s10969_s18, 0 }
   0x6   : > { %337 = sbr.rel (%p334_p2) target bundleno = 2707 (0xa93), region = 60  ;;  %p370_p3 = scmp.lt.s32.totalorder (!%p334_p2), %s9193_s19, 15 }
   0xb   : > { %s15251_s19 = smov (!%p370_p3, %s9193_s19), 15  ;;  %379 = sbr.rel (%p9196_p4) target bundleno = 1509 (0x5e5), region = 64 }
   0xc   : > { %s10046_s20 = sshll.u32 %s15251_s19, 9 }
   0xd   : > { %s10977_s23 = scalar_lea.vmem %s15076_s6, %s10046_s20 }
  0x10   : > { %v420_v0 = vld [vmem:[%s15070_s0 + $0xf8] sm:$0x1]  ;;  %vm449_vm0 = vcmask 1040384   ;;  %v419_v1 = vld [vmem:[%s15070_s0 + $0xf0] sm:$0x1]  ;;  %v10996_v3 = vld [vmem:[%s15070_s0 + $0xc8] sm:$0xff] }
  0x11   : > { %v10989_v2 = vld [vmem:[%s15070_s0 + $0xd0] sm:$0xff]  ;;  %9197 = vmatprep.subr.msk.mxu0 %vm449_vm0, %v420_v0  ;;  %10415 = vmatprep.subr.msk.mxu1 %vm449_vm0, %v420_v0  ;;  %v11003_v4 = vld [vmem:[%s15070_s0 + $0xa8] sm:$0xff]  ;;  %v15083_v5 = vmov 0.0   ;;  %v11011_v6 = vld [vmem:[%s15070_s0 + $0xa0] sm:$0xff]  ;;  %vm424_vm1 = vcmask 400384   ;;  %v10892_v57 = vmov 0  }
  0x12   : > { %9198 = vmatpush1.msk.msra.mxu0 %vm449_vm0, %v419_v1  ;;  %10422 = vmatpush1.msk.msra.mxu1 %vm449_vm0, %v419_v1  ;;  %380 = vst [vmem:[#allocation4] sm:$0xf] %v15083_v5  ;;  %v11018_v7 = vld [vmem:[%s15070_s0 + $0x80] sm:$0xff]  ;;  %v11025_v8 = vld [vmem:[%s15070_s0 + $0x78] sm:$0xff]  ;;  %v11039_v10 = vld [vmem:[%s15070_s0 + $0x50] sm:$0xff]  ;;  %s10893_s15 = smov 104  }
  0x13   : > { %485 = vmatprep.subr.mxu0 %v10989_v2  ;;  %10416 = vmatprep.subr.mxu1 %v10989_v2  ;;  %v11032_v9 = vld [vmem:[%s15070_s0 + $0x58] sm:$0xff]  ;;  %v11046_v11 = vld [vmem:[%s15070_s0 + $0x30] sm:$0xff]  ;;  %v11053_v12 = vld [vmem:[%s15070_s0 + $0x28] sm:$0xff]  ;;  %s10894_s16 = smov 127   ;;  %vm898_vm2 = vcmask 990208   ;;  %s10895_s24 = smov 105  }
  0x14   : > { %486 = vmatpush1.msra.mxu0 %v10996_v3  ;;  %10423 = vmatpush1.msra.mxu1 %v10996_v3  ;;  %v11060_v13 = vld [vmem:[%s15070_s0 + $0x8] sm:$0xff]  ;;  %v11067_v14 = vld [vmem:[%s15070_s0] sm:$0xff]  ;;  %v423_v18 = vld [vmem:[%s15070_s0 + $0x110] sm:$0x1]  ;;  %vm1018_vm3 = vcmask 850944   ;;  %vm928_vm4 = vcmask 1039360  }
  0x15   : > { %487 = vmatprep.subr.mxu0 %v11003_v4  ;;  %10417 = vmatprep.subr.mxu1 %v11003_v4  ;;  %v11076_v15 = vld [vmem:[%s15071_s1] sm:$0xff]  ;;  %v422_v17 = vld [vmem:[%s15070_s0 + $0x108] sm:$0x1]  ;;  %v11122_v23 = vld [vmem:[%s15070_s0 + $0xd8] sm:$0xff]  ;;  %vm973_vm5 = vcmask 859136  }
  0x16   : > { %488 = vmatpush1.msra.mxu0 %v11011_v6  ;;  %10424 = vmatpush1.msra.mxu1 %v11011_v6  ;;  %v11081_v16 = vld [vmem:[%s15071_s1 + $0x20] sm:$0xff]  ;;  %v11110_v21 = vld [vmem:[%s15071_s1 + $0x28] sm:$0xff]  ;;  %v11134_v25 = vld [vmem:[%s15070_s0 + $0xb8] sm:$0xff] }
  0x17   : > { %489 = vmatprep.subr.mxu0 %v11018_v7  ;;  %10418 = vmatprep.subr.mxu1 %v11018_v7  ;;  %v421_v19 = vld [vmem:[%s15070_s0 + $0x100] sm:$0x1]  ;;  %v11117_v22 = vld [vmem:[%s15071_s1 + $0x8] sm:$0xff]  ;;  %v11142_v26 = vld [vmem:[%s15070_s0 + $0xb0] sm:$0xff] }
  0x18   : > { %490 = vmatpush1.msra.mxu0 %v11025_v8  ;;  %10425 = vmatpush1.msra.mxu1 %v11025_v8  ;;  %v11103_v20 = vld [vmem:[%s15070_s0 + $0xe0] sm:$0xff]  ;;  %v11129_v24 = vld [vmem:[%s15070_s0 + $0xe8] sm:$0xff]  ;;  %v11157_v28 = vld [vmem:[%s15070_s0 + $0x90] sm:$0xff] }
  0x19   : > { %491 = vmatprep.subr.mxu0 %v11032_v9  ;;  %10419 = vmatprep.subr.mxu1 %v11032_v9  ;;  %v11150_v27 = vld [vmem:[%s15070_s0 + $0xc0] sm:$0xff]  ;;  %v11164_v29 = vld [vmem:[%s15071_s1 + $0x30] sm:$0xff]  ;;  %v11174_v31 = vld [vmem:[%s15070_s0 + $0x88] sm:$0xff] }
  0x1a   : > { %492 = vmatpush1.msra.mxu0 %v11039_v10  ;;  %10426 = vmatpush1.msra.mxu1 %v11039_v10  ;;  %v383_v30 = vld [vmem:[%s15071_s1 + $0x10] sm:$0xff]  ;;  %v11181_v32 = vld [vmem:[%s15070_s0 + $0x98] sm:$0xff]  ;;  %v11186_v33 = vld [vmem:[%s15070_s0 + $0x68] sm:$0xff] }
  0x1b   : > { %493 = vmatprep.subr.mxu0 %v11046_v11  ;;  %10420 = vmatprep.subr.mxu1 %v11046_v11  ;;  %v11196_v34 = vld [vmem:[%s15070_s0 + $0x70] sm:$0xff]  ;;  %v11203_v35 = vld [vmem:[%s15070_s0 + $0x60] sm:$0xff]  ;;  %v384_v36 = vld [vmem:[%s15071_s1 + $0x18] sm:$0xff] }
  0x1c   : > { %494 = vmatpush1.msra.mxu0 %v11053_v12  ;;  %10427 = vmatpush1.msra.mxu1 %v11053_v12  ;;  %v11213_v37 = vld [vmem:[%s15071_s1 + $0x38] sm:$0xff]  ;;  %v11220_v38 = vld [vmem:[%s15070_s0 + $0x40] sm:$0xff]  ;;  %v11225_v39 = vld [vmem:[%s15070_s0 + $0x48] sm:$0xff] }
  0x1d   : > { %495 = vmatprep.subr.mxu0 %v11060_v13  ;;  %10421 = vmatprep.subr.mxu1 %v11060_v13  ;;  %v11232_v40 = vld [vmem:[%s15070_s0 + $0x38] sm:$0xff]  ;;  %v11245_v42 = vld [vmem:[%s15070_s0 + $0x20] sm:$0xff]  ;;  %v11252_v43 = vld [vmem:[%s15070_s0 + $0x10] sm:$0xff] }
  0x1e   : > { %496 = vmatpush1.msra.mxu0 %v11067_v14  ;;  %10428 = vmatpush1.msra.mxu1 %v11067_v14  ;;  %v11240_v41 = vld [vmem:[%s15070_s0 + $0x18] sm:$0xff]  ;;  %v1084_v45 = vld [vmem:[%s15070_s0 + $0x108] sm:$0x1]  ;;  %v1081_v46 = vld [vmem:[%s15070_s0 + $0xf0] sm:$0x1] }
  0x1f   : > { %529 = vmatprep.mubr.f32.mxu0 %v15083_v5  ;;  %553 = vmatprep.mubr.f32.mxu1 %v15083_v5  ;;  %v1082_v44 = vld [vmem:[%s15070_s0 + $0xf8] sm:$0x1]  ;;  %v1083_v47 = vld [vmem:[%s15070_s0 + $0x100] sm:$0x1]  ;;  %v11337_v50 = vld [vmem:[%s15071_s1 + $0x48] sm:$0xff] }
  0x20   : > { %9199 = vmatmul.mubr.msk.f32.vlgmr.msra.gmra.mxu0 %vm424_vm1, %v11076_v15  ;;  %9203 = vmatmul.mubr.msk.f32.vlgmr.msra.gmra.mxu1 %vm424_vm1, %v11081_v16  ;;  %v11319_v48 = vld [vmem:[%s15071_s1 + $0x40] sm:$0xff]  ;;  %v1739_v49 = vld [vmem:[%s15070_s0 + $0xf8] sm:$0x1]  ;;  %v1738_v51 = vld [vmem:[%s15070_s0 + $0xf0] sm:$0x1] }
  0x21   : > { %9207 = vmatprep.subr.msk.mxu1 %vm449_vm0, %v422_v17  ;;  %10207 = vmatprep.subr.msk.mxu0 %vm449_vm0, %v423_v18  ;;  %v11355_v52 = vld [vmem:[%s15071_s1 + $0x50] sm:$0xff]  ;;  %v11373_v54 = vld [vmem:[%s15071_s1 + $0x58] sm:$0xff]  ;;  %v11386_v55 = vld [vmem:[%s15072_s2 + $0x8] sm:$0xff] }
  0x22   : > { %9208 = vmatpush1.msk.msra.mxu1 %vm449_vm0, %v421_v19  ;;  %535 = vmatprep.mubr.f32.mxu0 %v15083_v5  ;;  %v1085_v53 = vld [vmem:[%s15070_s0 + $0x110] sm:$0x1]  ;;  %v11393_v56 = vld [vmem:[%s15071_s1 + $0x60] sm:$0xff]  ;;  %v11407_v58 = vld [vmem:[%s15071_s1 + $0x68] sm:$0xff] }
  0x23   : > { %559 = vmatprep.mubr.f32.mxu1 %v15083_v5  ;;  %598 = vmatprep.subr.mxu1 %v11103_v20  ;;  %v11422_v59 = vld [vmem:[%s15071_s1 + $0x70] sm:$0xff]  ;;  %v11437_v60 = vld [vmem:[%s15071_s1 + $0x78] sm:$0xff]  ;;  %v11455_v62 = vld [vmem:[%s15071_s1 + $0x80] sm:$0xff] }
  0x24   : > { %10208 = vmatpush3.msk.msra.mxu0 %vm449_vm0, %v423_v18  ;;  %9204 = vmatmul.mubr.msk.f32.gmra.mxu1 %vm424_vm1, %v11110_v21  ;;  %v1742_v61 = vld [vmem:[%s15070_s0 + $0x110] sm:$0x1]  ;;  %v11470_v63 = vld [vmem:[%s15071_s1 + $0x88] sm:$0xff]  ;;  %v2143_v0 = vld [vmem:[%s15072_s2] sm:$0xff] }
  0x25   : > { %9200 = vmatmul.mubr.msk.f32.gmra.mxu0 %vm424_vm1, %v11117_v22  ;;  %599 = vmatpush1.msra.mxu1 %v11122_v23  ;;  %v11487_v1 = vld [vmem:[%s15071_s1 + $0x90] sm:$0xff]  ;;  %v11518_v17 = vld [vmem:[%s15071_s1 + $0xa0] sm:$0xff]  ;;  %v11535_v19 = vld [vmem:[%s15071_s1 + $0xa8] sm:$0xff] }
  0x26   : > { %10209 = vmatprep.subr.mxu0 %v11129_v24  ;;  %600 = vmatprep.subr.mxu1 %v11134_v25  ;;  %v1740_v18 = vld [vmem:[%s15070_s0 + $0x100] sm:$0x1] }
  0x27   : > { %10210 = vmatpush3.msra.mxu0 %v11129_v24  ;;  %601 = vmatpush1.msra.mxu1 %v11142_v26 }
  0x28   : > { %10211 = vmatprep.subr.mxu0 %v11150_v27  ;;  %541 = vmatprep.mubr.f32.mxu0 %v15083_v5 }
  0x29   : > { %565 = vmatprep.mubr.f32.mxu1 %v15083_v5  ;;  %602 = vmatprep.subr.mxu1 %v11157_v28 }
  0x2a   : > { %10212 = vmatpush3.msra.mxu0 %v11150_v27  ;;  %9205 = vmatmul.mubr.msk.f32.gmra.mxu1 %vm424_vm1, %v11164_v29 }
  0x2b   : > { %9201 = vmatmul.mubr.msk.f32.gmra.mxu0 %vm424_vm1, %v383_v30  ;;  %603 = vmatpush1.msra.mxu1 %v11174_v31 }
  0x2c   : > { %10213 = vmatprep.subr.mxu0 %v11181_v32  ;;  %604 = vmatprep.subr.mxu1 %v11186_v33 }
  0x2d   : > { %10214 = vmatpush3.msra.mxu0 %v11181_v32  ;;  %547 = vmatprep.mubr.f32.mxu0 %v15083_v5 }
  0x2e   : > { %10215 = vmatprep.subr.mxu0 %v11196_v34  ;;  %571 = vmatprep.mubr.f32.mxu1 %v15083_v5 }
  0x2f   : > { %605 = vmatpush1.msra.mxu1 %v11203_v35  ;;  %10216 = vmatpush3.msra.mxu0 %v11196_v34 }
  0x30   : > { %9202 = vmatmul.mubr.msk.f32.gmra.mxu0 %vm424_vm1, %v384_v36  ;;  %9206 = vmatmul.mubr.msk.f32.gmra.mxu1 %vm424_vm1, %v11213_v37 }
  0x31   : > { %606 = vmatprep.subr.mxu1 %v11220_v38  ;;  %10217 = vmatprep.subr.mxu0 %v11225_v39 }
  0x32   : > { %607 = vmatpush1.msra.mxu1 %v11232_v40  ;;  %10218 = vmatpush3.msra.mxu0 %v11225_v39 }
  0x33   : > { %608 = vmatprep.subr.mxu1 %v11240_v41  ;;  %10219 = vmatprep.subr.mxu0 %v11245_v42 }
  0x34   : > { %609 = vmatpush1.msra.mxu1 %v11252_v43  ;;  %642 = vmatprep.mubr.f32.mxu1 %v15083_v5 }
  0x35   : > { %10220 = vmatpush3.msra.mxu0 %v11245_v42  ;;  %10221 = vmatprep.mubr.msk.f32.mxu0 %vm424_vm1, %v11076_v15 }
  0x36   : > { %9209 = vmatmul.mubr.msk.f32.vlgmr.msra.gmra.mxu1 %vm424_vm1, %v11076_v15  ;;  %10222 = vmatmul.mubr.msk.f32.vlgmr.msra.gmra.mxu0 %vm424_vm1, %v11117_v22  ;;  %v11501_v15 = vld [vmem:[%s15071_s1 + $0x98] sm:$0xff] }
  0x37   : > { %9226 = vmatprep.subr.msk.mxu1 %vm449_vm0, %v1082_v44  ;;  %9236 = vmatprep.subr.msk.mxu0 %vm449_vm0, %v1084_v45 }
  0x38   : > { %9227 = vmatpush1.msk.msra.mxu1 %vm449_vm0, %v1081_v46  ;;  %648 = vmatprep.mubr.f32.mxu1 %v15083_v5 }
  0x39   : > { %10224 = vmatprep.mubr.msk.f32.mxu0 %vm424_vm1, %v383_v30  ;;  %9237 = vmatpush1.msk.msra.mxu0 %vm449_vm0, %v1083_v47 }
  0x3a   : > { %9210 = vmatmul.mubr.msk.f32.gmra.mxu1 %vm424_vm1, %v11117_v22  ;;  %10225 = vmatmul.mubr.msk.f32.gmra.mxu0 %vm424_vm1, %v384_v36  ;;  %v11571_v22 = vld [vmem:[%s15071_s1 + $0xb8] sm:$0xff] }
  0x3b   : > { %1258 = vmatprep.subr.mxu0 %v11103_v20  ;;  %1145 = vmatprep.subr.mxu1 %v10989_v2 }
  0x3c   : > { %1259 = vmatpush1.msra.mxu0 %v11122_v23  ;;  %1146 = vmatpush1.msra.mxu1 %v10996_v3 }
  0x3d   : > { %1260 = vmatprep.subr.mxu0 %v11134_v25  ;;  %654 = vmatprep.mubr.f32.mxu1 %v15083_v5 }
  0x3e   : > { %10227 = vmatprep.mubr.msk.f32.mxu0 %vm424_vm1, %v11081_v16  ;;  %1261 = vmatpush1.msra.mxu0 %v11142_v26 }
  0x3f   : > { %9211 = vmatmul.mubr.msk.f32.gmra.mxu1 %vm424_vm1, %v383_v30  ;;  %10228 = vmatmul.mubr.msk.f32.gmra.mxu0 %vm424_vm1, %v11110_v21  ;;  %v2397_v30 = vld [vmem:[%s15070_s0 + $0x100] sm:$0x1] }
  0x40   : > { %1262 = vmatprep.subr.mxu0 %v11157_v28  ;;  %1147 = vmatprep.subr.mxu1 %v11003_v4 }
  0x41   : > { %1263 = vmatpush1.msra.mxu0 %v11174_v31  ;;  %660 = vmatprep.mubr.f32.mxu1 %v15083_v5 }
  0x42   : > { %1264 = vmatprep.subr.mxu0 %v11186_v33  ;;  %10230 = vmatprep.mubr.msk.f32.mxu0 %vm424_vm1, %v11164_v29 }
  0x43   : > { %1148 = vmatpush1.msra.mxu1 %v11011_v6  ;;  %1265 = vmatpush1.msra.mxu0 %v11203_v35 }
  0x44   : > { %9212 = vmatmul.mubr.msk.f32.gmra.mxu1 %vm424_vm1, %v384_v36  ;;  %10231 = vmatmul.mubr.msk.f32.gmra.mxu0 %vm424_vm1, %v11213_v37  ;;  %v2396_v36 = vld [vmem:[%s15070_s0 + $0xf8] sm:$0x1] }
  0x45   : > { %1266 = vmatprep.subr.mxu0 %v11220_v38  ;;  %1149 = vmatprep.subr.mxu1 %v11018_v7 }
  0x46   : > { %1267 = vmatpush1.msra.mxu0 %v11232_v40  ;;  %666 = vmatprep.mubr.f32.mxu1 %v15083_v5 }
  0x47   : > { %1268 = vmatprep.subr.mxu0 %v11240_v41  ;;  %1150 = vmatpush1.msra.mxu1 %v11025_v8 }
  0x48   : > { %1269 = vmatpush1.msra.mxu0 %v11252_v43  ;;  %1302 = vmatprep.mubr.f32.mxu0 %v15083_v5 }
  0x49   : > { %9213 = vmatmul.mubr.msk.f32.gmra.mxu1 %vm424_vm1, %v11081_v16  ;;  %9238 = vmatmul.mubr.msk.f32.vlgmr.msra.gmra.mxu0 %vm424_vm1, %v11319_v48  ;;  %v1741_v16 = vld [vmem:[%s15070_s0 + $0x108] sm:$0x1] }
  0x4a   : > { %672 = vmatprep.mubr.f32.mxu1 %v15083_v5  ;;  %1151 = vmatprep.subr.mxu1 %v11032_v9 }
  0x4b   : > { %1308 = vmatprep.mubr.f32.mxu0 %v15083_v5  ;;  %1152 = vmatpush1.msra.mxu1 %v11039_v10 }
  0x4c   : > { %9256 = vmatprep.subr.msk.mxu0 %vm449_vm0, %v1739_v49  ;;  %1153 = vmatprep.subr.mxu1 %v11046_v11  ;;  %v11778_v49 = vld [vmem:[%s15073_s3] ss:$4 sm:$0x1f] }
  0x4d   : > { %9214 = vmatmul.mubr.msk.f32.gmra.mxu1 %vm424_vm1, %v11110_v21  ;;  %9239 = vmatmul.mubr.msk.f32.gmra.mxu0 %vm424_vm1, %v11337_v50  ;;  %v11555_v21 = vld [vmem:[%s15071_s1 + $0xb0] sm:$0xff] }
  0x4e   : > { %678 = vmatprep.mubr.f32.mxu1 %v15083_v5  ;;  %1314 = vmatprep.mubr.f32.mxu0 %v15083_v5 }
  0x4f   : > { %9257 = vmatpush1.msk.msra.mxu0 %vm449_vm0, %v1738_v51  ;;  %1154 = vmatpush1.msra.mxu1 %v11053_v12 }
  0x50   : > { %1802 = vmatprep.subr.mxu0 %v10989_v2  ;;  %1155 = vmatprep.subr.mxu1 %v11060_v13 }
  0x51   : > { %9215 = vmatmul.mubr.msk.f32.gmra.mxu1 %vm424_vm1, %v11164_v29  ;;  %9240 = vmatmul.mubr.msk.f32.gmra.mxu0 %vm424_vm1, %v11355_v52  ;;  %v2398_v29 = vld [vmem:[%s15070_s0 + $0x108] sm:$0x1] }
  0x52   : > { %684 = vmatprep.mubr.f32.mxu1 %v15083_v5  ;;  %1320 = vmatprep.mubr.f32.mxu0 %v15083_v5 }
  0x53   : > { %1803 = vmatpush1.msra.mxu0 %v10996_v3  ;;  %1156 = vmatpush1.msra.mxu1 %v11067_v14 }
  0x54   : > { %10233 = vmatprep.subr.msk.mxu1 %vm449_vm0, %v1085_v53  ;;  %1804 = vmatprep.subr.mxu0 %v11003_v4 }
  0x55   : > { %9216 = vmatmul.mubr.msk.f32.gmra.mxu1 %vm424_vm1, %v11213_v37  ;;  %9241 = vmatmul.mubr.msk.f32.gmra.mxu0 %vm424_vm1, %v11373_v54  ;;  %v2395_v37 = vld [vmem:[%s15070_s0 + $0xf0] sm:$0x1] }
  0x56   : > { %1189 = vmatprep.mubr.f32.mxu1 %v15083_v5  ;;  %1326 = vmatprep.mubr.f32.mxu0 %v15083_v5 }
  0x57   : > { %1805 = vmatpush1.msra.mxu0 %v11011_v6  ;;  %10456 = vset.pattern.permute.xlu1 %v10892_v57 }
  0x58   : > { %1806 = vmatprep.subr.mxu0 %v11018_v7  ;;  %2152 = vperm.xlu1 %10456, %v11386_v55  }
  0x59   : > { %9228 = vmatmul.mubr.msk.f32.vlgmr.msra.gmra.mxu1 %vm424_vm1, %v11319_v48  ;;  %9242 = vmatmul.mubr.msk.f32.gmra.mxu0 %vm424_vm1, %v11393_v56 }
  0x5a   : > { %10234 = vmatpush3.msk.msra.mxu1 %vm449_vm0, %v1085_v53  ;;  %1195 = vmatprep.mubr.f32.mxu1 %v15083_v5 }
  0x5b   : > { %1332 = vmatprep.mubr.f32.mxu0 %v15083_v5  ;;  %10235 = vmatprep.subr.mxu1 %v11129_v24 }
  0x5c   : > { %1807 = vmatpush1.msra.mxu0 %v11025_v8  ;;  %10236 = vmatpush3.msra.mxu1 %v11129_v24 }
  0x5d   : > { %9229 = vmatmul.mubr.msk.f32.gmra.mxu1 %vm424_vm1, %v11337_v50  ;;  %9243 = vmatmul.mubr.msk.f32.gmra.mxu0 %vm424_vm1, %v11407_v58 }
  0x5e   : > { %1201 = vmatprep.mubr.f32.mxu1 %v15083_v5  ;;  %1338 = vmatprep.mubr.f32.mxu0 %v15083_v5 }
  0x5f   : > { %1808 = vmatprep.subr.mxu0 %v11032_v9  ;;  %10237 = vmatprep.subr.mxu1 %v11150_v27 }
  0x60   : > { %1809 = vmatpush1.msra.mxu0 %v11039_v10  ;;  %10238 = vmatpush3.msra.mxu1 %v11150_v27 }
  0x61   : > { %9230 = vmatmul.mubr.msk.f32.gmra.mxu1 %vm424_vm1, %v11355_v52  ;;  %9244 = vmatmul.mubr.msk.f32.gmra.mxu0 %vm424_vm1, %v11422_v59 }
  0x62   : > { %1207 = vmatprep.mubr.f32.mxu1 %v15083_v5  ;;  %1344 = vmatprep.mubr.f32.mxu0 %v15083_v5 }
  0x63   : > { %1810 = vmatprep.subr.mxu0 %v11046_v11  ;;  %10239 = vmatprep.subr.mxu1 %v11181_v32 }
  0x64   : > { %1811 = vmatpush1.msra.mxu0 %v11053_v12  ;;  %10240 = vmatpush3.msra.mxu1 %v11181_v32 }
  0x65   : > { %9231 = vmatmul.mubr.msk.f32.gmra.mxu1 %vm424_vm1, %v11373_v54  ;;  %9245 = vmatmul.mubr.msk.f32.gmra.mxu0 %vm424_vm1, %v11437_v60 }
  0x66   : > { %1812 = vmatprep.subr.mxu0 %v11060_v13  ;;  %1213 = vmatprep.mubr.f32.mxu1 %v15083_v5 }
  0x67   : > { %1813 = vmatpush1.msra.mxu0 %v11067_v14  ;;  %1846 = vmatprep.mubr.f32.mxu0 %v15083_v5 }
  0x68   : > { %10241 = vmatprep.subr.mxu1 %v11196_v34  ;;  %10259 = vmatprep.subr.msk.mxu0 %vm449_vm0, %v1742_v61 }
  0x69   : > { %9232 = vmatmul.mubr.msk.f32.gmra.mxu1 %vm424_vm1, %v11393_v56  ;;  %9258 = vmatmul.mubr.msk.f32.vlgmr.msra.gmra.mxu0 %vm424_vm1, %v11455_v62 }
  0x6a   : > { %1219 = vmatprep.mubr.f32.mxu1 %v15083_v5  ;;  %1852 = vmatprep.mubr.f32.mxu0 %v15083_v5 }
  0x6b   : > { %10242 = vmatpush3.msra.mxu1 %v11196_v34  ;;  %10260 = vmatpush3.msk.msra.mxu0 %vm449_vm0, %v1742_v61 }
  0x6c   : > { %10243 = vmatprep.subr.mxu1 %v11225_v39  ;;  %10455 = vset.pattern.permute.xlu0 %v10892_v57 }
  0x6d   : > { %9233 = vmatmul.mubr.msk.f32.gmra.mxu1 %vm424_vm1, %v11407_v58  ;;  %9259 = vmatmul.mubr.msk.f32.gmra.mxu0 %vm424_vm1, %v11470_v63 }
  0x6e   : > { %1225 = vmatprep.mubr.f32.mxu1 %v15083_v5  ;;  %1858 = vmatprep.mubr.f32.mxu0 %v15083_v5 }
  0x6f   : > { %10244 = vmatpush3.msra.mxu1 %v11225_v39  ;;  %2147 = vperm.xlu1 %10456, %v2143_v0  }
  0x70   : > { %2809 = vperm.xlu0 %10455, %v11386_v55   ;;  %10261 = vmatprep.subr.mxu0 %v11129_v24 }
  0x71   : > { %9234 = vmatmul.mubr.msk.f32.gmra.mxu1 %vm424_vm1, %v11422_v59  ;;  %9260 = vmatmul.mubr.msk.f32.gmra.mxu0 %vm424_vm1, %v11487_v1 }
  0x72   : > { %1231 = vmatprep.mubr.f32.mxu1 %v15083_v5  ;;  %1864 = vmatprep.mubr.f32.mxu0 %v15083_v5 }
  0x73   : > { %10245 = vmatprep.subr.mxu1 %v11245_v42  ;;  %10262 = vmatpush3.msra.mxu0 %v11129_v24 }
  0x74   : > { %10246 = vmatpush3.msra.mxu1 %v11245_v42  ;;  %1490 = vperm.xlu1 %10456, %v2143_v0  }
  0x75   : > { %9235 = vmatmul.mubr.msk.f32.gmra.mxu1 %vm424_vm1, %v11437_v60  ;;  %9261 = vmatmul.mubr.msk.f32.gmra.mxu0 %vm424_vm1, %v11501_v15 }
  0x76   : > { %2804 = vperm.xlu0 %10455, %v2143_v0   ;;  %10247 = vmatprep.mubr.msk.f32.mxu1 %vm424_vm1, %v11319_v48 }
  0x77   : > { %1870 = vmatprep.mubr.f32.mxu0 %v15083_v5  ;;  %9266 = vmatprep.subr.msk.mxu1 %vm449_vm0, %v1741_v16 }
  0x78   : > { %10263 = vmatprep.subr.mxu0 %v11150_v27  ;;  %830 = vperm.xlu1 %10456, %v2143_v0  }
  0x79   : > { %10248 = vmatmul.mubr.msk.f32.vlgmr.msra.gmra.mxu1 %vm424_vm1, %v11337_v50  ;;  %9262 = vmatmul.mubr.msk.f32.gmra.mxu0 %vm424_vm1, %v11518_v17 }
  0x7a   : > { %9267 = vmatpush1.msk.msra.mxu1 %vm449_vm0, %v1740_v18  ;;  %10264 = vmatpush3.msra.mxu0 %v11150_v27 }
  0x7b   : > { %1495 = vperm.xlu0 %10455, %v11386_v55   ;;  %10250 = vmatprep.mubr.msk.f32.mxu1 %vm424_vm1, %v11355_v52 }
  0x7c   : > { %1876 = vmatprep.mubr.f32.mxu0 %v15083_v5  ;;  %1915 = vmatprep.subr.mxu1 %v11103_v20 }
  0x7d   : > { %10251 = vmatmul.mubr.msk.f32.gmra.mxu1 %vm424_vm1, %v11373_v54  ;;  %9263 = vmatmul.mubr.msk.f32.gmra.mxu0 %vm424_vm1, %v11535_v19 }
  0x7e   : > { %1916 = vmatpush1.msra.mxu1 %v11122_v23  ;;  %10265 = vmatprep.subr.mxu0 %v11181_v32 }
  0x7f   : > { %1917 = vmatprep.subr.mxu1 %v11134_v25  ;;  %10266 = vmatpush3.msra.mxu0 %v11181_v32 }
  0x80   : > { %1918 = vmatpush1.msra.mxu1 %v11142_v26  ;;  %835 = vperm.xlu0 %10455, %v11386_v55  }
  0x81   : > { %10253 = vmatprep.mubr.msk.f32.mxu1 %vm424_vm1, %v11393_v56  ;;  %1882 = vmatprep.mubr.f32.mxu0 %v15083_v5 }
  0x82   : > { %1919 = vmatprep.subr.mxu1 %v11157_v28  ;;  %10254 = vmatmul.mubr.msk.f32.gmra.mxu1 %vm424_vm1, %v11407_v58 }
  0x83   : > { %9264 = vmatmul.mubr.msk.f32.gmra.mxu0 %vm424_vm1, %v11555_v21  ;;  %1920 = vmatpush1.msra.mxu1 %v11174_v31 }
  0x84   : > { %10267 = vmatprep.subr.mxu0 %v11196_v34  ;;  %1921 = vmatprep.subr.mxu1 %v11186_v33 }
  0x85   : > { %10268 = vmatpush3.msra.mxu0 %v11196_v34  ;;  %10256 = vmatprep.mubr.msk.f32.mxu1 %vm424_vm1, %v11422_v59 }
  0x86   : > { %1888 = vmatprep.mubr.f32.mxu0 %v15083_v5  ;;  %1922 = vmatpush1.msra.mxu1 %v11203_v35 }
  0x87   : > { %10257 = vmatmul.mubr.msk.f32.gmra.mxu1 %vm424_vm1, %v11437_v60  ;;  %9265 = vmatmul.mubr.msk.f32.gmra.mxu0 %vm424_vm1, %v11571_v22 }
  0x88   : > { %1923 = vmatprep.subr.mxu1 %v11220_v38  ;;  %10269 = vmatprep.subr.mxu0 %v11225_v39 }
  0x89   : > { %1924 = vmatpush1.msra.mxu1 %v11232_v40  ;;  %10270 = vmatpush3.msra.mxu0 %v11225_v39 }
  0x8a   : > { %1925 = vmatprep.subr.mxu1 %v11240_v41  ;;  %10271 = vmatprep.subr.mxu0 %v11245_v42 }
  0x8b   : > { %1926 = vmatpush1.msra.mxu1 %v11252_v43  ;;  %1959 = vmatprep.mubr.f32.mxu1 %v15083_v5 }
  0x8c   : > { %10272 = vmatpush3.msra.mxu0 %v11245_v42  ;;  %10273 = vmatprep.mubr.msk.f32.mxu0 %vm424_vm1, %v11455_v62 }
  0x8d   : > { %9268 = vmatmul.mubr.msk.f32.vlgmr.msra.gmra.mxu1 %vm424_vm1, %v11455_v62  ;;  %10274 = vmatmul.mubr.msk.f32.vlgmr.msra.gmra.mxu0 %vm424_vm1, %v11470_v63 }
  0x8e   : > { %9296 = vmatprep.subr.msk.mxu0 %vm449_vm0, %v2398_v29  ;;  %1965 = vmatprep.mubr.f32.mxu1 %v15083_v5 }
  0x8f   : > { %10276 = vmatprep.mubr.msk.f32.mxu0 %vm424_vm1, %v11487_v1  ;;  %9297 = vmatpush1.msk.msra.mxu0 %vm449_vm0, %v2397_v30 }
  0x90   : > { %2572 = vmatprep.subr.mxu0 %v11103_v20  ;;  %9286 = vmatprep.subr.msk.mxu1 %vm449_vm0, %v2396_v36  ;;  %v11649_v20 = vld [vmem:[%s15071_s1 + $0xc0] sm:$0xff] }
  0x91   : > { %9269 = vmatmul.mubr.msk.f32.gmra.mxu1 %vm424_vm1, %v11470_v63  ;;  %10277 = vmatmul.mubr.msk.f32.gmra.mxu0 %vm424_vm1, %v11501_v15 }
  0x92   : > { %2573 = vmatpush1.msra.mxu0 %v11122_v23  ;;  %1971 = vmatprep.mubr.f32.mxu1 %v15083_v5 }
  0x93   : > { %2574 = vmatprep.subr.mxu0 %v11134_v25  ;;  %10279 = vmatprep.mubr.msk.f32.mxu0 %vm424_vm1, %v11518_v17 }
  0x94   : > { %2575 = vmatpush1.msra.mxu0 %v11142_v26  ;;  %9287 = vmatpush1.msk.msra.mxu1 %vm449_vm0, %v2395_v37 }
  0x95   : > { %9270 = vmatmul.mubr.msk.f32.gmra.mxu1 %vm424_vm1, %v11487_v1  ;;  %10280 = vmatmul.mubr.msk.f32.gmra.mxu0 %vm424_vm1, %v11535_v19 }
  0x96   : > { %2576 = vmatprep.subr.mxu0 %v11157_v28  ;;  %1977 = vmatprep.mubr.f32.mxu1 %v15083_v5  ;;  %v15082_v28 = vlaneseq }
  0x97   : > { %2577 = vmatpush1.msra.mxu0 %v11174_v31  ;;  %10282 = vmatprep.mubr.msk.f32.mxu0 %vm424_vm1, %v11555_v21 }
  0x98   : > { %2578 = vmatprep.subr.mxu0 %v11186_v33  ;;  %2459 = vmatprep.subr.mxu1 %v10989_v2  ;;  %v11664_v2 = vld [vmem:[%s15071_s1 + $0xc8] sm:$0xff] }
  0x99   : > { %2579 = vmatpush1.msra.mxu0 %v11203_v35  ;;  %9271 = vmatmul.mubr.msk.f32.gmra.mxu1 %vm424_vm1, %v11501_v15  ;;  %v11768_v35 = vshrl.u32 %v15082_v28, 7 }
  0x9a   : > { %10283 = vmatmul.mubr.msk.f32.gmra.mxu0 %vm424_vm1, %v11571_v22  ;;  %2580 = vmatprep.subr.mxu0 %v11220_v38 }
  0x9b   : > { %2581 = vmatpush1.msra.mxu0 %v11232_v40  ;;  %1983 = vmatprep.mubr.f32.mxu1 %v15083_v5  ;;  %15130 = vst [vmem:[#allocation8_spill] sm:$0xff] %v11768_v35  ;;  %v11773_v44 = vsub.s32 0, %v11768_v35  ;;  %v11781_v50 = vsub.s32 1, %v11768_v35 }
  0x9c   : > { %2582 = vmatprep.subr.mxu0 %v11240_v41  ;;  %2616 = vmatprep.mubr.f32.mxu0 %v15083_v5 }
  0x9d   : > { %2583 = vmatpush1.msra.mxu0 %v11252_v43  ;;  %9272 = vmatmul.mubr.msk.f32.gmra.mxu1 %vm424_vm1, %v11518_v17  ;;  %15131 = vst [vmem:[#allocation9_spill] sm:$0xff] %v11773_v44  ;;  %15132 = vst [vmem:[#allocation10_spill] sm:$0xff] %v11781_v50  ;;  %v863_v58 = vrot.slane %v11778_v49, %v11773_v44  ;;  %v867_v62 = vrot.slane %v11778_v49, %v11781_v50 }
  0x9e   : > { %9298 = vmatmul.mubr.msk.f32.vlgmr.msra.gmra.mxu0 %vm424_vm1, %v11649_v20  ;;  %2460 = vmatpush1.msra.mxu1 %v10996_v3  ;;  %v2359_v3 = vld [vmem:[%s15071_s1 + $0xd0] sm:$0xff] }
  0x9f   : > { %1989 = vmatprep.mubr.f32.mxu1 %v15083_v5  ;;  %2622 = vmatprep.mubr.f32.mxu0 %v15083_v5 }
  0xa0   : > { %2461 = vmatprep.subr.mxu1 %v11003_v4  ;;  %v2360_v4 = vld [vmem:[%s15071_s1 + $0xd8] sm:$0xff] }
  0xa1   : > { %9273 = vmatmul.mubr.msk.f32.gmra.mxu1 %vm424_vm1, %v11535_v19 }
  0xa2   : > { %9299 = vmatmul.mubr.msk.f32.gmra.mxu0 %vm424_vm1, %v11664_v2  ;;  %1995 = vmatprep.mubr.f32.mxu1 %v15083_v5 }
  0xa3   : > { %2462 = vmatpush1.msra.mxu1 %v11011_v6  ;;  %2628 = vmatprep.mubr.f32.mxu0 %v15083_v5  ;;  %v2399_v6 = vld [vmem:[%s15070_s0 + $0x110] sm:$0x1] }
  0xa4   : > { %2463 = vmatprep.subr.mxu1 %v11018_v7  ;;  %v2361_v7 = vld [vmem:[%s15071_s1 + $0xe0] sm:$0xff] }
  0xa5   : > { %9274 = vmatmul.mubr.msk.f32.gmra.mxu1 %vm424_vm1, %v11555_v21 }
  0xa6   : > { %9300 = vmatmul.mubr.msk.f32.gmra.mxu0 %vm424_vm1, %v2359_v3  ;;  %2464 = vmatpush1.msra.mxu1 %v11025_v8  ;;  %v2362_v8 = vld [vmem:[%s15071_s1 + $0xe8] sm:$0xff] }
  0xa7   : > { %2465 = vmatprep.subr.mxu1 %v11032_v9  ;;  %2001 = vmatprep.mubr.f32.mxu1 %v15083_v5  ;;  %v2363_v9 = vld [vmem:[%s15071_s1 + $0xf0] sm:$0xff] }
  0xa8   : > { %2466 = vmatpush1.msra.mxu1 %v11039_v10  ;;  %2634 = vmatprep.mubr.f32.mxu0 %v15083_v5  ;;  %v2364_v10 = vld [vmem:[%s15071_s1 + $0xf8] sm:$0xff] }
  0xa9   : > { %9275 = vmatmul.mubr.msk.f32.gmra.mxu1 %vm424_vm1, %v11571_v22  ;;  %2467 = vmatprep.subr.mxu1 %v11046_v11 }
  0xaa   : > { %9301 = vmatmul.mubr.msk.f32.gmra.mxu0 %vm424_vm1, %v2360_v4  ;;  %2468 = vmatpush1.msra.mxu1 %v11053_v12 }
  0xab   : > { %2469 = vmatprep.subr.mxu1 %v11060_v13  ;;  %2503 = vmatprep.mubr.f32.mxu1 %v15083_v5 }
  0xac   : > { %2470 = vmatpush1.msra.mxu1 %v11067_v14  ;;  %2640 = vmatprep.mubr.f32.mxu0 %v15083_v5 }
  0xad   : > { %9288 = vmatmul.mubr.msk.f32.vlgmr.msra.gmra.mxu1 %vm424_vm1, %v11649_v20  ;;  %10285 = vmatprep.subr.msk.mxu1 %vm449_vm0, %v2399_v6 }
  0xae   : > { %9302 = vmatmul.mubr.msk.f32.gmra.mxu0 %vm424_vm1, %v2361_v7  ;;  %2509 = vmatprep.mubr.f32.mxu1 %v15083_v5 }
  0xaf   : > { %2646 = vmatprep.mubr.f32.mxu0 %v15083_v5  ;;  %10286 = vmatpush3.msk.msra.mxu1 %vm449_vm0, %v2399_v6 }
  0xb0   : > { %10287 = vmatprep.subr.mxu1 %v11129_v24 }
  0xb1   : > { %9289 = vmatmul.mubr.msk.f32.gmra.mxu1 %vm424_vm1, %v11664_v2 }
  0xb2   : > { %9303 = vmatmul.mubr.msk.f32.gmra.mxu0 %vm424_vm1, %v2362_v8  ;;  %2515 = vmatprep.mubr.f32.mxu1 %v15083_v5 }
  0xb3   : > { %2652 = vmatprep.mubr.f32.mxu0 %v15083_v5  ;;  %10288 = vmatpush3.msra.mxu1 %v11129_v24 }
  0xb4   : > { %10289 = vmatprep.subr.mxu1 %v11150_v27 }
  0xb5   : > { %9290 = vmatmul.mubr.msk.f32.gmra.mxu1 %vm424_vm1, %v2359_v3 }
  0xb6   : > { %9304 = vmatmul.mubr.msk.f32.gmra.mxu0 %vm424_vm1, %v2363_v9  ;;  %2521 = vmatprep.mubr.f32.mxu1 %v15083_v5 }
  0xb7   : > { %2658 = vmatprep.mubr.f32.mxu0 %v15083_v5  ;;  %10290 = vmatpush3.msra.mxu1 %v11150_v27 }
  0xb8   : > { %10291 = vmatprep.subr.mxu1 %v11181_v32 }
  0xb9   : > { %9291 = vmatmul.mubr.msk.f32.gmra.mxu1 %vm424_vm1, %v2360_v4 }
  0xba   : > { %9305 = vmatmul.mubr.msk.f32.gmra.mxu0 %vm424_vm1, %v2364_v10  ;;  %2527 = vmatprep.mubr.f32.mxu1 %v15083_v5 }
  0xbb   : > { %10292 = vmatpush3.msra.mxu1 %v11181_v32 }
  0xbc   : > { %10293 = vmatprep.subr.mxu1 %v11196_v34 }
  0xbd   : > { %9292 = vmatmul.mubr.msk.f32.gmra.mxu1 %vm424_vm1, %v2361_v7 }
  0xbe   : > { %2533 = vmatprep.mubr.f32.mxu1 %v15083_v5  ;;  %10294 = vmatpush3.msra.mxu1 %v11196_v34 }
  0xbf   : > { %10295 = vmatprep.subr.mxu1 %v11225_v39 }
  0xc0   : > { %10296 = vmatpush3.msra.mxu1 %v11225_v39 }
  0xc1   : > { %9293 = vmatmul.mubr.msk.f32.gmra.mxu1 %vm424_vm1, %v2362_v8  ;;  %10297 = vmatprep.subr.mxu1 %v11245_v42 }
  0xc2   : > { %2539 = vmatprep.mubr.f32.mxu1 %v15083_v5  ;;  %10298 = vmatpush3.msra.mxu1 %v11245_v42 }
  0xc5   : > { %9294 = vmatmul.mubr.msk.f32.gmra.mxu1 %vm424_vm1, %v2363_v9 }
  0xc6   : > { %2545 = vmatprep.mubr.f32.mxu1 %v15083_v5 }
  0xc9   : > { %9295 = vmatmul.mubr.msk.f32.gmra.mxu1 %vm424_vm1, %v2364_v10 }
  0xca   : > { %10299 = vmatprep.mubr.msk.f32.mxu1 %vm424_vm1, %v11649_v20 }
  0xcd   : > { %10300 = vmatmul.mubr.msk.f32.vlgmr.msra.gmra.mxu1 %vm424_vm1, %v11664_v2 }
  0xce   : > { %10302 = vmatprep.mubr.msk.f32.mxu1 %vm424_vm1, %v2359_v3 }
  0xd1   : > { %10303 = vmatmul.mubr.msk.f32.gmra.mxu1 %vm424_vm1, %v2360_v4 }
  0xd2   : > { %10305 = vmatprep.mubr.msk.f32.mxu1 %vm424_vm1, %v2361_v7 }
  0xd3   : > { %v11761_v23 = vpop.permute.xlu1 %2152 }
  0xd5   : > { %10306 = vmatmul.mubr.msk.f32.gmra.mxu1 %vm424_vm1, %v2362_v8 }
  0xd6   : > { %10308 = vmatprep.mubr.msk.f32.mxu1 %vm424_vm1, %v2363_v9 }
  0xd9   : > { %10309 = vmatmul.mubr.msk.f32.gmra.mxu1 %vm424_vm1, %v2364_v10 }
  0xe0   : > { %v531_v11 = vpop.f32.mrf.mxu0  ;;  %v555_v12 = vpop.f32.mrf.mxu1 }
  0xe2   : > { %v533_v13 = vpop.f32.mrf.mxu0  ;;  %v557_v14 = vpop.f32.mrf.mxu1 }
  0xe4   : > { %v561_v24 = vpop.f32.mrf.mxu1 }
  0xe5   : > { %v537_v25 = vpop.f32.mrf.mxu0 }
  0xe6   : > { %v563_v26 = vpop.f32.mrf.mxu1 }
  0xe7   : > { %v539_v27 = vpop.f32.mrf.mxu0 }
  0xea   : > { %v11763_v31 = vpop.permute.xlu1 %2147  ;;  %v567_v32 = vpop.f32.mrf.mxu1 }
  0xeb   : > { %v11765_v33 = vpop.permute.xlu0 %2809  ;;  %v543_v34 = vpop.f32.mrf.mxu0 }
  0xec   : > { %v796_v38 = vmax.f32 %v531_v11, %v543_v34  ;;  %v569_v39 = vpop.f32.mrf.mxu1 }
  0xed   : > { %v545_v40 = vpop.f32.mrf.mxu0 }
  0xee   : > { %v806_v41 = vmax.f32 %v796_v38, %v555_v12  ;;  %v797_v42 = vmax.f32 %v533_v13, %v545_v40 }
  0xef   : > { %v11770_v43 = vpop.permute.xlu1 %1490 }
  0xf0   : > { %v816_v45 = vmax.f32 %v806_v41, %v567_v32  ;;  %v807_v46 = vmax.f32 %v797_v42, %v557_v14  ;;  %v549_v47 = vpop.f32.mrf.mxu0  ;;  %v573_v48 = vpop.f32.mrf.mxu1 }
  0xf1   : > { %v11783_v51 = vpop.permute.xlu0 %2804  ;;  %v801_v52 = vmax.f32 %v537_v25, %v549_v47 }
  0xf2   : > { %v817_v53 = vmax.f32 %v807_v46, %v569_v39  ;;  %v551_v54 = vpop.f32.mrf.mxu0  ;;  %v575_v55 = vpop.f32.mrf.mxu1 }
  0xf3   : > { %v11785_v56 = vpop.permute.xlu1 %830  ;;  %v802_v57 = vmax.f32 %v539_v27, %v551_v54  ;;  %v811_v59 = vmax.f32 %v801_v52, %v561_v24 }
  0xf4   : > { %15133 = vst [vmem:[#allocation11_spill] sm:$0xff] %v11785_v56  ;;  %v838_v60 = vadd.f32 %v11785_v56, %v816_v45  ;;  %v839_v61 = vadd.f32 %v11785_v56, %v817_v53 }
  0xf5   : > { %v812_v63 = vmax.f32 %v802_v57, %v563_v26  ;;  %v821_v18 = vmax.f32 %v811_v59, %v573_v48  ;;  %v11822_v26 = vsub.s32 4, %v11768_v35  ;;  %v11850_v59 = vsub.s32 2, %v11768_v35 }
  0xf6   : > { %v11793_v0 = vpop.permute.xlu0 %1495  ;;  %v11795_v1 = vpop.f32.mrf.mxu1  ;;  %v848_v15 = vmax.f32 %v838_v60, 0.0  ;;  %v849_v16 = vmax.f32 %v839_v61, 0.0 }
  0xf7   : > { %v10223_v17 = vpop.f32.mrf.mxu0  ;;  %v822_v19 = vmax.f32 %v812_v63, %v575_v55  ;;  %15134 = vst [vmem:[#allocation12_spill] sm:$0xff] %v11822_v26  ;;  %v11833_v41 = vrot.slane %v11778_v49, %v11822_v26  ;;  %15138 = vst [vmem:[#allocation16_spill] sm:$0xff] %v11850_v59 }
  0xf8   : > { %v646_v21 = vpop.f32.mrf.mxu1  ;;  %v885_v22 = vmul.f32 %v863_v58, %v848_v15  ;;  %v886_v29 = vmul.f32 %v867_v62, %v849_v16  ;;  %v11853_v15 = vsub.s32 3, %v11768_v35 }
  0xf9   : > { %v11797_v30 = vpop.f32.mrf.mxu0  ;;  %15136 = vst [vmem:[#allocation14_spill] sm:$0xff] %v11833_v41 }
  0xfa   : > { %v11799_v36 = vpop.f32.mrf.mxu1  ;;  %998 = vrot.lane.b32.xlu1 %v885_v22, %s10893_s15  ;;  %895 = vst [vmem:[#allocation2] sm:$0xff] %v885_v22  ;;  %912 = vrot.lane.b32.xlu0 %v885_v22, %s10894_s16  ;;  %896 = vst [vmem:[#allocation2 + $0x8] sm:$0xff] %v886_v29 }
  0xfb   : > { %v11803_v37 = vpop.permute.xlu0 %835  ;;  %v10226_v20 = vpop.f32.mrf.mxu0  ;;  %15139 = vst [vmem:[#allocation17_spill] sm:$0xff] %v11853_v15 }
  0xfc   : > { %v805_v2 = vmax.f32 %v10223_v17, %v10226_v20  ;;  %v652_v3 = vpop.f32.mrf.mxu1  ;;  %v843_v4 = vadd.f32 %v11803_v37, %v821_v18  ;;  %v844_v6 = vadd.f32 %v11803_v37, %v822_v19 }
  0xfd   : > { %v11807_v7 = vpop.f32.mrf.mxu0 }
  0xfe   : > { %914 = vrot.lane.b32.xlu1 %v886_v29, %s10894_s16  ;;  %v853_v8 = vmax.f32 %v843_v4, 0.0  ;;  %v854_v9 = vmax.f32 %v844_v6, 0.0  ;;  %v875_v4 = vrot.slane %v11778_v49, %v11853_v15 }
  0xff   : > { %v656_v10 = vpop.f32.mrf.mxu1  ;;  %v10229_v11 = vpop.f32.mrf.mxu0 }
 0x100   : > { %v815_v12 = vmax.f32 %v805_v2, %v10229_v11  ;;  %v11810_v13 = vmul.f32 %v863_v58, %v853_v8  ;;  %v11812_v14 = vmul.f32 %v867_v62, %v854_v9  ;;  %v798_v55 = vmax.f32 %v11795_v1, %v656_v10 }
 0x101   : > { %v658_v24 = vpop.f32.mrf.mxu1  ;;  %v11814_v25 = vpop.f32.mrf.mxu0  ;;  %v871_v1 = vrot.slane %v11778_v49, %v11850_v59 }
 0x102   : > { %920 = vrot.lane.b32.xlu0 %v11810_v13, %s10894_s16  ;;  %900 = vst [vmem:[#allocation2 + $0x20] sm:$0xff] %v11810_v13  ;;  %1000 = vrot.lane.b32.xlu1 %v886_v29, %s10893_s15  ;;  %901 = vst [vmem:[#allocation2 + $0x28] sm:$0xff] %v11812_v14  ;;  %v799_v60 = vmax.f32 %v646_v21, %v658_v24 }
 0x104   : > { %v662_v27 = vpop.f32.mrf.mxu1  ;;  %v10232_v32 = vpop.f32.mrf.mxu0 }
 0x105   : > { %v825_v34 = vmax.f32 %v815_v12, %v10232_v32  ;;  %v803_v16 = vmax.f32 %v11799_v36, %v662_v27 }
 0x106   : > { %1008 = vrot.lane.b32.xlu0 %v11810_v13, %s10893_s15  ;;  %v664_v38 = vpop.f32.mrf.mxu1  ;;  %v11826_v39 = vpop.f32.mrf.mxu0  ;;  %922 = vrot.lane.b32.xlu1 %v11812_v14, %s10894_s16 }
 0x107   : > { %15135 = vst [vmem:[#allocation13_spill] sm:$0xff] %v11826_v39  ;;  %v847_v40 = vadd.f32 %v11803_v37, %v825_v34  ;;  %v804_v29 = vmax.f32 %v652_v3, %v664_v38 }
 0x109   : > { %v857_v42 = vmax.f32 %v847_v40, 0.0  ;;  %v668_v45 = vpop.f32.mrf.mxu1  ;;  %v11835_v46 = vpop.f32.mrf.mxu0 }
 0x10a   : > { %1010 = vrot.lane.b32.xlu0 %v11812_v14, %s10893_s15  ;;  %v808_v61 = vmax.f32 %v798_v55, %v668_v45 }
 0x10b   : > { %v11840_v47 = vmul.f32 %v11833_v41, %v857_v42  ;;  %v670_v48 = vpop.f32.mrf.mxu1  ;;  %v11842_v52 = vpop.f32.mrf.mxu0 }
 0x10c   : > { %v809_v17 = vmax.f32 %v799_v60, %v670_v48 }
 0x10d   : > { %15137 = vst [vmem:[#allocation15_spill] sm:$0xff] %v11840_v47  ;;  %v674_v53 = vpop.f32.mrf.mxu1  ;;  %v11844_v54 = vpop.f32.mrf.mxu0 }
 0x10e   : > { %v813_v20 = vmax.f32 %v803_v16, %v674_v53 }
 0x10f   : > { %v676_v57 = vpop.f32.mrf.mxu1  ;;  %v11847_v58 = vpop.f32.mrf.mxu0 }
 0x110   : > { %v814_v9 = vmax.f32 %v804_v29, %v676_v57 }
 0x111   : > { %v680_v62 = vpop.f32.mrf.mxu1  ;;  %v1316_v63 = vpop.f32.mrf.mxu0 }
 0x112   : > { %v818_v18 = vmax.f32 %v808_v61, %v680_v62 }
 0x113   : > { %v682_v19 = vpop.f32.mrf.mxu1  ;;  %v1318_v22 = vpop.f32.mrf.mxu0 }
 0x114   : > { %v840_v2 = vadd.f32 %v11785_v56, %v818_v18  ;;  %v819_v21 = vmax.f32 %v809_v17, %v682_v19  ;;  %v1459_v18 = vmax.f32 %v11842_v52, %v1318_v22  ;;  %v11899_v19 = vld [vmem:[%s15073_s3 + $0x1] ss:$4 sm:$0x1f] }
 0x115   : > { %v686_v6 = vpop.f32.mrf.mxu1  ;;  %v1322_v8 = vpop.f32.mrf.mxu0 }
 0x116   : > { %v850_v10 = vmax.f32 %v840_v2, 0.0  ;;  %v841_v36 = vadd.f32 %v11785_v56, %v819_v21  ;;  %v823_v11 = vmax.f32 %v813_v20, %v686_v6  ;;  %v1463_v29 = vmax.f32 %v11844_v54, %v1322_v8 }
 0x117   : > { %v688_v12 = vpop.f32.mrf.mxu1  ;;  %v1324_v24 = vpop.f32.mrf.mxu0  ;;  %v1532_v6 = vrot.slane %v11899_v19, %v11850_v59 }
 0x118   : > { %v11862_v27 = vmul.f32 %v871_v1, %v850_v10  ;;  %v851_v32 = vmax.f32 %v841_v36, 0.0  ;;  %v845_v3 = vadd.f32 %v11803_v37, %v823_v11  ;;  %v824_v34 = vmax.f32 %v814_v9, %v688_v12 }
 0x119   : > { %v11865_v38 = vpop.f32.mrf.mxu1  ;;  %v1328_v40 = vpop.f32.mrf.mxu0  ;;  %v1464_v10 = vmax.f32 %v11847_v58, %v1324_v24  ;;  %v1536_v12 = vrot.slane %v11899_v19, %v11853_v15 }
 0x11a   : > { %897 = vst [vmem:[#allocation2 + $0x10] sm:$0xff] %v11862_v27  ;;  %v11868_v49 = vmul.f32 %v875_v4, %v851_v32  ;;  %v855_v42 = vmax.f32 %v845_v3, 0.0  ;;  %v846_v45 = vadd.f32 %v11803_v37, %v824_v34  ;;  %916 = vrot.lane.b32.xlu0 %v11862_v27, %s10894_s16  ;;  %v1458_v37 = vmax.f32 %v11835_v46, %v1316_v63 }
 0x11b   : > { %v11873_v48 = vpop.f32.mrf.mxu1  ;;  %v1330_v53 = vpop.f32.mrf.mxu0 }
 0x11c   : > { %15140 = vst [vmem:[#allocation18_spill] sm:$0xff] %v11868_v49  ;;  %899 = vst.msk [vmem:[#allocation2 + $0x18] sm:$0xff] %vm898_vm2, %v11868_v49  ;;  %v11877_v55 = vmul.f32 %v871_v1, %v855_v42  ;;  %v856_v57 = vmax.f32 %v846_v45, 0.0  ;;  %918 = vrot.lane.b32.xlu1 %v11868_v49, %s10894_s16  ;;  %v1468_v1 = vmax.f32 %v1458_v37, %v1328_v40 }
 0x11d   : > { %v11881_v60 = vpop.f32.mrf.mxu1  ;;  %v1334_v61 = vpop.f32.mrf.mxu0  ;;  %v1469_v20 = vmax.f32 %v1459_v18, %v1330_v53 }
 0x11e   : > { %902 = vst [vmem:[#allocation2 + $0x30] sm:$0xff] %v11877_v55  ;;  %v11885_v62 = vmul.f32 %v875_v4, %v856_v57  ;;  %1002 = vrot.lane.b32.xlu0 %v11862_v27, %s10893_s15  ;;  %v1473_v21 = vmax.f32 %v1463_v29, %v1334_v61 }
 0x11f   : > { %v11889_v16 = vpop.f32.mrf.mxu1  ;;  %v1336_v17 = vpop.f32.mrf.mxu0 }
 0x120   : > { %903 = vst.msk [vmem:[#allocation2 + $0x38] sm:$0xff] %vm898_vm2, %v11885_v62  ;;  %1012 = vrot.lane.b32.xlu1 %v11877_v55, %s10893_s15  ;;  %v1474_v3 = vmax.f32 %v1464_v10, %v1336_v17 }
 0x121   : > { %v1203_v46 = vpop.f32.mrf.mxu1  ;;  %v1340_v63 = vpop.f32.mrf.mxu0 }
 0x122   : > { %v1478_v2 = vmax.f32 %v1468_v1, %v1340_v63  ;;  %924 = vrot.lane.b32.xlu0 %v11877_v55, %s10894_s16 }
 0x123   : > { %v1205_v52 = vpop.f32.mrf.mxu1  ;;  %v1342_v22 = vpop.f32.mrf.mxu0 }
 0x124   : > { %v1500_v4 = vadd.f32 %v11770_v43, %v1478_v2  ;;  %v1479_v9 = vmax.f32 %v1469_v20, %v1342_v22  ;;  %926 = vrot.lane.b32.xlu1 %v11885_v62, %s10894_s16  ;;  %v1456_v22 = vmax.f32 %v11865_v38, %v1203_v46 }
 0x125   : > { %v1209_v54 = vpop.f32.mrf.mxu1  ;;  %v1346_v8 = vpop.f32.mrf.mxu0 }
 0x126   : > { %v1510_v36 = vmax.f32 %v1500_v4, 0.0  ;;  %v1501_v11 = vadd.f32 %v11770_v43, %v1479_v9  ;;  %v1483_v32 = vmax.f32 %v1473_v21, %v1346_v8  ;;  %v1461_v8 = vmax.f32 %v11881_v60, %v1209_v54 }
 0x127   : > { %v1211_v34 = vpop.f32.mrf.mxu1  ;;  %v1348_v40 = vpop.f32.mrf.mxu0 }
 0x128   : > { %v11913_v42 = vmul.f32 %v1532_v6, %v1510_v36  ;;  %v1511_v45 = vmax.f32 %v1501_v11, 0.0  ;;  %v1505_v53 = vadd.f32 %v11793_v0, %v1483_v32  ;;  %v1484_v57 = vmax.f32 %v1474_v3, %v1348_v40 }
 0x129   : > { %v1215_v61 = vpop.f32.mrf.mxu1  ;;  %v11916_v58 = vpop.f32.mrf.mxu0 }
 0x12a   : > { %1558 = vst [vmem:[#allocation2 + $0x50] sm:$0xff] %v11913_v42  ;;  %v11919_v24 = vmul.f32 %v1536_v12, %v1511_v45  ;;  %v1515_v37 = vmax.f32 %v1505_v53, 0.0  ;;  %1576 = vrot.lane.b32.xlu0 %v11913_v42, %s10894_s16  ;;  %v1506_v17 = vadd.f32 %v11793_v0, %v1484_v57  ;;  %v1466_v10 = vmax.f32 %v1456_v22, %v1215_v61 }
 0x12b   : > { %v1217_v18 = vpop.f32.mrf.mxu1  ;;  %v11924_v1 = vpop.f32.mrf.mxu0  ;;  %v1528_v53 = vrot.slane %v11899_v19, %v11781_v50 }
 0x12c   : > { %1559 = vst.msk [vmem:[#allocation2 + $0x58] sm:$0xff] %vm898_vm2, %v11919_v24  ;;  %v11928_v63 = vmul.f32 %v1532_v6, %v1515_v37  ;;  %1578 = vrot.lane.b32.xlu1 %v11919_v24, %s10894_s16  ;;  %v1516_v29 = vmax.f32 %v1506_v17, 0.0  ;;  %v1457_v6 = vmax.f32 %v11873_v48, %v1205_v52  ;;  %v1462_v48 = vmax.f32 %v11889_v16, %v1211_v34 }
 0x12d   : > { %v1221_v20 = vpop.f32.mrf.mxu1  ;;  %v11932_v2 = vpop.f32.mrf.mxu0 }
 0x12e   : > { %1562 = vst [vmem:[#allocation2 + $0x70] sm:$0xff] %v11928_v63  ;;  %1660 = vrot.lane.b32.xlu0 %v11913_v42, %s10893_s15  ;;  %v11938_v21 = vmul.f32 %v1536_v12, %v1516_v29  ;;  %v1467_v36 = vmax.f32 %v1457_v6, %v1217_v18  ;;  %v1524_v12 = vrot.slane %v11899_v19, %v11773_v44 }
 0x12f   : > { %v1223_v4 = vpop.f32.mrf.mxu1  ;;  %v11940_v9 = vpop.f32.mrf.mxu0  ;;  %v1471_v52 = vmax.f32 %v1461_v8, %v1221_v20 }
 0x130   : > { %1584 = vrot.lane.b32.xlu1 %v11928_v63, %s10894_s16  ;;  %1563 = vst.msk [vmem:[#allocation2 + $0x78] sm:$0xff] %vm898_vm2, %v11938_v21  ;;  %v1472_v57 = vmax.f32 %v1462_v48, %v1223_v4 }
 0x131   : > { %v1227_v38 = vpop.f32.mrf.mxu1  ;;  %v1860_v46 = vpop.f32.mrf.mxu0 }
 0x132   : > { %v1476_v11 = vmax.f32 %v1466_v10, %v1227_v38 }
 0x133   : > { %v1229_v32 = vpop.f32.mrf.mxu1  ;;  %v1862_v3 = vpop.f32.mrf.mxu0 }
 0x134   : > { %v1498_v40 = vadd.f32 %v11770_v43, %v1476_v11  ;;  %v1477_v45 = vmax.f32 %v1467_v36, %v1229_v32  ;;  %1670 = vrot.lane.b32.xlu1 %v11928_v63, %s10893_s15 }
 0x135   : > { %v1233_v60 = vpop.f32.mrf.mxu1  ;;  %v1866_v54 = vpop.f32.mrf.mxu0 }
 0x136   : > { %v1508_v61 = vmax.f32 %v1498_v40, 0.0  ;;  %v1499_v37 = vadd.f32 %v11770_v43, %v1477_v45  ;;  %v1481_v17 = vmax.f32 %v1471_v52, %v1233_v60 }
 0x137   : > { %v1235_v18 = vpop.f32.mrf.mxu1  ;;  %v1868_v29 = vpop.f32.mrf.mxu0 }
 0x138   : > { %v11957_v16 = vmul.f32 %v1524_v12, %v1508_v61  ;;  %v1509_v34 = vmax.f32 %v1499_v37, 0.0  ;;  %v1503_v20 = vadd.f32 %v11793_v0, %v1481_v17  ;;  %v1482_v22 = vmax.f32 %v1472_v57, %v1235_v18  ;;  %1586 = vrot.lane.b32.xlu1 %v11938_v21, %s10894_s16 }
 0x139   : > { %v10249_v6 = vpop.f32.mrf.mxu1  ;;  %v1872_v10 = vpop.f32.mrf.mxu0  ;;  %v2113_v37 = vmax.f32 %v11916_v58, %v1860_v46  ;;  %v2118_v58 = vmax.f32 %v11932_v2, %v1866_v54 }
 0x13a   : > { %1556 = vst [vmem:[#allocation2 + $0x40] sm:$0xff] %v11957_v16  ;;  %v11963_v4 = vmul.f32 %v1528_v53, %v1509_v34  ;;  %v1513_v38 = vmax.f32 %v1503_v20, 0.0  ;;  %v1504_v8 = vadd.f32 %v11793_v0, %v1482_v22  ;;  %1572 = vrot.lane.b32.xlu0 %v11957_v16, %s10894_s16  ;;  %v11989_v20 = vld [vmem:[%s15073_s3 + $0x2] ss:$4 sm:$0x1f] }
 0x13b   : > { %v11968_v36 = vpop.f32.mrf.mxu1  ;;  %v1874_v11 = vpop.f32.mrf.mxu0  ;;  %v2123_v17 = vmax.f32 %v2113_v37, %v1872_v10  ;;  %v2185_v2 = vrot.slane %v11989_v20, %v11781_v50 }
 0x13c   : > { %1557 = vst [vmem:[#allocation2 + $0x48] sm:$0xff] %v11963_v4  ;;  %v11971_v32 = vmul.f32 %v1524_v12, %v1513_v38  ;;  %v1514_v48 = vmax.f32 %v1504_v8, 0.0  ;;  %1656 = vrot.lane.b32.xlu1 %v11957_v16, %s10893_s15  ;;  %v2114_v12 = vmax.f32 %v11924_v1, %v1862_v3  ;;  %v2181_v38 = vrot.slane %v11989_v20, %v11773_v44 }
 0x13d   : > { %v10252_v52 = vpop.f32.mrf.mxu1  ;;  %v1878_v40 = vpop.f32.mrf.mxu0 }
 0x13e   : > { %1560 = vst [vmem:[#allocation2 + $0x60] sm:$0xff] %v11971_v32  ;;  %v1552_v45 = vmul.f32 %v1528_v53, %v1514_v48  ;;  %v1465_v60 = vmax.f32 %v10249_v6, %v10252_v52  ;;  %1580 = vrot.lane.b32.xlu0 %v11971_v32, %s10894_s16  ;;  %v2124_v46 = vmax.f32 %v2114_v12, %v1874_v11 }
 0x13f   : > { %v11978_v57 = vpop.f32.mrf.mxu1  ;;  %v1880_v61 = vpop.f32.mrf.mxu0  ;;  %v2128_v3 = vmax.f32 %v2118_v58, %v1878_v40  ;;  %v2119_v48 = vmax.f32 %v11940_v9, %v1868_v29 }
 0x140   : > { %1561 = vst [vmem:[#allocation2 + $0x68] sm:$0xff] %v1552_v45  ;;  %1574 = vrot.lane.b32.xlu1 %v11963_v4, %s10894_s16 }
 0x141   : > { %v2129_v12 = vmax.f32 %v2119_v48, %v1880_v61 }
 0x142   : > { %v10255_v18 = vpop.f32.mrf.mxu1  ;;  %1666 = vrot.lane.b32.xlu0 %v11971_v32, %s10893_s15 }
 0x143   : > { %v1475_v53 = vmax.f32 %v1465_v60, %v10255_v18  ;;  %v1884_v34 = vpop.f32.mrf.mxu0 }
 0x144   : > { %v2133_v22 = vmax.f32 %v2123_v17, %v1884_v34  ;;  %v11992_v6 = vpop.f32.mrf.mxu1  ;;  %1658 = vrot.lane.b32.xlu1 %v11963_v4, %s10893_s15  ;;  %v12006_v17 = vrot.slane %v11899_v19, %v11822_v26 }
 0x145   : > { %v1886_v1 = vpop.f32.mrf.mxu0 }
 0x146   : > { %v2155_v10 = vadd.f32 %v11763_v31, %v2133_v22  ;;  %v2134_v8 = vmax.f32 %v2124_v46, %v1886_v1  ;;  %1582 = vrot.lane.b32.xlu0 %v1552_v45, %s10894_s16 }
 0x147   : > { %v10258_v54 = vpop.f32.mrf.mxu1  ;;  %v1890_v11 = vpop.f32.mrf.mxu0 }
 0x148   : > { %v2165_v52 = vmax.f32 %v2155_v10, 0.0  ;;  %v2156_v60 = vadd.f32 %v11763_v31, %v2134_v8  ;;  %v1485_v37 = vmax.f32 %v1475_v53, %v10258_v54  ;;  %v2138_v40 = vmax.f32 %v2128_v3, %v1890_v11 }
 0x149   : > { %v12008_v18 = vpop.f32.mrf.mxu1  ;;  %v1892_v34 = vpop.f32.mrf.mxu0 }
 0x14a   : > { %v2203_v58 = vmul.f32 %v2181_v38, %v2165_v52  ;;  %v2166_v9 = vmax.f32 %v2156_v60, 0.0  ;;  %v1507_v29 = vadd.f32 %v11793_v0, %v1485_v37  ;;  %v2160_v46 = vadd.f32 %v11761_v23, %v2138_v40  ;;  %1668 = vrot.lane.b32.xlu0 %v1552_v45, %s10893_s15 }
 0x14b   : > { %v2139_v22 = vmax.f32 %v2129_v12, %v1892_v34 }
 0x14c   : > { %2213 = vst [vmem:[#allocation2 + $0x100] sm:$0xff] %v2203_v58  ;;  %v2204_v53 = vmul.f32 %v2185_v2, %v2166_v9  ;;  %v1517_v1 = vmax.f32 %v1507_v29, 0.0  ;;  %v2170_v61 = vmax.f32 %v2160_v46, 0.0  ;;  %2229 = vrot.lane.b32.xlu1 %v2203_v58, %s10894_s16 }
 0x14d   : > { %v2161_v19 = vadd.f32 %v11761_v23, %v2139_v22  ;;  %v1961_v3 = vpop.f32.mrf.mxu1  ;;  %v10275_v10 = vpop.f32.mrf.mxu0 }
 0x14e   : > { %2214 = vst [vmem:[#allocation2 + $0x108] sm:$0xff] %v2204_v53  ;;  %v12016_v8 = vmul.f32 %v12006_v17, %v1517_v1  ;;  %v2208_v0 = vmul.f32 %v2181_v38, %v2170_v61  ;;  %1624 = vrot.lane.b32.xlu0 %v1552_v45, %s10895_s24 }
 0x14f   : > { %v2171_v48 = vmax.f32 %v2161_v19, 0.0  ;;  %v1963_v54 = vpop.f32.mrf.mxu1  ;;  %v2074_v11 = vpop.f32.mrf.mxu0 }
 0x150   : > { %2217 = vst [vmem:[#allocation2 + $0x120] sm:$0xff] %v2208_v0  ;;  %2269 = vrot.lane.b32.xlu1 %v2203_v58, %s10895_s24 }
 0x151   : > { %v12020_v52 = vmul.f32 %v2185_v2, %v2171_v48  ;;  %v1967_v60 = vpop.f32.mrf.mxu1  ;;  %v10278_v37 = vpop.f32.mrf.mxu0 }
 0x152   : > { %2313 = vrot.lane.b32.xlu0 %v2203_v58, %s10893_s15  ;;  %v2122_v61 = vmax.f32 %v10275_v10, %v10278_v37 }
 0x153   : > { %2218 = vst [vmem:[#allocation2 + $0x128] sm:$0xff] %v12020_v52  ;;  %v1969_v40 = vpop.f32.mrf.mxu1  ;;  %v2084_v12 = vpop.f32.mrf.mxu0 }
 0x154   : > { %2231 = vrot.lane.b32.xlu1 %v2204_v53, %s10894_s16  ;;  %v2117_v2 = vmax.f32 %v2074_v11, %v2084_v12 }
 0x155   : > { %v1973_v38 = vpop.f32.mrf.mxu1  ;;  %v10281_v45 = vpop.f32.mrf.mxu0 }
 0x156   : > { %2315 = vrot.lane.b32.xlu0 %v2204_v53, %s10893_s15 }
 0x157   : > { %v1975_v34 = vpop.f32.mrf.mxu1  ;;  %v2094_v9 = vpop.f32.mrf.mxu0 }
 0x158   : > { %2271 = vrot.lane.b32.xlu1 %v2204_v53, %s10895_s24  ;;  %v2127_v58 = vmax.f32 %v2117_v2, %v2094_v9  ;;  %v2132_v53 = vmax.f32 %v2122_v61, %v10281_v45  ;;  %v2197_v9 = vrot.slane %v11989_v20, %v11822_v26  ;;  %v2115_v2 = vmax.f32 %v1961_v3, %v1973_v38 }
 0x159   : > { %v1979_v29 = vpop.f32.mrf.mxu1  ;;  %v2189_v38 = vrot.slane %v11989_v20, %v11850_v59 }
 0x15a   : > { %v10284_v46 = vpop.f32.mrf.mxu0  ;;  %2237 = vrot.lane.b32.xlu0 %v2208_v0, %s10894_s16  ;;  %v2120_v45 = vmax.f32 %v1967_v60, %v1979_v29 }
 0x15b   : > { %v1981_v22 = vpop.f32.mrf.mxu1  ;;  %v2142_v10 = vmax.f32 %v2132_v53, %v10284_v46 }
 0x15c   : > { %v2104_v1 = vpop.f32.mrf.mxu0 }
 0x15d   : > { %v2137_v19 = vmax.f32 %v2127_v58, %v2104_v1  ;;  %v1985_v48 = vpop.f32.mrf.mxu1  ;;  %v2116_v1 = vmax.f32 %v1963_v54, %v1975_v34  ;;  %v2121_v34 = vmax.f32 %v1969_v40, %v1981_v22 }
 0x15e   : > { %v12028_v28 = vpop.f32.mrf.mxu0  ;;  %2323 = vrot.lane.b32.xlu0 %v2208_v0, %s10893_s15 }
 0x15f   : > { %v2159_v5 = vadd.f32 %v11763_v31, %v2137_v19  ;;  %v1987_v35 = vpop.f32.mrf.mxu1  ;;  %v2125_v19 = vmax.f32 %v2115_v2, %v1985_v48 }
 0x160   : > { %v12032_v41 = vpop.f32.mrf.mxu0  ;;  %v2126_v61 = vmax.f32 %v2116_v1, %v1987_v35  ;;  %v2193_v35 = vrot.slane %v11989_v20, %v11853_v15 }
 0x161   : > { %v2169_v11 = vmax.f32 %v2159_v5, 0.0  ;;  %v1991_v12 = vpop.f32.mrf.mxu1 }
 0x162   : > { %v12036_v47 = vpop.f32.mrf.mxu0  ;;  %2279 = vrot.lane.b32.xlu0 %v2208_v0, %s10895_s24  ;;  %v2164_v0 = vadd.f32 %v11761_v23, %v2142_v10  ;;  %v2130_v46 = vmax.f32 %v2120_v45, %v1991_v12 }
 0x163   : > { %v1993_v37 = vpop.f32.mrf.mxu1  ;;  %v12039_v58 = vmul.f32 %v2197_v9, %v2169_v11 }
 0x164   : > { %v12041_v56 = vpop.f32.mrf.mxu0  ;;  %v2131_v29 = vmax.f32 %v2121_v34, %v1993_v37  ;;  %v2174_v40 = vmax.f32 %v2164_v0, 0.0 }
 0x165   : > { %2321 = vrot.lane.b32.xlu1 %v12039_v58, %s10893_s15  ;;  %v1997_v5 = vpop.f32.mrf.mxu1 }
 0x166   : > { %v2135_v49 = vmax.f32 %v2125_v19, %v1997_v5  ;;  %v2630_v3 = vpop.f32.mrf.mxu0  ;;  %2239 = vrot.lane.b32.xlu0 %v12020_v52, %s10894_s16 }
 0x167   : > { %v1999_v54 = vpop.f32.mrf.mxu1 }
 0x168   : > { %v2157_v48 = vadd.f32 %v11763_v31, %v2135_v49  ;;  %v2136_v53 = vmax.f32 %v2126_v61, %v1999_v54  ;;  %v2632_v11 = vpop.f32.mrf.mxu0 }
 0x169   : > { %v2003_v60 = vpop.f32.mrf.mxu1 }
 0x16a   : > { %v2167_v2 = vmax.f32 %v2157_v48, 0.0  ;;  %v2158_v1 = vadd.f32 %v11763_v31, %v2136_v53  ;;  %v2140_v19 = vmax.f32 %v2130_v46, %v2003_v60  ;;  %v12054_v10 = vpop.f32.mrf.mxu0  ;;  %2325 = vrot.lane.b32.xlu0 %v12020_v52, %s10893_s15 }
 0x16b   : > { %v2005_v22 = vpop.f32.mrf.mxu1 }
 0x16c   : > { %v12058_v12 = vmul.f32 %v2189_v38, %v2167_v2  ;;  %v2168_v49 = vmax.f32 %v2158_v1, 0.0  ;;  %v2162_v5 = vadd.f32 %v11761_v23, %v2140_v19  ;;  %v2141_v45 = vmax.f32 %v2131_v29, %v2005_v22  ;;  %v2638_v20 = vpop.f32.mrf.mxu0  ;;  %v999_v61 = vpop.permute.xlu1 %998 }
 0x16d   : > { %v12061_v37 = vpop.f32.mrf.mxu1  ;;  %v12070_v0 = vpop.permute.xlu0 %912  ;;  %v12076_v29 = vmul.f32 %v2197_v9, %v2174_v40 }
 0x16e   : > { %v12063_v54 = vmul.f32 %v2193_v35, %v2168_v49  ;;  %v2163_v31 = vadd.f32 %v11761_v23, %v2141_v45  ;;  %v2642_v34 = vpop.f32.mrf.mxu0  ;;  %2317 = vrot.lane.b32.xlu1 %v12058_v12, %s10893_s15  ;;  %2281 = vrot.lane.b32.xlu0 %v12020_v52, %s10895_s24  ;;  %15141 = vst [vmem:[#allocation19_spill] sm:$0xff] %v12070_v0  ;;  %v2172_v48 = vmax.f32 %v2162_v5, 0.0 }
 0x16f   : > { %v12072_v46 = vpop.f32.mrf.mxu1  ;;  %v2772_v52 = vmax.f32 %v12028_v28, %v2630_v3  ;;  %v2773_v49 = vmax.f32 %v12032_v41, %v2632_v11  ;;  %v2778_v11 = vmax.f32 %v12041_v56, %v2638_v20 }
 0x170   : > { %2216 = vst.msk [vmem:[#allocation2 + $0x118] sm:$0xff] %vm898_vm2, %v12063_v54  ;;  %v2173_v53 = vmax.f32 %v2163_v31, 0.0  ;;  %v2644_v60 = vpop.f32.mrf.mxu0  ;;  %v12078_v23 = vpop.permute.xlu1 %914  ;;  %v12091_v9 = vmul.f32 %v2189_v38, %v2172_v48 }
 0x171   : > { %15142 = vst [vmem:[#allocation20_spill] sm:$0xff] %v12078_v23  ;;  %v12080_v2 = vpop.f32.mrf.mxu1  ;;  %v2782_v5 = vmax.f32 %v2772_v52, %v2642_v34  ;;  %v2783_v3 = vmax.f32 %v2773_v49, %v2644_v60  ;;  %v12111_v52 = vld [vmem:[%s15073_s3 + $0x3] ss:$4 sm:$0x1f] }
 0x172   : > { %v12082_v1 = vmul.f32 %v2193_v35, %v2173_v53  ;;  %v2648_v19 = vpop.f32.mrf.mxu0  ;;  %2235 = vrot.lane.b32.xlu1 %v12063_v54, %s10894_s16  ;;  %2331 = vrot.lane.b32.xlu0 %v12076_v29, %s10893_s15  ;;  %v2850_v56 = vrot.slane %v12111_v52, %v11853_v15 }
 0x173   : > { %v12089_v22 = vpop.f32.mrf.mxu1 }
 0x174   : > { %2220 = vst.msk [vmem:[#allocation2 + $0x138] sm:$0xff] %vm898_vm2, %v12082_v1  ;;  %v2650_v40 = vpop.f32.mrf.mxu0  ;;  %v12095_v35 = vpop.permute.xlu0 %920 }
 0x175   : > { %15143 = vst [vmem:[#allocation21_spill] sm:$0xff] %v12095_v35  ;;  %v2517_v45 = vpop.f32.mrf.mxu1  ;;  %v12098_v31 = vpop.permute.xlu1 %1000 }
 0x176   : > { %15144 = vst [vmem:[#allocation22_spill] sm:$0xff] %v12098_v31  ;;  %v2654_v53 = vpop.f32.mrf.mxu0  ;;  %2241 = vrot.lane.b32.xlu1 %v12091_v9, %s10894_s16  ;;  %2233 = vrot.lane.b32.xlu0 %v12058_v12, %s10894_s16  ;;  %v1019_v28 = vsel %vm1018_vm3, %v999_v61, %v12098_v31  ;;  %v2788_v61 = vmax.f32 %v2778_v11, %v2650_v40 }
 0x177   : > { %v2792_v38 = vmax.f32 %v2782_v5, %v2654_v53  ;;  %v2519_v48 = vpop.f32.mrf.mxu1  ;;  %1035 = vst [vmem:[#allocation2 + $0x280] sm:$0xff] %v1019_v28 }
 0x178   : > { %v2656_v0 = vpop.f32.mrf.mxu0  ;;  %v1009_v41 = vpop.permute.xlu0 %1008 }
 0x179   : > { %v2814_v34 = vadd.f32 %v11783_v51, %v2792_v38  ;;  %v2793_v23 = vmax.f32 %v2783_v3, %v2656_v0  ;;  %v2523_v35 = vpop.f32.mrf.mxu1  ;;  %v2846_v0 = vrot.slane %v12111_v52, %v11850_v59  ;;  %v2770_v59 = vmax.f32 %v12061_v37, %v2517_v45 }
 0x17a   : > { %v2660_v39 = vpop.f32.mrf.mxu0  ;;  %2327 = vrot.lane.b32.xlu1 %v12091_v9, %s10893_s15  ;;  %2273 = vrot.lane.b32.xlu0 %v12058_v12, %s10895_s24 }
 0x17b   : > { %v2815_v60 = vadd.f32 %v11783_v51, %v2793_v23  ;;  %v12120_v20 = vpop.f32.mrf.mxu1  ;;  %v2824_v49 = vmax.f32 %v2814_v34, 0.0 }
 0x17c   : > { %v2662_v5 = vpop.f32.mrf.mxu0  ;;  %v12124_v53 = vpop.permute.xlu0 %1010 }
 0x17d   : > { %15145 = vst [vmem:[#allocation23_spill] sm:$0xff] %v12124_v53  ;;  %v2825_v28 = vmax.f32 %v2815_v60, 0.0  ;;  %v2798_v3 = vmax.f32 %v2788_v61, %v2662_v5  ;;  %v2529_v38 = vpop.f32.mrf.mxu1  ;;  %v1023_v23 = vsel %vm1018_vm3, %v1009_v41, %v12124_v53  ;;  %v2777_v60 = vmax.f32 %v12036_v47, %v12054_v10 }
 0x17e   : > { %2283 = vrot.lane.b32.xlu1 %v12091_v9, %s10895_s24  ;;  %2319 = vrot.lane.b32.xlu0 %v12063_v54, %s10893_s15  ;;  %1039 = vst [vmem:[#allocation2 + $0x2a0] sm:$0xff] %v1023_v23  ;;  %v12137_v61 = vmul.f32 %v2846_v0, %v2824_v49  ;;  %v2771_v47 = vmax.f32 %v12072_v46, %v2519_v48 }
 0x17f   : > { %v12132_v40 = vmul.f32 %v2850_v56, %v2825_v28  ;;  %v2820_v11 = vadd.f32 %v11765_v33, %v2798_v3  ;;  %v2531_v34 = vpop.f32.mrf.mxu1  ;;  %v2787_v41 = vmax.f32 %v2777_v60, %v2648_v19  ;;  %v2780_v49 = vmax.f32 %v2770_v59, %v2529_v38 }
 0x180   : > { %v2775_v19 = vmax.f32 %v12080_v2, %v2523_v35  ;;  %v2781_v37 = vmax.f32 %v2771_v47, %v2531_v34  ;;  %v12160_v2 = vpop.permute.xlu1 %922 }
 0x181   : > { %2873 = vst.msk [vmem:[#allocation2 + $0x158] sm:$0xff] %vm898_vm2, %v12132_v40  ;;  %v2830_v5 = vmax.f32 %v2820_v11, 0.0  ;;  %v2535_v15 = vpop.f32.mrf.mxu1  ;;  %v2797_v10 = vmax.f32 %v2787_v41, %v2660_v39 }
 0x182   : > { %2243 = vrot.lane.b32.xlu1 %v12082_v1, %s10894_s16  ;;  %2890 = vrot.lane.b32.xlu0 %v12137_v61, %s10894_s16  ;;  %v2785_v59 = vmax.f32 %v2775_v19, %v2535_v15  ;;  %v2776_v19 = vmax.f32 %v12089_v22, %v12120_v20 }
 0x183   : > { %v12146_v28 = vmul.f32 %v2850_v56, %v2830_v5  ;;  %v2537_v3 = vpop.f32.mrf.mxu1  ;;  %v2838_v56 = vrot.slane %v12111_v52, %v11773_v44  ;;  %v2819_v39 = vadd.f32 %v11765_v33, %v2797_v10  ;;  %v2842_v5 = vrot.slane %v12111_v52, %v11781_v50 }
 0x185   : > { %2877 = vst.msk [vmem:[#allocation2 + $0x178] sm:$0xff] %vm898_vm2, %v12146_v28  ;;  %v2541_v23 = vpop.f32.mrf.mxu1  ;;  %v2829_v15 = vmax.f32 %v2819_v39, 0.0  ;;  %v2786_v39 = vmax.f32 %v2776_v19, %v2537_v3 }
 0x186   : > { %v2790_v45 = vmax.f32 %v2780_v49, %v2541_v23  ;;  %2329 = vrot.lane.b32.xlu1 %v12082_v1, %s10893_s15  ;;  %2930 = vrot.lane.b32.xlu0 %v12137_v61, %s10895_s24 }
 0x187   : > { %v2543_v46 = vpop.f32.mrf.mxu1  ;;  %v12180_v23 = vmul.f32 %v2846_v0, %v2829_v15 }
 0x188   : > { %v2812_v48 = vadd.f32 %v11783_v51, %v2790_v45  ;;  %v2791_v38 = vmax.f32 %v2781_v37, %v2543_v46 }
 0x189   : > { %v2547_v11 = vpop.f32.mrf.mxu1 }
 0x18a   : > { %v2822_v35 = vmax.f32 %v2812_v48, 0.0  ;;  %v2813_v34 = vadd.f32 %v11783_v51, %v2791_v38  ;;  %v2795_v60 = vmax.f32 %v2785_v59, %v2547_v11  ;;  %2974 = vrot.lane.b32.xlu1 %v12137_v61, %s10893_s15  ;;  %2976 = vrot.lane.b32.xlu0 %v12132_v40, %s10893_s15 }
 0x18b   : > { %v2549_v46 = vpop.f32.mrf.mxu1 }
 0x18c   : > { %v12169_v41 = vmul.f32 %v2838_v56, %v2822_v35  ;;  %v2823_v47 = vmax.f32 %v2813_v34, 0.0  ;;  %v2817_v10 = vadd.f32 %v11765_v33, %v2795_v60  ;;  %v12186_v59 = vpop.permute.xlu0 %916  ;;  %v2796_v38 = vmax.f32 %v2786_v39, %v2549_v46 }
 0x18e   : > { %2892 = vrot.lane.b32.xlu1 %v12132_v40, %s10894_s16  ;;  %v12174_v49 = vpop.permute.xlu1 %918  ;;  %2970 = vrot.lane.b32.xlu0 %v12169_v41, %s10893_s15  ;;  %v12184_v37 = vmul.f32 %v2842_v5, %v2823_v47  ;;  %v2827_v45 = vmax.f32 %v2817_v10, 0.0  ;;  %v2818_v20 = vadd.f32 %v11765_v33, %v2796_v38  ;;  %v10301_v10 = vpop.f32.mrf.mxu1 }
 0x18f   : > { %946 = vst.msk [vmem:[#allocation2 + $0x98] sm:$0xff] %vm898_vm2, %v12174_v49 }
 0x190   : > { %v12194_v0 = vmul.f32 %v2838_v56, %v2827_v45  ;;  %v12205_v3 = vpop.permute.xlu0 %1002  ;;  %v2828_v56 = vmax.f32 %v2818_v20, 0.0  ;;  %v2731_v46 = vpop.f32.mrf.mxu1 }
 0x191   : > { %15147 = vst [vmem:[#allocation25_spill] sm:$0xff] %v12205_v3 }
 0x192   : > { %2898 = vrot.lane.b32.xlu1 %v12180_v23, %s10894_s16  ;;  %v12190_v48 = vpop.permute.xlu1 %1012  ;;  %2972 = vrot.lane.b32.xlu0 %v12184_v37, %s10893_s15  ;;  %v12221_v34 = vmul.f32 %v2842_v5, %v2828_v56  ;;  %v10304_v39 = vpop.f32.mrf.mxu1 }
 0x193   : > { %15146 = vst [vmem:[#allocation24_spill] sm:$0xff] %v12190_v48 }
 0x194   : > { %v12211_v11 = vpop.permute.xlu0 %924  ;;  %v2741_v38 = vpop.f32.mrf.mxu1 }
 0x196   : > { %2984 = vrot.lane.b32.xlu1 %v12180_v23, %s10893_s15  ;;  %v12198_v22 = vpop.permute.xlu1 %926  ;;  %2894 = vrot.lane.b32.xlu0 %v12194_v0, %s10894_s16  ;;  %v10307_v56 = vpop.f32.mrf.mxu1 }
 0x197   : > { %950 = vst.msk [vmem:[#allocation2 + $0xb8] sm:$0xff] %vm898_vm2, %v12198_v22 }
 0x198   : > { %v2751_v44 = vpop.f32.mrf.mxu1 }
 0x19a   : > { %2940 = vrot.lane.b32.xlu1 %v12180_v23, %s10895_s24  ;;  %2980 = vrot.lane.b32.xlu0 %v12194_v0, %s10893_s15  ;;  %v10310_v3 = vpop.f32.mrf.mxu1 }
 0x19c   : > { %v12223_v60 = vpop.permute.xlu0 %1576 }
 0x19e   : > { %2900 = vrot.lane.b32.xlu1 %v12146_v28, %s10894_s16  ;;  %v12215_v35 = vpop.permute.xlu1 %1578  ;;  %2936 = vrot.lane.b32.xlu0 %v12194_v0, %s10895_s24 }
 0x19f   : > { %1605 = vst.msk [vmem:[#allocation2 + $0xd8] sm:$0xff] %vm898_vm2, %v12215_v35 }
 0x1a0   : > { %v12237_v5 = vpop.permute.xlu0 %1660 }
 0x1a1   : > { %15149 = vst [vmem:[#allocation27_spill] sm:$0xff] %v12237_v5 }
 0x1a2   : > { %2986 = vrot.lane.b32.xlu1 %v12146_v28, %s10893_s15  ;;  %v12227_v15 = vpop.permute.xlu1 %1584  ;;  %2896 = vrot.lane.b32.xlu0 %v12221_v34, %s10894_s16 }
 0x1a6   : > { %2886 = vrot.lane.b32.xlu1 %v12169_v41, %s10894_s16  ;;  %v12233_v47 = vpop.permute.xlu1 %1670  ;;  %1622 = vrot.lane.b32.xlu0 %v11971_v32, %s10895_s24 }
 0x1a7   : > { %15148 = vst [vmem:[#allocation26_spill] sm:$0xff] %v12233_v47 }
 0x1aa   : > { %2926 = vrot.lane.b32.xlu1 %v12169_v41, %s10895_s24  ;;  %1616 = vrot.lane.b32.xlu0 %v11913_v42, %s10895_s24  ;;  %v12243_v19 = vpop.permute.xlu1 %1586 }
 0x1ab   : > { %1609 = vst.msk [vmem:[#allocation2 + $0xf8] sm:$0xff] %vm898_vm2, %v12243_v19 }
 0x1ac   : > { %v12247_v45 = vpop.permute.xlu0 %1572 }
 0x1ae   : > { %2888 = vrot.lane.b32.xlu1 %v12184_v37, %s10894_s16  ;;  %2932 = vrot.lane.b32.xlu0 %v12132_v40, %s10895_s24  ;;  %v12261_v20 = vpop.permute.xlu1 %1656 }
 0x1af   : > { %15151 = vst [vmem:[#allocation29_spill] sm:$0xff] %v12261_v20 }
 0x1b0   : > { %v12253_v32 = vpop.permute.xlu0 %1580 }
 0x1b2   : > { %1626 = vrot.lane.b32.xlu1 %v11928_v63, %s10895_s24  ;;  %965 = vrot.lane.b32.xlu0 %v11812_v14, %s10895_s24  ;;  %v2779_v14 = vmax.f32 %v10301_v10, %v10304_v39  ;;  %v12273_v63 = vpop.permute.xlu1 %1574 }
 0x1b4   : > { %v12259_v42 = vpop.permute.xlu0 %1666 }
 0x1b5   : > { %15150 = vst [vmem:[#allocation28_spill] sm:$0xff] %v12259_v42 }
 0x1b6   : > { %2928 = vrot.lane.b32.xlu1 %v12184_v37, %s10895_s24  ;;  %963 = vrot.lane.b32.xlu0 %v11810_v13, %s10895_s24  ;;  %v2789_v13 = vmax.f32 %v2779_v14, %v10307_v56 }
 0x1b8   : > { %v12267_v40 = vpop.permute.xlu0 %1582 }
 0x1ba   : > { %2942 = vrot.lane.b32.xlu1 %v12146_v28, %s10895_s24  ;;  %2287 = vrot.lane.b32.xlu0 %v12076_v29, %s10895_s24  ;;  %v12283_v28 = vpop.permute.xlu1 %1658  ;;  %v2799_v29 = vmax.f32 %v2789_v13, %v10310_v3  ;;  %v2774_v3 = vmax.f32 %v2731_v46, %v2741_v38  ;;  %v10457_v13 = vld [vmem:[#allocation2 + $0x8] sm:$0xff]  ;;  %v2761_v38 = vpop.f32.mrf.mxu1 }
 0x1bb   : > { %15154 = vst [vmem:[#allocation32_spill] sm:$0xff] %v12283_v28 }
 0x1bc   : > { %v12275_v50 = vpop.permute.xlu0 %1668 }
 0x1bd   : > { %15152 = vst [vmem:[#allocation30_spill] sm:$0xff] %v12275_v50 }
 0x1be   : > { %1614 = vrot.lane.b32.xlu1 %v11963_v4, %s10895_s24  ;;  %957 = vrot.lane.b32.xlu0 %v11862_v27, %s10895_s24  ;;  %v12291_v39 = vpop.permute.xlu1 %2229  ;;  %v2821_v27 = vadd.f32 %v11765_v33, %v2799_v29  ;;  %v10458_v29 = vld [vmem:[#allocation2] sm:$0xff] }
 0x1c0   : > { %v12281_v31 = vpop.permute.xlu0 %1624  ;;  %v2831_v56 = vmax.f32 %v2821_v27, 0.0 }
 0x1c1   : > { %15153 = vst [vmem:[#allocation31_spill] sm:$0xff] %v12281_v31 }
 0x1c2   : > { %1612 = vrot.lane.b32.xlu1 %v11957_v16, %s10895_s24  ;;  %2982 = vrot.lane.b32.xlu0 %v12221_v34, %s10893_s15  ;;  %v1460_v16 = vmax.f32 %v11968_v36, %v11978_v57  ;;  %v12308_v14 = vpop.permute.xlu1 %2269  ;;  %v2784_v36 = vmax.f32 %v2774_v3, %v2751_v44 }
 0x1c3   : > { %15155 = vst [vmem:[#allocation33_spill] sm:$0xff] %v12308_v14 }
 0x1c4   : > { %v12289_v10 = vpop.permute.xlu0 %2313  ;;  %v1470_v33 = vmax.f32 %v1460_v16, %v11992_v6  ;;  %v2794_v27 = vmax.f32 %v2784_v36, %v2761_v38  ;;  %v3015_v36 = vld [vmem:[%s15074_s4 + $0x8] sm:$0xff] }
 0x1c5   : > { %3222 = vmatprep.mubr.f32.mxu0 %v3015_v36  ;;  %3335 = vmatprep.mubr.f32.mxu1 %v3015_v36 }
 0x1c6   : > { %967 = vrot.lane.b32.xlu1 %v11877_v55, %s10895_s24  ;;  %2275 = vrot.lane.b32.xlu0 %v12063_v54, %s10895_s24  ;;  %v2854_v55 = vrot.slane %v12111_v52, %v11822_v26  ;;  %v12319_v52 = vpop.permute.xlu1 %2231 }
 0x1c8   : > { %v12298_v4 = vpop.permute.xlu0 %2315  ;;  %v2869_v57 = vmul.f32 %v2854_v55, %v2831_v56 }
 0x1ca   : > { %2285 = vrot.lane.b32.xlu1 %v12082_v1, %s10895_s24  ;;  %2938 = vrot.lane.b32.xlu0 %v12221_v34, %s10895_s24  ;;  %v1480_v1 = vmax.f32 %v1470_v33, %v12008_v18  ;;  %v2816_v18 = vadd.f32 %v11783_v51, %v2794_v27  ;;  %v12331_v3 = vpop.permute.xlu1 %2271 }
 0x1cc   : > { %v12310_v54 = vpop.permute.xlu0 %2237  ;;  %v1502_v6 = vadd.f32 %v11770_v43, %v1480_v1  ;;  %v800_v43 = vmax.f32 %v11797_v30, %v11807_v7  ;;  %v2826_v33 = vmax.f32 %v2816_v18, 0.0 }
 0x1ce   : > { %955 = vrot.lane.b32.xlu1 %v10457_v13, %s10895_s24  ;;  %1672 = vrot.lane.b32.xlu0 %v11938_v21, %s10893_s15  ;;  %v1512_v44 = vmax.f32 %v1502_v6, 0.0  ;;  %v810_v51 = vmax.f32 %v800_v43, %v11814_v25  ;;  %v2864_v30 = vmul.f32 %v2854_v55, %v2826_v33  ;;  %v15157_v25 = vld [vmem:[#allocation18_spill] sm:$0xff]  ;;  %v15159_v55 = vld [vmem:[#allocation15_spill] sm:$0xff] }
 0x1d0   : > { %v12317_v46 = vpop.permute.xlu0 %2323 }
 0x1d2   : > { %953 = vrot.lane.b32.xlu1 %v10458_v29, %s10895_s24  ;;  %2988 = vrot.lane.b32.xlu0 %v2869_v57, %s10893_s15  ;;  %v15158_v29 = vld [vmem:[#allocation11_spill] sm:$0xff] }
 0x1d4   : > { %v12324_v16 = vpop.permute.xlu0 %2279 }
 0x1d6   : > { %2277 = vrot.lane.b32.xlu1 %v12039_v58, %s10895_s24  ;;  %1662 = vrot.lane.b32.xlu0 %v11919_v24, %s10893_s15  ;;  %v1550_v58 = vmul.f32 %v12006_v17, %v1512_v44 }
 0x1d7   : > { %v2322_v13 = vpop.permute.xlu1 %2321 }
 0x1d8   : > { %v12333_v56 = vpop.permute.xlu0 %2239 }
 0x1da   : > { %1674 = vrot.lane.b32.xlu1 %v12016_v8, %s10893_s15  ;;  %2944 = vrot.lane.b32.xlu0 %v2869_v57, %s10895_s24  ;;  %v15156_v57 = vld [vmem:[#allocation13_spill] sm:$0xff] }
 0x1db   : > { %v820_v38 = vmax.f32 %v810_v51, %v15156_v57  ;;  %v15160_v51 = vld [vmem:[#allocation14_spill] sm:$0xff] }
 0x1dc   : > { %v12341_v1 = vpop.permute.xlu0 %2325 }
 0x1dd   : > { %v842_v6 = vadd.f32 %v15158_v29, %v820_v38 }
 0x1de   : > { %1664 = vrot.lane.b32.xlu1 %v1550_v58, %s10893_s15  ;;  %1014 = vrot.lane.b32.xlu0 %v11885_v62, %s10893_s15 }
 0x1df   : > { %v852_v18 = vmax.f32 %v842_v6, 0.0 }
 0x1e0   : > { %v12351_v7 = vpop.permute.xlu1 %2317  ;;  %v12353_v17 = vpop.permute.xlu0 %2281 }
 0x1e1   : > { %v889_v36 = vmul.f32 %v15160_v51, %v852_v18 }
 0x1e2   : > { %2978 = vrot.lane.b32.xlu1 %v2864_v30, %s10893_s15  ;;  %1004 = vrot.lane.b32.xlu0 %v15157_v25, %s10893_s15 }
 0x1e4   : > { %v12359_v27 = vpop.permute.xlu1 %2235  ;;  %v2332_v44 = vpop.permute.xlu0 %2331 }
 0x1e5   : > { %2262 = vst.msk [vmem:[#allocation2 + $0x198] sm:$0xff] %vm898_vm2, %v12359_v27 }
 0x1e6   : > { %1016 = vrot.lane.b32.xlu1 %v15159_v55, %s10893_s15  ;;  %1628 = vrot.lane.b32.xlu0 %v11938_v21, %s10895_s24 }
 0x1e8   : > { %v12367_v43 = vpop.permute.xlu1 %2241  ;;  %v12369_v33 = vpop.permute.xlu0 %2233 }
 0x1ea   : > { %2934 = vrot.lane.b32.xlu1 %v2864_v30, %s10895_s24  ;;  %1618 = vrot.lane.b32.xlu0 %v11919_v24, %s10895_s24  ;;  %v6044_v24 = vld [vmem:[%s15072_s2 + $0x8] sm:$0xff] }
 0x1ec   : > { %v12375_v57 = vpop.permute.xlu1 %2327  ;;  %v12377_v38 = vpop.permute.xlu0 %2273 }
 0x1ee   : > { %1006 = vrot.lane.b32.xlu1 %v889_v36, %s10893_s15  ;;  %969 = vrot.lane.b32.xlu0 %v11885_v62, %s10895_s24 }
 0x1f0   : > { %v12382_v21 = vpop.permute.xlu1 %2283  ;;  %v12384_v29 = vpop.permute.xlu0 %2319 }
 0x1f1   : > { %15161 = vst [vmem:[#allocation13_spill] sm:$0xff] %v12384_v29  ;;  %v2336_v30 = vsel %vm1018_vm3, %v12384_v29, %v2322_v13 }
 0x1f2   : > { %1630 = vrot.lane.b32.xlu1 %v12016_v8, %s10895_s24  ;;  %2352 = vst.msk [vmem:[#allocation2 + $0x398] sm:$0xff] %vm898_vm2, %v2336_v30  ;;  %959 = vrot.lane.b32.xlu0 %v15157_v25, %s10895_s24 }
 0x1f4   : > { %v2244_v62 = vpop.permute.xlu1 %2243  ;;  %v12396_v6 = vpop.permute.xlu0 %2890 }
 0x1f5   : > { %2266 = vst.msk [vmem:[#allocation2 + $0x1b8] sm:$0xff] %vm898_vm2, %v2244_v62 }
 0x1f6   : > { %1620 = vrot.lane.b32.xlu1 %v1550_v58, %s10895_s24  ;;  %6052 = vperm.xlu0 %10455, %v6044_v24   ;;  %v6043_v58 = vld [vmem:[%s15072_s2] sm:$0xff] }
 0x1f8   : > { %v12400_v13 = vpop.permute.xlu1 %2329  ;;  %v12402_v8 = vpop.permute.xlu0 %2930 }
 0x1f9   : > { %15162 = vst [vmem:[#allocation18_spill] sm:$0xff] %v12400_v13  ;;  %v2340_v18 = vsel %vm1018_vm3, %v12400_v13, %v2332_v44 }
 0x1fa   : > { %2356 = vst.msk [vmem:[#allocation2 + $0x3b8] sm:$0xff] %vm898_vm2, %v2340_v18  ;;  %971 = vrot.lane.b32.xlu1 %v15159_v55, %s10895_s24  ;;  %5396 = vperm.xlu0 %10455, %v6044_v24  }
 0x1fc   : > { %v12409_v25 = vpop.permute.xlu1 %2974  ;;  %v12411_v51 = vpop.permute.xlu0 %2976 }
 0x1fd   : > { %15163 = vst [vmem:[#allocation11_spill] sm:$0xff] %v12411_v51 }
 0x1fe   : > { %961 = vrot.lane.b32.xlu1 %v889_v36, %s10895_s24  ;;  %4740 = vperm.xlu0 %10455, %v6044_v24  }
 0x200   : > { %v2893_v30 = vpop.permute.xlu1 %2892  ;;  %v12417_v26 = vpop.permute.xlu0 %2970 }
 0x201   : > { %2919 = vst.msk [vmem:[#allocation2 + $0x1d8] sm:$0xff] %vm898_vm2, %v2893_v30  ;;  %v2904_v47 = vsel %vm928_vm4, %v12396_v6, %v2893_v30 }
 0x202   : > { %6047 = vperm.xlu1 %10456, %v6043_v58   ;;  %4084 = vperm.xlu0 %10455, %v6044_v24  }
 0x204   : > { %v2899_v44 = vpop.permute.xlu1 %2898  ;;  %v12420_v55 = vpop.permute.xlu0 %2972 }
 0x206   : > { %5391 = vperm.xlu1 %10456, %v6043_v58  }
 0x208   : > { %v12422_v18 = vpop.permute.xlu1 %2984  ;;  %v2895_v29 = vpop.permute.xlu0 %2894  ;;  %v3089_v50 = vld [vmem:[#allocation2 + $0x1d8] sm:$0xff] }
 0x20a   : > { %4735 = vperm.xlu1 %10456, %v6043_v58  }
 0x20c   : > { %v12424_v36 = vpop.permute.xlu1 %2940  ;;  %v12426_v13 = vpop.permute.xlu0 %2980 }
 0x20e   : > { %4079 = vperm.xlu1 %10456, %v6043_v58  }
 0x210   : > { %v2901_v31 = vpop.permute.xlu1 %2900  ;;  %v12428_v51 = vpop.permute.xlu0 %2936 }
 0x211   : > { %2923 = vst.msk [vmem:[#allocation2 + $0x1f8] sm:$0xff] %vm898_vm2, %v2901_v31  ;;  %v2907_v58 = vsel %vm928_vm4, %v2899_v44, %v2901_v31  ;;  %v2247_v31 = vsel %vm928_vm4, %v12369_v33, %v12359_v27  ;;  %v2249_v27 = vsel %vm928_vm4, %v12333_v56, %v12367_v43 }
 0x214   : > { %v12431_v24 = vpop.permute.xlu1 %2986  ;;  %v2897_v53 = vpop.permute.xlu0 %2896 }
 0x215   : > { %v2905_v48 = vsel %vm928_vm4, %v2895_v29, %v2897_v53  ;;  %v2906_v20 = vsel %vm928_vm4, %v2897_v53, %v2899_v44  ;;  %v3085_v29 = vld [vmem:[#allocation2 + $0x1b8] sm:$0xff] }
 0x216   : > { %3158 = vmatprep.subr.mxu0 %v2906_v20  ;;  %v3081_v20 = vld [vmem:[#allocation2 + $0x198] sm:$0xff] }
 0x217   : > { %3159 = vmatpush1.msra.mxu0 %v2905_v48  ;;  %v2250_v48 = vsel %vm928_vm4, %v12367_v43, %v2244_v62  ;;  %v3073_v62 = vld [vmem:[#allocation2 + $0x158] sm:$0xff]  ;;  %v2245_v43 = vsel %vm928_vm4, %v12291_v39, %v12319_v52  ;;  %v3067_v39 = vld [vmem:[#allocation2 + $0x128] sm:$0xff] }
 0x218   : > { %v2887_v28 = vpop.permute.xlu1 %2886  ;;  %v3093_v5 = vld [vmem:[#allocation2 + $0x1f8] sm:$0xff]  ;;  %v12435_v42 = vpop.permute.xlu0 %1622 }
 0x219   : > { %3271 = vmatprep.subr.mxu1 %v3093_v5 }
 0x21a   : > { %3272 = vmatpush1.msra.mxu1 %v2907_v58  ;;  %v2248_v58 = vsel %vm928_vm4, %v12310_v54, %v12333_v56  ;;  %v3065_v54 = vld [vmem:[#allocation2 + $0x118] sm:$0xff] }
 0x21b   : > { %3273 = vmatprep.subr.mxu1 %v3089_v50  ;;  %v3077_v50 = vld [vmem:[#allocation2 + $0x178] sm:$0xff] }
 0x21c   : > { %3274 = vmatpush1.msra.mxu1 %v2904_v47  ;;  %v12440_v14 = vpop.permute.xlu1 %2926  ;;  %v12442_v53 = vpop.permute.xlu0 %1616  ;;  %v3061_v56 = vld [vmem:[#allocation2 + $0xf8] sm:$0xff] }
 0x21d   : > { %3275 = vmatprep.subr.mxu1 %v3085_v29 }
 0x21e   : > { %3276 = vmatpush1.msra.mxu1 %v2250_v48 }
 0x21f   : > { %3277 = vmatprep.subr.mxu1 %v3081_v20  ;;  %v3063_v20 = vld [vmem:[#allocation2 + $0x108] sm:$0xff] }
 0x220   : > { %3278 = vmatpush1.msra.mxu1 %v2247_v31  ;;  %v2889_v5 = vpop.permute.xlu1 %2888  ;;  %v12449_v47 = vpop.permute.xlu0 %2932  ;;  %v931_v31 = vsel %vm928_vm4, %v12186_v59, %v12174_v49  ;;  %v1589_v49 = vsel %vm928_vm4, %v12273_v63, %v12223_v60 }
 0x221   : > { %v2902_v30 = vsel %vm928_vm4, %v2887_v28, %v2889_v5  ;;  %v2903_v44 = vsel %vm928_vm4, %v2889_v5, %v12396_v6  ;;  %3279 = vmatprep.subr.mxu1 %v3077_v50  ;;  %v3069_v6 = vld [vmem:[#allocation2 + $0x138] sm:$0xff]  ;;  %v1592_v5 = vsel %vm928_vm4, %v12267_v40, %v12227_v15 }
 0x222   : > { %3280 = vmatpush1.msra.mxu1 %v12180_v23  ;;  %3160 = vmatprep.subr.mxu0 %v2903_v44  ;;  %v2246_v23 = vsel %vm928_vm4, %v12319_v52, %v12369_v33  ;;  %v1593_v33 = vsel %vm928_vm4, %v12227_v15, %v12243_v19  ;;  %v3053_v52 = vld [vmem:[#allocation2 + $0xb8] sm:$0xff]  ;;  %v1588_v15 = vsel %vm928_vm4, %v12247_v45, %v12273_v63  ;;  %v15165_v45 = vld [vmem:[#allocation20_spill] sm:$0xff] }
 0x223   : > { %3281 = vmatprep.subr.mxu1 %v3073_v62  ;;  %3161 = vmatpush1.msra.mxu0 %v2902_v30  ;;  %v3045_v30 = vld [vmem:[#allocation2 + $0x78] sm:$0xff]  ;;  %v3044_v62 = vld [vmem:[#allocation2 + $0x70] sm:$0xff]  ;;  %v930_v63 = vsel %vm928_vm4, %v15165_v45, %v12186_v59  ;;  %v3042_v59 = vld [vmem:[#allocation2 + $0x60] sm:$0xff] }
 0x224   : > { %3282 = vmatpush1.msra.mxu1 %v12137_v61  ;;  %v12462_v28 = vpop.permute.xlu1 %1626  ;;  %v12464_v29 = vpop.permute.xlu0 %965  ;;  %3162 = vmatprep.subr.mxu0 %v2249_v27  ;;  %v3040_v27 = vld [vmem:[#allocation2 + $0x50] sm:$0xff] }
 0x225   : > { %3283 = vmatprep.subr.mxu1 %v3069_v6  ;;  %3163 = vmatpush1.msra.mxu0 %v2248_v58  ;;  %v15164_v58 = vld [vmem:[#allocation21_spill] sm:$0xff] }
 0x226   : > { %3284 = vmatpush1.msra.mxu1 %v12091_v9  ;;  %3164 = vmatprep.subr.mxu0 %v2246_v23  ;;  %v3057_v9 = vld [vmem:[#allocation2 + $0xd8] sm:$0xff] }
 0x227   : > { %3285 = vmatprep.subr.mxu1 %v3065_v54  ;;  %3165 = vmatpush1.msra.mxu0 %v2245_v43  ;;  %v3037_v23 = vld [vmem:[#allocation2 + $0x38] sm:$0xff]  ;;  %v3036_v54 = vld [vmem:[#allocation2 + $0x30] sm:$0xff] }
 0x228   : > { %3286 = vmatpush1.msra.mxu1 %v12058_v12  ;;  %v12474_v61 = vpop.permute.xlu1 %2928  ;;  %v12476_v48 = vpop.permute.xlu0 %963  ;;  %3166 = vmatprep.subr.mxu0 %v12221_v34  ;;  %v1590_v12 = vsel %vm928_vm4, %v12223_v60, %v12215_v35  ;;  %v3049_v35 = vld [vmem:[#allocation2 + $0x98] sm:$0xff]  ;;  %v932_v60 = vsel %vm928_vm4, %v15164_v58, %v12160_v2 }
 0x229   : > { %3287 = vmatprep.subr.mxu1 %v3061_v56  ;;  %3167 = vmatpush1.msra.mxu0 %v12194_v0  ;;  %v3066_v0 = vld [vmem:[#allocation2 + $0x120] sm:$0xff] }
 0x22a   : > { %3288 = vmatpush1.msra.mxu1 %v1593_v33  ;;  %3168 = vmatprep.subr.mxu0 %v12184_v37  ;;  %v934_v37 = vsel %vm928_vm4, %v12211_v11, %v12198_v22  ;;  %v1591_v22 = vsel %vm928_vm4, %v12253_v32, %v12267_v40  ;;  %v3041_v32 = vld [vmem:[#allocation2 + $0x58] sm:$0xff]  ;;  %v933_v40 = vsel %vm928_vm4, %v12160_v2, %v12211_v11  ;;  %v3032_v2 = vld [vmem:[#allocation2 + $0x10] sm:$0xff] }
 0x22b   : > { %3289 = vmatprep.subr.mxu1 %v3057_v9  ;;  %3169 = vmatpush1.msra.mxu0 %v12169_v41  ;;  %v3062_v41 = vld [vmem:[#allocation2 + $0x100] sm:$0xff]  ;;  %v3033_v33 = vld [vmem:[#allocation2 + $0x18] sm:$0xff]  ;;  %v3043_v9 = vld [vmem:[#allocation2 + $0x68] sm:$0xff] }
 0x22c   : > { %3290 = vmatpush1.msra.mxu1 %v1590_v12  ;;  %v12488_v34 = vpop.permute.xlu1 %2942  ;;  %v12490_v19 = vpop.permute.xlu0 %2287  ;;  %3170 = vmatprep.subr.mxu0 %v3067_v39  ;;  %v15166_v11 = vld [vmem:[#allocation19_spill] sm:$0xff] }
 0x22d   : > { %3291 = vmatprep.subr.mxu1 %v3053_v52  ;;  %3171 = vmatpush1.msra.mxu0 %v3066_v0  ;;  %v929_v56 = vsel %vm928_vm4, %v15166_v11, %v15165_v45  ;;  %v3039_v52 = vld [vmem:[#allocation2 + $0x48] sm:$0xff]  ;;  %v3038_v0 = vld [vmem:[#allocation2 + $0x40] sm:$0xff]  ;;  %v2947_v45 = vsel %vm973_vm5, %v12474_v61, %v12402_v8 }
 0x22e   : > { %3292 = vmatpush1.msra.mxu1 %v934_v37  ;;  %3172 = vmatprep.subr.mxu0 %v3063_v20  ;;  %v3035_v37 = vld [vmem:[#allocation2 + $0x28] sm:$0xff] }
 0x22f   : > { %3293 = vmatprep.subr.mxu1 %v3049_v35  ;;  %3173 = vmatpush1.msra.mxu0 %v3062_v41  ;;  %v3034_v41 = vld [vmem:[#allocation2 + $0x20] sm:$0xff] }
 0x230   : > { %3294 = vmatpush1.msra.mxu1 %v931_v31  ;;  %v12504_v50 = vpop.permute.xlu1 %1614  ;;  %v12506_v44 = vpop.permute.xlu0 %957  ;;  %3174 = vmatprep.subr.mxu0 %v1592_v5  ;;  %v3031_v5 = vld [vmem:[#allocation2 + $0x8] sm:$0xff] }
 0x231   : > { %3295 = vmatprep.subr.mxu1 %v3045_v30  ;;  %3175 = vmatpush1.msra.mxu0 %v1591_v22  ;;  %v3030_v22 = vld [vmem:[#allocation2] sm:$0xff] }
 0x232   : > { %3296 = vmatpush1.msra.mxu1 %v3044_v62  ;;  %3176 = vmatprep.subr.mxu0 %v1589_v49 }
 0x233   : > { %3297 = vmatprep.subr.mxu1 %v3041_v32  ;;  %3177 = vmatpush1.msra.mxu0 %v1588_v15  ;;  %v2990_v32 = vsel %vm1018_vm3, %v12417_v26, %v12420_v55 }
 0x234   : > { %v12520_v6 = vpop.permute.xlu1 %1612  ;;  %3298 = vmatpush1.msra.mxu1 %v3040_v27  ;;  %v2983_v43 = vpop.permute.xlu0 %2982  ;;  %3178 = vmatprep.subr.mxu0 %v933_v40  ;;  %v2338_v40 = vsel %vm1018_vm3, %v12341_v1, %v12375_v57 }
 0x235   : > { %3299 = vmatprep.subr.mxu1 %v3037_v23  ;;  %3179 = vmatpush1.msra.mxu0 %v932_v60  ;;  %v2995_v30 = vsel %vm1018_vm3, %v2983_v43, %v12422_v18  ;;  %v2994_v49 = vsel %vm1018_vm3, %v12426_v13, %v2983_v43  ;;  %v2337_v13 = vsel %vm1018_vm3, %v12317_v46, %v12341_v1 }
 0x236   : > { %3300 = vmatpush1.msra.mxu1 %v3036_v54  ;;  %3180 = vmatprep.subr.mxu0 %v930_v63  ;;  %v2334_v60 = vsel %vm1018_vm3, %v12298_v4, %v12351_v7  ;;  %v2293_v63 = vsel %vm973_vm5, %v12324_v16, %v12353_v17  ;;  %v2996_v16 = vsel %vm1018_vm3, %v12422_v18, %v12431_v24  ;;  %v15172_v18 = vld [vmem:[#allocation32_spill] sm:$0xff] }
 0x237   : > { %3301 = vmatprep.subr.mxu1 %v3033_v33  ;;  %3181 = vmatpush1.msra.mxu0 %v929_v56  ;;  %v2290_v56 = vsel %vm973_vm5, %v12331_v3, %v12377_v38 }
 0x238   : > { %v12528_v12 = vpop.permute.xlu1 %967  ;;  %3302 = vmatpush1.msra.mxu1 %v3032_v2  ;;  %v12530_v39 = vpop.permute.xlu0 %2275  ;;  %3182 = vmatprep.subr.mxu0 %v3043_v9  ;;  %v15167_v2 = vld [vmem:[#allocation33_spill] sm:$0xff] }
 0x239   : > { %3183 = vmatpush1.msra.mxu0 %v3042_v59  ;;  %v2289_v9 = vsel %vm973_vm5, %v15167_v2, %v12331_v3  ;;  %v15169_v59 = vld [vmem:[#allocation30_spill] sm:$0xff] }
 0x23a   : > { %3184 = vmatprep.subr.mxu0 %v3039_v52  ;;  %v12676_v2 = vld [vmem:[%s15074_s4 + $0x18] sm:$0xff] }
 0x23b   : > { %3185 = vmatpush1.msra.mxu0 %v3038_v0  ;;  %v15170_v0 = vld [vmem:[#allocation28_spill] sm:$0xff] }
 0x23c   : > { %v12532_v20 = vpop.permute.xlu1 %2285  ;;  %v2939_v35 = vpop.permute.xlu0 %2938  ;;  %3186 = vmatprep.subr.mxu0 %v3035_v37  ;;  %v1680_v3 = vsel %vm1018_vm3, %v15170_v0, %v15169_v59  ;;  %v3145_v0 = vld [vmem:[#allocation2 + $0x398] sm:$0xff] }
 0x23d   : > { %v2296_v31 = vsel %vm973_vm5, %v12532_v20, %v12490_v19  ;;  %3187 = vmatpush1.msra.mxu0 %v3034_v41  ;;  %v2991_v19 = vsel %vm1018_vm3, %v12420_v55, %v12409_v25  ;;  %v2333_v55 = vsel %vm1018_vm3, %v12289_v10, %v12298_v4  ;;  %v2951_v46 = vsel %vm973_vm5, %v2939_v35, %v12424_v36 }
 0x23e   : > { %2312 = vst.msk [vmem:[#allocation2 + $0x338] sm:$0xff] %vm898_vm2, %v2296_v31  ;;  %3188 = vmatprep.subr.mxu0 %v3031_v5  ;;  %v2950_v1 = vsel %vm973_vm5, %v12428_v51, %v2939_v35  ;;  %v2946_v4 = vsel %vm973_vm5, %v12440_v14, %v12474_v61  ;;  %v2294_v51 = vsel %vm973_vm5, %v12353_v17, %v12382_v21  ;;  %v15168_v17 = vld [vmem:[#allocation26_spill] sm:$0xff]  ;;  %v15171_v35 = vld [vmem:[#allocation27_spill] sm:$0xff]  ;;  %v15173_v31 = vld [vmem:[#allocation29_spill] sm:$0xff] }
 0x23f   : > { %3189 = vmatpush1.msra.mxu0 %v3030_v22  ;;  %v1681_v52 = vsel %vm1018_vm3, %v15169_v59, %v15168_v17  ;;  %v1676_v5 = vsel %vm1018_vm3, %v15173_v31, %v15172_v18  ;;  %v9346_v59 = vld [vmem:[%s15070_s0 + $0x208] sm:$0x1] }
 0x240   : > { %v12542_v62 = vpop.permute.xlu1 %955  ;;  %v12544_v15 = vpop.permute.xlu0 %1672  ;;  %3190 = vmatprep.subr.mxu0 %v2995_v30  ;;  %v15174_v30 = vld [vmem:[#allocation24_spill] sm:$0xff] }
 0x241   : > { %3191 = vmatpush2.msra.mxu0 %v2994_v49  ;;  %v15175_v49 = vld [vmem:[#allocation23_spill] sm:$0xff] }
 0x242   : > { %3192 = vmatprep.subr.mxu0 %v2991_v19  ;;  %v1024_v19 = vsel %vm1018_vm3, %v15175_v49, %v15174_v30  ;;  %v12721_v49 = vld [vmem:[%s15070_s0 + $0x1e0] sm:$0xff] }
 0x243   : > { %3193 = vmatpush2.msra.mxu0 %v2990_v32 }
 0x244   : > { %v12558_v27 = vpop.permute.xlu1 %953  ;;  %v2989_v58 = vpop.permute.xlu0 %2988  ;;  %3194 = vmatprep.subr.mxu0 %v2338_v40  ;;  %v3114_v40 = vld [vmem:[#allocation2 + $0x2a0] sm:$0xff] }
 0x245   : > { %v2997_v26 = vsel %vm1018_vm3, %v12431_v24, %v2989_v58  ;;  %3195 = vmatpush2.msra.mxu0 %v2337_v13  ;;  %v1677_v24 = vsel %vm1018_vm3, %v15172_v18, %v15171_v35  ;;  %v15176_v13 = vld [vmem:[#allocation25_spill] sm:$0xff]  ;;  %v15177_v58 = vld [vmem:[#allocation22_spill] sm:$0xff] }
 0x246   : > { %3013 = vst.msk [vmem:[#allocation2 + $0x3f8] sm:$0xff] %vm898_vm2, %v2997_v26  ;;  %3196 = vmatprep.subr.mxu0 %v2334_v60  ;;  %v1020_v60 = vsel %vm1018_vm3, %v15177_v58, %v15176_v13  ;;  %v15178_v26 = vld [vmem:[#allocation11_spill] sm:$0xff]  ;;  %v12703_v18 = vld [vmem:[%s15074_s4 + $0x28] sm:$0xff] }
 0x247   : > { %3197 = vmatpush2.msra.mxu0 %v2333_v55  ;;  %v3133_v58 = vld [vmem:[#allocation2 + $0x338] sm:$0xff] }
 0x248   : > { %v2278_v23 = vpop.permute.xlu1 %2277  ;;  %v12573_v43 = vpop.permute.xlu0 %1662  ;;  %3198 = vmatprep.subr.mxu0 %v2951_v46  ;;  %v3110_v46 = vld [vmem:[#allocation2 + $0x280] sm:$0xff] }
 0x249   : > { %v2292_v10 = vsel %vm973_vm5, %v12530_v39, %v2278_v23  ;;  %3199 = vmatpush2.msra.mxu0 %v2950_v1  ;;  %v15179_v1 = vld [vmem:[#allocation31_spill] sm:$0xff] }
 0x24a   : > { %2308 = vst.msk [vmem:[#allocation2 + $0x318] sm:$0xff] %vm898_vm2, %v2292_v10  ;;  %3200 = vmatprep.subr.mxu0 %v2947_v45  ;;  %v1637_v23 = vsel %vm973_vm5, %v15179_v1, %v12462_v28  ;;  %v1636_v45 = vsel %vm973_vm5, %v12435_v42, %v15179_v1  ;;  %v979_v42 = vsel %vm973_vm5, %v12464_v29, %v12528_v12 }
 0x24b   : > { %3201 = vmatpush2.msra.mxu0 %v2946_v4 }
 0x24c   : > { %v1675_v54 = vpop.permute.xlu1 %1674  ;;  %v2945_v11 = vpop.permute.xlu0 %2944  ;;  %3202 = vmatprep.subr.mxu0 %v2294_v51  ;;  %v1633_v51 = vsel %vm973_vm5, %v12504_v50, %v12442_v53 }
 0x24d   : > { %v1683_v14 = vsel %vm1018_vm3, %v12544_v15, %v1675_v54  ;;  %v2953_v61 = vsel %vm973_vm5, %v12488_v34, %v2945_v11  ;;  %v3157_v33 = vld [vmem:[#allocation2 + $0x3f8] sm:$0xff]  ;;  %3203 = vmatpush2.msra.mxu0 %v2293_v63  ;;  %v1632_v54 = vsel %vm973_vm5, %v12520_v6, %v12504_v50  ;;  %v978_v11 = vsel %vm973_vm5, %v12476_v48, %v12464_v29 }
 0x24e   : > { %1699 = vst.msk [vmem:[#allocation2 + $0x2f8] sm:$0xff] %vm898_vm2, %v1683_v14  ;;  %2969 = vst.msk [vmem:[#allocation2 + $0x378] sm:$0xff] %vm898_vm2, %v2953_v61  ;;  %3303 = vmatprep.subr.mxu1 %v3157_v33  ;;  %3204 = vmatprep.subr.mxu0 %v2290_v56  ;;  %v975_v14 = vsel %vm973_vm5, %v12542_v62, %v12506_v44  ;;  %v12662_v61 = vld [vmem:[%s15074_s4] sm:$0xff]  ;;  %v2992_v29 = vsel %vm1018_vm3, %v12409_v25, %v15178_v26  ;;  %v9347_v25 = vld [vmem:[%s15070_s0 + $0x210] sm:$0x1] }
 0x24f   : > { %3304 = vmatpush2.msra.mxu1 %v2996_v16  ;;  %3205 = vmatpush2.msra.mxu0 %v2289_v9  ;;  %v974_v48 = vsel %vm973_vm5, %v12558_v27, %v12542_v62  ;;  %v3149_v9 = vld [vmem:[#allocation2 + $0x3b8] sm:$0xff] }
 0x250   : > { %v1665_v37 = vpop.permute.xlu1 %1664  ;;  %3206 = vmatprep.subr.mxu0 %v1681_v52  ;;  %v12620_v22 = vpop.permute.xlu0 %1014  ;;  %v15180_v16 = vld [vmem:[#allocation18_spill] sm:$0xff] }
 0x251   : > { %v1679_v41 = vsel %vm1018_vm3, %v12573_v43, %v1665_v37  ;;  %3207 = vmatpush2.msra.mxu0 %v1680_v3  ;;  %v2339_v62 = vsel %vm1018_vm3, %v12375_v57, %v15180_v16  ;;  %v12694_v3 = vld [vmem:[%s15074_s4 + $0x10] sm:$0xff] }
 0x252   : > { %1695 = vst.msk [vmem:[#allocation2 + $0x2d8] sm:$0xff] %vm898_vm2, %v1679_v41  ;;  %3208 = vmatprep.subr.mxu0 %v1677_v24  ;;  %v15181_v57 = vld [vmem:[#allocation13_spill] sm:$0xff] }
 0x253   : > { %3209 = vmatpush2.msra.mxu0 %v1676_v5  ;;  %v2335_v37 = vsel %vm1018_vm3, %v12351_v7, %v15181_v57  ;;  %v12710_v41 = vld [vmem:[%s15070_s0 + $0x1e8] sm:$0xff]  ;;  %v2952_v7 = vsel %vm973_vm5, %v12424_v36, %v12488_v34  ;;  %v12729_v36 = vld [vmem:[%s15074_s4 + $0x20] sm:$0xff]  ;;  %v2948_v34 = vsel %vm973_vm5, %v12402_v8, %v12449_v47  ;;  %v2295_v8 = vsel %vm973_vm5, %v12382_v21, %v12532_v20  ;;  %v12762_v21 = vld [vmem:[%s15074_s4 + $0x30] sm:$0xff] }
 0x254   : > { %v2979_v32 = vpop.permute.xlu1 %2978  ;;  %3210 = vmatprep.subr.mxu0 %v1024_v19  ;;  %v12637_v10 = vpop.permute.xlu0 %1004  ;;  %v2291_v20 = vsel %vm973_vm5, %v12377_v38, %v12530_v39  ;;  %v12780_v38 = vld [vmem:[%s15070_s0 + $0x198] sm:$0xff]  ;;  %v1682_v39 = vsel %vm1018_vm3, %v15168_v17, %v12544_v15  ;;  %v12797_v15 = vld [vmem:[%s15074_s4 + $0x40] sm:$0xff]  ;;  %v1678_v17 = vsel %vm1018_vm3, %v15171_v35, %v12573_v43  ;;  %v1025_v43 = vsel %vm1018_vm3, %v15174_v30, %v12620_v22 }
 0x255   : > { %v2993_v55 = vsel %vm1018_vm3, %v15178_v26, %v2979_v32  ;;  %3211 = vmatpush2.msra.mxu0 %v3114_v40  ;;  %v3141_v24 = vld [vmem:[#allocation2 + $0x378] sm:$0xff]  ;;  %v1021_v30 = vsel %vm1018_vm3, %v15176_v13, %v12637_v10  ;;  %v9349_v57 = vld [vmem:[%s15070_s0 + $0x220] sm:$0x1] }
 0x256   : > { %3009 = vst.msk [vmem:[#allocation2 + $0x3d8] sm:$0xff] %vm898_vm2, %v2993_v55  ;;  %3212 = vmatprep.subr.mxu0 %v1020_v60  ;;  %v12738_v40 = vld [vmem:[%s15074_s4 + $0x38] sm:$0xff]  ;;  %v12745_v60 = vld [vmem:[%s15070_s0 + $0x1c0] sm:$0xff] }
 0x257   : > { %3213 = vmatpush2.msra.mxu0 %v3110_v46  ;;  %v12754_v26 = vld [vmem:[%s15070_s0 + $0x1b8] sm:$0xff] }
 0x258   : > { %v1017_v4 = vpop.permute.xlu1 %1016  ;;  %3214 = vmatprep.subr.mxu0 %v1637_v23  ;;  %v12670_v33 = vpop.permute.xlu0 %1628  ;;  %v3129_v46 = vld [vmem:[#allocation2 + $0x318] sm:$0xff]  ;;  %v12773_v23 = vld [vmem:[%s15074_s4 + $0x48] sm:$0xff] }
 0x259   : > { %v1026_v63 = vsel %vm1018_vm3, %v12620_v22, %v1017_v4  ;;  %3215 = vmatpush2.msra.mxu0 %v1636_v45  ;;  %v3125_v45 = vld [vmem:[#allocation2 + $0x2f8] sm:$0xff]  ;;  %v12829_v22 = vld [vmem:[%s15074_s4 + $0x50] sm:$0xff]  ;;  %v1638_v13 = vsel %vm973_vm5, %v12462_v28, %v12670_v33 }
 0x25a   : > { %1042 = vst.msk [vmem:[#allocation2 + $0x2b8] sm:$0xff] %vm898_vm2, %v1026_v63  ;;  %3216 = vmatprep.subr.mxu0 %v1633_v51  ;;  %v12789_v51 = vld [vmem:[%s15070_s0 + $0x190] sm:$0xff] }
 0x25b   : > { %3217 = vmatpush2.msra.mxu0 %v1632_v54  ;;  %v3121_v54 = vld [vmem:[#allocation2 + $0x2d8] sm:$0xff] }
 0x25c   : > { %v2935_v56 = vpop.permute.xlu1 %2934  ;;  %3218 = vmatprep.subr.mxu0 %v979_v42  ;;  %v12715_v31 = vpop.permute.xlu0 %1618  ;;  %v12806_v42 = vld [vmem:[%s15074_s4 + $0x58] sm:$0xff] }
 0x25d   : > { %v2949_v50 = vsel %vm973_vm5, %v12449_v47, %v2935_v56  ;;  %v3153_v6 = vld [vmem:[#allocation2 + $0x3d8] sm:$0xff]  ;;  %3219 = vmatpush2.msra.mxu0 %v978_v11  ;;  %v12813_v56 = vld [vmem:[%s15070_s0 + $0x170] sm:$0xff]  ;;  %v1634_v28 = vsel %vm973_vm5, %v12442_v53, %v12715_v31 }
 0x25e   : > { %2965 = vst.msk [vmem:[#allocation2 + $0x358] sm:$0xff] %vm898_vm2, %v2949_v50  ;;  %3305 = vmatprep.subr.mxu1 %v3153_v6  ;;  %3220 = vmatprep.subr.mxu0 %v975_v14  ;;  %v12822_v50 = vld [vmem:[%s15070_s0 + $0x168] sm:$0xff] }
 0x25f   : > { %3306 = vmatpush2.msra.mxu1 %v2992_v29  ;;  %3221 = vmatpush2.msra.mxu0 %v974_v48  ;;  %v12838_v48 = vld [vmem:[%s15074_s4 + $0x68] sm:$0xff] }
 0x260   : > { %3307 = vmatprep.subr.mxu1 %v3149_v9  ;;  %v1007_v27 = vpop.permute.xlu1 %1006  ;;  %3223 = vmatmul.mubr.f32.vlgmr.msra.gmra.mxu0 %v12662_v61  ;;  %v12767_v1 = vpop.permute.xlu0 %969 }
 0x261   : > { %v1022_v52 = vsel %vm1018_vm3, %v12637_v10, %v1007_v27  ;;  %3308 = vmatpush2.msra.mxu1 %v2339_v62  ;;  %3228 = vmatprep.mubr.f32.mxu0 %v12676_v2  ;;  %v3117_v11 = vld [vmem:[#allocation2 + $0x2b8] sm:$0xff]  ;;  %v12854_v10 = vld [vmem:[%s15070_s0 + $0x140] sm:$0xff]  ;;  %v980_v53 = vsel %vm973_vm5, %v12528_v12, %v12767_v1 }
 0x262   : > { %1038 = vst.msk [vmem:[#allocation2 + $0x298] sm:$0xff] %vm898_vm2, %v1022_v52  ;;  %3309 = vmatprep.subr.mxu1 %v3145_v0  ;;  %9351 = vmatprep.subr.msk.mxu0 %vm449_vm0, %v9347_v25  ;;  %v12845_v25 = vld [vmem:[%s15070_s0 + $0x148] sm:$0xff]  ;;  %v12860_v62 = vld [vmem:[%s15074_s4 + $0x60] sm:$0xff]  ;;  %v12884_v52 = vld [vmem:[%s15070_s0 + $0x118] sm:$0xff] }
 0x263   : > { %3310 = vmatpush2.msra.mxu1 %v2335_v37  ;;  %9352 = vmatpush1.msk.msra.mxu0 %vm449_vm0, %v9346_v59  ;;  %v12875_v59 = vld [vmem:[%s15070_s0 + $0x120] sm:$0xff]  ;;  %v9348_v12 = vld [vmem:[%s15070_s0 + $0x218] sm:$0x1] }
 0x264   : > { %3311 = vmatprep.subr.mxu1 %v3141_v24  ;;  %v1631_v5 = vpop.permute.xlu1 %1630  ;;  %3229 = vmatmul.mubr.f32.gmra.mxu0 %v12694_v3  ;;  %v960_v35 = vpop.permute.xlu0 %959  ;;  %v12899_v24 = vld [vmem:[%s15070_s0 + $0x1f8] sm:$0xff] }
 0x265   : > { %v1639_v19 = vsel %vm973_vm5, %v12670_v33, %v1631_v5  ;;  %3312 = vmatpush2.msra.mxu1 %v2952_v7  ;;  %v3137_v32 = vld [vmem:[#allocation2 + $0x358] sm:$0xff]  ;;  %3234 = vmatprep.mubr.f32.mxu0 %v12703_v18  ;;  %v976_v37 = vsel %vm973_vm5, %v12506_v44, %v960_v35  ;;  %v12904_v7 = vld [vmem:[%s15074_s4 + $0x70] sm:$0xff]  ;;  %v15182_v5 = vmov 0.0  }
 0x266   : > { %1655 = vst.msk [vmem:[#allocation2 + $0x278] sm:$0xff] %vm898_vm2, %v1639_v19  ;;  %3313 = vmatprep.subr.mxu1 %v3137_v32  ;;  %3734 = vmatprep.subr.mxu0 %v12710_v41  ;;  %v12868_v33 = vld [vmem:[%s15074_s4 + $0x78] sm:$0xff]  ;;  %v12912_v44 = vld [vmem:[%s15070_s0 + $0x1f0] sm:$0xff]  ;;  %v12938_v19 = vld [vmem:[%s15070_s0 + $0x1a8] sm:$0xff] }
 0x267   : > { %3314 = vmatpush2.msra.mxu1 %v2948_v34  ;;  %3735 = vmatpush1.msra.mxu0 %v12721_v49  ;;  %v12945_v32 = vld [vmem:[%s15070_s0 + $0x1a0] sm:$0xff] }
 0x268   : > { %3315 = vmatprep.subr.mxu1 %v3133_v58  ;;  %v1621_v47 = vpop.permute.xlu1 %1620  ;;  %3235 = vmatmul.mubr.f32.gmra.mxu0 %v12729_v36  ;;  %v12952_v34 = vld [vmem:[%s15070_s0 + $0x180] sm:$0xff]  ;;  %v12972_v58 = vld [vmem:[%s15070_s0 + $0x158] sm:$0xff] }
 0x269   : > { %v1635_v55 = vsel %vm973_vm5, %v12715_v31, %v1621_v47  ;;  %3316 = vmatpush2.msra.mxu1 %v2295_v8  ;;  %3240 = vmatprep.mubr.f32.mxu0 %v12738_v40  ;;  %v3113_v29 = vld [vmem:[#allocation2 + $0x298] sm:$0xff]  ;;  %v12919_v31 = vld [vmem:[%s15070_s0 + $0x1d0] sm:$0xff] }
 0x26a   : > { %1651 = vst.msk [vmem:[#allocation2 + $0x258] sm:$0xff] %vm898_vm2, %v1635_v55  ;;  %3317 = vmatprep.subr.mxu1 %v3129_v46  ;;  %3736 = vmatprep.subr.mxu0 %v12745_v60  ;;  %v12979_v8 = vld [vmem:[%s15070_s0 + $0x150] sm:$0xff]  ;;  %v9350_v55 = vld [vmem:[%s15070_s0 + $0x228] sm:$0x1]  ;;  %v13013_v46 = vld [vmem:[%s15070_s0 + $0x200] sm:$0xff] }
 0x26b   : > { %3318 = vmatpush2.msra.mxu1 %v2291_v20  ;;  %3737 = vmatpush1.msra.mxu0 %v12754_v26  ;;  %v12986_v47 = vld [vmem:[%s15070_s0 + $0x130] sm:$0xff]  ;;  %v13025_v20 = vld [vmem:[%s15071_s1 + $0x18] sm:$0xff] }
 0x26c   : > { %3319 = vmatprep.subr.mxu1 %v3125_v45  ;;  %v972_v4 = vpop.permute.xlu1 %971  ;;  %3241 = vmatmul.mubr.f32.gmra.mxu0 %v12762_v21  ;;  %v13049_v45 = vld [vmem:[%s15070_s0 + $0x1b0] sm:$0xff] }
 0x26d   : > { %v981_v63 = vsel %vm973_vm5, %v12767_v1, %v972_v4  ;;  %3320 = vmatpush2.msra.mxu1 %v1682_v39  ;;  %3246 = vmatprep.mubr.f32.mxu0 %v12773_v23  ;;  %v3109_v9 = vld [vmem:[#allocation2 + $0x278] sm:$0xff]  ;;  %v13058_v39 = vld [vmem:[%s15070_s0 + $0x188] sm:$0xff] }
 0x26e   : > { %997 = vst.msk [vmem:[#allocation2 + $0x238] sm:$0xff] %vm898_vm2, %v981_v63  ;;  %3321 = vmatprep.subr.mxu1 %v3121_v54  ;;  %3738 = vmatprep.subr.mxu0 %v12780_v38  ;;  %v13035_v1 = vld [vmem:[%s15070_s0 + $0x1d8] sm:$0xff]  ;;  %v13067_v4 = vld [vmem:[%s15071_s1 + $0x28] sm:$0xff]  ;;  %v13073_v63 = vld [vmem:[%s15070_s0 + $0x160] sm:$0xff] }
 0x26f   : > { %3322 = vmatpush2.msra.mxu1 %v1678_v17  ;;  %3739 = vmatpush1.msra.mxu0 %v12789_v51  ;;  %v13082_v54 = vld [vmem:[%s15070_s0 + $0x138] sm:$0xff]  ;;  %v9411_v17 = vld [vmem:[%s15070_s0 + $0x210] sm:$0x1] }
 0x270   : > { %3323 = vmatprep.subr.mxu1 %v3117_v11  ;;  %v962_v14 = vpop.permute.xlu1 %961  ;;  %3247 = vmatmul.mubr.f32.gmra.mxu0 %v12797_v15  ;;  %v3638_v11 = vld [vmem:[%s15071_s1 + $0x38] sm:$0xff] }
 0x271   : > { %v977_v6 = vsel %vm973_vm5, %v960_v35, %v962_v14  ;;  %3324 = vmatpush2.msra.mxu1 %v1025_v43  ;;  %3252 = vmatprep.mubr.f32.mxu0 %v12806_v42  ;;  %v3105_v16 = vld [vmem:[#allocation2 + $0x258] sm:$0xff]  ;;  %v9410_v43 = vld [vmem:[%s15070_s0 + $0x208] sm:$0x1]  ;;  %v13169_v35 = vld [vmem:[%s15071_s1 + $0x40] sm:$0xff] }
 0x272   : > { %993 = vst.msk [vmem:[#allocation2 + $0x218] sm:$0xff] %vm898_vm2, %v977_v6  ;;  %3325 = vmatprep.subr.mxu1 %v3113_v29  ;;  %3740 = vmatprep.subr.mxu0 %v12813_v56  ;;  %v9476_v14 = vld [vmem:[%s15070_s0 + $0x210] sm:$0x1]  ;;  %v9414_v6 = vld [vmem:[%s15070_s0 + $0x228] sm:$0x1] }
 0x273   : > { %3326 = vmatpush2.msra.mxu1 %v1021_v30  ;;  %3741 = vmatpush1.msra.mxu0 %v12822_v50  ;;  %v13189_v29 = vld [vmem:[%s15071_s1 + $0x48] sm:$0xff] }
 0x274   : > { %3327 = vmatprep.subr.mxu1 %v3109_v9  ;;  %3253 = vmatmul.mubr.f32.gmra.mxu0 %v12829_v22  ;;  %v9475_v30 = vld [vmem:[%s15070_s0 + $0x208] sm:$0x1]  ;;  %v4292_v9 = vld [vmem:[%s15071_s1 + $0x60] sm:$0xff] }
 0x275   : > { %3328 = vmatpush2.msra.mxu1 %v1638_v13  ;;  %3258 = vmatprep.mubr.f32.mxu0 %v12838_v48  ;;  %v3101_v27 = vld [vmem:[#allocation2 + $0x238] sm:$0xff]  ;;  %v4293_v13 = vld [vmem:[%s15071_s1 + $0x68] sm:$0xff] }
 0x276   : > { %3329 = vmatprep.subr.mxu1 %v3105_v16  ;;  %3742 = vmatprep.subr.mxu0 %v12845_v25  ;;  %v4294_v16 = vld [vmem:[%s15071_s1 + $0x70] sm:$0xff] }
 0x277   : > { %3330 = vmatpush2.msra.mxu1 %v1634_v28  ;;  %3743 = vmatpush1.msra.mxu0 %v12854_v10  ;;  %v9478_v28 = vld [vmem:[%s15070_s0 + $0x220] sm:$0x1] }
 0x278   : > { %3331 = vmatprep.subr.mxu1 %v3101_v27  ;;  %3259 = vmatmul.mubr.f32.gmra.mxu0 %v12860_v62  ;;  %v9479_v27 = vld [vmem:[%s15070_s0 + $0x228] sm:$0x1] }
 0x279   : > { %3332 = vmatpush2.msra.mxu1 %v980_v53  ;;  %v3097_v0 = vld [vmem:[#allocation2 + $0x218] sm:$0xff]  ;;  %3264 = vmatprep.mubr.f32.mxu0 %v12868_v33  ;;  %v13302_v53 = vld [vmem:[%s15071_s1 + $0x80] sm:$0xff] }
 0x27a   : > { %3333 = vmatprep.subr.mxu1 %v3097_v0  ;;  %3744 = vmatprep.subr.mxu0 %v12875_v59  ;;  %v13315_v0 = vld [vmem:[%s15071_s1 + $0x88] sm:$0xff] }
 0x27b   : > { %3334 = vmatpush2.msra.mxu1 %v976_v37  ;;  %3745 = vmatpush1.msra.mxu0 %v12884_v52  ;;  %v4947_v37 = vld [vmem:[%s15071_s1 + $0x98] sm:$0xff] }
 0x27c   : > { %3336 = vmatmul.mubr.f32.vlgmr.msra.gmra.mxu1 %v12662_v61  ;;  %9361 = vmatprep.subr.msk.mxu1 %vm449_vm0, %v9349_v57  ;;  %v12926_v61 = vld [vmem:[%s15070_s0 + $0x1c8] sm:$0xff]  ;;  %v13330_v57 = vld [vmem:[%s15071_s1 + $0x90] sm:$0xff] }
 0x27d   : > { %9362 = vmatpush1.msk.msra.mxu1 %vm449_vm0, %v9348_v12  ;;  %3341 = vmatprep.mubr.f32.mxu1 %v12676_v2  ;;  %v12933_v2 = vld [vmem:[%s15071_s1] sm:$0xff]  ;;  %v9541_v12 = vld [vmem:[%s15070_s0 + $0x210] sm:$0x1] }
 0x27e   : > { %3847 = vmatprep.subr.mxu1 %v12899_v24  ;;  %3265 = vmatmul.mubr.f32.gmra.mxu0 %v12904_v7 }
 0x27f   : > { %3848 = vmatpush1.msra.mxu1 %v12912_v44  ;;  %3778 = vmatprep.mubr.f32.mxu0 %v15182_v5 }
 0x280   : > { %3342 = vmatmul.mubr.f32.gmra.mxu1 %v12694_v3  ;;  %3849 = vmatprep.subr.mxu1 %v12919_v31  ;;  %v12960_v3 = vld [vmem:[%s15070_s0 + $0x178] sm:$0xff] }
 0x281   : > { %3347 = vmatprep.mubr.f32.mxu1 %v12703_v18  ;;  %3850 = vmatpush1.msra.mxu1 %v12926_v61  ;;  %v12967_v18 = vld [vmem:[%s15071_s1 + $0x8] sm:$0xff] }
 0x282   : > { %9353 = vmatmul.mubr.msk.f32.vlgmr.msra.gmra.mxu0 %vm424_vm1, %v12933_v2  ;;  %3851 = vmatprep.subr.mxu1 %v12938_v19 }
 0x283   : > { %3784 = vmatprep.mubr.f32.mxu0 %v15182_v5  ;;  %3852 = vmatpush1.msra.mxu1 %v12945_v32 }
 0x284   : > { %3348 = vmatmul.mubr.f32.gmra.mxu1 %v12729_v36  ;;  %3853 = vmatprep.subr.mxu1 %v12952_v34  ;;  %v12994_v36 = vld [vmem:[%s15070_s0 + $0x128] sm:$0xff] }
 0x285   : > { %3353 = vmatprep.mubr.f32.mxu1 %v12738_v40  ;;  %3854 = vmatpush1.msra.mxu1 %v12960_v3  ;;  %v13000_v40 = vld [vmem:[%s15071_s1 + $0x10] sm:$0xff] }
 0x286   : > { %9354 = vmatmul.mubr.msk.f32.gmra.mxu0 %vm424_vm1, %v12967_v18  ;;  %3855 = vmatprep.subr.mxu1 %v12972_v58 }
 0x287   : > { %3790 = vmatprep.mubr.f32.mxu0 %v15182_v5  ;;  %3856 = vmatpush1.msra.mxu1 %v12979_v8 }
 0x288   : > { %3354 = vmatmul.mubr.f32.gmra.mxu1 %v12762_v21  ;;  %3857 = vmatprep.subr.mxu1 %v12986_v47  ;;  %v9413_v21 = vld [vmem:[%s15070_s0 + $0x220] sm:$0x1] }
 0x289   : > { %3359 = vmatprep.mubr.f32.mxu1 %v12773_v23  ;;  %3858 = vmatpush1.msra.mxu1 %v12994_v36  ;;  %v13043_v23 = vld [vmem:[%s15071_s1 + $0x20] sm:$0xff] }
 0x28a   : > { %9355 = vmatmul.mubr.msk.f32.gmra.mxu0 %vm424_vm1, %v13000_v40  ;;  %10311 = vmatprep.subr.msk.mxu0 %vm449_vm0, %v9350_v55 }
 0x28b   : > { %3796 = vmatprep.mubr.f32.mxu0 %v15182_v5  ;;  %10312 = vmatpush3.msk.msra.mxu0 %vm449_vm0, %v9350_v55  ;;  %v4950_v55 = vld [vmem:[%s15071_s1 + $0xb0] sm:$0xff] }
 0x28c   : > { %3360 = vmatmul.mubr.f32.gmra.mxu1 %v12797_v15  ;;  %10313 = vmatprep.subr.mxu0 %v13013_v46  ;;  %v3637_v15 = vld [vmem:[%s15071_s1 + $0x30] sm:$0xff] }
 0x28d   : > { %3365 = vmatprep.mubr.f32.mxu1 %v12806_v42  ;;  %9425 = vmatprep.subr.msk.mxu1 %vm449_vm0, %v9413_v21  ;;  %v9412_v42 = vld [vmem:[%s15070_s0 + $0x218] sm:$0x1] }
 0x28e   : > { %9356 = vmatmul.mubr.msk.f32.gmra.mxu0 %vm424_vm1, %v13025_v20  ;;  %v4951_v21 = vld [vmem:[%s15071_s1 + $0xb8] sm:$0xff] }
 0x28f   : > { %3802 = vmatprep.mubr.f32.mxu0 %v15182_v5  ;;  %10314 = vmatpush3.msra.mxu0 %v13013_v46 }
 0x290   : > { %3366 = vmatmul.mubr.f32.gmra.mxu1 %v12829_v22  ;;  %10315 = vmatprep.subr.mxu0 %v13035_v1  ;;  %v13202_v22 = vld [vmem:[%s15071_s1 + $0x50] sm:$0xff] }
 0x291   : > { %3371 = vmatprep.mubr.f32.mxu1 %v12838_v48  ;;  %10316 = vmatpush3.msra.mxu0 %v13035_v1  ;;  %v4291_v48 = vld [vmem:[%s15071_s1 + $0x58] sm:$0xff] }
 0x292   : > { %9357 = vmatmul.mubr.msk.f32.gmra.mxu0 %vm424_vm1, %v13043_v23  ;;  %10317 = vmatprep.subr.mxu0 %v13049_v45 }
 0x293   : > { %3808 = vmatprep.mubr.f32.mxu0 %v15182_v5  ;;  %10318 = vmatpush3.msra.mxu0 %v13049_v45 }
 0x294   : > { %3372 = vmatmul.mubr.f32.gmra.mxu1 %v12860_v62  ;;  %10319 = vmatprep.subr.mxu0 %v13058_v39  ;;  %v4295_v62 = vld [vmem:[%s15071_s1 + $0x78] sm:$0xff] }
 0x295   : > { %3377 = vmatprep.mubr.f32.mxu1 %v12868_v33  ;;  %10320 = vmatpush3.msra.mxu0 %v13058_v39  ;;  %v9477_v33 = vld [vmem:[%s15070_s0 + $0x218] sm:$0x1] }
 0x296   : > { %9358 = vmatmul.mubr.msk.f32.gmra.mxu0 %vm424_vm1, %v13067_v4  ;;  %10321 = vmatprep.subr.mxu0 %v13073_v63 }
 0x297   : > { %3814 = vmatprep.mubr.f32.mxu0 %v15182_v5  ;;  %10322 = vmatpush3.msra.mxu0 %v13073_v63 }
 0x298   : > { %3378 = vmatmul.mubr.f32.gmra.mxu1 %v12904_v7  ;;  %10323 = vmatprep.subr.mxu0 %v13082_v54  ;;  %v4948_v7 = vld [vmem:[%s15071_s1 + $0xa0] sm:$0xff] }
 0x299   : > { %3891 = vmatprep.mubr.f32.mxu1 %v15182_v5  ;;  %10324 = vmatpush3.msra.mxu0 %v13082_v54 }
 0x29a   : > { %9359 = vmatmul.mubr.msk.f32.gmra.mxu0 %vm424_vm1, %v3637_v15  ;;  %9415 = vmatprep.subr.msk.mxu0 %vm449_vm0, %v9411_v17 }
 0x29b   : > { %3820 = vmatprep.mubr.f32.mxu0 %v15182_v5 }
 0x29c   : > { %9363 = vmatmul.mubr.msk.f32.vlgmr.msra.gmra.mxu1 %vm424_vm1, %v12933_v2 }
 0x29d   : > { %9426 = vmatpush1.msk.msra.mxu1 %vm449_vm0, %v9412_v42  ;;  %3897 = vmatprep.mubr.f32.mxu1 %v15182_v5 }
 0x29e   : > { %4503 = vmatprep.subr.mxu1 %v12899_v24  ;;  %9360 = vmatmul.mubr.msk.f32.gmra.mxu0 %vm424_vm1, %v3638_v11 }
 0x29f   : > { %4504 = vmatpush1.msra.mxu1 %v12912_v44  ;;  %10325 = vmatprep.mubr.msk.f32.mxu0 %vm424_vm1, %v12933_v2  ;;  %v4949_v2 = vld [vmem:[%s15071_s1 + $0xa8] sm:$0xff] }
 0x2a0   : > { %9364 = vmatmul.mubr.msk.f32.gmra.mxu1 %vm424_vm1, %v12967_v18  ;;  %4505 = vmatprep.subr.mxu1 %v12919_v31 }
 0x2a1   : > { %3903 = vmatprep.mubr.f32.mxu1 %v15182_v5  ;;  %4506 = vmatpush1.msra.mxu1 %v12926_v61 }
 0x2a2   : > { %10326 = vmatmul.mubr.msk.f32.vlgmr.msra.gmra.mxu0 %vm424_vm1, %v12967_v18  ;;  %4507 = vmatprep.subr.mxu1 %v12938_v19  ;;  %v9543_v18 = vld [vmem:[%s15070_s0 + $0x220] sm:$0x1] }
 0x2a3   : > { %10328 = vmatprep.mubr.msk.f32.mxu0 %vm424_vm1, %v13000_v40  ;;  %9416 = vmatpush1.msk.msra.mxu0 %vm449_vm0, %v9410_v43 }
 0x2a4   : > { %9365 = vmatmul.mubr.msk.f32.gmra.mxu1 %vm424_vm1, %v13000_v40  ;;  %4390 = vmatprep.subr.mxu0 %v12710_v41  ;;  %v9540_v40 = vld [vmem:[%s15070_s0 + $0x208] sm:$0x1] }
 0x2a5   : > { %3909 = vmatprep.mubr.f32.mxu1 %v15182_v5  ;;  %4508 = vmatpush1.msra.mxu1 %v12945_v32 }
 0x2a6   : > { %10329 = vmatmul.mubr.msk.f32.gmra.mxu0 %vm424_vm1, %v13025_v20  ;;  %4509 = vmatprep.subr.mxu1 %v12952_v34 }
 0x2a7   : > { %4391 = vmatpush1.msra.mxu0 %v12721_v49  ;;  %10331 = vmatprep.mubr.msk.f32.mxu0 %vm424_vm1, %v13043_v23 }
 0x2a8   : > { %9366 = vmatmul.mubr.msk.f32.gmra.mxu1 %vm424_vm1, %v13025_v20  ;;  %4392 = vmatprep.subr.mxu0 %v12745_v60 }
 0x2a9   : > { %3915 = vmatprep.mubr.f32.mxu1 %v15182_v5  ;;  %4393 = vmatpush1.msra.mxu0 %v12754_v26 }
 0x2aa   : > { %10332 = vmatmul.mubr.msk.f32.gmra.mxu0 %vm424_vm1, %v13067_v4  ;;  %4394 = vmatprep.subr.mxu0 %v12780_v38 }
 0x2ab   : > { %4510 = vmatpush1.msra.mxu1 %v12960_v3  ;;  %4395 = vmatpush1.msra.mxu0 %v12789_v51 }
 0x2ac   : > { %9367 = vmatmul.mubr.msk.f32.gmra.mxu1 %vm424_vm1, %v13043_v23  ;;  %4396 = vmatprep.subr.mxu0 %v12813_v56 }
 0x2ad   : > { %3921 = vmatprep.mubr.f32.mxu1 %v15182_v5  ;;  %10334 = vmatprep.mubr.msk.f32.mxu0 %vm424_vm1, %v3637_v15 }
 0x2ae   : > { %4397 = vmatpush1.msra.mxu0 %v12822_v50  ;;  %4511 = vmatprep.subr.mxu1 %v12972_v58 }
 0x2af   : > { %10335 = vmatmul.mubr.msk.f32.gmra.mxu0 %vm424_vm1, %v3638_v11  ;;  %4398 = vmatprep.subr.mxu0 %v12845_v25 }
 0x2b0   : > { %9368 = vmatmul.mubr.msk.f32.gmra.mxu1 %vm424_vm1, %v13067_v4  ;;  %4399 = vmatpush1.msra.mxu0 %v12854_v10 }
 0x2b1   : > { %3927 = vmatprep.mubr.f32.mxu1 %v15182_v5  ;;  %4512 = vmatpush1.msra.mxu1 %v12979_v8 }
 0x2b2   : > { %4400 = vmatprep.subr.mxu0 %v12875_v59  ;;  %4434 = vmatprep.mubr.f32.mxu0 %v15182_v5 }
 0x2b3   : > { %4401 = vmatpush1.msra.mxu0 %v12884_v52  ;;  %4513 = vmatprep.subr.mxu1 %v12986_v47 }
 0x2b4   : > { %9369 = vmatmul.mubr.msk.f32.gmra.mxu1 %vm424_vm1, %v3637_v15  ;;  %9417 = vmatmul.mubr.msk.f32.vlgmr.msra.gmra.mxu0 %vm424_vm1, %v13169_v35 }
 0x2b5   : > { %3933 = vmatprep.mubr.f32.mxu1 %v15182_v5  ;;  %4514 = vmatpush1.msra.mxu1 %v12994_v36 }
 0x2b6   : > { %4440 = vmatprep.mubr.f32.mxu0 %v15182_v5  ;;  %9480 = vmatprep.subr.msk.mxu1 %vm449_vm0, %v9476_v14 }
 0x2b7   : > { %10337 = vmatprep.subr.msk.mxu0 %vm449_vm0, %v9414_v6 }
 0x2b8   : > { %9370 = vmatmul.mubr.msk.f32.gmra.mxu1 %vm424_vm1, %v3638_v11  ;;  %9418 = vmatmul.mubr.msk.f32.gmra.mxu0 %vm424_vm1, %v13189_v29 }
 0x2b9   : > { %4547 = vmatprep.mubr.f32.mxu1 %v15182_v5  ;;  %4446 = vmatprep.mubr.f32.mxu0 %v15182_v5 }
 0x2ba   : > { %10338 = vmatpush3.msk.msra.mxu0 %vm449_vm0, %v9414_v6 }
 0x2bb   : > { %10339 = vmatprep.subr.mxu0 %v13013_v46 }
 0x2bc   : > { %9427 = vmatmul.mubr.msk.f32.vlgmr.msra.gmra.mxu1 %vm424_vm1, %v13169_v35  ;;  %9419 = vmatmul.mubr.msk.f32.gmra.mxu0 %vm424_vm1, %v13202_v22 }
 0x2bd   : > { %9481 = vmatpush1.msk.msra.mxu1 %vm449_vm0, %v9475_v30  ;;  %4553 = vmatprep.mubr.f32.mxu1 %v15182_v5 }
 0x2be   : > { %5046 = vmatprep.subr.mxu1 %v12710_v41  ;;  %4452 = vmatprep.mubr.f32.mxu0 %v15182_v5 }
 0x2bf   : > { %5047 = vmatpush1.msra.mxu1 %v12721_v49  ;;  %10340 = vmatpush3.msra.mxu0 %v13013_v46 }
 0x2c0   : > { %9428 = vmatmul.mubr.msk.f32.gmra.mxu1 %vm424_vm1, %v13189_v29  ;;  %9420 = vmatmul.mubr.msk.f32.gmra.mxu0 %vm424_vm1, %v4291_v48 }
 0x2c1   : > { %4559 = vmatprep.mubr.f32.mxu1 %v15182_v5  ;;  %5048 = vmatprep.subr.mxu1 %v12745_v60 }
 0x2c2   : > { %4458 = vmatprep.mubr.f32.mxu0 %v15182_v5  ;;  %5049 = vmatpush1.msra.mxu1 %v12754_v26 }
 0x2c3   : > { %5050 = vmatprep.subr.mxu1 %v12780_v38  ;;  %10341 = vmatprep.subr.mxu0 %v13035_v1 }
 0x2c4   : > { %9429 = vmatmul.mubr.msk.f32.gmra.mxu1 %vm424_vm1, %v13202_v22  ;;  %9421 = vmatmul.mubr.msk.f32.gmra.mxu0 %vm424_vm1, %v4292_v9 }
 0x2c5   : > { %4565 = vmatprep.mubr.f32.mxu1 %v15182_v5  ;;  %4464 = vmatprep.mubr.f32.mxu0 %v15182_v5 }
 0x2c6   : > { %5051 = vmatpush1.msra.mxu1 %v12789_v51  ;;  %10342 = vmatpush3.msra.mxu0 %v13035_v1 }
 0x2c7   : > { %5052 = vmatprep.subr.mxu1 %v12813_v56  ;;  %10343 = vmatprep.subr.mxu0 %v13049_v45 }
 0x2c8   : > { %9430 = vmatmul.mubr.msk.f32.gmra.mxu1 %vm424_vm1, %v4291_v48  ;;  %9422 = vmatmul.mubr.msk.f32.gmra.mxu0 %vm424_vm1, %v4293_v13 }
 0x2c9   : > { %4571 = vmatprep.mubr.f32.mxu1 %v15182_v5  ;;  %4470 = vmatprep.mubr.f32.mxu0 %v15182_v5 }
 0x2ca   : > { %5053 = vmatpush1.msra.mxu1 %v12822_v50  ;;  %10344 = vmatpush3.msra.mxu0 %v13049_v45 }
 0x2cb   : > { %10345 = vmatprep.subr.mxu0 %v13058_v39  ;;  %5054 = vmatprep.subr.mxu1 %v12845_v25 }
 0x2cc   : > { %9431 = vmatmul.mubr.msk.f32.gmra.mxu1 %vm424_vm1, %v4292_v9  ;;  %9423 = vmatmul.mubr.msk.f32.gmra.mxu0 %vm424_vm1, %v4294_v16 }
 0x2cd   : > { %4577 = vmatprep.mubr.f32.mxu1 %v15182_v5  ;;  %4476 = vmatprep.mubr.f32.mxu0 %v15182_v5 }
 0x2ce   : > { %10346 = vmatpush3.msra.mxu0 %v13058_v39  ;;  %5055 = vmatpush1.msra.mxu1 %v12854_v10 }
 0x2cf   : > { %10347 = vmatprep.subr.mxu0 %v13073_v63  ;;  %5056 = vmatprep.subr.mxu1 %v12875_v59 }
 0x2d0   : > { %9432 = vmatmul.mubr.msk.f32.gmra.mxu1 %vm424_vm1, %v4293_v13  ;;  %9424 = vmatmul.mubr.msk.f32.gmra.mxu0 %vm424_vm1, %v4295_v62 }
 0x2d1   : > { %4583 = vmatprep.mubr.f32.mxu1 %v15182_v5  ;;  %10348 = vmatpush3.msra.mxu0 %v13073_v63 }
 0x2d2   : > { %10349 = vmatprep.subr.mxu0 %v13082_v54  ;;  %10351 = vmatprep.mubr.msk.f32.mxu0 %vm424_vm1, %v13169_v35 }
 0x2d3   : > { %10350 = vmatpush3.msra.mxu0 %v13082_v54  ;;  %5057 = vmatpush1.msra.mxu1 %v12884_v52 }
 0x2d4   : > { %9433 = vmatmul.mubr.msk.f32.gmra.mxu1 %vm424_vm1, %v4294_v16  ;;  %10352 = vmatmul.mubr.msk.f32.vlgmr.msra.gmra.mxu0 %vm424_vm1, %v13189_v29 }
 0x2d5   : > { %4589 = vmatprep.mubr.f32.mxu1 %v15182_v5  ;;  %9490 = vmatprep.subr.msk.mxu0 %vm449_vm0, %v9478_v28 }
 0x2d6   : > { %10354 = vmatprep.mubr.msk.f32.mxu0 %vm424_vm1, %v13202_v22  ;;  %9491 = vmatpush1.msk.msra.mxu0 %vm449_vm0, %v9477_v33  ;;  %v13555_v33 = vpop.permute.xlu1 %6047 }
 0x2d7   : > { %5159 = vmatprep.subr.mxu0 %v12899_v24  ;;  %10363 = vmatprep.subr.msk.mxu1 %vm449_vm0, %v9479_v27 }
 0x2d8   : > { %9434 = vmatmul.mubr.msk.f32.gmra.mxu1 %vm424_vm1, %v4295_v62  ;;  %10355 = vmatmul.mubr.msk.f32.gmra.mxu0 %vm424_vm1, %v4291_v48 }
 0x2d9   : > { %5090 = vmatprep.mubr.f32.mxu1 %v15182_v5  ;;  %5160 = vmatpush1.msra.mxu0 %v12912_v44 }
 0x2da   : > { %5161 = vmatprep.subr.mxu0 %v12919_v31  ;;  %10357 = vmatprep.mubr.msk.f32.mxu0 %vm424_vm1, %v4292_v9 }
 0x2db   : > { %5162 = vmatpush1.msra.mxu0 %v12926_v61 }
 0x2dc   : > { %9482 = vmatmul.mubr.msk.f32.vlgmr.msra.gmra.mxu1 %vm424_vm1, %v13302_v53  ;;  %10358 = vmatmul.mubr.msk.f32.gmra.mxu0 %vm424_vm1, %v4293_v13 }
 0x2dd   : > { %5096 = vmatprep.mubr.f32.mxu1 %v15182_v5  ;;  %5163 = vmatprep.subr.mxu0 %v12938_v19 }
 0x2de   : > { %5164 = vmatpush1.msra.mxu0 %v12945_v32  ;;  %10364 = vmatpush3.msk.msra.mxu1 %vm449_vm0, %v9479_v27 }
 0x2df   : > { %5165 = vmatprep.subr.mxu0 %v12952_v34  ;;  %10360 = vmatprep.mubr.msk.f32.mxu0 %vm424_vm1, %v4294_v16 }
 0x2e0   : > { %9483 = vmatmul.mubr.msk.f32.gmra.mxu1 %vm424_vm1, %v13315_v0  ;;  %5166 = vmatpush1.msra.mxu0 %v12960_v3 }
 0x2e1   : > { %5102 = vmatprep.mubr.f32.mxu1 %v15182_v5  ;;  %10361 = vmatmul.mubr.msk.f32.gmra.mxu0 %vm424_vm1, %v4295_v62 }
 0x2e2   : > { %5167 = vmatprep.subr.mxu0 %v12972_v58  ;;  %10365 = vmatprep.subr.mxu1 %v13013_v46 }
 0x2e3   : > { %5168 = vmatpush1.msra.mxu0 %v12979_v8  ;;  %5203 = vmatprep.mubr.f32.mxu0 %v15182_v5 }
 0x2e4   : > { %9484 = vmatmul.mubr.msk.f32.gmra.mxu1 %vm424_vm1, %v13330_v57  ;;  %5169 = vmatprep.subr.mxu0 %v12986_v47 }
 0x2e5   : > { %5108 = vmatprep.mubr.f32.mxu1 %v15182_v5  ;;  %5170 = vmatpush1.msra.mxu0 %v12994_v36 }
 0x2e6   : > { %10366 = vmatpush3.msra.mxu1 %v13013_v46  ;;  %9492 = vmatmul.mubr.msk.f32.vlgmr.msra.gmra.mxu0 %vm424_vm1, %v13302_v53 }
 0x2e7   : > { %5209 = vmatprep.mubr.f32.mxu0 %v15182_v5  ;;  %10367 = vmatprep.subr.mxu1 %v13035_v1 }
 0x2e8   : > { %9485 = vmatmul.mubr.msk.f32.gmra.mxu1 %vm424_vm1, %v4947_v37  ;;  %9545 = vmatprep.subr.msk.mxu0 %vm449_vm0, %v9541_v12 }
 0x2e9   : > { %5114 = vmatprep.mubr.f32.mxu1 %v15182_v5  ;;  %10368 = vmatpush3.msra.mxu1 %v13035_v1 }
 0x2ea   : > { %9493 = vmatmul.mubr.msk.f32.gmra.mxu0 %vm424_vm1, %v13315_v0  ;;  %10369 = vmatprep.subr.mxu1 %v13049_v45 }
 0x2eb   : > { %5215 = vmatprep.mubr.f32.mxu0 %v15182_v5  ;;  %10370 = vmatpush3.msra.mxu1 %v13049_v45 }
 0x2ec   : > { %9486 = vmatmul.mubr.msk.f32.gmra.mxu1 %vm424_vm1, %v4948_v7  ;;  %10371 = vmatprep.subr.mxu1 %v13058_v39 }
 0x2ed   : > { %5120 = vmatprep.mubr.f32.mxu1 %v15182_v5  ;;  %10372 = vmatpush3.msra.mxu1 %v13058_v39 }
 0x2ee   : > { %9494 = vmatmul.mubr.msk.f32.gmra.mxu0 %vm424_vm1, %v13330_v57  ;;  %10373 = vmatprep.subr.mxu1 %v13073_v63 }
 0x2ef   : > { %5221 = vmatprep.mubr.f32.mxu0 %v15182_v5  ;;  %10374 = vmatpush3.msra.mxu1 %v13073_v63 }
 0x2f0   : > { %9487 = vmatmul.mubr.msk.f32.gmra.mxu1 %vm424_vm1, %v4949_v2  ;;  %10375 = vmatprep.subr.mxu1 %v13082_v54 }
 0x2f1   : > { %5126 = vmatprep.mubr.f32.mxu1 %v15182_v5  ;;  %10376 = vmatpush3.msra.mxu1 %v13082_v54 }
 0x2f2   : > { %9495 = vmatmul.mubr.msk.f32.gmra.mxu0 %vm424_vm1, %v4947_v37  ;;  %9555 = vmatprep.subr.msk.mxu1 %vm449_vm0, %v9543_v18 }
 0x2f3   : > { %5227 = vmatprep.mubr.f32.mxu0 %v15182_v5  ;;  %9546 = vmatpush1.msk.msra.mxu0 %vm449_vm0, %v9540_v40 }
 0x2f4   : > { %9488 = vmatmul.mubr.msk.f32.gmra.mxu1 %vm424_vm1, %v4950_v55  ;;  %5702 = vmatprep.subr.mxu0 %v12710_v41  ;;  %v9542_v41 = vld [vmem:[%s15070_s0 + $0x218] sm:$0x1] }
 0x2f5   : > { %5132 = vmatprep.mubr.f32.mxu1 %v15182_v5  ;;  %5703 = vmatpush1.msra.mxu0 %v12721_v49  ;;  %v13439_v49 = vld [vmem:[%s15071_s1 + $0xc0] sm:$0xff] }
 0x2f6   : > { %9496 = vmatmul.mubr.msk.f32.gmra.mxu0 %vm424_vm1, %v4948_v7  ;;  %5704 = vmatprep.subr.mxu0 %v12745_v60  ;;  %v5601_v60 = vld [vmem:[%s15071_s1 + $0xc8] sm:$0xff] }
 0x2f7   : > { %5233 = vmatprep.mubr.f32.mxu0 %v15182_v5  ;;  %5705 = vmatpush1.msra.mxu0 %v12754_v26  ;;  %v9544_v26 = vld [vmem:[%s15070_s0 + $0x228] sm:$0x1] }
 0x2f8   : > { %9489 = vmatmul.mubr.msk.f32.gmra.mxu1 %vm424_vm1, %v4951_v21  ;;  %5706 = vmatprep.subr.mxu0 %v12780_v38  ;;  %v5602_v38 = vld [vmem:[%s15071_s1 + $0xd0] sm:$0xff] }
 0x2f9   : > { %10377 = vmatprep.mubr.msk.f32.mxu1 %vm424_vm1, %v13302_v53  ;;  %5707 = vmatpush1.msra.mxu0 %v12789_v51  ;;  %v5603_v51 = vld [vmem:[%s15071_s1 + $0xd8] sm:$0xff] }
 0x2fa   : > { %9497 = vmatmul.mubr.msk.f32.gmra.mxu0 %vm424_vm1, %v4949_v2  ;;  %5708 = vmatprep.subr.mxu0 %v12813_v56  ;;  %v5604_v56 = vld [vmem:[%s15071_s1 + $0xe0] sm:$0xff] }
 0x2fb   : > { %5239 = vmatprep.mubr.f32.mxu0 %v15182_v5  ;;  %5709 = vmatpush1.msra.mxu0 %v12822_v50  ;;  %v5605_v50 = vld [vmem:[%s15071_s1 + $0xe8] sm:$0xff] }
 0x2fc   : > { %10378 = vmatmul.mubr.msk.f32.vlgmr.msra.gmra.mxu1 %vm424_vm1, %v13315_v0  ;;  %5710 = vmatprep.subr.mxu0 %v12845_v25  ;;  %v5606_v25 = vld [vmem:[%s15071_s1 + $0xf0] sm:$0xff] }
 0x2fd   : > { %10380 = vmatprep.mubr.msk.f32.mxu1 %vm424_vm1, %v13330_v57  ;;  %9556 = vmatpush1.msk.msra.mxu1 %vm449_vm0, %v9542_v41 }
 0x2fe   : > { %9498 = vmatmul.mubr.msk.f32.gmra.mxu0 %vm424_vm1, %v4950_v55  ;;  %5815 = vmatprep.subr.mxu1 %v12899_v24 }
 0x2ff   : > { %5816 = vmatpush1.msra.mxu1 %v12912_v44  ;;  %5245 = vmatprep.mubr.f32.mxu0 %v15182_v5 }
 0x300   : > { %10381 = vmatmul.mubr.msk.f32.gmra.mxu1 %vm424_vm1, %v4947_v37  ;;  %5817 = vmatprep.subr.mxu1 %v12919_v31 }
 0x301   : > { %10383 = vmatprep.mubr.msk.f32.mxu1 %vm424_vm1, %v4948_v7  ;;  %5818 = vmatpush1.msra.mxu1 %v12926_v61  ;;  %v13557_v7 = vpop.permute.xlu0 %6052 }
 0x302   : > { %9499 = vmatmul.mubr.msk.f32.gmra.mxu0 %vm424_vm1, %v4951_v21  ;;  %5819 = vmatprep.subr.mxu1 %v12938_v19 }
 0x303   : > { %5711 = vmatpush1.msra.mxu0 %v12854_v10  ;;  %5820 = vmatpush1.msra.mxu1 %v12945_v32  ;;  %v5607_v10 = vld [vmem:[%s15071_s1 + $0xf8] sm:$0xff] }
 0x304   : > { %10384 = vmatmul.mubr.msk.f32.gmra.mxu1 %vm424_vm1, %v4949_v2  ;;  %5712 = vmatprep.subr.mxu0 %v12875_v59 }
 0x305   : > { %5821 = vmatprep.subr.mxu1 %v12952_v34  ;;  %10386 = vmatprep.mubr.msk.f32.mxu1 %vm424_vm1, %v4950_v55  ;;  %v13561_v55 = vpop.permute.xlu1 %5391 }
 0x306   : > { %5713 = vmatpush1.msra.mxu0 %v12884_v52  ;;  %5746 = vmatprep.mubr.f32.mxu0 %v15182_v5 }
 0x307   : > { %5822 = vmatpush1.msra.mxu1 %v12960_v3  ;;  %9547 = vmatmul.mubr.msk.f32.vlgmr.msra.gmra.mxu0 %vm424_vm1, %v13439_v49 }
 0x308   : > { %10387 = vmatmul.mubr.msk.f32.gmra.mxu1 %vm424_vm1, %v4951_v21  ;;  %5823 = vmatprep.subr.mxu1 %v12972_v58 }
 0x309   : > { %5824 = vmatpush1.msra.mxu1 %v12979_v8  ;;  %5752 = vmatprep.mubr.f32.mxu0 %v15182_v5 }
 0x30a   : > { %5825 = vmatprep.subr.mxu1 %v12986_v47  ;;  %5859 = vmatprep.mubr.f32.mxu1 %v15182_v5 }
 0x30b   : > { %5826 = vmatpush1.msra.mxu1 %v12994_v36  ;;  %9548 = vmatmul.mubr.msk.f32.gmra.mxu0 %vm424_vm1, %v5601_v60 }
 0x30c   : > { %9557 = vmatmul.mubr.msk.f32.vlgmr.msra.gmra.mxu1 %vm424_vm1, %v13439_v49  ;;  %5758 = vmatprep.mubr.f32.mxu0 %v15182_v5 }
 0x30d   : > { %5865 = vmatprep.mubr.f32.mxu1 %v15182_v5  ;;  %10389 = vmatprep.subr.msk.mxu0 %vm449_vm0, %v9544_v26 }
 0x30e   : > { %10390 = vmatpush3.msk.msra.mxu0 %vm449_vm0, %v9544_v26 }
 0x30f   : > { %9549 = vmatmul.mubr.msk.f32.gmra.mxu0 %vm424_vm1, %v5602_v38  ;;  %10391 = vmatprep.subr.mxu0 %v13013_v46 }
 0x310   : > { %9558 = vmatmul.mubr.msk.f32.gmra.mxu1 %vm424_vm1, %v5601_v60  ;;  %5764 = vmatprep.mubr.f32.mxu0 %v15182_v5 }
 0x311   : > { %5871 = vmatprep.mubr.f32.mxu1 %v15182_v5  ;;  %10392 = vmatpush3.msra.mxu0 %v13013_v46 }
 0x312   : > { %10393 = vmatprep.subr.mxu0 %v13035_v1 }
 0x313   : > { %9550 = vmatmul.mubr.msk.f32.gmra.mxu0 %vm424_vm1, %v5603_v51 }
 0x314   : > { %9559 = vmatmul.mubr.msk.f32.gmra.mxu1 %vm424_vm1, %v5602_v38  ;;  %5770 = vmatprep.mubr.f32.mxu0 %v15182_v5 }
 0x315   : > { %5877 = vmatprep.mubr.f32.mxu1 %v15182_v5  ;;  %10394 = vmatpush3.msra.mxu0 %v13035_v1 }
 0x316   : > { %10395 = vmatprep.subr.mxu0 %v13049_v45 }
 0x317   : > { %9551 = vmatmul.mubr.msk.f32.gmra.mxu0 %vm424_vm1, %v5604_v56 }
 0x318   : > { %9560 = vmatmul.mubr.msk.f32.gmra.mxu1 %vm424_vm1, %v5603_v51  ;;  %5776 = vmatprep.mubr.f32.mxu0 %v15182_v5 }
 0x319   : > { %5883 = vmatprep.mubr.f32.mxu1 %v15182_v5  ;;  %10396 = vmatpush3.msra.mxu0 %v13049_v45 }
 0x31a   : > { %10397 = vmatprep.subr.mxu0 %v13058_v39 }
 0x31b   : > { %9552 = vmatmul.mubr.msk.f32.gmra.mxu0 %vm424_vm1, %v5605_v50 }
 0x31c   : > { %9561 = vmatmul.mubr.msk.f32.gmra.mxu1 %vm424_vm1, %v5604_v56  ;;  %5782 = vmatprep.mubr.f32.mxu0 %v15182_v5 }
 0x31d   : > { %5889 = vmatprep.mubr.f32.mxu1 %v15182_v5  ;;  %10398 = vmatpush3.msra.mxu0 %v13058_v39 }
 0x31e   : > { %10399 = vmatprep.subr.mxu0 %v13073_v63 }
 0x31f   : > { %9553 = vmatmul.mubr.msk.f32.gmra.mxu0 %vm424_vm1, %v5606_v25 }
 0x320   : > { %9562 = vmatmul.mubr.msk.f32.gmra.mxu1 %vm424_vm1, %v5605_v50  ;;  %5788 = vmatprep.mubr.f32.mxu0 %v15182_v5  ;;  %v3224_v59 = vpop.f32.mrf.mxu0 }
 0x321   : > { %5895 = vmatprep.mubr.f32.mxu1 %v15182_v5  ;;  %10400 = vmatpush3.msra.mxu0 %v13073_v63 }
 0x322   : > { %10401 = vmatprep.subr.mxu0 %v13082_v54  ;;  %v3226_v52 = vpop.f32.mrf.mxu0 }
 0x323   : > { %9554 = vmatmul.mubr.msk.f32.gmra.mxu0 %vm424_vm1, %v5607_v10 }
 0x324   : > { %9563 = vmatmul.mubr.msk.f32.gmra.mxu1 %vm424_vm1, %v5606_v25  ;;  %10402 = vmatpush3.msra.mxu0 %v13082_v54  ;;  %v3230_v24 = vpop.f32.mrf.mxu0 }
 0x325   : > { %5901 = vmatprep.mubr.f32.mxu1 %v15182_v5  ;;  %10403 = vmatprep.mubr.msk.f32.mxu0 %vm424_vm1, %v13439_v49 }
 0x326   : > { %v3232_v44 = vpop.f32.mrf.mxu0 }
 0x327   : > { %10404 = vmatmul.mubr.msk.f32.vlgmr.msra.gmra.mxu0 %vm424_vm1, %v5601_v60 }
 0x328   : > { %9564 = vmatmul.mubr.msk.f32.gmra.mxu1 %vm424_vm1, %v5607_v10  ;;  %10406 = vmatprep.mubr.msk.f32.mxu0 %vm424_vm1, %v5602_v38  ;;  %v3236_v31 = vpop.f32.mrf.mxu0 }
 0x329   : > { %v3384_v61 = vmax.f32 %v3224_v59, %v3236_v31  ;;  %v13573_v59 = vpop.permute.xlu1 %4735 }
 0x32a   : > { %v3238_v19 = vpop.f32.mrf.mxu0 }
 0x32b   : > { %10407 = vmatmul.mubr.msk.f32.gmra.mxu0 %vm424_vm1, %v5603_v51  ;;  %v3385_v47 = vmax.f32 %v3226_v52, %v3238_v19  ;;  %v13567_v51 = vpop.permute.xlu0 %5396 }
 0x32c   : > { %10409 = vmatprep.mubr.msk.f32.mxu0 %vm424_vm1, %v5604_v56  ;;  %v3242_v32 = vpop.f32.mrf.mxu0 }
 0x32d   : > { %v3388_v34 = vmax.f32 %v3230_v24, %v3242_v32 }
 0x32e   : > { %v3244_v5 = vpop.f32.mrf.mxu0 }
 0x32f   : > { %10410 = vmatmul.mubr.msk.f32.gmra.mxu0 %vm424_vm1, %v5605_v50  ;;  %v3389_v45 = vmax.f32 %v3232_v44, %v3244_v5 }
 0x330   : > { %10412 = vmatprep.mubr.msk.f32.mxu0 %vm424_vm1, %v5606_v25  ;;  %v3248_v3 = vpop.f32.mrf.mxu0 }
 0x331   : > { %v13530_v58 = vmax.f32 %v3384_v61, %v3248_v3  ;;  %v13583_v3 = vpop.permute.xlu0 %4740 }
 0x332   : > { %v3250_v8 = vpop.f32.mrf.mxu0 }
 0x333   : > { %15183 = vst [vmem:[#allocation15_spill] sm:$0xff] %v13530_v58  ;;  %10413 = vmatmul.mubr.msk.f32.gmra.mxu0 %vm424_vm1, %v5607_v10  ;;  %v13535_v1 = vmax.f32 %v3385_v47, %v3250_v8 }
 0x334   : > { %v3254_v36 = vpop.f32.mrf.mxu0 }
 0x335   : > { %v13533_v46 = vmax.f32 %v3388_v34, %v3254_v36  ;;  %15185 = vst [vmem:[#allocation21_spill] sm:$0xff] %v13535_v1 }
 0x336   : > { %v3256_v20 = vpop.f32.mrf.mxu0 }
 0x337   : > { %15184 = vst [vmem:[#allocation14_spill] sm:$0xff] %v13533_v46  ;;  %v13545_v15 = vmax.f32 %v3389_v45, %v3256_v20 }
 0x338   : > { %v13537_v23 = vpop.f32.mrf.mxu0 }
 0x339   : > { %15186 = vst [vmem:[#allocation20_spill] sm:$0xff] %v13537_v23  ;;  %15188 = vst [vmem:[#allocation33_spill] sm:$0xff] %v13545_v15 }
 0x33a   : > { %v13541_v4 = vpop.f32.mrf.mxu0 }
 0x33b   : > { %15187 = vst [vmem:[#allocation19_spill] sm:$0xff] %v13541_v4 }
 0x33c   : > { %v3337_v54 = vpop.f32.mrf.mxu1 }
 0x33e   : > { %v3339_v17 = vpop.f32.mrf.mxu1  ;;  %v13547_v42 = vpop.f32.mrf.mxu0 }
 0x33f   : > { %15189 = vst [vmem:[#allocation26_spill] sm:$0xff] %v13547_v42 }
 0x340   : > { %v3343_v43 = vpop.f32.mrf.mxu1  ;;  %v13551_v35 = vpop.f32.mrf.mxu0 }
 0x341   : > { %15190 = vst [vmem:[#allocation30_spill] sm:$0xff] %v13551_v35 }
 0x342   : > { %v3345_v6 = vpop.f32.mrf.mxu1  ;;  %v3780_v29 = vpop.f32.mrf.mxu0 }
 0x344   : > { %v3349_v22 = vpop.f32.mrf.mxu1  ;;  %v3782_v30 = vpop.f32.mrf.mxu0 }
 0x345   : > { %v3386_v48 = vmax.f32 %v3337_v54, %v3349_v22  ;;  %v13592_v54 = vld [vmem:[%s15073_s3] ss:$4 sm:$0x1f] }
 0x346   : > { %v3351_v9 = vpop.f32.mrf.mxu1  ;;  %v3786_v13 = vpop.f32.mrf.mxu0 }
 0x347   : > { %v3387_v16 = vmax.f32 %v3339_v17, %v3351_v9  ;;  %v13594_v17 = vpop.permute.xlu1 %4079 }
 0x348   : > { %v3355_v62 = vpop.f32.mrf.mxu1  ;;  %v3788_v28 = vpop.f32.mrf.mxu0 }
 0x349   : > { %v3390_v27 = vmax.f32 %v3343_v43, %v3355_v62 }
 0x34a   : > { %v3357_v53 = vpop.f32.mrf.mxu1  ;;  %v3792_v0 = vpop.f32.mrf.mxu0 }
 0x34b   : > { %v3391_v57 = vmax.f32 %v3345_v6, %v3357_v53  ;;  %v4045_v56 = vmax.f32 %v3780_v29, %v3792_v0  ;;  %v13601_v53 = vpop.permute.xlu0 %4084 }
 0x34c   : > { %v3361_v37 = vpop.f32.mrf.mxu1  ;;  %v3794_v12 = vpop.f32.mrf.mxu0 }
 0x34d   : > { %v13559_v2 = vmax.f32 %v3386_v48, %v3361_v37  ;;  %v4046_v52 = vmax.f32 %v3782_v30, %v3794_v12  ;;  %v15200_v37 = vld [vmem:[#allocation10_spill] sm:$0xff] }
 0x34e   : > { %v3363_v18 = vpop.f32.mrf.mxu1  ;;  %v3798_v40 = vpop.f32.mrf.mxu0  ;;  %v4116_v12 = vrot.slane %v13592_v54, %v15200_v37 }
 0x34f   : > { %15191 = vst [vmem:[#allocation28_spill] sm:$0xff] %v13559_v2  ;;  %v13563_v21 = vmax.f32 %v3387_v16, %v3363_v18  ;;  %v4050_v61 = vmax.f32 %v3786_v13, %v3798_v40  ;;  %v15199_v13 = vld [vmem:[#allocation9_spill] sm:$0xff] }
 0x350   : > { %v3367_v41 = vpop.f32.mrf.mxu1  ;;  %v3800_v49 = vpop.f32.mrf.mxu0  ;;  %v4112_v16 = vrot.slane %v13592_v54, %v15199_v13  ;;  %v13767_v2 = vld [vmem:[%s15073_s3 + $0x2] ss:$4 sm:$0x1f] }
 0x351   : > { %15192 = vst [vmem:[#allocation27_spill] sm:$0xff] %v13563_v21  ;;  %v13565_v60 = vmax.f32 %v3390_v27, %v3367_v41  ;;  %v4051_v8 = vmax.f32 %v3788_v28, %v3800_v49 }
 0x352   : > { %v3369_v26 = vpop.f32.mrf.mxu1  ;;  %v3804_v38 = vpop.f32.mrf.mxu0 }
 0x353   : > { %15193 = vst [vmem:[#allocation32_spill] sm:$0xff] %v13565_v60  ;;  %v13569_v50 = vmax.f32 %v3391_v57, %v3369_v26  ;;  %v4055_v32 = vmax.f32 %v4045_v56, %v3804_v38  ;;  %v5428_v60 = vrot.slane %v13767_v2, %v15200_v37 }
 0x354   : > { %v13571_v25 = vpop.f32.mrf.mxu1  ;;  %v3806_v10 = vpop.f32.mrf.mxu0 }
 0x355   : > { %15194 = vst [vmem:[#allocation29_spill] sm:$0xff] %v13569_v50  ;;  %15195 = vst [vmem:[#allocation24_spill] sm:$0xff] %v13571_v25  ;;  %v4056_v36 = vmax.f32 %v4046_v52, %v3806_v10 }
 0x356   : > { %v13577_v44 = vpop.f32.mrf.mxu1  ;;  %v3810_v31 = vpop.f32.mrf.mxu0 }
 0x357   : > { %15196 = vst [vmem:[#allocation23_spill] sm:$0xff] %v13577_v44  ;;  %v4060_v6 = vmax.f32 %v4050_v61, %v3810_v31 }
 0x358   : > { %v13581_v34 = vpop.f32.mrf.mxu1  ;;  %v3812_v5 = vpop.f32.mrf.mxu0 }
 0x359   : > { %15197 = vst [vmem:[#allocation25_spill] sm:$0xff] %v13581_v34  ;;  %v4061_v48 = vmax.f32 %v4051_v8, %v3812_v5 }
 0x35a   : > { %v13587_v20 = vpop.f32.mrf.mxu1  ;;  %v3816_v45 = vpop.f32.mrf.mxu0 }
 0x35b   : > { %15198 = vst [vmem:[#allocation22_spill] sm:$0xff] %v13587_v20  ;;  %v4065_v29 = vmax.f32 %v4055_v32, %v3816_v45 }
 0x35c   : > { %v3893_v22 = vpop.f32.mrf.mxu1  ;;  %v3818_v30 = vpop.f32.mrf.mxu0 }
 0x35d   : > { %v4087_v9 = vadd.f32 %v13594_v17, %v4065_v29  ;;  %v4066_v62 = vmax.f32 %v4056_v36, %v3818_v30 }
 0x35e   : > { %v3895_v28 = vpop.f32.mrf.mxu1  ;;  %v3822_v27 = vpop.f32.mrf.mxu0 }
 0x35f   : > { %v4097_v0 = vmax.f32 %v4087_v9, 0.0  ;;  %v4088_v57 = vadd.f32 %v13594_v17, %v4066_v62  ;;  %v4070_v18 = vmax.f32 %v4060_v6, %v3822_v27 }
 0x360   : > { %v3899_v40 = vpop.f32.mrf.mxu1  ;;  %v3824_v41 = vpop.f32.mrf.mxu0 }
 0x361   : > { %v13606_v49 = vmul.f32 %v4112_v16, %v4097_v0  ;;  %v4098_v26 = vmax.f32 %v4088_v57, 0.0  ;;  %v4092_v38 = vadd.f32 %v13601_v53, %v4070_v18  ;;  %v4071_v56 = vmax.f32 %v4061_v48, %v3824_v41 }
 0x362   : > { %v3901_v10 = vpop.f32.mrf.mxu1  ;;  %v10327_v52 = vpop.f32.mrf.mxu0 }
 0x363   : > { %4144 = vst [vmem:[#allocation2] sm:$0xff] %v13606_v49  ;;  %v13610_v31 = vmul.f32 %v4116_v12, %v4098_v26  ;;  %v4102_v61 = vmax.f32 %v4092_v38, 0.0  ;;  %v4093_v32 = vadd.f32 %v13601_v53, %v4071_v56 }
 0x364   : > { %v3905_v5 = vpop.f32.mrf.mxu1  ;;  %v4006_v8 = vpop.f32.mrf.mxu0 }
 0x365   : > { %4145 = vst [vmem:[#allocation2 + $0x8] sm:$0xff] %v13610_v31  ;;  %v13614_v36 = vmul.f32 %v4112_v16, %v4102_v61  ;;  %v4103_v45 = vmax.f32 %v4093_v32, 0.0  ;;  %v4047_v19 = vmax.f32 %v3893_v22, %v3905_v5 }
 0x366   : > { %v3907_v6 = vpop.f32.mrf.mxu1  ;;  %v10330_v29 = vpop.f32.mrf.mxu0 }
 0x367   : > { %4148 = vst [vmem:[#allocation2 + $0x20] sm:$0xff] %v13614_v36  ;;  %v13617_v30 = vmul.f32 %v4116_v12, %v4103_v45  ;;  %v4054_v9 = vmax.f32 %v10327_v52, %v10330_v29  ;;  %v15201_v52 = vld [vmem:[#allocation12_spill] sm:$0xff] }
 0x368   : > { %v3911_v48 = vpop.f32.mrf.mxu1  ;;  %v4016_v62 = vpop.f32.mrf.mxu0  ;;  %v4128_v29 = vrot.slane %v13592_v54, %v15201_v52 }
 0x369   : > { %4149 = vst [vmem:[#allocation2 + $0x28] sm:$0xff] %v13617_v30  ;;  %v4049_v27 = vmax.f32 %v4006_v8, %v4016_v62  ;;  %v4048_v8 = vmax.f32 %v3895_v28, %v3907_v6  ;;  %v15203_v6 = vld [vmem:[#allocation17_spill] sm:$0xff] }
 0x36a   : > { %v3913_v0 = vpop.f32.mrf.mxu1  ;;  %v10333_v57 = vpop.f32.mrf.mxu0 }
 0x36b   : > { %v4064_v41 = vmax.f32 %v4054_v9, %v10333_v57  ;;  %v4052_v57 = vmax.f32 %v3899_v40, %v3911_v48  ;;  %v4053_v11 = vmax.f32 %v3901_v10, %v3913_v0 }
 0x36c   : > { %v3917_v18 = vpop.f32.mrf.mxu1  ;;  %v4026_v26 = vpop.f32.mrf.mxu0 }
 0x36d   : > { %v4059_v16 = vmax.f32 %v4049_v27, %v4026_v26  ;;  %v4057_v62 = vmax.f32 %v4047_v19, %v3917_v18 }
 0x36e   : > { %v3919_v38 = vpop.f32.mrf.mxu1 }
 0x36f   : > { %v10336_v56 = vpop.f32.mrf.mxu0  ;;  %v4058_v26 = vmax.f32 %v4048_v8, %v3919_v38 }
 0x370   : > { %v3923_v61 = vpop.f32.mrf.mxu1  ;;  %v4074_v32 = vmax.f32 %v4064_v41, %v10336_v56  ;;  %v15202_v41 = vld [vmem:[#allocation16_spill] sm:$0xff] }
 0x371   : > { %v4036_v24 = vpop.f32.mrf.mxu0  ;;  %v4120_v22 = vrot.slane %v13592_v54, %v15202_v41 }
 0x372   : > { %v3925_v12 = vpop.f32.mrf.mxu1  ;;  %v4096_v45 = vadd.f32 %v13601_v53, %v4074_v32  ;;  %v4069_v63 = vmax.f32 %v4059_v16, %v4036_v24  ;;  %v4062_v24 = vmax.f32 %v4052_v57, %v3923_v61 }
 0x373   : > { %v4063_v48 = vmax.f32 %v4053_v11, %v3925_v12 }
 0x374   : > { %v3929_v39 = vpop.f32.mrf.mxu1  ;;  %v4106_v43 = vmax.f32 %v4096_v45, 0.0  ;;  %v4091_v9 = vadd.f32 %v13594_v17, %v4069_v63  ;;  %v4436_v27 = vpop.f32.mrf.mxu0  ;;  %v4124_v63 = vrot.slane %v13592_v54, %v15203_v6 }
 0x375   : > { %v4067_v47 = vmax.f32 %v4057_v62, %v3929_v39 }
 0x376   : > { %v13626_v5 = vmul.f32 %v4128_v29, %v4106_v43  ;;  %v3931_v56 = vpop.f32.mrf.mxu1  ;;  %v4101_v32 = vmax.f32 %v4091_v9, 0.0  ;;  %v4438_v14 = vpop.f32.mrf.mxu0 }
 0x377   : > { %v4089_v19 = vadd.f32 %v13594_v17, %v4067_v47  ;;  %v4068_v28 = vmax.f32 %v4058_v26, %v3931_v56 }
 0x378   : > { %v13631_v18 = vmul.f32 %v4128_v29, %v4101_v32  ;;  %v3935_v40 = vpop.f32.mrf.mxu1  ;;  %v4442_v39 = vpop.f32.mrf.mxu0 }
 0x379   : > { %v4099_v16 = vmax.f32 %v4089_v19, 0.0  ;;  %v4090_v43 = vadd.f32 %v13594_v17, %v4068_v28  ;;  %v4072_v38 = vmax.f32 %v4062_v24, %v3935_v40 }
 0x37a   : > { %v3937_v45 = vpop.f32.mrf.mxu1  ;;  %v4444_v8 = vpop.f32.mrf.mxu0 }
 0x37b   : > { %v13634_v62 = vmul.f32 %v4120_v22, %v4099_v16  ;;  %v4100_v10 = vmax.f32 %v4090_v43, 0.0  ;;  %v4094_v47 = vadd.f32 %v13601_v53, %v4072_v38  ;;  %v4073_v0 = vmax.f32 %v4063_v48, %v3937_v45 }
 0x37c   : > { %v13637_v61 = vpop.f32.mrf.mxu1  ;;  %v4448_v54 = vpop.f32.mrf.mxu0 }
 0x37d   : > { %4146 = vst [vmem:[#allocation2 + $0x10] sm:$0xff] %v13634_v62  ;;  %v13640_v29 = vmul.f32 %v4124_v63, %v4100_v10  ;;  %v4104_v11 = vmax.f32 %v4094_v47, 0.0  ;;  %v4095_v12 = vadd.f32 %v13601_v53, %v4073_v0  ;;  %4164 = vrot.lane.b32.xlu1 %v13634_v62, %s10894_s16  ;;  %v4701_v40 = vmax.f32 %v4436_v27, %v4448_v54 }
 0x37e   : > { %v13645_v17 = vpop.f32.mrf.mxu1  ;;  %v4450_v9 = vpop.f32.mrf.mxu0 }
 0x37f   : > { %4147 = vst.msk [vmem:[#allocation2 + $0x18] sm:$0xff] %vm898_vm2, %v13640_v29  ;;  %v4141_v57 = vmul.f32 %v4120_v22, %v4104_v11  ;;  %v4105_v26 = vmax.f32 %v4095_v12, 0.0  ;;  %v4702_v16 = vmax.f32 %v4438_v14, %v4450_v9  ;;  %v13670_v14 = vld [vmem:[%s15073_s3 + $0x1] ss:$4 sm:$0x1f] }
 0x380   : > { %v13649_v56 = vpop.f32.mrf.mxu1  ;;  %v4454_v32 = vpop.f32.mrf.mxu0 }
 0x381   : > { %4150 = vst [vmem:[#allocation2 + $0x30] sm:$0xff] %v4141_v57  ;;  %v13651_v24 = vmul.f32 %v4124_v63, %v4105_v26  ;;  %4166 = vrot.lane.b32.xlu1 %v13640_v29, %s10894_s16  ;;  %v4706_v45 = vmax.f32 %v4442_v39, %v4454_v32 }
 0x382   : > { %v13655_v53 = vpop.f32.mrf.mxu1  ;;  %v4456_v19 = vpop.f32.mrf.mxu0 }
 0x383   : > { %4151 = vst.msk [vmem:[#allocation2 + $0x38] sm:$0xff] %vm898_vm2, %v13651_v24  ;;  %4260 = vrot.lane.b32.xlu0 %v13651_v24, %s10893_s15  ;;  %v4707_v27 = vmax.f32 %v4444_v8, %v4456_v19  ;;  %v4768_v8 = vrot.slane %v13670_v14, %v15199_v13 }
 0x384   : > { %v4561_v22 = vpop.f32.mrf.mxu1  ;;  %v4460_v28 = vpop.f32.mrf.mxu0 }
 0x385   : > { %4172 = vrot.lane.b32.xlu1 %v4141_v57, %s10894_s16  ;;  %v4711_v10 = vmax.f32 %v4701_v40, %v4460_v28  ;;  %v4772_v40 = vrot.slane %v13670_v14, %v15200_v37 }
 0x386   : > { %v4563_v48 = vpop.f32.mrf.mxu1  ;;  %v4462_v63 = vpop.f32.mrf.mxu0 }
 0x387   : > { %4160 = vrot.lane.b32.xlu0 %v13606_v49, %s10894_s16  ;;  %v4712_v11 = vmax.f32 %v4702_v16, %v4462_v63  ;;  %v4703_v16 = vmax.f32 %v13637_v61, %v4561_v22 }
 0x388   : > { %v4567_v43 = vpop.f32.mrf.mxu1  ;;  %v4466_v38 = vpop.f32.mrf.mxu0 }
 0x389   : > { %4258 = vrot.lane.b32.xlu1 %v4141_v57, %s10893_s15  ;;  %v4716_v49 = vmax.f32 %v4706_v45, %v4466_v38  ;;  %v4708_v22 = vmax.f32 %v13649_v56, %v4567_v43 }
 0x38a   : > { %v4569_v47 = vpop.f32.mrf.mxu1  ;;  %v4468_v0 = vpop.f32.mrf.mxu0 }
 0x38b   : > { %4162 = vrot.lane.b32.xlu0 %v13610_v31, %s10894_s16  ;;  %v4717_v19 = vmax.f32 %v4707_v27, %v4468_v0 }
 0x38c   : > { %v4573_v54 = vpop.f32.mrf.mxu1  ;;  %v4472_v12 = vpop.f32.mrf.mxu0 }
 0x38d   : > { %4174 = vrot.lane.b32.xlu1 %v13651_v24, %s10894_s16  ;;  %v4721_v39 = vmax.f32 %v4711_v10, %v4472_v12  ;;  %v4704_v12 = vmax.f32 %v13645_v17, %v4563_v48 }
 0x38e   : > { %v4575_v9 = vpop.f32.mrf.mxu1  ;;  %v4474_v57 = vpop.f32.mrf.mxu0 }
 0x38f   : > { %4168 = vrot.lane.b32.xlu0 %v13614_v36, %s10894_s16  ;;  %v4743_v26 = vadd.f32 %v13573_v59, %v4721_v39  ;;  %v4722_v32 = vmax.f32 %v4712_v11, %v4474_v57  ;;  %v4713_v11 = vmax.f32 %v4703_v16, %v4573_v54 }
 0x390   : > { %v4579_v28 = vpop.f32.mrf.mxu1  ;;  %v4478_v63 = vpop.f32.mrf.mxu0 }
 0x391   : > { %v4753_v38 = vmax.f32 %v4743_v26, 0.0  ;;  %4246 = vrot.lane.b32.xlu1 %v13610_v31, %s10893_s15  ;;  %v4744_v45 = vadd.f32 %v13573_v59, %v4722_v32  ;;  %v4726_v10 = vmax.f32 %v4716_v49, %v4478_v63  ;;  %v4714_v49 = vmax.f32 %v4704_v12, %v4575_v9 }
 0x392   : > { %v4581_v39 = vpop.f32.mrf.mxu1  ;;  %v4480_v44 = vpop.f32.mrf.mxu0  ;;  %v4709_v32 = vmax.f32 %v13655_v53, %v4569_v47  ;;  %v4718_v43 = vmax.f32 %v4708_v22, %v4579_v28  ;;  %v4780_v53 = vrot.slane %v13670_v14, %v15203_v6 }
 0x393   : > { %v13686_v0 = vmul.f32 %v4768_v8, %v4753_v38  ;;  %v4754_v27 = vmax.f32 %v4744_v45, 0.0  ;;  %4254 = vrot.lane.b32.xlu0 %v13614_v36, %s10893_s15  ;;  %v4748_v61 = vadd.f32 %v13583_v3, %v4726_v10  ;;  %v4727_v31 = vmax.f32 %v4717_v19, %v4480_v44 }
 0x394   : > { %v4585_v57 = vpop.f32.mrf.mxu1  ;;  %v13692_v26 = vpop.f32.mrf.mxu0  ;;  %v4776_v36 = vrot.slane %v13670_v14, %v15202_v41  ;;  %v4719_v10 = vmax.f32 %v4709_v32, %v4581_v39 }
 0x395   : > { %4800 = vst [vmem:[#allocation2 + $0x40] sm:$0xff] %v13686_v0  ;;  %v13695_v17 = vmul.f32 %v4772_v40, %v4754_v27  ;;  %v4758_v48 = vmax.f32 %v4748_v61, 0.0  ;;  %v4723_v54 = vmax.f32 %v4713_v11, %v4585_v57  ;;  %v4749_v63 = vadd.f32 %v13583_v3, %v4727_v31 }
 0x396   : > { %v4587_v16 = vpop.f32.mrf.mxu1  ;;  %v4662_v56 = vpop.f32.mrf.mxu0 }
 0x397   : > { %4801 = vst [vmem:[#allocation2 + $0x48] sm:$0xff] %v13695_v17  ;;  %v13702_v44 = vmul.f32 %v4768_v8, %v4758_v48  ;;  %v4745_v9 = vadd.f32 %v13573_v59, %v4723_v54  ;;  %v4724_v19 = vmax.f32 %v4714_v49, %v4587_v16  ;;  %4170 = vrot.lane.b32.xlu0 %v13617_v30, %s10894_s16  ;;  %v4759_v38 = vmax.f32 %v4749_v63, 0.0 }
 0x398   : > { %v4591_v47 = vpop.f32.mrf.mxu1  ;;  %v13709_v45 = vpop.f32.mrf.mxu0 }
 0x399   : > { %4804 = vst [vmem:[#allocation2 + $0x60] sm:$0xff] %v13702_v44  ;;  %v4755_v28 = vmax.f32 %v4745_v9, 0.0  ;;  %v4746_v8 = vadd.f32 %v13573_v59, %v4724_v19  ;;  %v4728_v12 = vmax.f32 %v4718_v43, %v4591_v47  ;;  %v13713_v11 = vmul.f32 %v4772_v40, %v4759_v38 }
 0x39a   : > { %v4593_v27 = vpop.f32.mrf.mxu1  ;;  %v4672_v61 = vpop.f32.mrf.mxu0 }
 0x39b   : > { %v13715_v22 = vmul.f32 %v4776_v36, %v4755_v28  ;;  %v4756_v57 = vmax.f32 %v4746_v8, 0.0  ;;  %v4750_v31 = vadd.f32 %v13583_v3, %v4728_v12  ;;  %v4729_v49 = vmax.f32 %v4719_v10, %v4593_v27  ;;  %4256 = vrot.lane.b32.xlu0 %v13617_v30, %s10893_s15  ;;  %4805 = vst [vmem:[#allocation2 + $0x68] sm:$0xff] %v13713_v11 }
 0x39c   : > { %v5092_v39 = vpop.f32.mrf.mxu1  ;;  %v4705_v48 = vmax.f32 %v4662_v56, %v4672_v61  ;;  %v13721_v54 = vpop.f32.mrf.mxu0  ;;  %v13751_v61 = vrot.slane %v13670_v14, %v15201_v52 }
 0x39d   : > { %4802 = vst [vmem:[#allocation2 + $0x50] sm:$0xff] %v13715_v22  ;;  %v13724_v40 = vmul.f32 %v4780_v53, %v4756_v57  ;;  %v4760_v32 = vmax.f32 %v4750_v31, 0.0  ;;  %v4751_v63 = vadd.f32 %v13583_v3, %v4729_v49  ;;  %4820 = vrot.lane.b32.xlu1 %v13715_v22, %s10894_s16 }
 0x39e   : > { %v5094_v16 = vpop.f32.mrf.mxu1  ;;  %v4682_v43 = vpop.f32.mrf.mxu0 }
 0x39f   : > { %4803 = vst.msk [vmem:[#allocation2 + $0x58] sm:$0xff] %vm898_vm2, %v13724_v40  ;;  %v13731_v30 = vmul.f32 %v4776_v36, %v4760_v32  ;;  %v4761_v56 = vmax.f32 %v4751_v63, 0.0  ;;  %4904 = vrot.lane.b32.xlu0 %v13715_v22, %s10893_s15  ;;  %v4715_v9 = vmax.f32 %v4705_v48, %v4682_v43 }
 0x3a0   : > { %v5098_v19 = vpop.f32.mrf.mxu1 }
 0x3a1   : > { %4806 = vst [vmem:[#allocation2 + $0x70] sm:$0xff] %v13731_v30  ;;  %v13736_v38 = vmul.f32 %v4780_v53, %v4761_v56  ;;  %4822 = vrot.lane.b32.xlu1 %v13724_v40, %s10894_s16  ;;  %v13740_v47 = vpop.f32.mrf.mxu0 }
 0x3a2   : > { %v5100_v10 = vpop.f32.mrf.mxu1 }
 0x3a3   : > { %4807 = vst.msk [vmem:[#allocation2 + $0x78] sm:$0xff] %vm898_vm2, %v13736_v38  ;;  %4916 = vrot.lane.b32.xlu0 %v13736_v38, %s10893_s15  ;;  %v4692_v36 = vpop.f32.mrf.mxu0 }
 0x3a4   : > { %v5104_v28 = vpop.f32.mrf.mxu1  ;;  %v4725_v8 = vmax.f32 %v4715_v9, %v4692_v36 }
 0x3a5   : > { %4906 = vrot.lane.b32.xlu1 %v13724_v40, %s10893_s15 }
 0x3a6   : > { %v4747_v53 = vadd.f32 %v13573_v59, %v4725_v8  ;;  %v5106_v12 = vpop.f32.mrf.mxu1  ;;  %v5205_v27 = vpop.f32.mrf.mxu0  ;;  %v5357_v8 = vmax.f32 %v5092_v39, %v5104_v28  ;;  %v5424_v28 = vrot.slane %v13767_v2, %v15199_v13 }
 0x3a8   : > { %v4757_v57 = vmax.f32 %v4747_v53, 0.0  ;;  %v5110_v31 = vpop.f32.mrf.mxu1  ;;  %v5207_v49 = vpop.f32.mrf.mxu0 }
 0x3a9   : > { %4828 = vrot.lane.b32.xlu1 %v13731_v30, %s10894_s16  ;;  %v5362_v23 = vmax.f32 %v5098_v19, %v5110_v31 }
 0x3aa   : > { %v13756_v48 = vmul.f32 %v13751_v61, %v4757_v57  ;;  %v5112_v32 = vpop.f32.mrf.mxu1  ;;  %v5211_v63 = vpop.f32.mrf.mxu0  ;;  %v5358_v57 = vmax.f32 %v5094_v16, %v5106_v12 }
 0x3ab   : > { %v5363_v12 = vmax.f32 %v5100_v10, %v5112_v32 }
 0x3ac   : > { %v5116_v43 = vpop.f32.mrf.mxu1  ;;  %v13758_v56 = vpop.f32.mrf.mxu0 }
 0x3ad   : > { %4914 = vrot.lane.b32.xlu1 %v13731_v30, %s10893_s15  ;;  %v5367_v25 = vmax.f32 %v5357_v8, %v5116_v43 }
 0x3ae   : > { %v5118_v59 = vpop.f32.mrf.mxu1  ;;  %v5217_v14 = vpop.f32.mrf.mxu0 }
 0x3af   : > { %v5368_v58 = vmax.f32 %v5358_v57, %v5118_v59  ;;  %v5359_v39 = vmax.f32 %v5205_v27, %v5217_v14 }
 0x3b0   : > { %v5122_v9 = vpop.f32.mrf.mxu1  ;;  %v5219_v36 = vpop.f32.mrf.mxu0 }
 0x3b1   : > { %4262 = vrot.lane.b32.xlu1 %v13626_v5, %s10893_s15  ;;  %v5372_v43 = vmax.f32 %v5362_v23, %v5122_v9  ;;  %v5360_v14 = vmax.f32 %v5207_v49, %v5219_v36 }
 0x3b2   : > { %v5124_v53 = vpop.f32.mrf.mxu1  ;;  %v5223_v21 = vpop.f32.mrf.mxu0 }
 0x3b3   : > { %v5364_v57 = vmax.f32 %v5211_v63, %v5223_v21 }
 0x3b4   : > { %v5128_v4 = vpop.f32.mrf.mxu1  ;;  %v5225_v1 = vpop.f32.mrf.mxu0 }
 0x3b5   : > { %v5377_v20 = vmax.f32 %v5367_v25, %v5128_v4  ;;  %4830 = vrot.lane.b32.xlu1 %v13736_v38, %s10894_s16  ;;  %v5373_v4 = vmax.f32 %v5363_v12, %v5124_v53  ;;  %v5365_v21 = vmax.f32 %v13758_v56, %v5225_v1  ;;  %v5432_v1 = vrot.slane %v13767_v2, %v15202_v41 }
 0x3b6   : > { %v5130_v50 = vpop.f32.mrf.mxu1  ;;  %v5229_v16 = vpop.f32.mrf.mxu0 }
 0x3b7   : > { %v5399_v8 = vadd.f32 %v13561_v55, %v5377_v20  ;;  %v5378_v34 = vmax.f32 %v5368_v58, %v5130_v50  ;;  %v5369_v35 = vmax.f32 %v5359_v39, %v5229_v16 }
 0x3b8   : > { %v5134_v19 = vpop.f32.mrf.mxu1  ;;  %v5231_v31 = vpop.f32.mrf.mxu0 }
 0x3b9   : > { %v5409_v25 = vmax.f32 %v5399_v8, 0.0  ;;  %v5400_v59 = vadd.f32 %v13561_v55, %v5378_v34  ;;  %v5382_v27 = vmax.f32 %v5372_v43, %v5134_v19  ;;  %v5370_v34 = vmax.f32 %v5360_v14, %v5231_v31 }
 0x3ba   : > { %v5136_v15 = vpop.f32.mrf.mxu1  ;;  %v5235_v42 = vpop.f32.mrf.mxu0 }
 0x3bb   : > { %v5446_v10 = vmul.f32 %v5424_v28, %v5409_v25  ;;  %v5410_v23 = vmax.f32 %v5400_v59, 0.0  ;;  %v5404_v20 = vadd.f32 %v13567_v51, %v5382_v27  ;;  %v5383_v58 = vmax.f32 %v5373_v4, %v5136_v15 }
 0x3bc   : > { %v10379_v50 = vpop.f32.mrf.mxu1  ;;  %v5237_v32 = vpop.f32.mrf.mxu0  ;;  %v5374_v39 = vmax.f32 %v5364_v57, %v5235_v42  ;;  %v5436_v25 = vrot.slane %v13767_v2, %v15203_v6 }
 0x3bd   : > { %5456 = vst [vmem:[#allocation2 + $0x100] sm:$0xff] %v5446_v10  ;;  %v5447_v9 = vmul.f32 %v5428_v60, %v5410_v23  ;;  %v5414_v46 = vmax.f32 %v5404_v20, 0.0  ;;  %v5405_v53 = vadd.f32 %v13567_v51, %v5383_v58  ;;  %5556 = vrot.lane.b32.xlu1 %v5446_v10, %s10893_s15  ;;  %5472 = vrot.lane.b32.xlu0 %v5446_v10, %s10894_s16 }
 0x3be   : > { %v13782_v49 = vpop.f32.mrf.mxu1  ;;  %v5241_v63 = vpop.f32.mrf.mxu0  ;;  %v4710_v58 = vmax.f32 %v13692_v26, %v13709_v45 }
 0x3bf   : > { %5457 = vst [vmem:[#allocation2 + $0x108] sm:$0xff] %v5447_v9  ;;  %v13784_v36 = vmul.f32 %v5424_v28, %v5414_v46  ;;  %v5415_v15 = vmax.f32 %v5405_v53, 0.0  ;;  %v5379_v16 = vmax.f32 %v5369_v35, %v5241_v63  ;;  %v5375_v46 = vmax.f32 %v5365_v21, %v5237_v32 }
 0x3c0   : > { %v10382_v12 = vpop.f32.mrf.mxu1  ;;  %v5243_v43 = vpop.f32.mrf.mxu0 }
 0x3c1   : > { %5460 = vst [vmem:[#allocation2 + $0x120] sm:$0xff] %v13784_v36  ;;  %v13787_v8 = vmul.f32 %v5428_v60, %v5415_v15  ;;  %v5401_v19 = vadd.f32 %v13561_v55, %v5379_v16  ;;  %5512 = vrot.lane.b32.xlu1 %v5446_v10, %s10895_s24  ;;  %4816 = vrot.lane.b32.xlu0 %v13686_v0, %s10894_s16 }
 0x3c2   : > { %v5380_v56 = vmax.f32 %v5370_v34, %v5243_v43  ;;  %v13795_v42 = vpop.f32.mrf.mxu1  ;;  %v5247_v35 = vpop.f32.mrf.mxu0  ;;  %v5366_v60 = vmax.f32 %v10379_v50, %v10382_v12  ;;  %v4720_v12 = vmax.f32 %v4710_v58, %v13721_v54 }
 0x3c3   : > { %5461 = vst [vmem:[#allocation2 + $0x128] sm:$0xff] %v13787_v8  ;;  %v5411_v28 = vmax.f32 %v5401_v19, 0.0  ;;  %v5384_v31 = vmax.f32 %v5374_v39, %v5247_v35 }
 0x3c4   : > { %v5402_v4 = vadd.f32 %v13561_v55, %v5380_v56  ;;  %v10385_v59 = vpop.f32.mrf.mxu1  ;;  %v5249_v27 = vpop.f32.mrf.mxu0 }
 0x3c5   : > { %v13801_v14 = vmul.f32 %v5432_v1, %v5411_v28  ;;  %v5406_v57 = vadd.f32 %v13567_v51, %v5384_v31  ;;  %4900 = vrot.lane.b32.xlu1 %v13686_v0, %s10893_s15  ;;  %5474 = vrot.lane.b32.xlu0 %v5447_v9, %s10894_s16  ;;  %v5385_v23 = vmax.f32 %v5375_v46, %v5249_v27 }
 0x3c6   : > { %v5412_v10 = vmax.f32 %v5402_v4, 0.0  ;;  %v13807_v20 = vpop.f32.mrf.mxu1  ;;  %v5376_v32 = vmax.f32 %v5366_v60, %v10385_v59  ;;  %v4730_v28 = vmax.f32 %v4720_v12, %v13740_v47 }
 0x3c7   : > { %v5416_v50 = vmax.f32 %v5406_v57, 0.0  ;;  %v5748_v53 = vpop.f32.mrf.mxu0  ;;  %v5407_v34 = vadd.f32 %v13567_v51, %v5385_v23 }
 0x3c8   : > { %v13811_v21 = vmul.f32 %v5436_v25, %v5412_v10  ;;  %v10388_v63 = vpop.f32.mrf.mxu1 }
 0x3c9   : > { %v13814_v15 = vmul.f32 %v5432_v1, %v5416_v50  ;;  %v5386_v39 = vmax.f32 %v5376_v32, %v10388_v63  ;;  %5558 = vrot.lane.b32.xlu1 %v5447_v9, %s10893_s15  ;;  %4818 = vrot.lane.b32.xlu0 %v13695_v17, %s10894_s16  ;;  %v5750_v16 = vpop.f32.mrf.mxu0  ;;  %v5417_v26 = vmax.f32 %v5407_v34, 0.0 }
 0x3ca   : > { %5459 = vst.msk [vmem:[#allocation2 + $0x118] sm:$0xff] %vm898_vm2, %v13811_v21  ;;  %v13821_v45 = vpop.f32.mrf.mxu1 }
 0x3cb   : > { %v5408_v43 = vadd.f32 %v13567_v51, %v5386_v39  ;;  %v5754_v19 = vpop.f32.mrf.mxu0  ;;  %v13825_v1 = vmul.f32 %v5436_v25, %v5417_v26  ;;  %v13837_v51 = vrot.slane %v13767_v2, %v15201_v52  ;;  %v4752_v25 = vadd.f32 %v13583_v3, %v4730_v28 }
 0x3cc   : > { %v5861_v46 = vpop.f32.mrf.mxu1 }
 0x3cd   : > { %5514 = vrot.lane.b32.xlu1 %v5447_v9, %s10895_s24  ;;  %5480 = vrot.lane.b32.xlu0 %v13784_v36, %s10894_s16  ;;  %v5756_v56 = vpop.f32.mrf.mxu0  ;;  %5463 = vst.msk [vmem:[#allocation2 + $0x138] sm:$0xff] %vm898_vm2, %v13825_v1  ;;  %v5418_v54 = vmax.f32 %v5408_v43, 0.0  ;;  %v4762_v10 = vmax.f32 %v4752_v25, 0.0  ;;  %v5361_v25 = vmax.f32 %v13782_v49, %v13795_v42 }
 0x3ce   : > { %v13832_v35 = vpop.f32.mrf.mxu1 }
 0x3cf   : > { %v5760_v60 = vpop.f32.mrf.mxu0  ;;  %v5455_v47 = vmul.f32 %v13837_v51, %v5418_v54  ;;  %v13856_v63 = vmul.f32 %v13751_v61, %v4762_v10  ;;  %v13865_v61 = vld [vmem:[%s15073_s3 + $0x3] ss:$4 sm:$0x1f] }
 0x3d0   : > { %v13839_v31 = vpop.f32.mrf.mxu1  ;;  %v6013_v58 = vmax.f32 %v5748_v53, %v5760_v60  ;;  %v6080_v10 = vrot.slane %v13865_v61, %v15199_v13  ;;  %v6084_v49 = vrot.slane %v13865_v61, %v15200_v37 }
 0x3d1   : > { %4902 = vrot.lane.b32.xlu1 %v13695_v17, %s10893_s15  ;;  %5566 = vrot.lane.b32.xlu0 %v13784_v36, %s10893_s15  ;;  %v5762_v9 = vpop.f32.mrf.mxu0 }
 0x3d2   : > { %v13845_v4 = vpop.f32.mrf.mxu1  ;;  %v6014_v32 = vmax.f32 %v5750_v16, %v5762_v9 }
 0x3d3   : > { %v5766_v59 = vpop.f32.mrf.mxu0 }
 0x3d4   : > { %v5873_v27 = vpop.f32.mrf.mxu1  ;;  %v6018_v26 = vmax.f32 %v5754_v19, %v5766_v59 }
 0x3d5   : > { %5574 = vrot.lane.b32.xlu1 %v5455_v47, %s10893_s15  ;;  %5522 = vrot.lane.b32.xlu0 %v13784_v36, %s10895_s24  ;;  %v5768_v2 = vpop.f32.mrf.mxu0 }
 0x3d6   : > { %v5875_v57 = vpop.f32.mrf.mxu1  ;;  %v6019_v43 = vmax.f32 %v5756_v56, %v5768_v2 }
 0x3d7   : > { %v5772_v23 = vpop.f32.mrf.mxu0 }
 0x3d8   : > { %v5879_v50 = vpop.f32.mrf.mxu1  ;;  %v6023_v36 = vmax.f32 %v6013_v58, %v5772_v23 }
 0x3d9   : > { %5530 = vrot.lane.b32.xlu1 %v5455_v47, %s10895_s24  ;;  %4824 = vrot.lane.b32.xlu0 %v13702_v44, %s10894_s16  ;;  %v5774_v3 = vpop.f32.mrf.mxu0  ;;  %v6015_v47 = vmax.f32 %v5861_v46, %v5873_v27 }
 0x3da   : > { %v5881_v34 = vpop.f32.mrf.mxu1  ;;  %v6024_v28 = vmax.f32 %v6014_v32, %v5774_v3  ;;  %v5371_v3 = vmax.f32 %v5361_v25, %v13807_v20  ;;  %v6016_v32 = vmax.f32 %v13832_v35, %v5875_v57 }
 0x3db   : > { %v5778_v39 = vpop.f32.mrf.mxu0 }
 0x3dc   : > { %v5885_v12 = vpop.f32.mrf.mxu1  ;;  %v6028_v16 = vmax.f32 %v6018_v26, %v5778_v39  ;;  %v5381_v13 = vmax.f32 %v5371_v3, %v13821_v45 }
 0x3dd   : > { %4918 = vrot.lane.b32.xlu1 %v13856_v63, %s10893_s15  ;;  %4910 = vrot.lane.b32.xlu0 %v13702_v44, %s10893_s15  ;;  %v5780_v53 = vpop.f32.mrf.mxu0  ;;  %v6025_v39 = vmax.f32 %v6015_v47, %v5885_v12  ;;  %v6092_v47 = vrot.slane %v13865_v61, %v15203_v6 }
 0x3de   : > { %v5887_v54 = vpop.f32.mrf.mxu1  ;;  %v6029_v56 = vmax.f32 %v6019_v43, %v5780_v53  ;;  %v6088_v53 = vrot.slane %v13865_v61, %v15202_v41  ;;  %v6020_v43 = vmax.f32 %v13839_v31, %v5879_v50 }
 0x3df   : > { %v5784_v60 = vpop.f32.mrf.mxu0  ;;  %v6026_v20 = vmax.f32 %v6016_v32, %v5887_v54 }
 0x3e0   : > { %v6033_v19 = vmax.f32 %v6023_v36, %v5784_v60  ;;  %v5891_v9 = vpop.f32.mrf.mxu1 }
 0x3e1   : > { %5482 = vrot.lane.b32.xlu0 %v13787_v8, %s10894_s16  ;;  %v5786_v59 = vpop.f32.mrf.mxu0  ;;  %v6030_v41 = vmax.f32 %v6020_v43, %v5891_v9 }
 0x3e2   : > { %v6055_v2 = vadd.f32 %v13555_v33, %v6033_v19  ;;  %v6034_v23 = vmax.f32 %v6024_v28, %v5786_v59  ;;  %v5893_v58 = vpop.f32.mrf.mxu1  ;;  %v6021_v19 = vmax.f32 %v13845_v4, %v5881_v34  ;;  %v5403_v4 = vadd.f32 %v13561_v55, %v5381_v13 }
 0x3e3   : > { %v5790_v42 = vpop.f32.mrf.mxu0 }
 0x3e4   : > { %v6065_v46 = vmax.f32 %v6055_v2, 0.0  ;;  %v6056_v27 = vadd.f32 %v13555_v33, %v6034_v23  ;;  %v6038_v26 = vmax.f32 %v6028_v16, %v5790_v42  ;;  %v5897_v36 = vpop.f32.mrf.mxu1  ;;  %v6031_v2 = vmax.f32 %v6021_v19, %v5893_v58 }
 0x3e5   : > { %v6035_v28 = vmax.f32 %v6025_v39, %v5897_v36  ;;  %5568 = vrot.lane.b32.xlu0 %v13787_v8, %s10893_s15  ;;  %v5792_v35 = vpop.f32.mrf.mxu0  ;;  %v5413_v55 = vmax.f32 %v5403_v4, 0.0 }
 0x3e6   : > { %v13885_v37 = vmul.f32 %v6080_v10, %v6065_v46  ;;  %v6066_v57 = vmax.f32 %v6056_v27, 0.0  ;;  %v6060_v12 = vadd.f32 %v13557_v7, %v6038_v26  ;;  %v6039_v60 = vmax.f32 %v6029_v56, %v5792_v35  ;;  %v5899_v16 = vpop.f32.mrf.mxu1 }
 0x3e7   : > { %v6057_v45 = vadd.f32 %v13555_v33, %v6035_v28  ;;  %v6036_v25 = vmax.f32 %v6026_v20, %v5899_v16 }
 0x3e8   : > { %v13890_v31 = vmul.f32 %v6084_v49, %v6066_v57  ;;  %v6070_v50 = vmax.f32 %v6060_v12, 0.0  ;;  %v6061_v54 = vadd.f32 %v13557_v7, %v6039_v60  ;;  %v5903_v59 = vpop.f32.mrf.mxu1 }
 0x3e9   : > { %v6067_v23 = vmax.f32 %v6057_v45, 0.0  ;;  %v6058_v56 = vadd.f32 %v13555_v33, %v6036_v25  ;;  %v6040_v3 = vmax.f32 %v6030_v41, %v5903_v59  ;;  %5524 = vrot.lane.b32.xlu0 %v13787_v8, %s10895_s24 }
 0x3ea   : > { %v13899_v34 = vmul.f32 %v6080_v10, %v6070_v50  ;;  %v6071_v9 = vmax.f32 %v6061_v54, 0.0  ;;  %v5905_v32 = vpop.f32.mrf.mxu1 }
 0x3eb   : > { %v13901_v39 = vmul.f32 %v6088_v53, %v6067_v23  ;;  %v6068_v42 = vmax.f32 %v6058_v56, 0.0  ;;  %v6062_v6 = vadd.f32 %v13557_v7, %v6040_v3  ;;  %v6041_v46 = vmax.f32 %v6031_v2, %v5905_v32 }
 0x3ec   : > { %v13904_v58 = vmul.f32 %v6084_v49, %v6071_v9  ;;  %v5450_v49 = vmul.f32 %v13837_v51, %v5413_v55 }
 0x3ed   : > { %v6105_v27 = vmul.f32 %v6092_v47, %v6068_v42  ;;  %v6072_v26 = vmax.f32 %v6062_v6, 0.0  ;;  %v6063_v36 = vadd.f32 %v13557_v7, %v6041_v46  ;;  %6132 = vrot.lane.b32.xlu1 %v13901_v39, %s10894_s16  ;;  %4826 = vrot.lane.b32.xlu0 %v13713_v11, %s10894_s16 }
 0x3ef   : > { %6115 = vst.msk [vmem:[#allocation2 + $0x158] sm:$0xff] %vm898_vm2, %v6105_v27  ;;  %v13912_v8 = vmul.f32 %v6088_v53, %v6072_v26  ;;  %v6073_v10 = vmax.f32 %v6063_v36, 0.0  ;;  %v4165_v13 = vpop.permute.xlu1 %4164 }
 0x3f1   : > { %v13914_v43 = vmul.f32 %v6092_v47, %v6073_v10  ;;  %5476 = vrot.lane.b32.xlu1 %v13801_v14, %s10894_s16  ;;  %4912 = vrot.lane.b32.xlu0 %v13713_v11, %s10893_s15 }
 0x3f3   : > { %6119 = vst.msk [vmem:[#allocation2 + $0x178] sm:$0xff] %vm898_vm2, %v13914_v43  ;;  %v4167_v20 = vpop.permute.xlu1 %4166 }
 0x3f4   : > { %v13924_v28 = vsel %vm928_vm4, %v4165_v13, %v4167_v20  ;;  %4193 = vst.msk [vmem:[#allocation2 + $0x98] sm:$0xff] %vm898_vm2, %v4167_v20 }
 0x3f5   : > { %v4261_v53 = vpop.permute.xlu0 %4260  ;;  %6134 = vrot.lane.b32.xlu1 %v6105_v27, %s10894_s16  ;;  %5564 = vrot.lane.b32.xlu0 %v5450_v49, %s10893_s15 }
 0x3f7   : > { %v4173_v35 = vpop.permute.xlu1 %4172 }
 0x3f9   : > { %6218 = vrot.lane.b32.xlu1 %v6105_v27, %s10893_s15  ;;  %5520 = vrot.lane.b32.xlu0 %v5450_v49, %s10895_s24  ;;  %v4161_v51 = vpop.permute.xlu0 %4160  ;;  %v10405_v49 = vpop.f32.mrf.mxu0 }
 0x3fb   : > { %v4259_v57 = vpop.permute.xlu1 %4258 }
 0x3fc   : > { %v4270_v12 = vsel %vm1018_vm3, %v4259_v57, %v4261_v53 }
 0x3fd   : > { %4286 = vst [vmem:[#allocation2 + $0x2b0] sm:$0xff] %v4270_v12  ;;  %6174 = vrot.lane.b32.xlu1 %v6105_v27, %s10895_s24  ;;  %4908 = vrot.lane.b32.xlu0 %v13756_v48, %s10893_s15  ;;  %v4163_v60 = vpop.permute.xlu0 %4162 }
 0x3fe   : > { %v13936_v16 = vsel %vm928_vm4, %v4161_v51, %v4163_v60  ;;  %v13939_v19 = vsel %vm928_vm4, %v4163_v60, %v4165_v13 }
 0x3ff   : > { %v4175_v41 = vpop.permute.xlu1 %4174 }
 0x400   : > { %v13942_v45 = vsel %vm928_vm4, %v4173_v35, %v4175_v41  ;;  %4197 = vst.msk [vmem:[#allocation2 + $0xb8] sm:$0xff] %vm898_vm2, %v4175_v41 }
 0x401   : > { %5478 = vrot.lane.b32.xlu1 %v13811_v21, %s10894_s16  ;;  %6216 = vrot.lane.b32.xlu0 %v13901_v39, %s10893_s15  ;;  %v4169_v25 = vpop.permute.xlu0 %4168 }
 0x403   : > { %v13963_v2 = vpop.permute.xlu1 %4246 }
 0x405   : > { %5562 = vrot.lane.b32.xlu1 %v13811_v21, %s10893_s15  ;;  %6172 = vrot.lane.b32.xlu0 %v13901_v39, %s10895_s24  ;;  %v4255_v50 = vpop.permute.xlu0 %4254 }
 0x409   : > { %5518 = vrot.lane.b32.xlu1 %v13811_v21, %s10895_s24  ;;  %5560 = vrot.lane.b32.xlu0 %v13801_v14, %s10893_s15  ;;  %v4171_v54 = vpop.permute.xlu0 %4170 }
 0x40a   : > { %v13958_v47 = vsel %vm928_vm4, %v4169_v25, %v4171_v54  ;;  %v13961_v59 = vsel %vm928_vm4, %v4171_v54, %v4173_v35 }
 0x40d   : > { %6140 = vrot.lane.b32.xlu1 %v13912_v8, %s10894_s16  ;;  %5516 = vrot.lane.b32.xlu0 %v13801_v14, %s10895_s24  ;;  %v4257_v23 = vpop.permute.xlu0 %4256 }
 0x40e   : > { %v4268_v21 = vsel %vm1018_vm3, %v4255_v50, %v4257_v23  ;;  %v4269_v56 = vsel %vm1018_vm3, %v4257_v23, %v4259_v57 }
 0x40f   : > { %4284 = vst [vmem:[#allocation2 + $0x2a0] sm:$0xff] %v4268_v21  ;;  %4285 = vst [vmem:[#allocation2 + $0x2a8] sm:$0xff] %v4269_v56  ;;  %v4821_v3 = vpop.permute.xlu1 %4820 }
 0x411   : > { %6226 = vrot.lane.b32.xlu1 %v13912_v8, %s10893_s15  ;;  %6228 = vrot.lane.b32.xlu0 %v13914_v43, %s10893_s15  ;;  %v13983_v32 = vpop.permute.xlu0 %4904 }
 0x413   : > { %v4823_v4 = vpop.permute.xlu1 %4822 }
 0x414   : > { %v13976_v9 = vsel %vm928_vm4, %v4821_v3, %v4823_v4  ;;  %4849 = vst.msk [vmem:[#allocation2 + $0xd8] sm:$0xff] %vm898_vm2, %v4823_v4 }
 0x415   : > { %6182 = vrot.lane.b32.xlu1 %v13912_v8, %s10895_s24  ;;  %6184 = vrot.lane.b32.xlu0 %v13914_v43, %s10895_s24  ;;  %v14000_v27 = vpop.permute.xlu0 %4916 }
 0x417   : > { %v13985_v42 = vpop.permute.xlu1 %4906 }
 0x418   : > { %v4922_v6 = vsel %vm1018_vm3, %v13983_v32, %v13985_v42 }
 0x419   : > { %4938 = vst [vmem:[#allocation2 + $0x2d0] sm:$0xff] %v4922_v6  ;;  %5484 = vrot.lane.b32.xlu1 %v13814_v15, %s10894_s16  ;;  %5572 = vrot.lane.b32.xlu0 %v13825_v1, %s10893_s15 }
 0x41b   : > { %v13994_v46 = vpop.permute.xlu1 %4828 }
 0x41d   : > { %5570 = vrot.lane.b32.xlu1 %v13814_v15, %s10893_s15  ;;  %5528 = vrot.lane.b32.xlu0 %v13825_v1, %s10895_s24 }
 0x41f   : > { %v14002_v26 = vpop.permute.xlu1 %4914 }
 0x420   : > { %v14007_v36 = vsel %vm1018_vm3, %v14002_v26, %v14000_v27 }
 0x421   : > { %15204 = vst [vmem:[#allocation11_spill] sm:$0xff] %v14007_v36  ;;  %5526 = vrot.lane.b32.xlu1 %v13814_v15, %s10895_s24  ;;  %6128 = vrot.lane.b32.xlu0 %v13885_v37, %s10894_s16 }
 0x423   : > { %v4263_v55 = vpop.permute.xlu1 %4262 }
 0x424   : > { %v4271_v10 = vsel %vm1018_vm3, %v4261_v53, %v4263_v55  ;;  %v5974_v53 = vpop.f32.mrf.mxu0 }
 0x425   : > { %4287 = vst.msk [vmem:[#allocation2 + $0x2b8] sm:$0xff] %vm898_vm2, %v4271_v10  ;;  %6142 = vrot.lane.b32.xlu1 %v13914_v43, %s10894_s16  ;;  %6130 = vrot.lane.b32.xlu0 %v13890_v31, %s10894_s16 }
 0x426   : > { %v10408_v51 = vpop.f32.mrf.mxu0 }
 0x427   : > { %v4831_v13 = vpop.permute.xlu1 %4830  ;;  %v6022_v54 = vmax.f32 %v10405_v49, %v10408_v51 }
 0x428   : > { %v14021_v20 = vsel %vm928_vm4, %v13994_v46, %v4831_v13  ;;  %4853 = vst.msk [vmem:[#allocation2 + $0xf8] sm:$0xff] %vm898_vm2, %v4831_v13  ;;  %v5984_v12 = vpop.f32.mrf.mxu0 }
 0x429   : > { %5486 = vrot.lane.b32.xlu1 %v13825_v1, %s10894_s16  ;;  %6136 = vrot.lane.b32.xlu0 %v13899_v34, %s10894_s16 }
 0x42a   : > { %v10411_v25 = vpop.f32.mrf.mxu0 }
 0x42c   : > { %v5994_v56 = vpop.f32.mrf.mxu0 }
 0x42d   : > { %6212 = vrot.lane.b32.xlu1 %v13885_v37, %s10893_s15  ;;  %6222 = vrot.lane.b32.xlu0 %v13899_v34, %s10893_s15 }
 0x42e   : > { %v10414_v49 = vpop.f32.mrf.mxu0 }
 0x42f   : > { %v5557_v43 = vpop.permute.xlu1 %5556  ;;  %v5473_v35 = vpop.permute.xlu0 %5472 }
 0x431   : > { %6168 = vrot.lane.b32.xlu1 %v13885_v37, %s10895_s24  ;;  %6178 = vrot.lane.b32.xlu0 %v13899_v34, %s10895_s24 }
 0x433   : > { %v5513_v1 = vpop.permute.xlu1 %5512  ;;  %v4817_v57 = vpop.permute.xlu0 %4816 }
 0x435   : > { %6214 = vrot.lane.b32.xlu1 %v13890_v31, %s10893_s15  ;;  %6138 = vrot.lane.b32.xlu0 %v13904_v58, %s10894_s16 }
 0x437   : > { %v4901_v60 = vpop.permute.xlu1 %4900  ;;  %v14040_v41 = vpop.permute.xlu0 %5474 }
 0x438   : > { %v14044_v50 = vsel %vm928_vm4, %v5473_v35, %v14040_v41  ;;  %v14072_v35 = vld [vmem:[#allocation2] sm:$0xff] }
 0x439   : > { %6170 = vrot.lane.b32.xlu1 %v13890_v31, %s10895_s24  ;;  %4248 = vrot.lane.b32.xlu0 %v13634_v62, %s10893_s15  ;;  %v6032_v62 = vmax.f32 %v6022_v54, %v10411_v25 }
 0x43b   : > { %v14050_v23 = vpop.permute.xlu1 %5558  ;;  %v4819_v21 = vpop.permute.xlu0 %4818  ;;  %v6042_v51 = vmax.f32 %v6032_v62, %v10414_v49 }
 0x43c   : > { %v14054_v4 = vsel %vm1018_vm3, %v5557_v43, %v14050_v23  ;;  %v14057_v6 = vsel %vm928_vm4, %v4817_v57, %v4819_v21  ;;  %v14060_v55 = vsel %vm928_vm4, %v4819_v21, %v4821_v3  ;;  %v6017_v3 = vmax.f32 %v5974_v53, %v5984_v12  ;;  %v6004_v62 = vpop.f32.mrf.mxu0 }
 0x43d   : > { %4250 = vrot.lane.b32.xlu1 %v13640_v29, %s10893_s15  ;;  %4252 = vrot.lane.b32.xlu0 %v13631_v18, %s10893_s15 }
 0x43f   : > { %v14066_v10 = vpop.permute.xlu1 %5514  ;;  %v5481_v13 = vpop.permute.xlu0 %5480 }
 0x440   : > { %v14070_v43 = vsel %vm973_vm5, %v5513_v1, %v14066_v10  ;;  %v6027_v1 = vmax.f32 %v6017_v3, %v5994_v56 }
 0x441   : > { %4244 = vrot.lane.b32.xlu1 %v14072_v35, %s10893_s15  ;;  %4868 = vrot.lane.b32.xlu0 %v13713_v11, %s10895_s24  ;;  %v6064_v11 = vadd.f32 %v13557_v7, %v6042_v51 }
 0x443   : > { %v4903_v57 = vpop.permute.xlu1 %4902  ;;  %v5567_v25 = vpop.permute.xlu0 %5566 }
 0x444   : > { %v14079_v54 = vsel %vm1018_vm3, %v4901_v60, %v4903_v57  ;;  %v14083_v21 = vsel %vm1018_vm3, %v4903_v57, %v13983_v32  ;;  %v6074_v32 = vmax.f32 %v6064_v11, 0.0  ;;  %v6037_v60 = vmax.f32 %v6027_v1, %v6004_v62  ;;  %v10460_v11 = vld [vmem:[#allocation2 + $0x30] sm:$0xff] }
 0x445   : > { %15205 = vst [vmem:[#allocation31_spill] sm:$0xff] %v14079_v54  ;;  %15206 = vst [vmem:[#allocation18_spill] sm:$0xff] %v14083_v21  ;;  %4870 = vrot.lane.b32.xlu1 %v13731_v30, %s10895_s24  ;;  %4872 = vrot.lane.b32.xlu0 %v13736_v38, %s10895_s24  ;;  %v6096_v30 = vrot.slane %v13865_v61, %v15201_v52 }
 0x447   : > { %v14090_v53 = vpop.permute.xlu1 %5574  ;;  %v5523_v12 = vpop.permute.xlu0 %5522  ;;  %v6111_v7 = vmul.f32 %v6096_v30, %v6074_v32 }
 0x449   : > { %4874 = vrot.lane.b32.xlu1 %v13856_v63, %s10895_s24  ;;  %4866 = vrot.lane.b32.xlu0 %v13702_v44, %s10895_s24  ;;  %v6059_v63 = vadd.f32 %v13555_v33, %v6037_v60 }
 0x44b   : > { %v14098_v49 = vpop.permute.xlu1 %5530  ;;  %v4825_v38 = vpop.permute.xlu0 %4824  ;;  %v6069_v52 = vmax.f32 %v6059_v63, 0.0  ;;  %v6257_v63 = vld [vmem:[%s15074_s4 + $0x8] sm:$0xff] }
 0x44c   : > { %6464 = vmatprep.mubr.f32.mxu1 %v6257_v63  ;;  %6577 = vmatprep.mubr.f32.mxu0 %v6257_v63 }
 0x44d   : > { %4858 = vrot.lane.b32.xlu1 %v13695_v17, %s10895_s24  ;;  %4860 = vrot.lane.b32.xlu0 %v13715_v22, %s10895_s24  ;;  %v6106_v33 = vmul.f32 %v6096_v30, %v6069_v52 }
 0x44f   : > { %v4919_v56 = vpop.permute.xlu1 %4918  ;;  %v4911_v3 = vpop.permute.xlu0 %4910 }
 0x450   : > { %v4927_v44 = vsel %vm1018_vm3, %v14000_v27, %v4919_v56 }
 0x451   : > { %4943 = vst.msk [vmem:[#allocation2 + $0x2f8] sm:$0xff] %vm898_vm2, %v4927_v44  ;;  %6230 = vrot.lane.b32.xlu1 %v6111_v7, %s10893_s15  ;;  %6224 = vrot.lane.b32.xlu0 %v13904_v58, %s10893_s15  ;;  %v3409_v44 = vld [vmem:[%s15075_s5 + $0x8] sm:$0xff] }
 0x453   : > { %v14111_v17 = vpop.permute.xlu0 %5482 }
 0x454   : > { %v14115_v22 = vsel %vm928_vm4, %v5481_v13, %v14111_v17 }
 0x455   : > { %4862 = vrot.lane.b32.xlu1 %v13724_v40, %s10895_s24  ;;  %6180 = vrot.lane.b32.xlu0 %v13904_v58, %s10895_s24 }
 0x457   : > { %v14121_v61 = vpop.permute.xlu0 %5568 }
 0x458   : > { %v14125_v27 = vsel %vm1018_vm3, %v5567_v25, %v14121_v61 }
 0x459   : > { %6186 = vrot.lane.b32.xlu1 %v6111_v7, %s10895_s24  ;;  %6220 = vrot.lane.b32.xlu0 %v6106_v33, %s10893_s15  ;;  %v10463_v7 = vld [vmem:[#allocation2 + $0x20] sm:$0xff] }
 0x45b   : > { %v14129_v51 = vpop.permute.xlu0 %5524 }
 0x45c   : > { %v14133_v13 = vsel %vm973_vm5, %v5523_v12, %v14129_v51 }
 0x45d   : > { %4856 = vrot.lane.b32.xlu1 %v13686_v0, %s10895_s24  ;;  %4864 = vrot.lane.b32.xlu0 %v13756_v48, %s10895_s24 }
 0x45f   : > { %v14139_v40 = vpop.permute.xlu1 %6132  ;;  %v4827_v57 = vpop.permute.xlu0 %4826 }
 0x460   : > { %v14142_v25 = vsel %vm928_vm4, %v4825_v38, %v4827_v57  ;;  %v14146_v1 = vsel %vm928_vm4, %v4827_v57, %v13994_v46  ;;  %v10461_v46 = vld [vmem:[#allocation2 + $0x28] sm:$0xff] }
 0x461   : > { %4214 = vrot.lane.b32.xlu1 %v10460_v11, %s10895_s24  ;;  %6176 = vrot.lane.b32.xlu0 %v6106_v33, %s10895_s24 }
 0x463   : > { %v5477_v12 = vpop.permute.xlu1 %5476  ;;  %v4913_v0 = vpop.permute.xlu0 %4912 }
 0x464   : > { %v14152_v48 = vsel %vm928_vm4, %v14040_v41, %v5477_v12  ;;  %v14155_v62 = vsel %vm1018_vm3, %v4911_v3, %v4913_v0  ;;  %v14159_v32 = vsel %vm1018_vm3, %v4913_v0, %v14002_v26  ;;  %v10462_v41 = vld [vmem:[#allocation2 + $0x8] sm:$0xff] }
 0x465   : > { %15207 = vst [vmem:[#allocation13_spill] sm:$0xff] %v14155_v62  ;;  %4218 = vrot.lane.b32.xlu1 %v13626_v5, %s10895_s24  ;;  %4212 = vrot.lane.b32.xlu0 %v10461_v46, %s10895_s24 }
 0x467   : > { %v6135_v30 = vpop.permute.xlu1 %6134  ;;  %v5565_v60 = vpop.permute.xlu0 %5564 }
 0x468   : > { %v14166_v38 = vsel %vm928_vm4, %v14139_v40, %v6135_v30  ;;  %6161 = vst.msk [vmem:[#allocation2 + $0x1d8] sm:$0xff] %vm898_vm2, %v6135_v30 }
 0x469   : > { %4202 = vrot.lane.b32.xlu1 %v10462_v41, %s10895_s24  ;;  %4216 = vrot.lane.b32.xlu0 %v13651_v24, %s10895_s24 }
 0x46b   : > { %v14172_v26 = vpop.permute.xlu1 %6218  ;;  %v5521_v5 = vpop.permute.xlu0 %5520 }
 0x46d   : > { %4206 = vrot.lane.b32.xlu1 %v13640_v29, %s10895_s24  ;;  %4210 = vrot.lane.b32.xlu0 %v10463_v7, %s10895_s24  ;;  %v10464_v29 = vld [vmem:[#allocation2 + $0x10] sm:$0xff] }
 0x46f   : > { %v14180_v56 = vpop.permute.xlu1 %6174  ;;  %v4909_v3 = vpop.permute.xlu0 %4908 }
 0x470   : > { %v4923_v24 = vsel %vm1018_vm3, %v13985_v42, %v4909_v3 }
 0x471   : > { %4939 = vst.msk [vmem:[#allocation2 + $0x2d8] sm:$0xff] %vm898_vm2, %v4923_v24  ;;  %4200 = vrot.lane.b32.xlu1 %v14072_v35, %s10895_s24  ;;  %4204 = vrot.lane.b32.xlu0 %v10464_v29, %s10895_s24  ;;  %v3408_v35 = vld [vmem:[%s15075_s5] sm:$0xff] }
 0x473   : > { %v5479_v52 = vpop.permute.xlu1 %5478  ;;  %v14191_v33 = vpop.permute.xlu0 %6216 }
 0x474   : > { %v14194_v57 = vsel %vm928_vm4, %v5477_v12, %v5479_v52  ;;  %5505 = vst.msk [vmem:[#allocation2 + $0x198] sm:$0xff] %vm898_vm2, %v5479_v52  ;;  %v14200_v42 = vsel %vm1018_vm3, %v14191_v33, %v14172_v26 }
 0x475   : > { %3417 = vperm.xlu1 %10456, %v3409_v44   ;;  %4208 = vrot.lane.b32.xlu0 %v13631_v18, %s10895_s24 }
 0x477   : > { %v5563_v11 = vpop.permute.xlu1 %5562  ;;  %v14207_v0 = vpop.permute.xlu0 %6172 }
 0x478   : > { %v5579_v12 = vsel %vm1018_vm3, %v5563_v11, %v5565_v60  ;;  %v14213_v46 = vsel %vm973_vm5, %v14207_v0, %v14180_v56 }
 0x479   : > { %15208 = vst [vmem:[#allocation9_spill] sm:$0xff] %v14213_v46  ;;  %5595 = vst.msk [vmem:[#allocation2 + $0x398] sm:$0xff] %vm898_vm2, %v5579_v12  ;;  %6659 = vperm.xlu1 %10456, %v3409_v44   ;;  %3412 = vperm.xlu0 %10455, %v3408_v35  }
 0x47b   : > { %v5519_v30 = vpop.permute.xlu1 %5518  ;;  %v5561_v18 = vpop.permute.xlu0 %5560 }
 0x47c   : > { %v5535_v41 = vsel %vm973_vm5, %v5519_v30, %v5521_v5  ;;  %v14219_v7 = vsel %vm1018_vm3, %v14050_v23, %v5561_v18  ;;  %v14222_v63 = vsel %vm1018_vm3, %v5561_v18, %v5563_v11 }
 0x47d   : > { %15209 = vst [vmem:[#allocation10_spill] sm:$0xff] %v14222_v63  ;;  %5551 = vst.msk [vmem:[#allocation2 + $0x318] sm:$0xff] %vm898_vm2, %v5535_v41  ;;  %6654 = vperm.xlu0 %10455, %v3408_v35   ;;  %v6319_v63 = vld [vmem:[#allocation2 + $0x178] sm:$0xff] }
 0x47f   : > { %v6141_v60 = vpop.permute.xlu1 %6140  ;;  %v5517_v3 = vpop.permute.xlu0 %5516 }
 0x480   : > { %v14227_v24 = vsel %vm973_vm5, %v14066_v10, %v5517_v3  ;;  %v14230_v29 = vsel %vm973_vm5, %v5517_v3, %v5519_v30 }
 0x481   : > { %15210 = vst [vmem:[#allocation12_spill] sm:$0xff] %v14230_v29 }
 0x483   : > { %v14232_v5 = vpop.permute.xlu1 %6226  ;;  %v14234_v44 = vpop.permute.xlu0 %6228 }
 0x484   : > { %v14239_v23 = vsel %vm1018_vm3, %v14232_v5, %v14234_v44 }
 0x487   : > { %v14241_v52 = vpop.permute.xlu1 %6182  ;;  %v14243_v35 = vpop.permute.xlu0 %6184 }
 0x488   : > { %v14248_v10 = vsel %vm973_vm5, %v14241_v52, %v14243_v35 }
 0x489   : > { %15211 = vst [vmem:[#allocation16_spill] sm:$0xff] %v14248_v10 }
 0x48b   : > { %v5485_v11 = vpop.permute.xlu1 %5484  ;;  %v5573_v12 = vpop.permute.xlu0 %5572 }
 0x48c   : > { %v14252_v30 = vsel %vm928_vm4, %v14111_v17, %v5485_v11  ;;  %v5583_v18 = vsel %vm1018_vm3, %v5573_v12, %v14090_v53 }
 0x48d   : > { %5599 = vst.msk [vmem:[#allocation2 + $0x3b8] sm:$0xff] %vm898_vm2, %v5583_v18 }
 0x48f   : > { %v5571_v41 = vpop.permute.xlu1 %5570  ;;  %v5529_v3 = vpop.permute.xlu0 %5528 }
 0x490   : > { %v14259_v36 = vsel %vm1018_vm3, %v14121_v61, %v5571_v41  ;;  %v14262_v29 = vsel %vm1018_vm3, %v5571_v41, %v5573_v12  ;;  %v5539_v46 = vsel %vm973_vm5, %v5529_v3, %v14098_v49 }
 0x491   : > { %5555 = vst.msk [vmem:[#allocation2 + $0x338] sm:$0xff] %vm898_vm2, %v5539_v46 }
 0x493   : > { %v5527_v17 = vpop.permute.xlu1 %5526  ;;  %v6129_v54 = vpop.permute.xlu0 %6128 }
 0x494   : > { %v14269_v53 = vsel %vm973_vm5, %v14129_v51, %v5527_v17  ;;  %v14272_v18 = vsel %vm973_vm5, %v5527_v17, %v5529_v3 }
 0x495   : > { %15212 = vst [vmem:[#allocation17_spill] sm:$0xff] %v14272_v18  ;;  %v6331_v18 = vld [vmem:[#allocation2 + $0x1d8] sm:$0xff] }
 0x497   : > { %v6143_v10 = vpop.permute.xlu1 %6142  ;;  %v6131_v61 = vpop.permute.xlu0 %6130 }
 0x498   : > { %v6149_v21 = vsel %vm928_vm4, %v6141_v60, %v6143_v10  ;;  %6165 = vst.msk [vmem:[#allocation2 + $0x1f8] sm:$0xff] %vm898_vm2, %v6143_v10  ;;  %v6144_v12 = vsel %vm928_vm4, %v6129_v54, %v6131_v61  ;;  %v6145_v49 = vsel %vm928_vm4, %v6131_v61, %v14139_v40  ;;  %v6323_v61 = vld [vmem:[#allocation2 + $0x198] sm:$0xff] }
 0x49b   : > { %v5487_v46 = vpop.permute.xlu1 %5486  ;;  %v6137_v41 = vpop.permute.xlu0 %6136 }
 0x49c   : > { %v5493_v62 = vsel %vm928_vm4, %v5485_v11, %v5487_v46  ;;  %5509 = vst.msk [vmem:[#allocation2 + $0x1b8] sm:$0xff] %vm898_vm2, %v5487_v46 }
 0x49f   : > { %v6213_v51 = vpop.permute.xlu1 %6212  ;;  %v14281_v3 = vpop.permute.xlu0 %6222  ;;  %v6335_v17 = vld [vmem:[#allocation2 + $0x1f8] sm:$0xff] }
 0x4a0   : > { %6513 = vmatprep.subr.mxu0 %v6335_v17 }
 0x4a1   : > { %6514 = vmatpush1.msra.mxu0 %v6149_v21 }
 0x4a2   : > { %6515 = vmatprep.subr.mxu0 %v6331_v18 }
 0x4a3   : > { %6516 = vmatpush1.msra.mxu0 %v14166_v38  ;;  %v6169_v54 = vpop.permute.xlu1 %6168  ;;  %v14284_v10 = vpop.permute.xlu0 %6178  ;;  %v6327_v40 = vld [vmem:[#allocation2 + $0x1b8] sm:$0xff] }
 0x4a4   : > { %6517 = vmatprep.subr.mxu0 %v6327_v40  ;;  %v6311_v40 = vld [vmem:[#allocation2 + $0x138] sm:$0xff] }
 0x4a5   : > { %6518 = vmatpush1.msra.mxu0 %v5493_v62  ;;  %v6315_v62 = vld [vmem:[#allocation2 + $0x158] sm:$0xff] }
 0x4a6   : > { %6519 = vmatprep.subr.mxu0 %v6323_v61 }
 0x4a7   : > { %6520 = vmatpush1.msra.mxu0 %v14194_v57  ;;  %v6215_v11 = vpop.permute.xlu1 %6214  ;;  %v6139_v46 = vpop.permute.xlu0 %6138 }
 0x4a8   : > { %v14288_v17 = vsel %vm1018_vm3, %v6213_v51, %v6215_v11  ;;  %v14292_v21 = vsel %vm1018_vm3, %v6215_v11, %v14191_v33  ;;  %v6147_v38 = vsel %vm928_vm4, %v6137_v41, %v6139_v46  ;;  %v6148_v18 = vsel %vm928_vm4, %v6139_v46, %v6141_v60  ;;  %6521 = vmatprep.subr.mxu0 %v6319_v63  ;;  %v6283_v11 = vld [vmem:[#allocation2 + $0x58] sm:$0xff] }
 0x4a9   : > { %6522 = vmatpush1.msra.mxu0 %v13912_v8  ;;  %6400 = vmatprep.subr.mxu1 %v6148_v18  ;;  %v6279_v18 = vld [vmem:[#allocation2 + $0x38] sm:$0xff] }
 0x4aa   : > { %6523 = vmatprep.subr.mxu0 %v6315_v62  ;;  %6401 = vmatpush1.msra.mxu1 %v6147_v38 }
 0x4ab   : > { %6524 = vmatpush1.msra.mxu0 %v13901_v39  ;;  %v6171_v57 = vpop.permute.xlu1 %6170  ;;  %v4249_v51 = vpop.permute.xlu0 %4248  ;;  %6402 = vmatprep.subr.mxu1 %v6145_v49  ;;  %v6307_v39 = vld [vmem:[#allocation2 + $0x118] sm:$0xff] }
 0x4ac   : > { %v14299_v33 = vsel %vm973_vm5, %v6169_v54, %v6171_v57  ;;  %v14303_v41 = vsel %vm973_vm5, %v6171_v57, %v14207_v0  ;;  %v14307_v8 = vsel %vm1018_vm3, %v13963_v2, %v4249_v51  ;;  %6525 = vmatprep.subr.mxu0 %v6311_v40  ;;  %6403 = vmatpush1.msra.mxu1 %v6144_v12  ;;  %v6303_v0 = vld [vmem:[#allocation2 + $0xf8] sm:$0xff]  ;;  %v6304_v54 = vld [vmem:[#allocation2 + $0x100] sm:$0xff] }
 0x4ad   : > { %6526 = vmatpush1.msra.mxu0 %v13814_v15  ;;  %6404 = vmatprep.subr.mxu1 %v14252_v30  ;;  %v6299_v15 = vld [vmem:[#allocation2 + $0xd8] sm:$0xff] }
 0x4ae   : > { %6527 = vmatprep.subr.mxu0 %v6307_v39  ;;  %6405 = vmatpush1.msra.mxu1 %v14115_v22 }
 0x4af   : > { %6528 = vmatpush1.msra.mxu0 %v13801_v14  ;;  %v4251_v63 = vpop.permute.xlu1 %4250  ;;  %v4253_v60 = vpop.permute.xlu0 %4252  ;;  %6406 = vmatprep.subr.mxu1 %v14152_v48  ;;  %v6295_v48 = vld [vmem:[#allocation2 + $0xb8] sm:$0xff] }
 0x4b0   : > { %v14315_v49 = vsel %vm1018_vm3, %v4249_v51, %v4251_v63  ;;  %v4267_v12 = vsel %vm1018_vm3, %v4251_v63, %v4253_v60  ;;  %6529 = vmatprep.subr.mxu0 %v6303_v0  ;;  %6407 = vmatpush1.msra.mxu1 %v14044_v50  ;;  %v6278_v51 = vld [vmem:[#allocation2 + $0x30] sm:$0xff]  ;;  %v6284_v63 = vld [vmem:[#allocation2 + $0x60] sm:$0xff]  ;;  %v6281_v60 = vld [vmem:[#allocation2 + $0x48] sm:$0xff] }
 0x4b1   : > { %4283 = vst.msk [vmem:[#allocation2 + $0x298] sm:$0xff] %vm898_vm2, %v4267_v12  ;;  %6530 = vmatpush1.msra.mxu0 %v14021_v20  ;;  %6408 = vmatprep.subr.mxu1 %v13904_v58  ;;  %v6309_v20 = vld [vmem:[#allocation2 + $0x128] sm:$0xff]  ;;  %v6308_v58 = vld [vmem:[#allocation2 + $0x120] sm:$0xff] }
 0x4b2   : > { %6531 = vmatprep.subr.mxu0 %v6299_v15  ;;  %6409 = vmatpush1.msra.mxu1 %v13899_v34  ;;  %v6291_v34 = vld [vmem:[#allocation2 + $0x98] sm:$0xff]  ;;  %v6280_v12 = vld [vmem:[#allocation2 + $0x40] sm:$0xff] }
 0x4b3   : > { %6532 = vmatpush1.msra.mxu0 %v13976_v9  ;;  %v4245_v14 = vpop.permute.xlu1 %4244  ;;  %v4869_v22 = vpop.permute.xlu0 %4868  ;;  %6410 = vmatprep.subr.mxu1 %v13890_v31  ;;  %v6305_v9 = vld [vmem:[#allocation2 + $0x108] sm:$0xff] }
 0x4b4   : > { %v14327_v50 = vsel %vm1018_vm3, %v4245_v14, %v13963_v2  ;;  %6533 = vmatprep.subr.mxu0 %v6295_v48  ;;  %6411 = vmatpush1.msra.mxu1 %v13885_v37  ;;  %v6287_v2 = vld [vmem:[#allocation2 + $0x78] sm:$0xff]  ;;  %v6276_v14 = vld [vmem:[#allocation2 + $0x20] sm:$0xff] }
 0x4b5   : > { %4280 = vst [vmem:[#allocation2 + $0x280] sm:$0xff] %v14327_v50  ;;  %6534 = vmatpush1.msra.mxu0 %v13942_v45  ;;  %6412 = vmatprep.subr.mxu1 %v6309_v20  ;;  %v6286_v45 = vld [vmem:[#allocation2 + $0x70] sm:$0xff] }
 0x4b6   : > { %6535 = vmatprep.subr.mxu0 %v6291_v34  ;;  %6413 = vmatpush1.msra.mxu1 %v6308_v58  ;;  %v6272_v34 = vld [vmem:[#allocation2] sm:$0xff] }
 0x4b7   : > { %6536 = vmatpush1.msra.mxu0 %v13924_v28  ;;  %v4871_v31 = vpop.permute.xlu1 %4870  ;;  %v4873_v30 = vpop.permute.xlu0 %4872  ;;  %6414 = vmatprep.subr.mxu1 %v6305_v9  ;;  %v6282_v28 = vld [vmem:[#allocation2 + $0x50] sm:$0xff] }
 0x4b8   : > { %v14334_v37 = vsel %vm973_vm5, %v4869_v22, %v4871_v31  ;;  %v14337_v61 = vsel %vm973_vm5, %v4871_v31, %v4873_v30  ;;  %6537 = vmatprep.subr.mxu0 %v6287_v2  ;;  %6415 = vmatpush1.msra.mxu1 %v6304_v54 }
 0x4b9   : > { %6538 = vmatpush1.msra.mxu0 %v6286_v45  ;;  %6416 = vmatprep.subr.mxu1 %v14146_v1  ;;  %v6275_v1 = vld [vmem:[#allocation2 + $0x18] sm:$0xff] }
 0x4ba   : > { %6539 = vmatprep.subr.mxu0 %v6283_v11  ;;  %6417 = vmatpush1.msra.mxu1 %v14142_v25  ;;  %v6274_v25 = vld [vmem:[#allocation2 + $0x10] sm:$0xff]  ;;  %v15216_v11 = vld [vmem:[#allocation16_spill] sm:$0xff] }
 0x4bb   : > { %6540 = vmatpush1.msra.mxu0 %v6282_v28  ;;  %v4875_v46 = vpop.permute.xlu1 %4874  ;;  %v4867_v38 = vpop.permute.xlu0 %4866  ;;  %6418 = vmatprep.subr.mxu1 %v14060_v55  ;;  %v15215_v45 = vld [vmem:[#allocation18_spill] sm:$0xff]  ;;  %v15217_v28 = vld [vmem:[#allocation31_spill] sm:$0xff] }
 0x4bc   : > { %v4883_v62 = vsel %vm973_vm5, %v4873_v30, %v4875_v46  ;;  %v14344_v57 = vsel %vm973_vm5, %v4867_v38, %v4869_v22  ;;  %6541 = vmatprep.subr.mxu0 %v6279_v18  ;;  %6419 = vmatpush1.msra.mxu1 %v14057_v6  ;;  %v6285_v6 = vld [vmem:[#allocation2 + $0x68] sm:$0xff]  ;;  %v6356_v46 = vld [vmem:[#allocation2 + $0x2a0] sm:$0xff]  ;;  %v6375_v18 = vld [vmem:[#allocation2 + $0x338] sm:$0xff] }
 0x4bd   : > { %4899 = vst.msk [vmem:[#allocation2 + $0x278] sm:$0xff] %vm898_vm2, %v4883_v62  ;;  %6542 = vmatpush1.msra.mxu0 %v6278_v51  ;;  %6420 = vmatprep.subr.mxu1 %v13961_v59  ;;  %v6273_v22 = vld [vmem:[#allocation2 + $0x8] sm:$0xff] }
 0x4be   : > { %6543 = vmatprep.subr.mxu0 %v6275_v1  ;;  %6421 = vmatpush1.msra.mxu1 %v13958_v47  ;;  %v15218_v38 = vld [vmem:[#allocation9_spill] sm:$0xff] }
 0x4bf   : > { %6544 = vmatpush1.msra.mxu0 %v6274_v25  ;;  %v4859_v55 = vpop.permute.xlu1 %4858  ;;  %v4861_v40 = vpop.permute.xlu0 %4860  ;;  %6422 = vmatprep.subr.mxu1 %v13939_v19  ;;  %v15219_v25 = vld [vmem:[#allocation17_spill] sm:$0xff] }
 0x4c0   : > { %v14352_v39 = vsel %vm973_vm5, %v4859_v55, %v4861_v40  ;;  %6423 = vmatpush1.msra.mxu1 %v13936_v16  ;;  %v6277_v16 = vld [vmem:[#allocation2 + $0x28] sm:$0xff] }
 0x4c1   : > { %6424 = vmatprep.subr.mxu1 %v6285_v6  ;;  %v6367_v6 = vld [vmem:[#allocation2 + $0x2f8] sm:$0xff] }
 0x4c2   : > { %6425 = vmatpush1.msra.mxu1 %v6284_v63 }
 0x4c3   : > { %v6231_v59 = vpop.permute.xlu1 %6230  ;;  %v6225_v0 = vpop.permute.xlu0 %6224  ;;  %6426 = vmatprep.subr.mxu1 %v6281_v60 }
 0x4c4   : > { %v6239_v47 = vsel %vm1018_vm3, %v14234_v44, %v6231_v59  ;;  %v6236_v19 = vsel %vm1018_vm3, %v14281_v3, %v6225_v0  ;;  %v6237_v15 = vsel %vm1018_vm3, %v6225_v0, %v14232_v5  ;;  %6427 = vmatpush1.msra.mxu1 %v6280_v12  ;;  %v6363_v12 = vld [vmem:[#allocation2 + $0x2d8] sm:$0xff] }
 0x4c5   : > { %6255 = vst.msk [vmem:[#allocation2 + $0x3f8] sm:$0xff] %vm898_vm2, %v6239_v47  ;;  %6428 = vmatprep.subr.mxu1 %v6277_v16 }
 0x4c6   : > { %6429 = vmatpush1.msra.mxu1 %v6276_v14  ;;  %v6355_v14 = vld [vmem:[#allocation2 + $0x298] sm:$0xff] }
 0x4c7   : > { %v4863_v48 = vpop.permute.xlu1 %4862  ;;  %v6181_v20 = vpop.permute.xlu0 %6180  ;;  %6430 = vmatprep.subr.mxu1 %v6273_v22  ;;  %v10896_v22 = vmov 1966171168  }
 0x4c8   : > { %v14363_v44 = vsel %vm973_vm5, %v4861_v40, %v4863_v48  ;;  %v6192_v3 = vsel %vm973_vm5, %v14284_v10, %v6181_v20  ;;  %v6193_v5 = vsel %vm973_vm5, %v6181_v20, %v14241_v52  ;;  %6431 = vmatpush1.msra.mxu1 %v6272_v34  ;;  %v15220_v40 = vld [vmem:[#allocation12_spill] sm:$0xff]  ;;  %v6351_v20 = vld [vmem:[#allocation2 + $0x278] sm:$0xff]  ;;  %v6258_v34 = vld [vmem:[%s15074_s4 + $0x10] sm:$0xff] }
 0x4c9   : > { %6432 = vmatprep.subr.mxu1 %v6237_v15  ;;  %v6259_v15 = vld [vmem:[%s15074_s4 + $0x18] sm:$0xff] }
 0x4ca   : > { %6433 = vmatpush2.msra.mxu1 %v6236_v19  ;;  %v6358_v19 = vld [vmem:[#allocation2 + $0x2b0] sm:$0xff] }
 0x4cb   : > { %v6187_v58 = vpop.permute.xlu1 %6186  ;;  %v6221_v9 = vpop.permute.xlu0 %6220  ;;  %6434 = vmatprep.subr.mxu1 %v14292_v21 }
 0x4cc   : > { %v6195_v31 = vsel %vm973_vm5, %v14243_v35, %v6187_v58  ;;  %v6235_v30 = vsel %vm1018_vm3, %v14172_v26, %v6221_v9  ;;  %v6399_v2 = vld [vmem:[#allocation2 + $0x3f8] sm:$0xff]  ;;  %6435 = vmatpush2.msra.mxu1 %v14288_v17  ;;  %v6260_v9 = vld [vmem:[%s15074_s4 + $0x20] sm:$0xff] }
 0x4cd   : > { %6211 = vst.msk [vmem:[#allocation2 + $0x378] sm:$0xff] %vm898_vm2, %v6195_v31  ;;  %6251 = vst.msk [vmem:[#allocation2 + $0x3d8] sm:$0xff] %vm898_vm2, %v6235_v30  ;;  %6545 = vmatprep.subr.mxu0 %v6399_v2  ;;  %6436 = vmatprep.subr.mxu1 %v14259_v36  ;;  %v15222_v2 = vld [vmem:[#allocation14_spill] sm:$0xff] }
 0x4ce   : > { %6546 = vmatpush2.msra.mxu0 %v14239_v23  ;;  %6437 = vmatpush2.msra.mxu1 %v14125_v27 }
 0x4cf   : > { %v4857_v52 = vpop.permute.xlu1 %4856  ;;  %v4865_v10 = vpop.permute.xlu0 %4864  ;;  %6438 = vmatprep.subr.mxu1 %v14219_v7 }
 0x4d0   : > { %v14382_v26 = vsel %vm973_vm5, %v4857_v52, %v4859_v55  ;;  %v4879_v35 = vsel %vm973_vm5, %v4863_v48, %v4865_v10  ;;  %6439 = vmatpush2.msra.mxu1 %v14054_v4  ;;  %v6391_v4 = vld [vmem:[#allocation2 + $0x3b8] sm:$0xff]  ;;  %v3449_v48 = vunpack.c.l.s4 %v10896_v22 }
 0x4d1   : > { %4895 = vst.msk [vmem:[#allocation2 + $0x258] sm:$0xff] %vm898_vm2, %v4879_v35  ;;  %6440 = vmatprep.subr.mxu1 %v6193_v5  ;;  %v6371_v55 = vld [vmem:[#allocation2 + $0x318] sm:$0xff] }
 0x4d2   : > { %6441 = vmatpush2.msra.mxu1 %v6192_v3  ;;  %v6261_v3 = vld [vmem:[%s15074_s4 + $0x28] sm:$0xff]  ;;  %v3450_v58 = vunpack.c.0.s8 %v3449_v48  ;;  %v15223_v52 = vld [vmem:[#allocation26_spill] sm:$0xff] }
 0x4d3   : > { %v4215_v36 = vpop.permute.xlu1 %4214  ;;  %v6177_v17 = vpop.permute.xlu0 %6176  ;;  %6442 = vmatprep.subr.mxu1 %v14303_v41  ;;  %v15214_v41 = vld [vmem:[#allocation13_spill] sm:$0xff]  ;;  %v15224_v10 = vmax.f32 %v15222_v2, %v15223_v52  ;;  %v15226_v35 = vld [vmem:[#allocation30_spill] sm:$0xff] }
 0x4d4   : > { %v6191_v27 = vsel %vm973_vm5, %v14180_v56, %v6177_v17  ;;  %v6395_v23 = vld [vmem:[#allocation2 + $0x3d8] sm:$0xff]  ;;  %6443 = vmatpush2.msra.mxu1 %v14299_v33 }
 0x4d5   : > { %6207 = vst.msk [vmem:[#allocation2 + $0x358] sm:$0xff] %vm898_vm2, %v6191_v27  ;;  %6547 = vmatprep.subr.mxu0 %v6395_v23  ;;  %6444 = vmatprep.subr.mxu1 %v14269_v53  ;;  %v6387_v33 = vld [vmem:[#allocation2 + $0x398] sm:$0xff]  ;;  %v15228_v27 = vld [vmem:[#allocation32_spill] sm:$0xff]  ;;  %v15229_v23 = vld [vmem:[#allocation25_spill] sm:$0xff] }
 0x4d6   : > { %6548 = vmatpush2.msra.mxu0 %v14200_v42  ;;  %6445 = vmatpush2.msra.mxu1 %v14133_v13  ;;  %v15213_v53 = vld [vmem:[#allocation10_spill] sm:$0xff] }
 0x4d7   : > { %v4219_v7 = vpop.permute.xlu1 %4218  ;;  %6549 = vmatprep.subr.mxu0 %v6391_v4  ;;  %v4213_v21 = vpop.permute.xlu0 %4212  ;;  %6446 = vmatprep.subr.mxu1 %v14227_v24  ;;  %v6383_v42 = vld [vmem:[#allocation2 + $0x378] sm:$0xff]  ;;  %v15230_v4 = vmax.f32 %v15228_v27, %v15229_v23 }
 0x4d8   : > { %v4225_v56 = vsel %vm973_vm5, %v4213_v21, %v4215_v36  ;;  %6550 = vmatpush2.msra.mxu0 %v14262_v29  ;;  %6447 = vmatpush2.msra.mxu1 %v14070_v43  ;;  %v6347_v5 = vld [vmem:[#allocation2 + $0x258] sm:$0xff] }
 0x4d9   : > { %6551 = vmatprep.subr.mxu0 %v6387_v33  ;;  %6448 = vmatprep.subr.mxu1 %v14159_v32  ;;  %v6357_v32 = vld [vmem:[#allocation2 + $0x2a8] sm:$0xff] }
 0x4da   : > { %6552 = vmatpush2.msra.mxu0 %v15213_v53  ;;  %6449 = vmatpush2.msra.mxu1 %v15214_v41 }
 0x4db   : > { %v4203_v13 = vpop.permute.xlu1 %4202  ;;  %6553 = vmatprep.subr.mxu0 %v6383_v42  ;;  %v4217_v54 = vpop.permute.xlu0 %4216  ;;  %6450 = vmatprep.subr.mxu1 %v15215_v45  ;;  %v15234_v42 = vld [vmem:[#allocation8_spill] sm:$0xff] }
 0x4dc   : > { %v14404_v24 = vsel %vm973_vm5, %v4215_v36, %v4217_v54  ;;  %v4227_v29 = vsel %vm973_vm5, %v4217_v54, %v4219_v7  ;;  %6554 = vmatpush2.msra.mxu0 %v15216_v11  ;;  %v6379_v43 = vld [vmem:[#allocation2 + $0x358] sm:$0xff]  ;;  %6451 = vmatpush2.msra.mxu1 %v15217_v28  ;;  %v14461_v41 = vsub.s32 %v3450_v58, %v15234_v42  ;;  %v15235_v11 = vlaneseq }
 0x4dd   : > { %4243 = vst.msk [vmem:[#allocation2 + $0x238] sm:$0xff] %vm898_vm2, %v4227_v29  ;;  %6555 = vmatprep.subr.mxu0 %v6379_v43  ;;  %6452 = vmatprep.subr.mxu1 %v6357_v32  ;;  %v14466_v29 = vld [vmem:[%s15074_s4 + $0x30] sm:$0xff] }
 0x4de   : > { %6556 = vmatpush2.msra.mxu0 %v15218_v38  ;;  %6453 = vmatpush2.msra.mxu1 %v6356_v46  ;;  %vm14469_vm6 = vcmp.lt.s32.totalorder %v15235_v11, 505 }
 0x4df   : > { %v4207_v62 = vpop.permute.xlu1 %4206  ;;  %6557 = vmatprep.subr.mxu0 %v6375_v18  ;;  %v4211_v51 = vpop.permute.xlu0 %4210  ;;  %6454 = vmatprep.subr.mxu1 %v14307_v8 }
 0x4e0   : > { %v4224_v1 = vsel %vm973_vm5, %v4211_v51, %v4213_v21  ;;  %6558 = vmatpush2.msra.mxu0 %v15219_v25  ;;  %6455 = vmatpush2.msra.mxu1 %v14327_v50  ;;  %v15221_v50 = vld [vmem:[#allocation11_spill] sm:$0xff]  ;;  %v15231_v21 = vld [vmem:[#allocation29_spill] sm:$0xff] }
 0x4e1   : > { %6559 = vmatprep.subr.mxu0 %v6371_v55  ;;  %6456 = vmatprep.subr.mxu1 %v14334_v37  ;;  %v6362_v37 = vld [vmem:[#allocation2 + $0x2d0] sm:$0xff]  ;;  %v15238_v51 = vld [vmem:[#allocation15_spill] sm:$0xff] }
 0x4e2   : > { %6560 = vmatpush2.msra.mxu0 %v15220_v40  ;;  %6457 = vmatpush2.msra.mxu1 %v14344_v57  ;;  %v6359_v57 = vld [vmem:[#allocation2 + $0x2b8] sm:$0xff]  ;;  %v15241_v40 = vld [vmem:[#allocation21_spill] sm:$0xff] }
 0x4e3   : > { %v4201_v63 = vpop.permute.xlu1 %4200  ;;  %6561 = vmatprep.subr.mxu0 %v6367_v6  ;;  %v4205_v60 = vpop.permute.xlu0 %4204  ;;  %6458 = vmatprep.subr.mxu1 %v14352_v39  ;;  %v6256_v39 = vld [vmem:[%s15074_s4] sm:$0xff] }
 0x4e4   : > { %v4220_v8 = vsel %vm973_vm5, %v4201_v63, %v4203_v13  ;;  %v4221_v59 = vsel %vm973_vm5, %v4203_v13, %v4205_v60  ;;  %v4222_v0 = vsel %vm973_vm5, %v4205_v60, %v4207_v62  ;;  %6562 = vmatpush2.msra.mxu0 %v15221_v50  ;;  %6459 = vmatpush2.msra.mxu1 %v14382_v26  ;;  %v15242_v6 = vld [vmem:[#allocation19_spill] sm:$0xff] }
 0x4e5   : > { %6563 = vmatprep.subr.mxu0 %v6363_v12  ;;  %6460 = vmatprep.subr.mxu1 %v4225_v56  ;;  %v15232_v56 = vld [vmem:[#allocation22_spill] sm:$0xff]  ;;  %v15243_v63 = vmax.f32 %v15241_v40, %v15242_v6  ;;  %v15247_v12 = vld [vmem:[#allocation27_spill] sm:$0xff] }
 0x4e6   : > { %6564 = vmatpush2.msra.mxu0 %v6362_v37  ;;  %6461 = vmatpush2.msra.mxu1 %v4224_v1  ;;  %v15233_v33 = vmax.f32 %v15231_v21, %v15232_v56  ;;  %v15239_v1 = vld [vmem:[#allocation20_spill] sm:$0xff]  ;;  %v15248_v37 = vld [vmem:[#allocation23_spill] sm:$0xff] }
 0x4e7   : > { %6565 = vmatprep.subr.mxu0 %v6359_v57  ;;  %v4209_v47 = vpop.permute.xlu0 %4208  ;;  %6462 = vmatprep.subr.mxu1 %v4221_v59  ;;  %v15240_v25 = vmax.f32 %v15238_v51, %v15239_v1  ;;  %v15245_v59 = vld [vmem:[#allocation24_spill] sm:$0xff]  ;;  %v15249_v57 = vmax.f32 %v15247_v12, %v15248_v37 }
 0x4e8   : > { %v4223_v16 = vsel %vm973_vm5, %v4207_v62, %v4209_v47  ;;  %6566 = vmatpush2.msra.mxu0 %v6358_v19  ;;  %6463 = vmatpush2.msra.mxu1 %v4220_v8  ;;  %v14476_v62 = vld [vmem:[%s15074_s4 + $0x48] sm:$0xff] }
 0x4e9   : > { %4239 = vst.msk [vmem:[#allocation2 + $0x218] sm:$0xff] %vm898_vm2, %v4223_v16  ;;  %6567 = vmatprep.subr.mxu0 %v6355_v14  ;;  %6465 = vmatmul.mubr.f32.vlgmr.msra.gmra.mxu1 %v6256_v39  ;;  %v15244_v8 = vld [vmem:[#allocation28_spill] sm:$0xff] }
 0x4ea   : > { %6568 = vmatpush2.msra.mxu0 %v14315_v49  ;;  %6470 = vmatprep.mubr.f32.mxu1 %v6259_v15  ;;  %v6343_v49 = vld [vmem:[#allocation2 + $0x238] sm:$0xff]  ;;  %v14498_v14 = vld [vmem:[%s15074_s4 + $0x40] sm:$0xff]  ;;  %v6269_v21 = vld [vmem:[%s15074_s4 + $0x68] sm:$0xff] }
 0x4eb   : > { %6569 = vmatprep.subr.mxu0 %v6351_v20 }
 0x4ec   : > { %6570 = vmatpush2.msra.mxu0 %v14337_v61  ;;  %v6263_v61 = vld [vmem:[%s15074_s4 + $0x38] sm:$0xff] }
 0x4ed   : > { %6571 = vmatprep.subr.mxu0 %v6347_v5  ;;  %6471 = vmatmul.mubr.f32.gmra.mxu1 %v6258_v34 }
 0x4ee   : > { %6572 = vmatpush2.msra.mxu0 %v14363_v44  ;;  %6476 = vmatprep.mubr.f32.mxu1 %v6261_v3  ;;  %v15225_v44 = vld [vmem:[#allocation33_spill] sm:$0xff] }
 0x4ef   : > { %6573 = vmatprep.subr.mxu0 %v6343_v49  ;;  %v15227_v36 = vmax.f32 %v15225_v44, %v15226_v35 }
 0x4f0   : > { %v3418_v31 = vpop.permute.xlu1 %3417  ;;  %6574 = vmatpush2.msra.mxu0 %v14404_v24  ;;  %v6339_v30 = vld [vmem:[#allocation2 + $0x218] sm:$0xff] }
 0x4f1   : > { %v3424_v26 = vadd.f32 %v3418_v31, %v15224_v10  ;;  %v3425_v17 = vadd.f32 %v3418_v31, %v15227_v36  ;;  %v3426_v7 = vadd.f32 %v3418_v31, %v15230_v4  ;;  %v3427_v53 = vadd.f32 %v3418_v31, %v15233_v33  ;;  %6575 = vmatprep.subr.mxu0 %v6339_v30 }
 0x4f2   : > { %6576 = vmatpush2.msra.mxu0 %v4222_v0  ;;  %6477 = vmatmul.mubr.f32.gmra.mxu1 %v6260_v9  ;;  %v15246_v0 = vmax.f32 %v15244_v8, %v15245_v59 }
 0x4f3   : > { %v3432_v13 = vmax.f32 %v3424_v26, 0.0  ;;  %v3433_v54 = vmax.f32 %v3425_v17, 0.0  ;;  %v3434_v45 = vmax.f32 %v3426_v7, 0.0  ;;  %v3435_v24 = vmax.f32 %v3427_v53, 0.0  ;;  %6578 = vmatmul.mubr.f32.vlgmr.msra.gmra.mxu0 %v6256_v39  ;;  %6482 = vmatprep.mubr.f32.mxu1 %v6263_v61  ;;  %v6267_v26 = vld [vmem:[%s15074_s4 + $0x58] sm:$0xff]  ;;  %v6266_v17 = vld [vmem:[%s15074_s4 + $0x50] sm:$0xff] }
 0x4f4   : > { %v3413_v28 = vpop.permute.xlu0 %3412  ;;  %6583 = vmatprep.mubr.f32.mxu0 %v6259_v15 }
 0x4f5   : > { %v3512_v32 = vcombine.low %v3432_v13, %v3433_v54  ;;  %v3513_v46 = vcombine.high %v3432_v13, %v3433_v54  ;;  %v3514_v38 = vcombine.low %v3434_v45, %v3435_v24  ;;  %v3515_v18 = vcombine.high %v3434_v45, %v3435_v24  ;;  %v6268_v45 = vld [vmem:[%s15074_s4 + $0x60] sm:$0xff] }
 0x4f6   : > { %v3420_v55 = vadd.f32 %v3413_v28, %v15240_v25  ;;  %v3421_v60 = vadd.f32 %v3413_v28, %v15243_v63  ;;  %v3422_v50 = vadd.f32 %v3413_v28, %v15246_v0  ;;  %v3423_v39 = vadd.f32 %v3413_v28, %v15249_v57  ;;  %6483 = vmatmul.mubr.f32.gmra.mxu1 %v14466_v29 }
 0x4f7   : > { %v3522_v47 = vrot.slane %v3512_v32, %v14461_v41  ;;  %v3529_v19 = vrot.slane %v3513_v46, %v14461_v41  ;;  %v3536_v15 = vrot.slane %v3514_v38, %v14461_v41  ;;  %v3543_v16 = vrot.slane %v3515_v18, %v14461_v41  ;;  %6584 = vmatmul.mubr.f32.gmra.mxu0 %v6258_v34  ;;  %v6271_v46 = vld [vmem:[%s15074_s4 + $0x78] sm:$0xff] }
 0x4f8   : > { %v3428_v22 = vmax.f32 %v3420_v55, 0.0  ;;  %v3429_v48 = vmax.f32 %v3421_v60, 0.0  ;;  %v3430_v20 = vmax.f32 %v3422_v50, 0.0  ;;  %v3431_v5 = vmax.f32 %v3423_v39, 0.0  ;;  %6589 = vmatprep.mubr.f32.mxu0 %v6261_v3  ;;  %6488 = vmatprep.mubr.f32.mxu1 %v14476_v62 }
 0x4f9   : > { %v3544_v58 = vcombine.low %v3522_v47, %v3536_v15  ;;  %v3545_v49 = vcombine.high %v3522_v47, %v3536_v15  ;;  %v3546_v31 = vcombine.low %v3529_v19, %v3543_v16  ;;  %v3547_v30 = vcombine.high %v3529_v19, %v3543_v16 }
 0x4fa   : > { %v3444_v2 = vcombine.low %v3428_v22, %v3429_v48  ;;  %v3445_v52 = vcombine.high %v3428_v22, %v3429_v48  ;;  %v3446_v10 = vcombine.low %v3430_v20, %v3431_v5  ;;  %v3447_v34 = vcombine.high %v3430_v20, %v3431_v5  ;;  %6489 = vmatmul.mubr.f32.gmra.mxu1 %v14498_v14 }
 0x4fb   : > { %v3554_v44 = vrot.slane %v3544_v58, %v14461_v41  ;;  %v3561_v3 = vrot.slane %v3546_v31, %v14461_v41  ;;  %v3568_v35 = vrot.slane %v3545_v49, %v14461_v41  ;;  %v3575_v36 = vrot.slane %v3547_v30, %v14461_v41  ;;  %6590 = vmatmul.mubr.f32.gmra.mxu0 %v6260_v9 }
 0x4fc   : > { %v3454_v27 = vrot.slane %v3444_v2, %v14461_v41  ;;  %v3461_v23 = vrot.slane %v3445_v52, %v14461_v41  ;;  %v3468_v4 = vrot.slane %v3446_v10, %v14461_v41  ;;  %v3475_v7 = vrot.slane %v3447_v34, %v14461_v41  ;;  %6595 = vmatprep.mubr.f32.mxu0 %v6263_v61 }
 0x4fd   : > { %v3576_v56 = vcombine.high %v3554_v44, %v3554_v44  ;;  %v3577_v33 = vcombine.high %v3561_v3, %v3561_v3  ;;  %v3578_v9 = vcombine.high %v3568_v35, %v3568_v35  ;;  %v3579_v53 = vcombine.high %v3575_v36, %v3575_v36  ;;  %3616 = vst.msk [vmem:[#allocation3 + $0x40] ss:$2 sm:$0xf] %vm14469_vm6, %v3554_v44  ;;  %v6655_v44 = vpop.permute.xlu0 %6654 }
 0x4fe   : > { %3618 = vst.msk [vmem:[#allocation3 + $0x48] ss:$2 sm:$0xf] %vm14469_vm6, %v3568_v35  ;;  %3624 = vst.msk [vmem:[#allocation3 + $0x60] ss:$2 sm:$0xf] %vm14469_vm6, %v3561_v3  ;;  %6494 = vmatprep.mubr.f32.mxu1 %v6267_v26  ;;  %v3476_v61 = vcombine.low %v3454_v27, %v3468_v4  ;;  %v3477_v42 = vcombine.high %v3454_v27, %v3468_v4  ;;  %v3478_v13 = vcombine.low %v3461_v23, %v3475_v7 }
 0x4ff   : > { %3626 = vst.msk [vmem:[#allocation3 + $0x68] ss:$2 sm:$0xf] %vm14469_vm6, %v3575_v36  ;;  %v3479_v54 = vcombine.high %v3461_v23, %v3475_v7  ;;  %6495 = vmatmul.mubr.f32.gmra.mxu1 %v6266_v17  ;;  %3620 = vst.msk [vmem:[#allocation3 + $0x50] ss:$2 sm:$0xf] %vm14469_vm6, %v3576_v56  ;;  %6596 = vmatmul.mubr.f32.gmra.mxu0 %v14466_v29 }
 0x500   : > { %3622 = vst.msk [vmem:[#allocation3 + $0x58] ss:$2 sm:$0xf] %vm14469_vm6, %v3578_v9  ;;  %3628 = vst.msk [vmem:[#allocation3 + $0x70] ss:$2 sm:$0xf] %vm14469_vm6, %v3577_v33  ;;  %6500 = vmatprep.mubr.f32.mxu1 %v6269_v21  ;;  %v3486_v24 = vrot.slane %v3476_v61, %v14461_v41  ;;  %v3493_v11 = vrot.slane %v3478_v13, %v14461_v41  ;;  %v3500_v28 = vrot.slane %v3477_v42, %v14461_v41 }
 0x501   : > { %3630 = vst.msk [vmem:[#allocation3 + $0x78] ss:$2 sm:$0xf] %vm14469_vm6, %v3579_v53  ;;  %v3507_v32 = vrot.slane %v3479_v54, %v14461_v41  ;;  %6601 = vmatprep.mubr.f32.mxu0 %v14476_v62  ;;  %v6270_v62 = vld [vmem:[%s15074_s4 + $0x70] sm:$0xff] }
 0x502   : > { %v3508_v29 = vcombine.high %v3486_v24, %v3486_v24  ;;  %v3509_v38 = vcombine.high %v3493_v11, %v3493_v11  ;;  %v3510_v18 = vcombine.high %v3500_v28, %v3500_v28  ;;  %3600 = vst.msk [vmem:[#allocation3] ss:$2 sm:$0xf] %vm14469_vm6, %v3486_v24  ;;  %3602 = vst.msk [vmem:[#allocation3 + $0x8] ss:$2 sm:$0xf] %vm14469_vm6, %v3500_v28  ;;  %v6660_v24 = vpop.permute.xlu1 %6659 }
 0x503   : > { %v3511_v51 = vcombine.high %v3507_v32, %v3507_v32  ;;  %3608 = vst.msk [vmem:[#allocation3 + $0x20] ss:$2 sm:$0xf] %vm14469_vm6, %v3493_v11  ;;  %3610 = vst.msk [vmem:[#allocation3 + $0x28] ss:$2 sm:$0xf] %vm14469_vm6, %v3507_v32  ;;  %6501 = vmatmul.mubr.f32.gmra.mxu1 %v6268_v45  ;;  %6602 = vmatmul.mubr.f32.gmra.mxu0 %v14498_v14 }
 0x504   : > { %6506 = vmatprep.mubr.f32.mxu1 %v6271_v46  ;;  %3604 = vst.msk [vmem:[#allocation3 + $0x10] ss:$2 sm:$0xf] %vm14469_vm6, %v3508_v29  ;;  %3606 = vst.msk [vmem:[#allocation3 + $0x18] ss:$2 sm:$0xf] %vm14469_vm6, %v3510_v18  ;;  %6607 = vmatprep.mubr.f32.mxu0 %v6267_v26 }
 0x505   : > { %3612 = vst.msk [vmem:[#allocation3 + $0x30] ss:$2 sm:$0xf] %vm14469_vm6, %v3509_v38  ;;  %3614 = vst.msk [vmem:[#allocation3 + $0x38] ss:$2 sm:$0xf] %vm14469_vm6, %v3511_v51 }
 0x507   : > { %6507 = vmatmul.mubr.f32.gmra.mxu1 %v6270_v62  ;;  %6608 = vmatmul.mubr.f32.gmra.mxu0 %v6266_v17 }
 0x508   : > { %6613 = vmatprep.mubr.f32.mxu0 %v6269_v21 }
 0x50b   : > { %6614 = vmatmul.mubr.f32.gmra.mxu0 %v6268_v45 }
 0x50c   : > { %6619 = vmatprep.mubr.f32.mxu0 %v6271_v46 }
 0x50f   : > { %6620 = vmatmul.mubr.f32.gmra.mxu0 %v6270_v62 }
 0x5a9   : > { %v6466_v1 = vpop.f32.mrf.mxu1 }
 0x5ab   : > { %v6468_v25 = vpop.f32.mrf.mxu1 }
 0x5ad   : > { %v6472_v55 = vpop.f32.mrf.mxu1 }
 0x5af   : > { %v6474_v40 = vpop.f32.mrf.mxu1 }
 0x5b2   : > { %v6478_v6 = vpop.f32.mrf.mxu1 }
 0x5b3   : > { %v6579_v63 = vpop.f32.mrf.mxu0  ;;  %v6626_v20 = vmax.f32 %v6466_v1, %v6478_v6 }
 0x5b4   : > { %v6480_v60 = vpop.f32.mrf.mxu1 }
 0x5b5   : > { %v6581_v8 = vpop.f32.mrf.mxu0  ;;  %v6627_v14 = vmax.f32 %v6468_v25, %v6480_v60 }
 0x5b6   : > { %v6484_v59 = vpop.f32.mrf.mxu1 }
 0x5b7   : > { %v6585_v0 = vpop.f32.mrf.mxu0  ;;  %v6630_v36 = vmax.f32 %v6472_v55, %v6484_v59 }
 0x5b8   : > { %v6486_v50 = vpop.f32.mrf.mxu1 }
 0x5b9   : > { %v6587_v12 = vpop.f32.mrf.mxu0  ;;  %v6631_v10 = vmax.f32 %v6474_v40, %v6486_v50 }
 0x5ba   : > { %v6490_v37 = vpop.f32.mrf.mxu1 }
 0x5bb   : > { %v6591_v57 = vpop.f32.mrf.mxu0  ;;  %v6634_v31 = vmax.f32 %v6626_v20, %v6490_v37 }
 0x5bc   : > { %v6492_v39 = vpop.f32.mrf.mxu1  ;;  %v6628_v3 = vmax.f32 %v6579_v63, %v6591_v57 }
 0x5bd   : > { %v6593_v47 = vpop.f32.mrf.mxu0  ;;  %v6635_v5 = vmax.f32 %v6627_v14, %v6492_v39 }
 0x5be   : > { %v6629_v4 = vmax.f32 %v6581_v8, %v6593_v47 }
 0x5bf   : > { %v6496_v19 = vpop.f32.mrf.mxu1  ;;  %v6597_v15 = vpop.f32.mrf.mxu0 }
 0x5c0   : > { %v6638_v21 = vmax.f32 %v6630_v36, %v6496_v19  ;;  %v6632_v53 = vmax.f32 %v6585_v0, %v6597_v15 }
 0x5c1   : > { %v6498_v16 = vpop.f32.mrf.mxu1  ;;  %v6599_v22 = vpop.f32.mrf.mxu0 }
 0x5c2   : > { %v6639_v17 = vmax.f32 %v6631_v10, %v6498_v16  ;;  %v6633_v11 = vmax.f32 %v6587_v12, %v6599_v22 }
 0x5c3   : > { %v6502_v48 = vpop.f32.mrf.mxu1  ;;  %v6603_v58 = vpop.f32.mrf.mxu0 }
 0x5c4   : > { %v6642_v26 = vmax.f32 %v6634_v31, %v6502_v48  ;;  %v6636_v7 = vmax.f32 %v6628_v3, %v6603_v58 }
 0x5c5   : > { %v6504_v49 = vpop.f32.mrf.mxu1  ;;  %v6605_v30 = vpop.f32.mrf.mxu0 }
 0x5c6   : > { %v6643_v2 = vmax.f32 %v6635_v5, %v6504_v49  ;;  %v6662_v56 = vadd.f32 %v6655_v44, %v6642_v26  ;;  %v6637_v61 = vmax.f32 %v6629_v4, %v6605_v30 }
 0x5c7   : > { %v6508_v52 = vpop.f32.mrf.mxu1  ;;  %v6609_v34 = vpop.f32.mrf.mxu0 }
 0x5c8   : > { %v6663_v23 = vadd.f32 %v6655_v44, %v6643_v2  ;;  %v6646_v54 = vmax.f32 %v6638_v21, %v6508_v52  ;;  %v6640_v28 = vmax.f32 %v6632_v53, %v6609_v34  ;;  %v6670_v29 = vmax.f32 %v6662_v56, 0.0 }
 0x5c9   : > { %v6510_v35 = vpop.f32.mrf.mxu1  ;;  %v6611_v27 = vpop.f32.mrf.mxu0 }
 0x5ca   : > { %v6647_v9 = vmax.f32 %v6639_v17, %v6510_v35  ;;  %v6671_v13 = vmax.f32 %v6663_v23, 0.0  ;;  %v6641_v51 = vmax.f32 %v6633_v11, %v6611_v27  ;;  %v6666_v55 = vadd.f32 %v6660_v24, %v6646_v54 }
 0x5cb   : > { %v6615_v33 = vpop.f32.mrf.mxu0 }
 0x5cc   : > { %v6644_v42 = vmax.f32 %v6636_v7, %v6615_v33  ;;  %v6667_v38 = vadd.f32 %v6660_v24, %v6647_v9  ;;  %v6686_v25 = vcombine.low %v6670_v29, %v6671_v13  ;;  %v6687_v6 = vcombine.high %v6670_v29, %v6671_v13 }
 0x5cd   : > { %v6617_v45 = vpop.f32.mrf.mxu0  ;;  %v6674_v39 = vmax.f32 %v6666_v55, 0.0 }
 0x5ce   : > { %v6664_v32 = vadd.f32 %v6655_v44, %v6644_v42  ;;  %v6645_v46 = vmax.f32 %v6637_v61, %v6617_v45  ;;  %v6675_v59 = vmax.f32 %v6667_v38, 0.0  ;;  %v6696_v57 = vrot.slane %v6686_v25, %v14461_v41 }
 0x5cf   : > { %v6621_v18 = vpop.f32.mrf.mxu0  ;;  %v6703_v47 = vrot.slane %v6687_v6, %v14461_v41 }
 0x5d0   : > { %v6665_v62 = vadd.f32 %v6655_v44, %v6645_v46  ;;  %v6648_v1 = vmax.f32 %v6640_v28, %v6621_v18  ;;  %v6672_v63 = vmax.f32 %v6664_v32, 0.0  ;;  %v6754_v14 = vcombine.low %v6674_v39, %v6675_v59 }
 0x5d1   : > { %v6623_v40 = vpop.f32.mrf.mxu0  ;;  %v6755_v22 = vcombine.high %v6674_v39, %v6675_v59 }
 0x5d2   : > { %v6673_v60 = vmax.f32 %v6665_v62, 0.0  ;;  %v6649_v8 = vmax.f32 %v6641_v51, %v6623_v40  ;;  %v6668_v0 = vadd.f32 %v6660_v24, %v6648_v1  ;;  %v6764_v26 = vrot.slane %v6754_v14, %v14461_v41 }
 0x5d3   : > { %v6771_v44 = vrot.slane %v6755_v22, %v14461_v41 }
 0x5d4   : > { %v6688_v50 = vcombine.low %v6672_v63, %v6673_v60  ;;  %v6689_v12 = vcombine.high %v6672_v63, %v6673_v60  ;;  %v6669_v37 = vadd.f32 %v6660_v24, %v6649_v8  ;;  %v6676_v48 = vmax.f32 %v6668_v0, 0.0 }
 0x5d6   : > { %v6710_v19 = vrot.slane %v6688_v50, %v14461_v41  ;;  %v6717_v15 = vrot.slane %v6689_v12, %v14461_v41  ;;  %v6677_v16 = vmax.f32 %v6669_v37, 0.0 }
 0x5d8   : > { %v6718_v20 = vcombine.low %v6696_v57, %v6710_v19  ;;  %v6719_v5 = vcombine.high %v6696_v57, %v6710_v19  ;;  %v6720_v58 = vcombine.low %v6703_v47, %v6717_v15  ;;  %v6721_v49 = vcombine.high %v6703_v47, %v6717_v15 }
 0x5d9   : > { %v6756_v31 = vcombine.low %v6676_v48, %v6677_v16  ;;  %v6757_v30 = vcombine.high %v6676_v48, %v6677_v16 }
 0x5da   : > { %v6728_v2 = vrot.slane %v6718_v20, %v14461_v41  ;;  %v6735_v52 = vrot.slane %v6720_v58, %v14461_v41  ;;  %v6742_v10 = vrot.slane %v6719_v5, %v14461_v41  ;;  %v6749_v34 = vrot.slane %v6721_v49, %v14461_v41 }
 0x5db   : > { %v6778_v3 = vrot.slane %v6756_v31, %v14461_v41  ;;  %v6785_v35 = vrot.slane %v6757_v30, %v14461_v41 }
 0x5dc   : > { %v6750_v36 = vcombine.high %v6728_v2, %v6728_v2  ;;  %v6751_v17 = vcombine.high %v6735_v52, %v6735_v52  ;;  %v6752_v27 = vcombine.high %v6742_v10, %v6742_v10  ;;  %v6753_v23 = vcombine.high %v6749_v34, %v6749_v34  ;;  %6839 = vst.msk [vmem:[#allocation3 + $0x1] ss:$2 sm:$0xf] %vm14469_vm6, %v6728_v2 }
 0x5dd   : > { %6841 = vst.msk [vmem:[#allocation3 + $0x9] ss:$2 sm:$0xf] %vm14469_vm6, %v6742_v10  ;;  %6847 = vst.msk [vmem:[#allocation3 + $0x21] ss:$2 sm:$0xf] %vm14469_vm6, %v6735_v52  ;;  %v6786_v4 = vcombine.low %v6764_v26, %v6778_v3  ;;  %v6787_v7 = vcombine.high %v6764_v26, %v6778_v3  ;;  %v6788_v21 = vcombine.low %v6771_v44, %v6785_v35 }
 0x5de   : > { %6849 = vst.msk [vmem:[#allocation3 + $0x29] ss:$2 sm:$0xf] %vm14469_vm6, %v6749_v34  ;;  %v6789_v56 = vcombine.high %v6771_v44, %v6785_v35  ;;  %6843 = vst.msk [vmem:[#allocation3 + $0x11] ss:$2 sm:$0xf] %vm14469_vm6, %v6750_v36 }
 0x5df   : > { %6845 = vst.msk [vmem:[#allocation3 + $0x19] ss:$2 sm:$0xf] %vm14469_vm6, %v6752_v27  ;;  %6851 = vst.msk [vmem:[#allocation3 + $0x31] ss:$2 sm:$0xf] %vm14469_vm6, %v6751_v17  ;;  %v6796_v33 = vrot.slane %v6786_v4, %v14461_v41  ;;  %v6803_v9 = vrot.slane %v6788_v21, %v14461_v41  ;;  %v6810_v53 = vrot.slane %v6787_v7, %v14461_v41 }
 0x5e0   : > { %6853 = vst.msk [vmem:[#allocation3 + $0x39] ss:$2 sm:$0xf] %vm14469_vm6, %v6753_v23  ;;  %v6817_v61 = vrot.slane %v6789_v56, %v14461_v41 }
 0x5e1   : > { %v6818_v42 = vcombine.high %v6796_v33, %v6796_v33  ;;  %v6819_v13 = vcombine.high %v6803_v9, %v6803_v9  ;;  %v6820_v54 = vcombine.high %v6810_v53, %v6810_v53  ;;  %6855 = vst.msk [vmem:[#allocation3 + $0x41] ss:$2 sm:$0xf] %vm14469_vm6, %v6796_v33  ;;  %6857 = vst.msk [vmem:[#allocation3 + $0x49] ss:$2 sm:$0xf] %vm14469_vm6, %v6810_v53 }
 0x5e2   : > { %v6821_v45 = vcombine.high %v6817_v61, %v6817_v61  ;;  %6863 = vst.msk [vmem:[#allocation3 + $0x61] ss:$2 sm:$0xf] %vm14469_vm6, %v6803_v9  ;;  %6865 = vst.msk [vmem:[#allocation3 + $0x69] ss:$2 sm:$0xf] %vm14469_vm6, %v6817_v61 }
 0x5e3   : > { %6859 = vst.msk [vmem:[#allocation3 + $0x51] ss:$2 sm:$0xf] %vm14469_vm6, %v6818_v42  ;;  %6861 = vst.msk [vmem:[#allocation3 + $0x59] ss:$2 sm:$0xf] %vm14469_vm6, %v6820_v54 }
 0x5e4   : > { %6867 = vst.msk [vmem:[#allocation3 + $0x71] ss:$2 sm:$0xf] %vm14469_vm6, %v6819_v13  ;;  %6869 = vst.msk [vmem:[#allocation3 + $0x79] ss:$2 sm:$0xf] %vm14469_vm6, %v6821_v45 }
 0x5e5 PF: > { %v10465_v41 = vld [vmem:[%s10977_s23 + $0x74] ss:$8 sps:$4 sm:$0xff]   ;;  %v10469_v11 = vld [vmem:[%s10977_s23 + $0x70] ss:$8 sps:$4 sm:$0xff]   ;;  %v10471_v43 = vld [vmem:[%s10977_s23 + $0x64] ss:$8 sps:$4 sm:$0xff]   ;;  %v6881_v10 = vlaneseq }
 0x5e6   : > { %v10467_v24 = vld [vmem:[%s10977_s23 + $0x174] ss:$8 sps:$4 sm:$0xff]   ;;  %7298 = vmatprep.subr.bf16.mxu0 %v10465_v41  ;;  %v10470_v28 = vld [vmem:[%s10977_s23 + $0x170] ss:$8 sps:$4 sm:$0xff]   ;;  %v10473_v32 = vld [vmem:[%s10977_s23 + $0x164] ss:$8 sps:$4 sm:$0xff]  }
 0x5e7   : > { %7339 = vmatprep.subr.bf16.mxu1 %v10467_v24  ;;  %7299 = vmatpush1.bf16.msra.mxu0 %v10469_v11  ;;  %v10475_v46 = vld [vmem:[%s10977_s23 + $0x60] ss:$8 sps:$4 sm:$0xff]   ;;  %v10477_v38 = vld [vmem:[%s10977_s23 + $0x54] ss:$8 sps:$4 sm:$0xff]   ;;  %v10481_v51 = vld [vmem:[%s10977_s23 + $0x50] ss:$8 sps:$4 sm:$0xff]  }
 0x5e8   : > { %7340 = vmatpush1.bf16.msra.mxu1 %v10470_v28  ;;  %7300 = vmatprep.subr.bf16.mxu0 %v10471_v43  ;;  %v10476_v29 = vld [vmem:[%s10977_s23 + $0x160] ss:$8 sps:$4 sm:$0xff]   ;;  %v10479_v18 = vld [vmem:[%s10977_s23 + $0x154] ss:$8 sps:$4 sm:$0xff]   ;;  %v10482_v62 = vld [vmem:[%s10977_s23 + $0x150] ss:$8 sps:$4 sm:$0xff]  }
 0x5e9   : > { %7341 = vmatprep.subr.bf16.mxu1 %v10473_v32  ;;  %v10483_v1 = vld [vmem:[%s10977_s23 + $0x44] ss:$8 sps:$4 sm:$0xff]   ;;  %v10487_v55 = vld [vmem:[%s10977_s23 + $0x40] ss:$8 sps:$4 sm:$0xff]   ;;  %v10489_v6 = vld [vmem:[%s10977_s23 + $0x34] ss:$8 sps:$4 sm:$0xff]  }
 0x5ea   : > { %v10485_v25 = vld [vmem:[%s10977_s23 + $0x144] ss:$8 sps:$4 sm:$0xff]   ;;  %v10488_v40 = vld [vmem:[%s10977_s23 + $0x140] ss:$8 sps:$4 sm:$0xff]   ;;  %v10491_v63 = vld [vmem:[%s10977_s23 + $0x134] ss:$8 sps:$4 sm:$0xff]  }
 0x5eb   : > { %7301 = vmatpush1.bf16.msra.mxu0 %v10475_v46  ;;  %v10493_v60 = vld [vmem:[%s10977_s23 + $0x30] ss:$8 sps:$4 sm:$0xff]   ;;  %v10495_v59 = vld [vmem:[%s10977_s23 + $0x24] ss:$8 sps:$4 sm:$0xff]   ;;  %v10499_v50 = vld [vmem:[%s10977_s23 + $0x20] ss:$8 sps:$4 sm:$0xff]  }
 0x5ec   : > { %7342 = vmatpush1.bf16.msra.mxu1 %v10476_v29  ;;  %7302 = vmatprep.subr.bf16.mxu0 %v10477_v38  ;;  %v10494_v8 = vld [vmem:[%s10977_s23 + $0x130] ss:$8 sps:$4 sm:$0xff]   ;;  %v10497_v0 = vld [vmem:[%s10977_s23 + $0x124] ss:$8 sps:$4 sm:$0xff]   ;;  %vm7288_vm7 = vcmask 1043456   ;;  %vm7289_vm8 = vcmask 1044480  }
 0x5ed   : > { %7343 = vmatprep.subr.bf16.mxu1 %v10479_v18  ;;  %v10500_v12 = vld [vmem:[%s10977_s23 + $0x120] ss:$8 sps:$4 sm:$0xff]   ;;  %v10501_v37 = vld [vmem:[%s10977_s23 + $0x14] ss:$8 sps:$4 sm:$0xff]   ;;  %v10505_v39 = vld [vmem:[%s10977_s23 + $0x10] ss:$8 sps:$4 sm:$0xff]  }
 0x5ee   : > { %v10503_v57 = vld [vmem:[%s10977_s23 + $0x114] ss:$8 sps:$4 sm:$0xff]   ;;  %v10506_v47 = vld [vmem:[%s10977_s23 + $0x110] ss:$8 sps:$4 sm:$0xff]   ;;  %v10897_v19 = vmov 65535   ;;  %v14658_v36 = vshrl.u32 %v6881_v10, 7 }
 0x5ef   : > { %7303 = vmatpush1.bf16.msra.mxu0 %v10481_v51  ;;  %v7290_v15 = vsel %vm7288_vm7, 4294967295, %v10897_v19  ;;  %v10507_v16 = vld [vmem:[%s10977_s23 + $0x4] ss:$8 sps:$4 sm:$0xff]   ;;  %v10515_v22 = vld [vmem:[%s10977_s23 + $0x1f4] ss:$8 sps:$4 sm:$0x1f]  }
 0x5f0   : > { %7344 = vmatpush1.bf16.msra.mxu1 %v10482_v62  ;;  %7304 = vmatprep.subr.bf16.mxu0 %v10483_v1  ;;  %v10509_v14 = vld [vmem:[%s10977_s23 + $0x104] ss:$8 sps:$4 sm:$0xff]   ;;  %v14646_v48 = vsel %vm7289_vm8, %v7290_v15, 0  ;;  %v10511_v20 = vld [vmem:[%s10977_s23] ss:$8 sps:$4 sm:$0xff]   ;;  %s10048_s29 = sshll.u32 %s10969_s18, 5 }
 0x5f1   : > { %7345 = vmatprep.subr.bf16.mxu1 %v10485_v25  ;;  %v10512_v5 = vld [vmem:[%s10977_s23 + $0x100] ss:$8 sps:$4 sm:$0xff]   ;;  %v10518_v58 = vld [vmem:[%s10977_s23 + $0x1f0] ss:$8 sps:$4 sm:$0x1f]   ;;  %v7296_v31 = vand.u32 %v10515_v22, %v14646_v48  ;;  %s14671_s30 = scalar_lea.vmem [#allocation3], %s10048_s29 }
 0x5f2   : > { %v10513_v49 = vld [vmem:[%s10977_s23 + $0xf4] ss:$8 sps:$4 sm:$0xff]   ;;  %v10517_v30 = vld [vmem:[%s10977_s23 + $0xf0] ss:$8 sps:$4 sm:$0xff]   ;;  %v10898_v2 = vmov 1983009808   ;;  %v7293_v34 = vand.u32 %v10518_v58, %v14646_v48 }
 0x5f3   : > { %7305 = vmatpush1.bf16.msra.mxu0 %v10487_v55  ;;  %v6879_v52 = vunpack.c.l.s4 %v10898_v2  ;;  %v10519_v26 = vld [vmem:[%s10977_s23 + $0xe4] ss:$8 sps:$4 sm:$0xff]   ;;  %v10523_v3 = vld [vmem:[%s10977_s23 + $0xe0] ss:$8 sps:$4 sm:$0xff]   ;;  %v10525_v27 = vld [vmem:[%s10977_s23 + $0xd4] ss:$8 sps:$4 sm:$0xff]  }
 0x5f4   : > { %7346 = vmatpush1.bf16.msra.mxu1 %v10488_v40  ;;  %7306 = vmatprep.subr.bf16.mxu0 %v10489_v6  ;;  %v10521_v44 = vld [vmem:[%s10977_s23 + $0x1e4] ss:$8 sps:$4 sm:$0xff]   ;;  %v10524_v17 = vld [vmem:[%s10977_s23 + $0x1e0] ss:$8 sps:$4 sm:$0xff]   ;;  %v10527_v23 = vld [vmem:[%s10977_s23 + $0x1d4] ss:$8 sps:$4 sm:$0xff]  }
 0x5f5   : > { %7347 = vmatprep.subr.bf16.mxu1 %v10491_v63  ;;  %v6880_v35 = vunpack.c.0.s8 %v6879_v52  ;;  %v10529_v4 = vld [vmem:[%s10977_s23 + $0xd0] ss:$8 sps:$4 sm:$0xff]   ;;  %v10531_v56 = vld [vmem:[%s10977_s23 + $0xc4] ss:$8 sps:$4 sm:$0xff]   ;;  %v10535_v53 = vld [vmem:[%s10977_s23 + $0xc0] ss:$8 sps:$4 sm:$0xff]  }
 0x5f6   : > { %v10530_v7 = vld [vmem:[%s10977_s23 + $0x1d0] ss:$8 sps:$4 sm:$0xff]   ;;  %v10533_v33 = vld [vmem:[%s10977_s23 + $0x1c4] ss:$8 sps:$4 sm:$0xff]   ;;  %v10536_v13 = vld [vmem:[%s10977_s23 + $0x1c0] ss:$8 sps:$4 sm:$0xff]  }
 0x5f7   : > { %7307 = vmatpush1.bf16.msra.mxu0 %v10493_v60  ;;  %v14667_v21 = vsub.s32 %v6880_v35, %v14658_v36  ;;  %v6875_v9 = vld [vmem:[%s14671_s30] sm:$0xff]  ;;  %v10537_v54 = vld [vmem:[%s10977_s23 + $0xb4] ss:$8 sps:$4 sm:$0xff]   ;;  %v10541_v11 = vld [vmem:[%s10977_s23 + $0xb0] ss:$8 sps:$4 sm:$0xff]   ;;  %vm7284_vm9 = vcmask 990208  }
 0x5f8   : > { %7348 = vmatpush1.bf16.msra.mxu1 %v10494_v8  ;;  %7308 = vmatprep.subr.bf16.mxu0 %v10495_v59  ;;  %v6877_v61 = vcombine.high %v6875_v9, %v6875_v9  ;;  %v10539_v45 = vld [vmem:[%s10977_s23 + $0x1b4] ss:$8 sps:$4 sm:$0xff]   ;;  %v10542_v32 = vld [vmem:[%s10977_s23 + $0x1b0] ss:$8 sps:$4 sm:$0xff]   ;;  %v10543_v46 = vld [vmem:[%s10977_s23 + $0xa4] ss:$8 sps:$4 sm:$0xff]  }
 0x5f9   : > { %7349 = vmatprep.subr.bf16.mxu1 %v10497_v0  ;;  %v6884_v42 = vrot.slane %v6875_v9, %v14667_v21  ;;  %v10545_v29 = vld [vmem:[%s10977_s23 + $0x1a4] ss:$8 sps:$4 sm:$0xff]   ;;  %v10547_v18 = vld [vmem:[%s10977_s23 + $0xa0] ss:$8 sps:$4 sm:$0xff]   ;;  %v10549_v62 = vld [vmem:[%s10977_s23 + $0x94] ss:$8 sps:$4 sm:$0xff]  }
 0x5fa   : > { %v6891_v24 = vrot.slane %v6877_v61, %v14667_v21  ;;  %v10548_v51 = vld [vmem:[%s10977_s23 + $0x1a0] ss:$8 sps:$4 sm:$0xff]   ;;  %v10551_v1 = vld [vmem:[%s10977_s23 + $0x194] ss:$8 sps:$4 sm:$0xff]   ;;  %v10553_v25 = vld [vmem:[%s10977_s23 + $0x90] ss:$8 sps:$4 sm:$0xff]  }
 0x5fb   : > { %7309 = vmatpush1.bf16.msra.mxu0 %v10499_v50  ;;  %v6892_v41 = vcombine.high %v6884_v42, %v6884_v42  ;;  %v10554_v55 = vld [vmem:[%s10977_s23 + $0x190] ss:$8 sps:$4 sm:$0xff]   ;;  %v10555_v40 = vld [vmem:[%s10977_s23 + $0x84] ss:$8 sps:$4 sm:$0xff]   ;;  %v10559_v63 = vld [vmem:[%s10977_s23 + $0x80] ss:$8 sps:$4 sm:$0xff]   ;;  %v6898_v0 = vpack.c.bf16 %v6884_v42, %v6884_v42 }
 0x5fc   : > { %7350 = vmatpush1.bf16.msra.mxu1 %v10500_v12  ;;  %7310 = vmatprep.subr.bf16.mxu0 %v10501_v37  ;;  %v6893_v43 = vcombine.high %v6891_v24, %v6891_v24  ;;  %v10557_v6 = vld [vmem:[%s10977_s23 + $0x184] ss:$8 sps:$4 sm:$0xff]   ;;  %v10560_v60 = vld [vmem:[%s10977_s23 + $0x180] ss:$8 sps:$4 sm:$0xff]   ;;  %v10564_v8 = vld [vmem:[%s10977_s23 + $0x274] ss:$8 sps:$4 sm:$0xff]   ;;  %v6900_v50 = vpack.c.bf16 %v6891_v24, %v6891_v24 }
 0x5fd   : > { %7351 = vmatprep.subr.bf16.mxu1 %v10503_v57  ;;  %v6899_v28 = vpack.c.bf16 %v6892_v41, %v6892_v41  ;;  %v10567_v59 = vld [vmem:[%s10977_s23 + $0x374] ss:$8 sps:$4 sm:$0xff]   ;;  %v10562_v12 = vld [vmem:[%s10977_s23 + $0x270] ss:$8 sps:$4 sm:$0xff]   ;;  %v10570_v57 = vld [vmem:[%s10977_s23 + $0x264] ss:$8 sps:$4 sm:$0xff]  }
 0x5fe   : > { %v6901_v38 = vpack.c.bf16 %v6893_v43, %v6893_v43  ;;  %v10565_v37 = vld [vmem:[%s10977_s23 + $0x370] ss:$8 sps:$4 sm:$0xff]   ;;  %v10571_v19 = vld [vmem:[%s10977_s23 + $0x360] ss:$8 sps:$4 sm:$0xff]   ;;  %v10576_v15 = vld [vmem:[%s10977_s23 + $0x254] ss:$8 sps:$4 sm:$0xff]  }
 0x5ff   : > { %7311 = vmatpush1.bf16.msra.mxu0 %v10505_v39  ;;  %7330 = vmatprep.mubr.bf16.mxu0 %v6899_v28  ;;  %v10573_v39 = vld [vmem:[%s10977_s23 + $0x364] ss:$8 sps:$4 sm:$0xff]   ;;  %v10577_v22 = vld [vmem:[%s10977_s23 + $0x350] ss:$8 sps:$4 sm:$0xff]   ;;  %v10580_v58 = vld [vmem:[%s10977_s23 + $0x240] ss:$8 sps:$4 sm:$0xff]  }
 0x600   : > { %7352 = vmatpush1.bf16.msra.mxu1 %v10506_v47  ;;  %7312 = vmatprep.subr.bf16.mxu0 %v10507_v16  ;;  %v10568_v47 = vld [vmem:[%s10977_s23 + $0x260] ss:$8 sps:$4 sm:$0xff]   ;;  %v10579_v16 = vld [vmem:[%s10977_s23 + $0x354] ss:$8 sps:$4 sm:$0xff]   ;;  %v10586_v2 = vld [vmem:[%s10977_s23 + $0x230] ss:$8 sps:$4 sm:$0xff]  }
 0x601   : > { %7353 = vmatprep.subr.bf16.mxu1 %v10509_v14  ;;  %9642 = vmatprep.mubr.msk.bf16.mxu1 %vm7284_vm9, %v6901_v38  ;;  %v10574_v14 = vld [vmem:[%s10977_s23 + $0x250] ss:$8 sps:$4 sm:$0xff]   ;;  %v10594_v10 = vld [vmem:[%s10977_s23 + $0x224] ss:$8 sps:$4 sm:$0xff]   ;;  %v10603_v35 = vld [vmem:[%s10977_s23 + $0x314] ss:$8 sps:$4 sm:$0xff]  }
 0x602   : > { %v10589_v52 = vld [vmem:[%s10977_s23 + $0x330] ss:$8 sps:$4 sm:$0xff]   ;;  %v10615_v61 = vld [vmem:[%s10977_s23 + $0x3f4] ss:$8 sps:$4 sm:$0x1f]   ;;  %p10039_p5 = scmp.ne.s32.totalorder %s10969_s18, 3 }
 0x603   : > { %7313 = vmatpush1.bf16.msra.mxu0 %v10511_v20  ;;  %v10582_v20 = vld [vmem:[%s10977_s23 + $0x244] ss:$8 sps:$4 sm:$0xff]   ;;  %v10613_v41 = vld [vmem:[%s10977_s23 + $0x3f0] ss:$8 sps:$4 sm:$0x1f]   ;;  %v7813_v28 = vand.u32 %v10615_v61, %v14646_v48  ;;  %s10900_s24 = smov (!%p10039_p5), 126  }
 0x604   : > { %7354 = vmatpush1.bf16.msra.mxu1 %v10512_v5  ;;  %7314 = vmatprep.subr.bf16.mxu0 %v10513_v49  ;;  %v10585_v5 = vld [vmem:[%s10977_s23 + $0x344] ss:$8 sps:$4 sm:$0xff]   ;;  %v10583_v49 = vld [vmem:[%s10977_s23 + $0x340] ss:$8 sps:$4 sm:$0xff]   ;;  %v10610_v43 = vld [vmem:[%s10977_s23 + $0x2f0] ss:$8 sps:$4 sm:$0xff]  }
 0x605   : > { %7355 = vmatprep.subr.bf16.mxu1 %v7296_v31  ;;  %v10588_v31 = vld [vmem:[%s10977_s23 + $0x234] ss:$8 sps:$4 sm:$0xff]   ;;  %v10616_v38 = vld [vmem:[%s10977_s23 + $0x2e0] ss:$8 sps:$4 sm:$0xff]   ;;  %v10679_v61 = vld [vmem:[%s10977_s23 + $0x444] ss:$8 sps:$4 sm:$0xff]  }
 0x606   : > { %s10901_s12 = smov (!%p10039_p5), 2  }
 0x607   : > { %7315 = vmatpush2.bf16.msra.mxu0 %v10517_v30  ;;  %v10591_v30 = vld [vmem:[%s10977_s23 + $0x334] ss:$8 sps:$4 sm:$0xff]  }
 0x608   : > { %7356 = vmatpush2.bf16.msra.mxu1 %v7293_v34  ;;  %7316 = vmatprep.subr.bf16.mxu0 %v10519_v26  ;;  %v10597_v34 = vld [vmem:[%s10977_s23 + $0x324] ss:$8 sps:$4 sm:$0xff]   ;;  %v10592_v26 = vld [vmem:[%s10977_s23 + $0x220] ss:$8 sps:$4 sm:$0xff]  }
 0x609   : > { %7357 = vmatprep.subr.bf16.mxu1 %v10521_v44  ;;  %v10595_v44 = vld [vmem:[%s10977_s23 + $0x320] ss:$8 sps:$4 sm:$0xff]  }
 0x60b   : > { %7317 = vmatpush2.bf16.msra.mxu0 %v10523_v3  ;;  %v10600_v3 = vld [vmem:[%s10977_s23 + $0x214] ss:$8 sps:$4 sm:$0xff]  }
 0x60c   : > { %7358 = vmatpush2.bf16.msra.mxu1 %v10524_v17  ;;  %7318 = vmatprep.subr.bf16.mxu0 %v10525_v27  ;;  %v9645_v17 = vld [vmem:[%s14671_s30 + $0x8] sm:$0xff] }
 0x60d   : > { %7359 = vmatprep.subr.bf16.mxu1 %v10527_v23  ;;  %v7398_v27 = vcombine.high %v9645_v17, %v9645_v17  ;;  %v14723_v23 = vrot.slane %v9645_v17, %v14667_v21 }
 0x60f   : > { %7319 = vmatpush2.bf16.msra.mxu0 %v10529_v4  ;;  %v10598_v4 = vld [vmem:[%s10977_s23 + $0x210] ss:$8 sps:$4 sm:$0xff]   ;;  %v14731_v9 = vrot.slane %v7398_v27, %v14667_v21  ;;  %v10668_v27 = vld [vmem:[%s10977_s23 + $0x560] ss:$8 sps:$4 sm:$0xff]  }
 0x610   : > { %7360 = vmatpush2.bf16.msra.mxu1 %v10530_v7  ;;  %7320 = vmatprep.subr.bf16.mxu0 %v10531_v56  ;;  %v10601_v7 = vld [vmem:[%s10977_s23 + $0x310] ss:$8 sps:$4 sm:$0xff]   ;;  %v10606_v56 = vld [vmem:[%s10977_s23 + $0x204] ss:$8 sps:$4 sm:$0xff]  }
 0x611   : > { %7361 = vmatprep.subr.bf16.mxu1 %v10533_v33  ;;  %v7413_v33 = vcombine.high %v14723_v23, %v14723_v23 }
 0x613   : > { %7321 = vmatpush2.bf16.msra.mxu0 %v10535_v53  ;;  %v10609_v53 = vld [vmem:[%s10977_s23 + $0x304] ss:$8 sps:$4 sm:$0xff]   ;;  %v7420_v42 = vpack.c.bf16 %v7413_v33, %v7413_v33  ;;  %v10671_v33 = vld [vmem:[%s10977_s23 + $0x450] ss:$8 sps:$4 sm:$0xff]  }
 0x614   : > { %7362 = vmatpush2.bf16.msra.mxu1 %v10536_v13  ;;  %7322 = vmatprep.subr.bf16.mxu0 %v10537_v54  ;;  %v7414_v13 = vcombine.high %v14731_v9, %v14731_v9  ;;  %v10604_v54 = vld [vmem:[%s10977_s23 + $0x200] ss:$8 sps:$4 sm:$0xff]  }
 0x615   : > { %7363 = vmatprep.subr.bf16.mxu1 %v10539_v45  ;;  %v10607_v45 = vld [vmem:[%s10977_s23 + $0x300] ss:$8 sps:$4 sm:$0xff]  }
 0x616   : > { %v7422_v24 = vpack.c.bf16 %v7414_v13, %v7414_v13  ;;  %v10677_v13 = vld [vmem:[%s10977_s23 + $0x440] ss:$8 sps:$4 sm:$0xff]  }
 0x617   : > { %7323 = vmatpush2.bf16.msra.mxu0 %v10541_v11  ;;  %v10612_v11 = vld [vmem:[%s10977_s23 + $0x2f4] ss:$8 sps:$4 sm:$0xff]  }
 0x618   : > { %7364 = vmatpush2.bf16.msra.mxu1 %v10542_v32  ;;  %7324 = vmatprep.subr.bf16.mxu0 %v10543_v46  ;;  %v7810_v32 = vand.u32 %v10613_v41, %v14646_v48  ;;  %v10618_v46 = vld [vmem:[%s10977_s23 + $0x2e4] ss:$8 sps:$4 sm:$0xff]   ;;  %v10688_v41 = vld [vmem:[%s10977_s23 + $0x534] ss:$8 sps:$4 sm:$0xff]  }
 0x619   : > { %7365 = vmatprep.subr.bf16.mxu1 %v10545_v29  ;;  %v10621_v29 = vld [vmem:[%s10977_s23 + $0x3e4] ss:$8 sps:$4 sm:$0xff]  }
 0x61b   : > { %7325 = vmatpush2.bf16.msra.mxu0 %v10547_v18  ;;  %v10619_v18 = vld [vmem:[%s10977_s23 + $0x3e0] ss:$8 sps:$4 sm:$0xff]  }
 0x61c   : > { %7366 = vmatpush2.bf16.msra.mxu1 %v10548_v51  ;;  %7326 = vmatprep.subr.bf16.mxu0 %v10549_v62  ;;  %v10624_v51 = vld [vmem:[%s10977_s23 + $0x2d4] ss:$8 sps:$4 sm:$0xff]  }
 0x61d   : > { %7367 = vmatprep.subr.bf16.mxu1 %v10551_v1  ;;  %v10627_v62 = vld [vmem:[%s10977_s23 + $0x3d4] ss:$8 sps:$4 sm:$0xff]   ;;  %v10622_v1 = vld [vmem:[%s10977_s23 + $0x2d0] ss:$8 sps:$4 sm:$0xff]  }
 0x61f   : > { %7327 = vmatpush2.bf16.msra.mxu0 %v10553_v25  ;;  %v10625_v25 = vld [vmem:[%s10977_s23 + $0x3d0] ss:$8 sps:$4 sm:$0xff]  }
 0x620   : > { %7368 = vmatpush2.bf16.msra.mxu1 %v10554_v55  ;;  %7328 = vmatprep.subr.bf16.mxu0 %v10555_v40  ;;  %v10630_v55 = vld [vmem:[%s10977_s23 + $0x2c4] ss:$8 sps:$4 sm:$0xff]  }
 0x621   : > { %7369 = vmatprep.subr.bf16.mxu1 %v10557_v6  ;;  %v10633_v40 = vld [vmem:[%s10977_s23 + $0x3c4] ss:$8 sps:$4 sm:$0xff]   ;;  %v10628_v6 = vld [vmem:[%s10977_s23 + $0x2c0] ss:$8 sps:$4 sm:$0xff]  }
 0x623   : > { %7329 = vmatpush2.bf16.msra.mxu0 %v10559_v63  ;;  %v10631_v63 = vld [vmem:[%s10977_s23 + $0x3c0] ss:$8 sps:$4 sm:$0xff]  }
 0x624   : > { %7370 = vmatpush2.bf16.msra.mxu1 %v10560_v60  ;;  %7815 = vmatprep.subr.bf16.mxu0 %v10564_v8  ;;  %v10636_v60 = vld [vmem:[%s10977_s23 + $0x2b4] ss:$8 sps:$4 sm:$0xff]  }
 0x625   : > { %7856 = vmatprep.subr.bf16.mxu1 %v10567_v59  ;;  %v10639_v8 = vld [vmem:[%s10977_s23 + $0x3b4] ss:$8 sps:$4 sm:$0xff]   ;;  %v10634_v59 = vld [vmem:[%s10977_s23 + $0x2b0] ss:$8 sps:$4 sm:$0xff]  }
 0x626   : > { %7331 = vmatmul.mubr.bf16.vlgmr.msra.gmra.mxu0 %v6898_v0  ;;  %v10637_v0 = vld [vmem:[%s10977_s23 + $0x3b0] ss:$8 sps:$4 sm:$0xff]  }
 0x627   : > { %7372 = vmatmul.mubr.bf16.vlgmr.msra.gmra.mxu1 %v6900_v50  ;;  %7816 = vmatpush1.bf16.msra.mxu0 %v10562_v12  ;;  %v10642_v50 = vld [vmem:[%s10977_s23 + $0x2a4] ss:$8 sps:$4 sm:$0xff]  }
 0x628   : > { %7857 = vmatpush1.bf16.msra.mxu1 %v10565_v37  ;;  %7817 = vmatprep.subr.bf16.mxu0 %v10570_v57  ;;  %v10645_v12 = vld [vmem:[%s10977_s23 + $0x3a4] ss:$8 sps:$4 sm:$0xff]   ;;  %v10640_v37 = vld [vmem:[%s10977_s23 + $0x2a0] ss:$8 sps:$4 sm:$0xff]  }
 0x629   : > { %7858 = vmatprep.subr.bf16.mxu1 %v10573_v39  ;;  %7847 = vmatprep.mubr.bf16.mxu0 %v7420_v42  ;;  %v10643_v57 = vld [vmem:[%s10977_s23 + $0x3a0] ss:$8 sps:$4 sm:$0xff]   ;;  %v10648_v39 = vld [vmem:[%s10977_s23 + $0x294] ss:$8 sps:$4 sm:$0xff]   ;;  %v10682_v42 = vld [vmem:[%s10977_s23 + $0x544] ss:$8 sps:$4 sm:$0xff]  }
 0x62a   : > { %9774 = vmatprep.mubr.msk.bf16.mxu1 %vm7284_vm9, %v7422_v24  ;;  %v10683_v24 = vld [vmem:[%s10977_s23 + $0x430] ss:$8 sps:$4 sm:$0xff]  }
 0x62b   : > { %7818 = vmatpush1.bf16.msra.mxu0 %v10568_v47  ;;  %v10651_v47 = vld [vmem:[%s10977_s23 + $0x394] ss:$8 sps:$4 sm:$0xff]  }
 0x62c   : > { %7859 = vmatpush1.bf16.msra.mxu1 %v10571_v19  ;;  %7819 = vmatprep.subr.bf16.mxu0 %v10576_v15  ;;  %v10646_v19 = vld [vmem:[%s10977_s23 + $0x290] ss:$8 sps:$4 sm:$0xff]  }
 0x62d   : > { %7860 = vmatprep.subr.bf16.mxu1 %v10579_v16  ;;  %v10649_v15 = vld [vmem:[%s10977_s23 + $0x390] ss:$8 sps:$4 sm:$0xff]   ;;  %v10654_v16 = vld [vmem:[%s10977_s23 + $0x284] ss:$8 sps:$4 sm:$0xff]  }
 0x62f   : > { %7820 = vmatpush1.bf16.msra.mxu0 %v10574_v14  ;;  %v10657_v14 = vld [vmem:[%s10977_s23 + $0x384] ss:$8 sps:$4 sm:$0xff]  }
 0x630   : > { %7861 = vmatpush1.bf16.msra.mxu1 %v10577_v22  ;;  %7821 = vmatprep.subr.bf16.mxu0 %v10582_v20  ;;  %v10652_v22 = vld [vmem:[%s10977_s23 + $0x280] ss:$8 sps:$4 sm:$0xff]  }
 0x631   : > { %7862 = vmatprep.subr.bf16.mxu1 %v10585_v5  ;;  %v10655_v20 = vld [vmem:[%s10977_s23 + $0x380] ss:$8 sps:$4 sm:$0xff]   ;;  %v10661_v5 = vld [vmem:[%s10977_s23 + $0x474] ss:$8 sps:$4 sm:$0xff]  }
 0x633   : > { %7822 = vmatpush1.bf16.msra.mxu0 %v10580_v58  ;;  %v10664_v58 = vld [vmem:[%s10977_s23 + $0x574] ss:$8 sps:$4 sm:$0xff]  }
 0x634   : > { %7863 = vmatpush1.bf16.msra.mxu1 %v10583_v49  ;;  %7823 = vmatprep.subr.bf16.mxu0 %v10588_v31  ;;  %v7419_v49 = vpack.c.bf16 %v14723_v23, %v14723_v23  ;;  %v7421_v31 = vpack.c.bf16 %v14731_v9, %v14731_v9  ;;  %v10673_v23 = vld [vmem:[%s10977_s23 + $0x454] ss:$8 sps:$4 sm:$0xff]  }
 0x635   : > { %7864 = vmatprep.subr.bf16.mxu1 %v10591_v30  ;;  %v10659_v30 = vld [vmem:[%s10977_s23 + $0x470] ss:$8 sps:$4 sm:$0xff]  }
 0x637   : > { %7824 = vmatpush1.bf16.msra.mxu0 %v10586_v2  ;;  %v10662_v2 = vld [vmem:[%s10977_s23 + $0x570] ss:$8 sps:$4 sm:$0xff]  }
 0x638   : > { %7865 = vmatpush1.bf16.msra.mxu1 %v10589_v52  ;;  %7825 = vmatprep.subr.bf16.mxu0 %v10594_v10  ;;  %v10667_v52 = vld [vmem:[%s10977_s23 + $0x464] ss:$8 sps:$4 sm:$0xff]   ;;  %v9777_v10 = vld [vmem:[%s14671_s30 + $0x10] sm:$0xff] }
 0x639   : > { %7866 = vmatprep.subr.bf16.mxu1 %v10597_v34  ;;  %v10670_v34 = vld [vmem:[%s10977_s23 + $0x564] ss:$8 sps:$4 sm:$0xff]  }
 0x63b   : > { %7826 = vmatpush1.bf16.msra.mxu0 %v10592_v26  ;;  %v7915_v26 = vcombine.high %v9777_v10, %v9777_v10 }
 0x63c   : > { %7867 = vmatpush1.bf16.msra.mxu1 %v10595_v44  ;;  %7827 = vmatprep.subr.bf16.mxu0 %v10600_v3  ;;  %v14785_v44 = vrot.slane %v9777_v10, %v14667_v21  ;;  %v10665_v3 = vld [vmem:[%s10977_s23 + $0x460] ss:$8 sps:$4 sm:$0xff]  }
 0x63d   : > { %7868 = vmatprep.subr.bf16.mxu1 %v10603_v35  ;;  %v14791_v17 = vrot.slane %v7915_v26, %v14667_v21  ;;  %v10740_v10 = vld [vmem:[%s10977_s23 + $0x5a0] ss:$8 sps:$4 sm:$0xff]   ;;  %v10748_v26 = vld [vmem:[%s10977_s23 + $0x594] ss:$8 sps:$4 sm:$0xff]  }
 0x63e   : > { %v7930_v35 = vcombine.high %v14785_v44, %v14785_v44 }
 0x63f   : > { %7828 = vmatpush1.bf16.msra.mxu0 %v10598_v4  ;;  %v10676_v4 = vld [vmem:[%s10977_s23 + $0x554] ss:$8 sps:$4 sm:$0xff]  }
 0x640   : > { %7869 = vmatpush1.bf16.msra.mxu1 %v10601_v7  ;;  %7829 = vmatprep.subr.bf16.mxu0 %v10606_v56  ;;  %v7937_v7 = vpack.c.bf16 %v7930_v35, %v7930_v35  ;;  %v7931_v56 = vcombine.high %v14791_v17, %v14791_v17  ;;  %v10743_v35 = vld [vmem:[%s10977_s23 + $0x490] ss:$8 sps:$4 sm:$0xff]  }
 0x641   : > { %7870 = vmatprep.subr.bf16.mxu1 %v10609_v53  ;;  %v10674_v53 = vld [vmem:[%s10977_s23 + $0x550] ss:$8 sps:$4 sm:$0xff]  }
 0x642   : > { %v7939_v9 = vpack.c.bf16 %v7931_v56, %v7931_v56 }
 0x643   : > { %7830 = vmatpush1.bf16.msra.mxu0 %v10604_v54  ;;  %v10680_v54 = vld [vmem:[%s10977_s23 + $0x540] ss:$8 sps:$4 sm:$0xff]  }
 0x644   : > { %7871 = vmatpush1.bf16.msra.mxu1 %v10607_v45  ;;  %7831 = vmatprep.subr.bf16.mxu0 %v10612_v11  ;;  %v10685_v45 = vld [vmem:[%s10977_s23 + $0x434] ss:$8 sps:$4 sm:$0xff]   ;;  %v10686_v11 = vld [vmem:[%s10977_s23 + $0x530] ss:$8 sps:$4 sm:$0xff]  }
 0x645   : > { %7872 = vmatprep.subr.bf16.mxu1 %v7813_v28  ;;  %v10691_v28 = vld [vmem:[%s10977_s23 + $0x424] ss:$8 sps:$4 sm:$0xff]  }
 0x647   : > { %7832 = vmatpush2.bf16.msra.mxu0 %v10610_v43  ;;  %v10694_v43 = vld [vmem:[%s10977_s23 + $0x524] ss:$8 sps:$4 sm:$0xff]  }
 0x648   : > { %7873 = vmatpush2.bf16.msra.mxu1 %v7810_v32  ;;  %7833 = vmatprep.subr.bf16.mxu0 %v10618_v46  ;;  %v10689_v32 = vld [vmem:[%s10977_s23 + $0x420] ss:$8 sps:$4 sm:$0xff]  }
 0x649   : > { %7874 = vmatprep.subr.bf16.mxu1 %v10621_v29  ;;  %v10692_v46 = vld [vmem:[%s10977_s23 + $0x520] ss:$8 sps:$4 sm:$0xff]   ;;  %v10697_v29 = vld [vmem:[%s10977_s23 + $0x414] ss:$8 sps:$4 sm:$0xff]  }
 0x64b   : > { %7834 = vmatpush2.bf16.msra.mxu0 %v10616_v38  ;;  %v10700_v38 = vld [vmem:[%s10977_s23 + $0x514] ss:$8 sps:$4 sm:$0xff]  }
 0x64c   : > { %7875 = vmatpush2.bf16.msra.mxu1 %v10619_v18  ;;  %7835 = vmatprep.subr.bf16.mxu0 %v10624_v51  ;;  %v10695_v18 = vld [vmem:[%s10977_s23 + $0x410] ss:$8 sps:$4 sm:$0xff]  }
 0x64d   : > { %7876 = vmatprep.subr.bf16.mxu1 %v10627_v62  ;;  %v10698_v51 = vld [vmem:[%s10977_s23 + $0x510] ss:$8 sps:$4 sm:$0xff]   ;;  %v10703_v62 = vld [vmem:[%s10977_s23 + $0x404] ss:$8 sps:$4 sm:$0xff]  }
 0x64f   : > { %7836 = vmatpush2.bf16.msra.mxu0 %v10622_v1  ;;  %v10706_v1 = vld [vmem:[%s10977_s23 + $0x504] ss:$8 sps:$4 sm:$0xff]  }
 0x650   : > { %7877 = vmatpush2.bf16.msra.mxu1 %v10625_v25  ;;  %7837 = vmatprep.subr.bf16.mxu0 %v10630_v55  ;;  %v10712_v25 = vld [vmem:[%s10977_s23 + $0x5f4] ss:$8 sps:$4 sm:$0x1f]   ;;  %v10701_v55 = vld [vmem:[%s10977_s23 + $0x400] ss:$8 sps:$4 sm:$0xff]  }
 0x651   : > { %7878 = vmatprep.subr.bf16.mxu1 %v10633_v40  ;;  %v10704_v40 = vld [vmem:[%s10977_s23 + $0x500] ss:$8 sps:$4 sm:$0xff]  }
 0x653   : > { %7838 = vmatpush2.bf16.msra.mxu0 %v10628_v6  ;;  %v10710_v6 = vld [vmem:[%s10977_s23 + $0x5f0] ss:$8 sps:$4 sm:$0x1f]  }
 0x654   : > { %7879 = vmatpush2.bf16.msra.mxu1 %v10631_v63  ;;  %7839 = vmatprep.subr.bf16.mxu0 %v10636_v60  ;;  %v10709_v63 = vld [vmem:[%s10977_s23 + $0x4f4] ss:$8 sps:$4 sm:$0xff]   ;;  %v8330_v60 = vand.u32 %v10712_v25, %v14646_v48  ;;  %v10777_v25 = vld [vmem:[%s10977_s23 + $0x740] ss:$8 sps:$4 sm:$0xff]  }
 0x655   : > { %7880 = vmatprep.subr.bf16.mxu1 %v10639_v8  ;;  %v10707_v8 = vld [vmem:[%s10977_s23 + $0x4f0] ss:$8 sps:$4 sm:$0xff]  }
 0x657   : > { %7840 = vmatpush2.bf16.msra.mxu0 %v10634_v59  ;;  %v8327_v59 = vand.u32 %v10710_v6, %v14646_v48  ;;  %v10780_v6 = vld [vmem:[%s10977_s23 + $0x630] ss:$8 sps:$4 sm:$0xff]  }
 0x658   : > { %7881 = vmatpush2.bf16.msra.mxu1 %v10637_v0  ;;  %7841 = vmatprep.subr.bf16.mxu0 %v10642_v50  ;;  %v10715_v0 = vld [vmem:[%s10977_s23 + $0x4e4] ss:$8 sps:$4 sm:$0xff]  }
 0x659   : > { %7882 = vmatprep.subr.bf16.mxu1 %v10645_v12  ;;  %v10718_v50 = vld [vmem:[%s10977_s23 + $0x5e4] ss:$8 sps:$4 sm:$0xff]   ;;  %v10713_v12 = vld [vmem:[%s10977_s23 + $0x4e0] ss:$8 sps:$4 sm:$0xff]  }
 0x65b   : > { %7842 = vmatpush2.bf16.msra.mxu0 %v10640_v37  ;;  %v10716_v37 = vld [vmem:[%s10977_s23 + $0x5e0] ss:$8 sps:$4 sm:$0xff]  }
 0x65c   : > { %7883 = vmatpush2.bf16.msra.mxu1 %v10643_v57  ;;  %7843 = vmatprep.subr.bf16.mxu0 %v10648_v39  ;;  %v10721_v57 = vld [vmem:[%s10977_s23 + $0x4d4] ss:$8 sps:$4 sm:$0xff]  }
 0x65d   : > { %7884 = vmatprep.subr.bf16.mxu1 %v10651_v47  ;;  %v10724_v39 = vld [vmem:[%s10977_s23 + $0x5d4] ss:$8 sps:$4 sm:$0xff]   ;;  %v10719_v47 = vld [vmem:[%s10977_s23 + $0x4d0] ss:$8 sps:$4 sm:$0xff]  }
 0x65f   : > { %7844 = vmatpush2.bf16.msra.mxu0 %v10646_v19  ;;  %v10722_v19 = vld [vmem:[%s10977_s23 + $0x5d0] ss:$8 sps:$4 sm:$0xff]  }
 0x660   : > { %7885 = vmatpush2.bf16.msra.mxu1 %v10649_v15  ;;  %7845 = vmatprep.subr.bf16.mxu0 %v10654_v16  ;;  %v10727_v15 = vld [vmem:[%s10977_s23 + $0x4c4] ss:$8 sps:$4 sm:$0xff]  }
 0x661   : > { %7886 = vmatprep.subr.bf16.mxu1 %v10657_v14  ;;  %v10730_v16 = vld [vmem:[%s10977_s23 + $0x5c4] ss:$8 sps:$4 sm:$0xff]   ;;  %v10725_v14 = vld [vmem:[%s10977_s23 + $0x4c0] ss:$8 sps:$4 sm:$0xff]  }
 0x663   : > { %7846 = vmatpush2.bf16.msra.mxu0 %v10652_v22  ;;  %v10728_v22 = vld [vmem:[%s10977_s23 + $0x5c0] ss:$8 sps:$4 sm:$0xff]  }
 0x664   : > { %7887 = vmatpush2.bf16.msra.mxu1 %v10655_v20  ;;  %8332 = vmatprep.subr.bf16.mxu0 %v10661_v5  ;;  %v10733_v20 = vld [vmem:[%s10977_s23 + $0x4b4] ss:$8 sps:$4 sm:$0xff]  }
 0x665   : > { %8373 = vmatprep.subr.bf16.mxu1 %v10664_v58  ;;  %v10736_v5 = vld [vmem:[%s10977_s23 + $0x5b4] ss:$8 sps:$4 sm:$0xff]   ;;  %v10731_v58 = vld [vmem:[%s10977_s23 + $0x4b0] ss:$8 sps:$4 sm:$0xff]  }
 0x666   : > { %7848 = vmatmul.mubr.bf16.vlgmr.msra.gmra.mxu0 %v7419_v49  ;;  %v10734_v49 = vld [vmem:[%s10977_s23 + $0x5b0] ss:$8 sps:$4 sm:$0xff]  }
 0x667   : > { %7889 = vmatmul.mubr.bf16.vlgmr.msra.gmra.mxu1 %v7421_v31  ;;  %8333 = vmatpush1.bf16.msra.mxu0 %v10659_v30  ;;  %v10739_v31 = vld [vmem:[%s10977_s23 + $0x4a4] ss:$8 sps:$4 sm:$0xff]  }
 0x668   : > { %8374 = vmatpush1.bf16.msra.mxu1 %v10662_v2  ;;  %8334 = vmatprep.subr.bf16.mxu0 %v10667_v52  ;;  %v10742_v30 = vld [vmem:[%s10977_s23 + $0x5a4] ss:$8 sps:$4 sm:$0xff]   ;;  %v9909_v2 = vld [vmem:[%s14671_s30 + $0x18] sm:$0xff]  ;;  %v10737_v52 = vld [vmem:[%s10977_s23 + $0x4a0] ss:$8 sps:$4 sm:$0xff]  }
 0x669   : > { %8375 = vmatprep.subr.bf16.mxu1 %v10670_v34  ;;  %8364 = vmatprep.mubr.bf16.mxu0 %v7937_v7  ;;  %v10745_v34 = vld [vmem:[%s10977_s23 + $0x494] ss:$8 sps:$4 sm:$0xff]   ;;  %v14855_v7 = vrot.slane %v9909_v2, %v14667_v21 }
 0x66a   : > { %9906 = vmatprep.mubr.msk.bf16.mxu1 %vm7284_vm9, %v7939_v9  ;;  %v10752_v9 = vld [vmem:[%s10977_s23 + $0x580] ss:$8 sps:$4 sm:$0xff]  }
 0x66b   : > { %8335 = vmatpush1.bf16.msra.mxu0 %v10665_v3  ;;  %v8432_v3 = vcombine.high %v9909_v2, %v9909_v2  ;;  %v10813_v2 = vld [vmem:[%s10977_s23 + $0x7e0] ss:$8 sps:$4 sm:$0xff]  }
 0x66c   : > { %8376 = vmatpush1.bf16.msra.mxu1 %v10668_v27  ;;  %8336 = vmatprep.subr.bf16.mxu0 %v10673_v23  ;;  %v10746_v27 = vld [vmem:[%s10977_s23 + $0x590] ss:$8 sps:$4 sm:$0xff]   ;;  %v10751_v23 = vld [vmem:[%s10977_s23 + $0x484] ss:$8 sps:$4 sm:$0xff]  }
 0x66d   : > { %8377 = vmatprep.subr.bf16.mxu1 %v10676_v4  ;;  %v10754_v4 = vld [vmem:[%s10977_s23 + $0x584] ss:$8 sps:$4 sm:$0xff]   ;;  %v14858_v56 = vrot.slane %v8432_v3, %v14667_v21 }
 0x66e   : > { %v10827_v3 = vld [vmem:[%s10977_s23 + $0x7c4] ss:$8 sps:$4 sm:$0xff]  }
 0x66f   : > { %8337 = vmatpush1.bf16.msra.mxu0 %v10671_v33  ;;  %v10749_v33 = vld [vmem:[%s10977_s23 + $0x480] ss:$8 sps:$4 sm:$0xff]  }
 0x670   : > { %8378 = vmatpush1.bf16.msra.mxu1 %v10674_v53  ;;  %8338 = vmatprep.subr.bf16.mxu0 %v10679_v61  ;;  %v10758_v53 = vld [vmem:[%s10977_s23 + $0x674] ss:$8 sps:$4 sm:$0xff]  }
 0x671   : > { %8379 = vmatprep.subr.bf16.mxu1 %v10682_v42  ;;  %v10761_v61 = vld [vmem:[%s10977_s23 + $0x774] ss:$8 sps:$4 sm:$0xff]   ;;  %v8447_v42 = vcombine.high %v14855_v7, %v14855_v7 }
 0x673   : > { %8339 = vmatpush1.bf16.msra.mxu0 %v10677_v13  ;;  %v8448_v13 = vcombine.high %v14858_v56, %v14858_v56 }
 0x674   : > { %8380 = vmatpush1.bf16.msra.mxu1 %v10680_v54  ;;  %8340 = vmatprep.subr.bf16.mxu0 %v10685_v45  ;;  %v7936_v54 = vpack.c.bf16 %v14785_v44, %v14785_v44  ;;  %v7938_v45 = vpack.c.bf16 %v14791_v17, %v14791_v17  ;;  %v10762_v44 = vld [vmem:[%s10977_s23 + $0x660] ss:$8 sps:$4 sm:$0xff]  }
 0x675   : > { %8381 = vmatprep.subr.bf16.mxu1 %v10688_v41  ;;  %v10756_v41 = vld [vmem:[%s10977_s23 + $0x670] ss:$8 sps:$4 sm:$0xff]   ;;  %v10765_v17 = vld [vmem:[%s10977_s23 + $0x760] ss:$8 sps:$4 sm:$0xff]  }
 0x677   : > { %8341 = vmatpush1.bf16.msra.mxu0 %v10683_v24  ;;  %v10759_v24 = vld [vmem:[%s10977_s23 + $0x770] ss:$8 sps:$4 sm:$0xff]  }
 0x678   : > { %8382 = vmatpush1.bf16.msra.mxu1 %v10686_v11  ;;  %8342 = vmatprep.subr.bf16.mxu0 %v10691_v28  ;;  %v10764_v11 = vld [vmem:[%s10977_s23 + $0x664] ss:$8 sps:$4 sm:$0xff]  }
 0x679   : > { %8383 = vmatprep.subr.bf16.mxu1 %v10694_v43  ;;  %v10767_v28 = vld [vmem:[%s10977_s23 + $0x764] ss:$8 sps:$4 sm:$0xff]   ;;  %v8454_v43 = vpack.c.bf16 %v8447_v42, %v8447_v42  ;;  %v10834_v42 = vld [vmem:[%s10977_s23 + $0x6a0] ss:$8 sps:$4 sm:$0xff]  }
 0x67b   : > { %8343 = vmatpush1.bf16.msra.mxu0 %v10689_v32  ;;  %v8456_v32 = vpack.c.bf16 %v8448_v13, %v8448_v13  ;;  %v10837_v13 = vld [vmem:[%s10977_s23 + $0x7a0] ss:$8 sps:$4 sm:$0xff]  }
 0x67c   : > { %8384 = vmatpush1.bf16.msra.mxu1 %v10692_v46  ;;  %8344 = vmatprep.subr.bf16.mxu0 %v10697_v29  ;;  %v10770_v46 = vld [vmem:[%s10977_s23 + $0x654] ss:$8 sps:$4 sm:$0xff]  }
 0x67d   : > { %8385 = vmatprep.subr.bf16.mxu1 %v10700_v38  ;;  %v10773_v29 = vld [vmem:[%s10977_s23 + $0x754] ss:$8 sps:$4 sm:$0xff]   ;;  %v10768_v38 = vld [vmem:[%s10977_s23 + $0x650] ss:$8 sps:$4 sm:$0xff]  }
 0x67f   : > { %8345 = vmatpush1.bf16.msra.mxu0 %v10695_v18  ;;  %v10771_v18 = vld [vmem:[%s10977_s23 + $0x750] ss:$8 sps:$4 sm:$0xff]  }
 0x680   : > { %8386 = vmatpush1.bf16.msra.mxu1 %v10698_v51  ;;  %8346 = vmatprep.subr.bf16.mxu0 %v10703_v62  ;;  %v10776_v51 = vld [vmem:[%s10977_s23 + $0x644] ss:$8 sps:$4 sm:$0xff]  }
 0x681   : > { %8387 = vmatprep.subr.bf16.mxu1 %v10706_v1  ;;  %v10779_v62 = vld [vmem:[%s10977_s23 + $0x744] ss:$8 sps:$4 sm:$0xff]   ;;  %v10774_v1 = vld [vmem:[%s10977_s23 + $0x640] ss:$8 sps:$4 sm:$0xff]  }
 0x683   : > { %8347 = vmatpush1.bf16.msra.mxu0 %v10701_v55  ;;  %v10782_v55 = vld [vmem:[%s10977_s23 + $0x634] ss:$8 sps:$4 sm:$0xff]  }
 0x684   : > { %8388 = vmatpush1.bf16.msra.mxu1 %v10704_v40  ;;  %8348 = vmatprep.subr.bf16.mxu0 %v10709_v63  ;;  %v10785_v40 = vld [vmem:[%s10977_s23 + $0x734] ss:$8 sps:$4 sm:$0xff]   ;;  %v10783_v63 = vld [vmem:[%s10977_s23 + $0x730] ss:$8 sps:$4 sm:$0xff]  }
 0x685   : > { %8389 = vmatprep.subr.bf16.mxu1 %v8330_v60  ;;  %v10788_v60 = vld [vmem:[%s10977_s23 + $0x624] ss:$8 sps:$4 sm:$0xff]  }
 0x687   : > { %8349 = vmatpush2.bf16.msra.mxu0 %v10707_v8  ;;  %v10791_v8 = vld [vmem:[%s10977_s23 + $0x724] ss:$8 sps:$4 sm:$0xff]  }
 0x688   : > { %8390 = vmatpush2.bf16.msra.mxu1 %v8327_v59  ;;  %8350 = vmatprep.subr.bf16.mxu0 %v10715_v0  ;;  %v10786_v59 = vld [vmem:[%s10977_s23 + $0x620] ss:$8 sps:$4 sm:$0xff]  }
 0x689   : > { %8391 = vmatprep.subr.bf16.mxu1 %v10718_v50  ;;  %v10789_v0 = vld [vmem:[%s10977_s23 + $0x720] ss:$8 sps:$4 sm:$0xff]   ;;  %v10794_v50 = vld [vmem:[%s10977_s23 + $0x614] ss:$8 sps:$4 sm:$0xff]  }
 0x68b   : > { %8351 = vmatpush2.bf16.msra.mxu0 %v10713_v12  ;;  %v10797_v12 = vld [vmem:[%s10977_s23 + $0x714] ss:$8 sps:$4 sm:$0xff]  }
 0x68c   : > { %8392 = vmatpush2.bf16.msra.mxu1 %v10716_v37  ;;  %8352 = vmatprep.subr.bf16.mxu0 %v10721_v57  ;;  %v10792_v37 = vld [vmem:[%s10977_s23 + $0x610] ss:$8 sps:$4 sm:$0xff]  }
 0x68d   : > { %8393 = vmatprep.subr.bf16.mxu1 %v10724_v39  ;;  %v10795_v57 = vld [vmem:[%s10977_s23 + $0x710] ss:$8 sps:$4 sm:$0xff]   ;;  %v10800_v39 = vld [vmem:[%s10977_s23 + $0x604] ss:$8 sps:$4 sm:$0xff]  }
 0x68f   : > { %8353 = vmatpush2.bf16.msra.mxu0 %v10719_v47  ;;  %v10803_v47 = vld [vmem:[%s10977_s23 + $0x704] ss:$8 sps:$4 sm:$0xff]  }
 0x690   : > { %8394 = vmatpush2.bf16.msra.mxu1 %v10722_v19  ;;  %8354 = vmatprep.subr.bf16.mxu0 %v10727_v15  ;;  %v10809_v19 = vld [vmem:[%s10977_s23 + $0x7f4] ss:$8 sps:$4 sm:$0x1f]   ;;  %v10798_v15 = vld [vmem:[%s10977_s23 + $0x600] ss:$8 sps:$4 sm:$0xff]  }
 0x691   : > { %8395 = vmatprep.subr.bf16.mxu1 %v10730_v16  ;;  %v10801_v16 = vld [vmem:[%s10977_s23 + $0x700] ss:$8 sps:$4 sm:$0xff]  }
 0x693   : > { %8355 = vmatpush2.bf16.msra.mxu0 %v10725_v14  ;;  %v10807_v14 = vld [vmem:[%s10977_s23 + $0x7f0] ss:$8 sps:$4 sm:$0x1f]  }
 0x694   : > { %8396 = vmatpush2.bf16.msra.mxu1 %v10728_v22  ;;  %8356 = vmatprep.subr.bf16.mxu0 %v10733_v20  ;;  %v10806_v22 = vld [vmem:[%s10977_s23 + $0x6f4] ss:$8 sps:$4 sm:$0xff]   ;;  %v8847_v20 = vand.u32 %v10809_v19, %v14646_v48 }
 0x695   : > { %8397 = vmatprep.subr.bf16.mxu1 %v10736_v5  ;;  %v10804_v5 = vld [vmem:[%s10977_s23 + $0x6f0] ss:$8 sps:$4 sm:$0xff]  }
 0x697   : > { %8357 = vmatpush2.bf16.msra.mxu0 %v10731_v58  ;;  %v8844_v58 = vand.u32 %v10807_v14, %v14646_v48  ;;  %v10816_v48 = vld [vmem:[%s10977_s23 + $0x6d0] ss:$8 sps:$4 sm:$0xff]  }
 0x698   : > { %8398 = vmatpush2.bf16.msra.mxu1 %v10734_v49  ;;  %8358 = vmatprep.subr.bf16.mxu0 %v10739_v31  ;;  %v10812_v49 = vld [vmem:[%s10977_s23 + $0x6e4] ss:$8 sps:$4 sm:$0xff]  }
 0x699   : > { %8399 = vmatprep.subr.bf16.mxu1 %v10742_v30  ;;  %v10815_v31 = vld [vmem:[%s10977_s23 + $0x7e4] ss:$8 sps:$4 sm:$0xff]   ;;  %v10810_v30 = vld [vmem:[%s10977_s23 + $0x6e0] ss:$8 sps:$4 sm:$0xff]  }
 0x69b   : > { %8359 = vmatpush2.bf16.msra.mxu0 %v10737_v52  ;;  %v10818_v52 = vld [vmem:[%s10977_s23 + $0x6d4] ss:$8 sps:$4 sm:$0xff]  }
 0x69c   : > { %8400 = vmatpush2.bf16.msra.mxu1 %v10740_v10  ;;  %8360 = vmatprep.subr.bf16.mxu0 %v10745_v34  ;;  %v10821_v10 = vld [vmem:[%s10977_s23 + $0x7d4] ss:$8 sps:$4 sm:$0xff]   ;;  %v10819_v34 = vld [vmem:[%s10977_s23 + $0x7d0] ss:$8 sps:$4 sm:$0xff]  }
 0x69d   : > { %8401 = vmatprep.subr.bf16.mxu1 %v10748_v26  ;;  %v10824_v26 = vld [vmem:[%s10977_s23 + $0x6c4] ss:$8 sps:$4 sm:$0xff]  }
 0x69f   : > { %8361 = vmatpush2.bf16.msra.mxu0 %v10743_v35  ;;  %v10822_v35 = vld [vmem:[%s10977_s23 + $0x6c0] ss:$8 sps:$4 sm:$0xff]  }
 0x6a0   : > { %8402 = vmatpush2.bf16.msra.mxu1 %v10746_v27  ;;  %8362 = vmatprep.subr.bf16.mxu0 %v10751_v23  ;;  %v10825_v27 = vld [vmem:[%s10977_s23 + $0x7c0] ss:$8 sps:$4 sm:$0xff]   ;;  %v10830_v23 = vld [vmem:[%s10977_s23 + $0x6b4] ss:$8 sps:$4 sm:$0xff]  }
 0x6a1   : > { %8403 = vmatprep.subr.bf16.mxu1 %v10754_v4  ;;  %v10833_v4 = vld [vmem:[%s10977_s23 + $0x7b4] ss:$8 sps:$4 sm:$0xff]  }
 0x6a3   : > { %8363 = vmatpush2.bf16.msra.mxu0 %v10749_v33  ;;  %v10828_v33 = vld [vmem:[%s10977_s23 + $0x6b0] ss:$8 sps:$4 sm:$0xff]  }
 0x6a4   : > { %8404 = vmatpush2.bf16.msra.mxu1 %v10752_v9  ;;  %8849 = vmatprep.subr.bf16.mxu0 %v10758_v53  ;;  %v10831_v9 = vld [vmem:[%s10977_s23 + $0x7b0] ss:$8 sps:$4 sm:$0xff]   ;;  %v10836_v53 = vld [vmem:[%s10977_s23 + $0x6a4] ss:$8 sps:$4 sm:$0xff]  }
 0x6a5   : > { %8890 = vmatprep.subr.bf16.mxu1 %v10761_v61  ;;  %v10839_v61 = vld [vmem:[%s10977_s23 + $0x7a4] ss:$8 sps:$4 sm:$0xff]  }
 0x6a6   : > { %8365 = vmatmul.mubr.bf16.vlgmr.msra.gmra.mxu0 %v7936_v54  ;;  %v10842_v54 = vld [vmem:[%s10977_s23 + $0x694] ss:$8 sps:$4 sm:$0xff]  }
 0x6a7   : > { %8406 = vmatmul.mubr.bf16.vlgmr.msra.gmra.mxu1 %v7938_v45  ;;  %8850 = vmatpush1.bf16.msra.mxu0 %v10756_v41  ;;  %v10845_v45 = vld [vmem:[%s10977_s23 + $0x794] ss:$8 sps:$4 sm:$0xff]   ;;  %v10840_v41 = vld [vmem:[%s10977_s23 + $0x690] ss:$8 sps:$4 sm:$0xff]  }
 0x6a8   : > { %8891 = vmatpush1.bf16.msra.mxu1 %v10759_v24  ;;  %8851 = vmatprep.subr.bf16.mxu0 %v10764_v11  ;;  %v10843_v24 = vld [vmem:[%s10977_s23 + $0x790] ss:$8 sps:$4 sm:$0xff]   ;;  %v10848_v11 = vld [vmem:[%s10977_s23 + $0x684] ss:$8 sps:$4 sm:$0xff]  }
 0x6a9   : > { %8892 = vmatprep.subr.bf16.mxu1 %v10767_v28  ;;  %8881 = vmatprep.mubr.bf16.mxu0 %v8454_v43  ;;  %v10851_v28 = vld [vmem:[%s10977_s23 + $0x784] ss:$8 sps:$4 sm:$0xff]   ;;  %v10846_v43 = vld [vmem:[%s10977_s23 + $0x680] ss:$8 sps:$4 sm:$0xff]  }
 0x6aa   : > { %10038 = vmatprep.mubr.msk.bf16.mxu1 %vm7284_vm9, %v8456_v32  ;;  %v10849_v32 = vld [vmem:[%s10977_s23 + $0x780] ss:$8 sps:$4 sm:$0xff]   ;;  %s10899_s23 = smov (!%p10039_p5), 127  }
 0x6ab   : > { %8852 = vmatpush1.bf16.msra.mxu0 %v10762_v44  ;;  %v8453_v44 = vpack.c.bf16 %v14855_v7, %v14855_v7 }
 0x6ac   : > { %8893 = vmatpush1.bf16.msra.mxu1 %v10765_v17  ;;  %8853 = vmatprep.subr.bf16.mxu0 %v10770_v46  ;;  %v8455_v17 = vpack.c.bf16 %v14858_v56, %v14858_v56 }
 0x6ad   : > { %8894 = vmatprep.subr.bf16.mxu1 %v10773_v29 }
 0x6af   : > { %8854 = vmatpush1.bf16.msra.mxu0 %v10768_v38 }
 0x6b0   : > { %8895 = vmatpush1.bf16.msra.mxu1 %v10771_v18  ;;  %8855 = vmatprep.subr.bf16.mxu0 %v10776_v51 }
 0x6b1   : > { %8896 = vmatprep.subr.bf16.mxu1 %v10779_v62 }
 0x6b3   : > { %8856 = vmatpush1.bf16.msra.mxu0 %v10774_v1 }
 0x6b4   : > { %8897 = vmatpush1.bf16.msra.mxu1 %v10777_v25  ;;  %8857 = vmatprep.subr.bf16.mxu0 %v10782_v55 }
 0x6b5   : > { %8898 = vmatprep.subr.bf16.mxu1 %v10785_v40 }
 0x6b7   : > { %8858 = vmatpush1.bf16.msra.mxu0 %v10780_v6 }
 0x6b8   : > { %8899 = vmatpush1.bf16.msra.mxu1 %v10783_v63  ;;  %8859 = vmatprep.subr.bf16.mxu0 %v10788_v60 }
 0x6b9   : > { %8900 = vmatprep.subr.bf16.mxu1 %v10791_v8 }
 0x6bb   : > { %8860 = vmatpush1.bf16.msra.mxu0 %v10786_v59 }
 0x6bc   : > { %8901 = vmatpush1.bf16.msra.mxu1 %v10789_v0  ;;  %8861 = vmatprep.subr.bf16.mxu0 %v10794_v50  ;;  %v6870_v50 = vld [vmem:[#allocation4] sm:$0xf] }
 0x6bd   : > { %8902 = vmatprep.subr.bf16.mxu1 %v10797_v12 }
 0x6bf   : > { %8862 = vmatpush1.bf16.msra.mxu0 %v10792_v37 }
 0x6c0   : > { %8903 = vmatpush1.bf16.msra.mxu1 %v10795_v57  ;;  %8863 = vmatprep.subr.bf16.mxu0 %v10800_v39 }
 0x6c1   : > { %8904 = vmatprep.subr.bf16.mxu1 %v10803_v47 }
 0x6c3   : > { %8864 = vmatpush1.bf16.msra.mxu0 %v10798_v15 }
 0x6c4   : > { %8905 = vmatpush1.bf16.msra.mxu1 %v10801_v16  ;;  %8865 = vmatprep.subr.bf16.mxu0 %v10806_v22 }
 0x6c5   : > { %8906 = vmatprep.subr.bf16.mxu1 %v8847_v20 }
 0x6c7   : > { %8866 = vmatpush2.bf16.msra.mxu0 %v10804_v5 }
 0x6c8   : > { %8907 = vmatpush2.bf16.msra.mxu1 %v8844_v58  ;;  %8867 = vmatprep.subr.bf16.mxu0 %v10812_v49 }
 0x6c9   : > { %8908 = vmatprep.subr.bf16.mxu1 %v10815_v31 }
 0x6cb   : > { %8868 = vmatpush2.bf16.msra.mxu0 %v10810_v30 }
 0x6cc   : > { %8909 = vmatpush2.bf16.msra.mxu1 %v10813_v2  ;;  %8869 = vmatprep.subr.bf16.mxu0 %v10818_v52 }
 0x6cd   : > { %8910 = vmatprep.subr.bf16.mxu1 %v10821_v10 }
 0x6cf   : > { %8870 = vmatpush2.bf16.msra.mxu0 %v10816_v48 }
 0x6d0   : > { %8911 = vmatpush2.bf16.msra.mxu1 %v10819_v34  ;;  %8871 = vmatprep.subr.bf16.mxu0 %v10824_v26 }
 0x6d1   : > { %8912 = vmatprep.subr.bf16.mxu1 %v10827_v3 }
 0x6d3   : > { %8872 = vmatpush2.bf16.msra.mxu0 %v10822_v35 }
 0x6d4   : > { %8913 = vmatpush2.bf16.msra.mxu1 %v10825_v27  ;;  %8873 = vmatprep.subr.bf16.mxu0 %v10830_v23 }
 0x6d5   : > { %8914 = vmatprep.subr.bf16.mxu1 %v10833_v4 }
 0x6d7   : > { %8874 = vmatpush2.bf16.msra.mxu0 %v10828_v33 }
 0x6d8   : > { %8915 = vmatpush2.bf16.msra.mxu1 %v10831_v9  ;;  %8875 = vmatprep.subr.bf16.mxu0 %v10836_v53 }
 0x6d9   : > { %8916 = vmatprep.subr.bf16.mxu1 %v10839_v61 }
 0x6db   : > { %8876 = vmatpush2.bf16.msra.mxu0 %v10834_v42 }
 0x6dc   : > { %8917 = vmatpush2.bf16.msra.mxu1 %v10837_v13  ;;  %8877 = vmatprep.subr.bf16.mxu0 %v10842_v54 }
 0x6dd   : > { %8918 = vmatprep.subr.bf16.mxu1 %v10845_v45 }
 0x6df   : > { %8878 = vmatpush2.bf16.msra.mxu0 %v10840_v41 }
 0x6e0   : > { %8919 = vmatpush2.bf16.msra.mxu1 %v10843_v24  ;;  %8879 = vmatprep.subr.bf16.mxu0 %v10848_v11 }
 0x6e1   : > { %8920 = vmatprep.subr.bf16.mxu1 %v10851_v28 }
 0x6e3   : > { %8880 = vmatpush2.bf16.msra.mxu0 %v10846_v43 }
 0x6e4   : > { %8921 = vmatpush2.bf16.msra.mxu1 %v10849_v32 }
 0x6e6   : > { %v7332_v46 = vpop.f32.mrf.mxu0  ;;  %8882 = vmatmul.mubr.bf16.vlgmr.msra.gmra.mxu0 %v8453_v44 }
 0x6e7   : > { %v7373_v29 = vpop.f32.mrf.mxu1  ;;  %8923 = vmatmul.mubr.bf16.vlgmr.msra.gmra.mxu1 %v8455_v17 }
 0x6e8   : > { %v7374_v38 = vadd.f32 %v7373_v29, %v7332_v46  ;;  %v7334_v18 = vpop.f32.mrf.mxu0 }
 0x6e9   : > { %v7375_v51 = vpop.f32.mrf.mxu1 }
 0x6ea   : > { %v7376_v62 = vadd.f32 %v7375_v51, %v7334_v18  ;;  %v7336_v1 = vpop.f32.mrf.mxu0 }
 0x6eb   : > { %v7377_v25 = vpop.f32.mrf.mxu1 }
 0x6ec   : > { %v7382_v55 = vcombine.low %v7374_v38, %v7376_v62  ;;  %v7337_v40 = vpop.f32.mrf.mxu0 }
 0x6ed   : > { %v7378_v6 = vpop.f32.mrf.mxu1 }
 0x6ee   : > { %v7389_v59 = vrot.slane %v7382_v55, %v14667_v21 }
 0x6f0   : > { %v7391_v19 = vadd.f32 %v7389_v59, %v6870_v50 }
 0x726   : > { %v7849_v63 = vpop.f32.mrf.mxu0 }
 0x727   : > { %v7890_v7 = vpop.f32.mrf.mxu1 }
 0x728   : > { %v7891_v60 = vadd.f32 %v7890_v7, %v7849_v63  ;;  %v7851_v8 = vpop.f32.mrf.mxu0 }
 0x729   : > { %v7892_v56 = vpop.f32.mrf.mxu1 }
 0x72a   : > { %v7893_v0 = vadd.f32 %v7892_v56, %v7851_v8  ;;  %v7853_v12 = vpop.f32.mrf.mxu0 }
 0x72b   : > { %v7894_v37 = vpop.f32.mrf.mxu1 }
 0x72c   : > { %v7899_v57 = vcombine.low %v7891_v60, %v7893_v0  ;;  %v7854_v39 = vpop.f32.mrf.mxu0 }
 0x72d   : > { %v7895_v47 = vpop.f32.mrf.mxu1 }
 0x72e   : > { %v7906_v15 = vrot.slane %v7899_v57, %v14667_v21 }
 0x730   : > { %v7908_v16 = vadd.f32 %v7906_v15, %v7391_v19 }
 0x766   : > { %v8366_v14 = vpop.f32.mrf.mxu0 }
 0x767   : > { %v8407_v22 = vpop.f32.mrf.mxu1 }
 0x768   : > { %v8408_v20 = vadd.f32 %v8407_v22, %v8366_v14  ;;  %v8368_v5 = vpop.f32.mrf.mxu0 }
 0x769   : > { %v8409_v58 = vpop.f32.mrf.mxu1 }
 0x76a   : > { %v8410_v49 = vadd.f32 %v8409_v58, %v8368_v5  ;;  %v8370_v31 = vpop.f32.mrf.mxu0 }
 0x76b   : > { %v8411_v30 = vpop.f32.mrf.mxu1 }
 0x76c   : > { %v8416_v2 = vcombine.low %v8408_v20, %v8410_v49  ;;  %v8371_v52 = vpop.f32.mrf.mxu0 }
 0x76d   : > { %v8412_v10 = vpop.f32.mrf.mxu1 }
 0x76e   : > { %v8423_v48 = vrot.slane %v8416_v2, %v14667_v21 }
 0x770   : > { %v8425_v34 = vadd.f32 %v8423_v48, %v7908_v16 }
 0x7a6   : > { %v8883_v26 = vpop.f32.mrf.mxu0 }
 0x7a7   : > { %v8924_v3 = vpop.f32.mrf.mxu1 }
 0x7a8   : > { %v8885_v35 = vpop.f32.mrf.mxu0  ;;  %v8925_v23 = vadd.f32 %v8924_v3, %v8883_v26 }
 0x7a9   : > { %v8926_v27 = vpop.f32.mrf.mxu1 }
 0x7aa   : > { %v8927_v4 = vadd.f32 %v8926_v27, %v8885_v35  ;;  %v8887_v33 = vpop.f32.mrf.mxu0 }
 0x7ab   : > { %v8928_v9 = vpop.f32.mrf.mxu1 }
 0x7ac   : > { %v8933_v53 = vcombine.low %v8925_v23, %v8927_v4  ;;  %v8888_v61 = vpop.f32.mrf.mxu0 }
 0x7ad   : > { %v8929_v42 = vpop.f32.mrf.mxu1 }
 0x7ae   : > { %v8940_v13 = vrot.slane %v8933_v53, %v14667_v21  ;;  %8947 = sbr.rel (%p10039_p5) target bundleno = 2692 (0xa84), region = 68 }
 0x7b0   : > { %v8942_v54 = vadd.f32 %v8940_v13, %v8425_v34 }
 0x7b2   : > { %8943 = vst [vmem:[#allocation4] sm:$0xf] %v8942_v54 }
 0x7b3   : > { %v9001_v45 = vld [vmem:[%s15078_s8 + $0xf8] sm:$0xff]  ;;  %v9000_v24 = vld [vmem:[%s15078_s8 + $0xf0] sm:$0xff]  ;;  %v8999_v28 = vld [vmem:[%s15078_s8 + $0xe8] sm:$0xff]  ;;  %v8953_v38 = vsub.s32 0, %v14658_v36  ;;  %v8957_v18 = vsub.s32 1, %v14658_v36  ;;  %vm9090_vm10 = vcmask 25600  }
 0x7b4   : > { %v8985_v41 = vld [vmem:[%s15078_s8 + $0x78] sm:$0xff]  ;;  %10172 = vmatprep.subr.mxu0 %v9001_v45  ;;  %v8984_v11 = vld [vmem:[%s15078_s8 + $0x70] sm:$0xff]  ;;  %v8983_v43 = vld [vmem:[%s15078_s8 + $0x68] sm:$0xff]  ;;  %vm9121_vm11 = vcmask 1024  }
 0x7b5   : > { %10173 = vmatpush3.msra.mxu0 %v8985_v41  ;;  %v8998_v32 = vld [vmem:[%s15078_s8 + $0xe0] sm:$0xff]  ;;  %v8997_v17 = vld [vmem:[%s15078_s8 + $0xd8] sm:$0xff]  ;;  %v8996_v29 = vld [vmem:[%s15078_s8 + $0xd0] sm:$0xff] }
 0x7b6   : > { %10174 = vmatprep.subr.mxu0 %v9000_v24  ;;  %v8982_v44 = vld [vmem:[%s15078_s8 + $0x60] sm:$0xff]  ;;  %v8981_v46 = vld [vmem:[%s15078_s8 + $0x58] sm:$0xff]  ;;  %v8980_v51 = vld [vmem:[%s15078_s8 + $0x50] sm:$0xff] }
 0x7b7   : > { %10175 = vmatpush3.msra.mxu0 %v8984_v11  ;;  %v8995_v62 = vld [vmem:[%s15078_s8 + $0xc8] sm:$0xff]  ;;  %v8949_v25 = vld [vmem:[%s15077_s7] sm:$0x3]  ;;  %v8993_v63 = vld [vmem:[%s15078_s8 + $0xb8] sm:$0xff] }
 0x7b8   : > { %10176 = vmatprep.subr.mxu0 %v8999_v28  ;;  %v8979_v1 = vld [vmem:[%s15078_s8 + $0x48] sm:$0xff]  ;;  %v8994_v36 = vld [vmem:[%s15078_s8 + $0xc0] sm:$0xff]  ;;  %v8954_v55 = vrot.slane %v8949_v25, %v8953_v38  ;;  %v8958_v40 = vrot.slane %v8949_v25, %v8957_v18  ;;  %v8977_v60 = vld [vmem:[%s15078_s8 + $0x38] sm:$0xff] }
 0x7b9   : > { %10177 = vmatpush3.msra.mxu0 %v8983_v43  ;;  %v8978_v6 = vld [vmem:[%s15078_s8 + $0x40] sm:$0xff]  ;;  %v8992_v56 = vld [vmem:[%s15078_s8 + $0xb0] sm:$0xff]  ;;  %v8991_v50 = vld [vmem:[%s15078_s8 + $0xa8] sm:$0xff] }
 0x7ba   : > { %10178 = vmatprep.subr.mxu0 %v8998_v32  ;;  %v8959_v7 = vcombine.low %v8954_v55, %v8958_v40  ;;  %v8948_v8 = vld [vmem:[#allocation4] sm:$0xf]  ;;  %v8976_v0 = vld [vmem:[%s15078_s8 + $0x30] sm:$0xff]  ;;  %v8975_v37 = vld [vmem:[%s15078_s8 + $0x28] sm:$0xff] }
 0x7bb   : > { %10179 = vmatpush3.msra.mxu0 %v8982_v44  ;;  %v8990_v57 = vld [vmem:[%s15078_s8 + $0xa0] sm:$0xff]  ;;  %v8989_v19 = vld [vmem:[%s15078_s8 + $0x98] sm:$0xff]  ;;  %v8988_v14 = vld [vmem:[%s15078_s8 + $0x90] sm:$0xff] }
 0x7bc   : > { %10180 = vmatprep.subr.mxu0 %v8997_v17  ;;  %v8966_v59 = vrot.slane %v8959_v7, %v14667_v21  ;;  %v8974_v47 = vld [vmem:[%s15078_s8 + $0x20] sm:$0xff]  ;;  %v8973_v16 = vld [vmem:[%s15078_s8 + $0x18] sm:$0xff]  ;;  %v8972_v20 = vld [vmem:[%s15078_s8 + $0x10] sm:$0xff] }
 0x7bd   : > { %10181 = vmatpush3.msra.mxu0 %v8981_v46  ;;  %v8971_v5 = vld [vmem:[%s15078_s8 + $0x8] sm:$0xff]  ;;  %v8986_v58 = vld [vmem:[%s15078_s8 + $0x80] sm:$0xff] }
 0x7be   : > { %10182 = vmatprep.subr.mxu0 %v8996_v29  ;;  %v8968_v12 = vadd.f32 %v8966_v59, %v8948_v8  ;;  %v8970_v49 = vld [vmem:[%s15078_s8] sm:$0xff] }
 0x7bf   : > { %10183 = vmatpush3.msra.mxu0 %v8980_v51  ;;  %v10040_v30 = vld [vmem:[%s15079_s9] ss:$0 sm:$0xff] }
 0x7c0   : > { %10184 = vmatprep.subr.mxu0 %v8995_v62  ;;  %v8969_v39 = vmax.f32 %v8968_v12, 0.0 }
 0x7c1   : > { %10185 = vmatpush3.msra.mxu0 %v8979_v1 }
 0x7c2   : > { %10186 = vmatprep.subr.mxu0 %v8994_v36  ;;  %v9016_v15 = vrot.slane %v8969_v39, %v14667_v21  ;;  %v8987_v21 = vld [vmem:[%s15078_s8 + $0x88] sm:$0xff] }
 0x7c3   : > { %10187 = vmatpush3.msra.mxu0 %v8978_v6 }
 0x7c4   : > { %10188 = vmatprep.subr.mxu0 %v8993_v63  ;;  %v9017_v22 = vcombine.high %v9016_v15, %v9016_v15 }
 0x7c5   : > { %10189 = vmatpush3.msra.mxu0 %v8977_v60 }
 0x7c6   : > { %10190 = vmatprep.subr.mxu0 %v8992_v56  ;;  %9084 = vmatprep.mubr.f32.mxu0 %v9017_v22 }
 0x7c7   : > { %10191 = vmatpush3.msra.mxu0 %v8976_v0 }
 0x7c8   : > { %10192 = vmatprep.subr.mxu0 %v8991_v50 }
 0x7c9   : > { %10193 = vmatpush3.msra.mxu0 %v8975_v37 }
 0x7ca   : > { %10194 = vmatprep.subr.mxu0 %v8990_v57 }
 0x7cb   : > { %10195 = vmatpush3.msra.mxu0 %v8974_v47 }
 0x7cc   : > { %10196 = vmatprep.subr.mxu0 %v8989_v19 }
 0x7cd   : > { %10197 = vmatpush3.msra.mxu0 %v8973_v16 }
 0x7ce   : > { %10198 = vmatprep.subr.mxu0 %v8988_v14 }
 0x7cf   : > { %10199 = vmatpush3.msra.mxu0 %v8972_v20 }
 0x7d0   : > { %10200 = vmatprep.subr.mxu0 %v8987_v21 }
 0x7d1   : > { %10201 = vmatpush3.msra.mxu0 %v8971_v5 }
 0x7d2   : > { %10202 = vmatprep.subr.mxu0 %v8986_v58 }
 0x7d3   : > { %10203 = vmatpush3.msra.mxu0 %v8970_v49 }
 0x7d4   : > { %9085 = vmatmul.mubr.f32.vlgmr.msra.gmra.mxu0 %v9016_v15 }
 0x894   : > { %v10204_v31 = vpop.f32.mrf.mxu0 }
 0x896   : > { %v10205_v2 = vpop.f32.mrf.mxu0 }
 0x897   : > { %v10206_v52 = vadd.f32 %v10205_v2, %v10204_v31 }
 0x899   : > { %v9087_v10 = vadd.f32 %v10206_v52, %v10040_v30 }
 0x89b   : > { %9091 = vst.msk [vmem:[#allocation5] sm:$0x3] %vm9090_vm10, %v9087_v10  ;;  %9104 = vrot.lane.b32.xlu1 %v9087_v10, %s10899_s23  ;;  %9093 = vrot.lane.b32.xlu0 %v9087_v10, %s10900_s24 }
 0x90d   : > { %v9094_v48 = vpop.permute.xlu0 %9093  ;;  %v9105_v23 = vpop.permute.xlu1 %9104 }
 0x90e   : > { %v9096_v34 = vadd.f32 %v9094_v48, %v9087_v10  ;;  %v9107_v4 = vmul.f32 %v9105_v23, %v9087_v10 }
 0x910   : > { %v9097_v26 = vsub.f32 %v9096_v34, %v9087_v10  ;;  %v9108_v33 = vadd.f32 %v9107_v4, %v9107_v4 }
 0x912   : > { %v9098_v3 = vmax.f32 %v9097_v26, 0.0 }
 0x914   : > { %9100 = vrot.lane.b32.xlu0 %v9098_v3, %s10899_s23 }
 0x986   : > { %v9101_v35 = vpop.permute.xlu0 %9100 }
 0x987   : > { %v9103_v27 = vmul.f32 %v9101_v35, %v9098_v3 }
 0x989   : > { %9110 = vrot.lane.b32.xlu1 %v9103_v27, %s10901_s12 }
 0x9fb   : > { %v9111_v9 = vpop.permute.xlu1 %9110 }
 0x9fc   : > { %v9113_v53 = vsub.f32 %v9108_v33, %v9111_v9 }
 0x9fe   : > { %9115 = vrot.lane.b32.xlu0 %v9113_v53, %s10900_s24 }
 0xa70   : > { %v9116_v61 = vpop.permute.xlu0 %9115 }
 0xa71   : > { %10853 = vrcp.f32 %v9116_v61 }
 0xa7e   : > { %v10854_v42 = vpop.eup %10853 }
 0xa7f   : > { %v9119_v13 = vmul.f32 %v10854_v42, %v9103_v27 }
 0xa81   : > { %v10041_v54 = vadd.f32 -0.5, %v9119_v13 }
 0xa83   : > { %9122 = vst.msk [vmem:[%s15080_s10] sm:$0x3] %vm9121_vm11, %v10041_v54 }
 0xa84 PF: > { %p10433_p6 = scmp.eq.s32.totalorder %s10969_s18, 3  ;;  %s10902_s19 = smov [#allocation5]  }
 0xa85   : > { %s9133_s20 = sshll.u32 %s10902_s19, 4  ;;  %s9134_s20 = int_to_ptr.vmem [resolvable:$true] %s9133_s20 }
 0xa86   : > { %s10855_s21 = scalar_lea.vmem %s9134_s20, 32  ;;  %p10862_p10 = scmp.lt.s32.totalorder %s9134_s20, %s9134_s20 }
 0xa87   : > { %p10856_p7 = scmp.ne.s32.totalorder %s9134_s20, %s10855_s21  ;;  %p10863_p11 = scmp.lt.s32.totalorder %s10855_s21, %s10855_s21 }
 0xa89   : > { %p10857_p8 = pnand %p10856_p7, %p10433_p6  ;;  %p10864_p12 = por %p10863_p11, %p10862_p10 }
 0xa8b   : > { %p10858_p9 = pneg %p10857_p8 }
 0xa8d   : > { %p10865_p13 = pnand %p10864_p12, %p10858_p9 }
 0xa8f   : > { %10868 = shalt.err (!%p10865_p13)
}
 0xa90   : > { %10430 = dma.vmem_to_hbm [thread:$0]  (%p10433_p6), %s9134_s20, 32, %s15081_s11, [#allocation6]  }
 0xa91   : > { %10884 = dma.done.wait (%p10433_p6), [#allocation6], 32  }
 0xa92   : > { %10886 = vsyncadd (%p10433_p6), [#allocation6], 4294967264 }
 0xa93 PF: > { %s23_s17 = sadd.s32 1, %s10889_s17  }
 0xa94   : > { %p20_p0 = scmp.ge.s32.totalorder %s23_s17, 6  }
 0xa96   :  { %22 = sbr.rel (!%p20_p0) target bundleno = 1 (0x1), region = 145 }
 0xa9b   :  { %9149 = vsyncpa [#allocation6], 1 }
 0xa9c   :  { %9151 = vsyncpa [#allocation6 + $0x1], 1 }

</bundles_post_ra>
